<compile_context>
chip_gen: v6e
topology: v6e:2x2x1
jax: 0.10.0
libtpu: 0.0.40
codegen_flags: <defaults>
</compile_context>

<pallas_src>
import functools

import jax
import jax.numpy as jnp
from jax.experimental import pallas as pl
from jax.experimental.pallas import tpu as pltpu


def _pointnetfeat_kernel(x_ref, w1_ref, w2_ref, w3_ref, t1_ref, t2_ref, t3_ref,
                         gfeat_ref, pfeat_ref, acc_ref,
                         *, n_points, tile_n, chunk, fold_w, compute_dtype):
    t = pl.program_id(1)
    n_t = pl.num_programs(1)

    # Lane-wide running-max accumulator, reset at the first point tile of each
    # batch element (scratch persists across grid iterations).
    @pl.when(t == 0)
    def _init():
        acc_ref[...] = jnp.full(acc_ref.shape, -jnp.inf, dtype=acc_ref.dtype)

    x = x_ref[0].astype(compute_dtype)                                # (6, TN)

    # conv1 (1x1, BN scale folded into W) + shift + ReLU: (64,6) @ (6,TN)
    h1 = jnp.dot(w1_ref[...], x, preferred_element_type=jnp.float32)
    h1 = jnp.maximum(h1 + t1_ref[...], 0.0)                           # (64, TN)
    pfeat_ref[0] = h1.astype(pfeat_ref.dtype)                         # lane-dense store

    # conv2 (1x1, scale folded) + shift + ReLU: (128,64) @ (64,TN)
    h2 = jnp.dot(w2_ref[...], h1.astype(compute_dtype),
                 preferred_element_type=jnp.float32)
    h2 = jnp.maximum(h2 + t2_ref[...], 0.0)                           # (128, TN)
    h2c = h2.astype(compute_dtype)

    n_folds = tile_n // fold_w

    def run_chunks(valid_cols):
        # conv3 (1x1, scale folded), chunked over the 1024 output channels.
        # The per-channel BN3 shift commutes with the max over points, so it is
        # NOT applied here -- it is added once at the final write.
        for c in range(0, 1024, chunk):
            h3c = jnp.dot(w3_ref[c:c + chunk, :], h2c,
                          preferred_element_type=jnp.float32)         # (chunk, TN)
            if valid_cols is not None:
                h3c = jnp.where(valid_cols, h3c, -jnp.inf)
            # VPU lane-fold (chunk, TN) -> (chunk, fold_w): no XLU work here.
            folded = h3c[:, 0:fold_w]
            for j in range(1, n_folds):
                folded = jnp.maximum(folded, h3c[:, j * fold_w:(j + 1) * fold_w])
            acc_ref[c:c + chunk, :] = jnp.maximum(acc_ref[c:c + chunk, :], folded)

    need_mask = (n_points % tile_n) != 0
    if need_mask:
        is_last = t == n_t - 1

        @pl.when(is_last)
        def _masked():
            col = t * tile_n + jax.lax.broadcasted_iota(jnp.int32, (1, tile_n), 1)
            run_chunks(col < n_points)

        @pl.when(jnp.logical_not(is_last))
        def _unmasked():
            run_chunks(None)
    else:
        run_chunks(None)

    # Single cross-lane reduce + lane-dense global-feature write, once per batch.
    @pl.when(t == n_t - 1)
    def _finalize():
        g = jnp.max(acc_ref[...], axis=1) + t3_ref[0]                 # (1024,)
        gfeat_ref[0, 0] = g


def pointnetfeat_forward(x_ncw, params, *, tile_n=1024, chunk=256, use_bf16=True):
    """x_ncw: (B, 6, N) float32 in PyTorch NCW layout.

    Returns (global_feat (B, 1024), pointfeat (B, 64, N)) matching PyTorch.
    tile_n: points per grid step; 1024-2048 is a good default on v5e/v6e/v7x
      (the working set is only a few MiB, so VMEM is not the binding constraint
      on any generation -- large TN amortizes grid overhead and feeds the MXU).
    use_bf16: bf16 MXU inputs with f32 accumulation (default; ~3-4x MXU-time
      cut on v6e/v7x, ~2x on v5e).  use_bf16=False is the f32 accuracy path.
    """
    B, cin, N = x_ncw.shape
    assert cin == 6
    (w1, s1, t1), (w2, s2, t2), (w3, s3, t3) = params

    # Fold the BN scale into the conv weights in f32, before any bf16 cast.
    w1f = w1 * s1                                                     # (64, 6)
    w2f = w2 * s2                                                     # (128, 64)
    w3f = w3 * s3                                                     # (1024, 128)

    # Point-axis tile: full N if it fits, otherwise a lane-dense multiple of 128.
    if N <= tile_n:
        tn = N
    else:
        tn = max(128, (tile_n // 128) * 128)
    n_tiles = pl.cdiv(N, tn)
    fold_w = 128 if (tn % 128 == 0) else tn

    compute_dtype = jnp.bfloat16 if use_bf16 else jnp.float32
    w1c, w2c, w3c = (w.astype(compute_dtype) for w in (w1f, w2f, w3f))
    t3_row = t3.reshape(1, 1024)                                      # lane-dense shift

    assert 1024 % chunk == 0
    kernel = functools.partial(
        _pointnetfeat_kernel, n_points=N, tile_n=tn, chunk=chunk,
        fold_w=fold_w, compute_dtype=compute_dtype)

    const = lambda shape: pl.BlockSpec(shape, lambda b, t: (0, 0))

    gfeat, pfeat = pl.pallas_call(
        kernel,
        out_shape=(
            jax.ShapeDtypeStruct((B, 1, 1024), jnp.float32),   # global max feature
            jax.ShapeDtypeStruct((B, 64, N), jnp.float32),     # pointfeat, NCW layout
        ),
        grid_spec=pltpu.PrefetchScalarGridSpec(
            num_scalar_prefetch=0,
            grid=(B, n_tiles),
            in_specs=[
                pl.BlockSpec((1, 6, tn), lambda b, t: (b, 0, t)),      # x tile
                const((64, 6)), const((128, 64)), const((1024, 128)),  # scale-folded weights
                const((64, 1)), const((128, 1)),                       # shift1, shift2
                const((1, 1024)),                                      # shift3 (lane-dense)
            ],
            out_specs=[
                pl.BlockSpec((1, 1, 1024), lambda b, t: (b, 0, 0)),    # written at last tile
                pl.BlockSpec((1, 64, tn), lambda b, t: (b, 0, t)),     # lane-dense pointfeat
            ],
            scratch_shapes=[pltpu.VMEM((1024, fold_w), jnp.float32)],  # lane-wide max acc
        ),
        compiler_params=pltpu.CompilerParams(
            dimension_semantics=("parallel", "arbitrary")),
    )(x_ncw, w1c, w2c, w3c, t1, t2, t3_row)

    return gfeat.reshape(B, 1024), pfeat


def make_params(key):
    """Deterministic synthetic conv + BN params, folded for inference-mode BN.

    Weights are channel-major (cout, cin); scale/shift are (cout, 1).
    """
    eps = 1e-5
    layer_dims = [(6, 64), (64, 128), (128, 1024)]
    params = []
    for i, (cin, cout) in enumerate(layer_dims):
        k_w, k_b, k_g, k_be, k_m, k_v = jax.random.split(
            jax.random.fold_in(key, i), 6)
        w = jax.random.normal(k_w, (cout, cin), jnp.float32) * (1.0 / jnp.sqrt(cin))
        b = jax.random.normal(k_b, (cout,), jnp.float32) * 0.1
        gamma = 1.0 + 0.1 * jax.random.normal(k_g, (cout,), jnp.float32)
        beta = 0.1 * jax.random.normal(k_be, (cout,), jnp.float32)
        mean = 0.1 * jax.random.normal(k_m, (cout,), jnp.float32)
        var = jnp.abs(jax.random.normal(k_v, (cout,), jnp.float32)) + 0.5
        scale = gamma / jnp.sqrt(var + eps)                     # (cout,)
        shift = beta + scale * (b - mean)                       # conv bias folded in
        params.append((w, scale.reshape(cout, 1), shift.reshape(cout, 1)))
    return tuple(params)


def reference_forward(x_ncw, params):
    """Pure-JAX reference mirroring the PyTorch forward (inference-mode BN)."""
    (w1, s1, t1), (w2, s2, t2), (w3, s3, t3) = params
    hi = jax.lax.Precision.HIGHEST

    def layer(h, w, s, t, relu=True):
        y = jnp.einsum('oc,bcn->bon', w, h, precision=hi) * s[None] + t[None]
        return jnp.maximum(y, 0.0) if relu else y

    h1 = layer(x_ncw, w1, s1, t1)
    h2 = layer(h1, w2, s2, t2)
    h3 = layer(h2, w3, s3, t3, relu=False)
    return jnp.max(h3, axis=2), h1                              # (B,1024), (B,64,N)


if __name__ == "__main__":
    key = jax.random.PRNGKey(0)
    k_x, k_p = jax.random.split(key)
    params = make_params(k_p)

    # 1) Small single-tile case (N <= TN), f32 accuracy path.
    B, N = 2, 16
    x_small = jax.random.normal(k_x, (B, 6, N), jnp.float32)     # PyTorch NCW input
    gfeat, pointfeat = pointnetfeat_forward(x_small, params, use_bf16=False)
    jax.block_until_ready((gfeat, pointfeat))
    g_ref, pf_ref = reference_forward(x_small, params)
    assert gfeat.shape == (B, 1024) and pointfeat.shape == (B, 64, N)
    assert jnp.allclose(gfeat, g_ref, atol=1e-3, rtol=1e-3)
    assert jnp.allclose(pointfeat, pf_ref, atol=1e-3, rtol=1e-3)

    # 2) Multi-tile case exercising the lane-wide running max (3 tiles of 128), f32.
    B2, N2 = 2, 384
    x_big = jax.random.normal(jax.random.fold_in(k_x, 1), (B2, 6, N2), jnp.float32)
    g2, pf2 = pointnetfeat_forward(x_big, params, tile_n=128, use_bf16=False)
    jax.block_until_ready((g2, pf2))
    g2_ref, pf2_ref = reference_forward(x_big, params)
    assert jnp.allclose(g2, g2_ref, atol=1e-3, rtol=1e-3)
    assert jnp.allclose(pf2, pf2_ref, atol=1e-3, rtol=1e-3)

    # 3) Ragged last tile (N % TN != 0) exercising the last-tile-only mask, f32.
    B3, N3 = 2, 300
    x_rag = jax.random.normal(jax.random.fold_in(k_x, 2), (B3, 6, N3), jnp.float32)
    g3, pf3 = pointnetfeat_forward(x_rag, params, tile_n=256, use_bf16=False)
    jax.block_until_ready((g3, pf3))
    g3_ref, pf3_ref = reference_forward(x_rag, params)
    assert jnp.allclose(g3, g3_ref, atol=1e-3, rtol=1e-3)
    assert jnp.allclose(pf3, pf3_ref, atol=1e-3, rtol=1e-3)

    # 4) Default path: bf16 MXU inputs, f32 accumulation -> looser tolerance.
    g4, pf4 = pointnetfeat_forward(x_big, params, tile_n=128)
    jax.block_until_ready((g4, pf4))
    assert jnp.allclose(g4, g2_ref, atol=5e-2, rtol=5e-2)
    assert jnp.allclose(pf4, pf2_ref, atol=5e-2, rtol=5e-2)

    print("KERNEL_OK")
</pallas_src>

<mosaic_0001>
module attributes {stable_mosaic.version = 11 : i64} {
  func.func @_pointnetfeat_kernel(%arg0: i32, %arg1: i32, %arg2: memref<1x6x16xf32, #tpu.memory_space<vmem>>, %arg3: memref<64x6xf32, #tpu.memory_space<vmem>>, %arg4: memref<128x64xf32, #tpu.memory_space<vmem>>, %arg5: memref<1024x128xf32, #tpu.memory_space<vmem>>, %arg6: memref<64x1xf32, #tpu.memory_space<vmem>>, %arg7: memref<128x1xf32, #tpu.memory_space<vmem>>, %arg8: memref<1x1024xf32, #tpu.memory_space<vmem>>, %arg9: memref<1x1x1024xf32, #tpu.memory_space<vmem>>, %arg10: memref<1x64x16xf32, #tpu.memory_space<vmem>>, %arg11: memref<1024x16xf32, #tpu.memory_space<vmem>>) attributes {dimension_semantics = [#tpu.dimension_semantics<parallel>, #tpu.dimension_semantics<arbitrary>], iteration_bounds = array<i64: 2, 1>, scalar_prefetch = 0 : i64, scratch_operands = 1 : i64, tpu.core_type = #tpu.core_type<tc>, window_params = [{transform_indices = @transform_0, window_bounds = array<i64: 1, 6, 16>}, {pipeline_mode = #tpu.pipeline_mode<synchronous>, transform_indices = @transform_1, window_bounds = array<i64: 64, 6>}, {pipeline_mode = #tpu.pipeline_mode<synchronous>, transform_indices = @transform_2, window_bounds = array<i64: 128, 64>}, {pipeline_mode = #tpu.pipeline_mode<synchronous>, transform_indices = @transform_3, window_bounds = array<i64: 1024, 128>}, {pipeline_mode = #tpu.pipeline_mode<synchronous>, transform_indices = @transform_4, window_bounds = array<i64: 64, 1>}, {pipeline_mode = #tpu.pipeline_mode<synchronous>, transform_indices = @transform_5, window_bounds = array<i64: 128, 1>}, {pipeline_mode = #tpu.pipeline_mode<synchronous>, transform_indices = @transform_6, window_bounds = array<i64: 1, 1024>}, {transform_indices = @transform_7, window_bounds = array<i64: 1, 1, 1024>}, {transform_indices = @transform_8, window_bounds = array<i64: 1, 64, 16>}]} {
    %c0_i32 = arith.constant 0 : i32
    %0 = arith.cmpi eq, %arg1, %c0_i32 : i32
    %1 = arith.extui %0 : i1 to i32
    %c0_i32_0 = arith.constant 0 : i32
    %2 = arith.cmpi ne, %1, %c0_i32_0 : i32
    scf.if %2 {
      %cst_44 = arith.constant 0xFF800000 : f32
      %45 = vector.broadcast %cst_44 : f32 to vector<1024x16xf32>
      %c0_45 = arith.constant 0 : index
      %c0_46 = arith.constant 0 : index
      %46 = vector.load %arg11[%c0_45, %c0_46] : memref<1024x16xf32, #tpu.memory_space<vmem>>, vector<1024x16xf32>
      tpu.vector_store %arg11[%c0_45, %c0_46], %45 {strides = array<i32>} : memref<1024x16xf32, #tpu.memory_space<vmem>>, vector<1024x16xf32>,
    } else {
    }
    %c0 = arith.constant 0 : index
    %c0_1 = arith.constant 0 : index
    %c0_2 = arith.constant 0 : index
    %3 = vector.load %arg2[%c0, %c0_1, %c0_2] : memref<1x6x16xf32, #tpu.memory_space<vmem>>, vector<1x6x16xf32>
    %4 = vector.shape_cast %3 : vector<1x6x16xf32> to vector<6x16xf32>
    %c0_3 = arith.constant 0 : index
    %c0_4 = arith.constant 0 : index
    %5 = vector.load %arg3[%c0_3, %c0_4] : memref<64x6xf32, #tpu.memory_space<vmem>>, vector<64x6xf32>
    %cst = arith.constant dense<0.000000e+00> : vector<64x16xf32>
    %6 = tpu.matmul %5, %4, %cst {dimension_numbers = #tpu.dot_dimension_numbers<[1], [0], [0], [1], [0, 0, 1, 1], [], []>} : vector<64x6xf32>, vector<6x16xf32>, vector<64x16xf32> -> vector<64x16xf32>
    %c0_5 = arith.constant 0 : index
    %c0_6 = arith.constant 0 : index
    %7 = vector.load %arg6[%c0_5, %c0_6] : memref<64x1xf32, #tpu.memory_space<vmem>>, vector<64x1xf32>
    %8 = vector.broadcast %7 : vector<64x1xf32> to vector<64x16xf32>
    %9 = arith.addf %6, %8 : vector<64x16xf32>
    %cst_7 = arith.constant 0.000000e+00 : f32
    %10 = vector.broadcast %cst_7 : f32 to vector<64x16xf32>
    %11 = arith.maximumf %9, %10 : vector<64x16xf32>
    %c0_8 = arith.constant 0 : index
    %c0_9 = arith.constant 0 : index
    %c0_10 = arith.constant 0 : index
    %12 = vector.load %arg10[%c0_8, %c0_9, %c0_10] : memref<1x64x16xf32, #tpu.memory_space<vmem>>, vector<1x64x16xf32>
    %13 = vector.shape_cast %12 : vector<1x64x16xf32> to vector<64x16xf32>
    %14 = vector.shape_cast %11 : vector<64x16xf32> to vector<1x64x16xf32>
    tpu.vector_store %arg10[%c0_8, %c0_9, %c0_10], %14 {strides = array<i32>} : memref<1x64x16xf32, #tpu.memory_space<vmem>>, vector<1x64x16xf32>,
    %c0_11 = arith.constant 0 : index
    %c0_12 = arith.constant 0 : index
    %15 = vector.load %arg4[%c0_11, %c0_12] : memref<128x64xf32, #tpu.memory_space<vmem>>, vector<128x64xf32>
    %cst_13 = arith.constant dense<0.000000e+00> : vector<128x16xf32>
    %16 = tpu.matmul %15, %11, %cst_13 {dimension_numbers = #tpu.dot_dimension_numbers<[1], [0], [0], [1], [0, 0, 1, 1], [], []>} : vector<128x64xf32>, vector<64x16xf32>, vector<128x16xf32> -> vector<128x16xf32>
    %c0_14 = arith.constant 0 : index
    %c0_15 = arith.constant 0 : index
    %17 = vector.load %arg7[%c0_14, %c0_15] : memref<128x1xf32, #tpu.memory_space<vmem>>, vector<128x1xf32>
    %18 = vector.broadcast %17 : vector<128x1xf32> to vector<128x16xf32>
    %19 = arith.addf %16, %18 : vector<128x16xf32>
    %cst_16 = arith.constant 0.000000e+00 : f32
    %20 = vector.broadcast %cst_16 : f32 to vector<128x16xf32>
    %21 = arith.maximumf %19, %20 : vector<128x16xf32>
    %c0_17 = arith.constant 0 : index
    %c0_18 = arith.constant 0 : index
    %22 = vector.load %arg5[%c0_17, %c0_18] : memref<1024x128xf32, #tpu.memory_space<vmem>>, vector<256x128xf32>
    %cst_19 = arith.constant dense<0.000000e+00> : vector<256x16xf32>
    %23 = tpu.matmul %22, %21, %cst_19 {dimension_numbers = #tpu.dot_dimension_numbers<[1], [0], [0], [1], [0, 0, 1, 1], [], []>} : vector<256x128xf32>, vector<128x16xf32>, vector<256x16xf32> -> vector<256x16xf32>
    %c0_20 = arith.constant 0 : index
    %c0_21 = arith.constant 0 : index
    %24 = vector.load %arg11[%c0_20, %c0_21] : memref<1024x16xf32, #tpu.memory_space<vmem>>, vector<256x16xf32>
    %25 = arith.maximumf %24, %23 : vector<256x16xf32>
    %c0_22 = arith.constant 0 : index
    %c0_23 = arith.constant 0 : index
    %26 = vector.load %arg11[%c0_22, %c0_23] : memref<1024x16xf32, #tpu.memory_space<vmem>>, vector<256x16xf32>
    tpu.vector_store %arg11[%c0_22, %c0_23], %25 {strides = array<i32>} : memref<1024x16xf32, #tpu.memory_space<vmem>>, vector<256x16xf32>,
    %c256 = arith.constant 256 : index
    %c0_24 = arith.constant 0 : index
    %27 = vector.load %arg5[%c256, %c0_24] : memref<1024x128xf32, #tpu.memory_space<vmem>>, vector<256x128xf32>
    %cst_25 = arith.constant dense<0.000000e+00> : vector<256x16xf32>
    %28 = tpu.matmul %27, %21, %cst_25 {dimension_numbers = #tpu.dot_dimension_numbers<[1], [0], [0], [1], [0, 0, 1, 1], [], []>} : vector<256x128xf32>, vector<128x16xf32>, vector<256x16xf32> -> vector<256x16xf32>
    %c256_26 = arith.constant 256 : index
    %c0_27 = arith.constant 0 : index
    %29 = vector.load %arg11[%c256_26, %c0_27] : memref<1024x16xf32, #tpu.memory_space<vmem>>, vector<256x16xf32>
    %30 = arith.maximumf %29, %28 : vector<256x16xf32>
    %c256_28 = arith.constant 256 : index
    %c0_29 = arith.constant 0 : index
    %31 = vector.load %arg11[%c256_28, %c0_29] : memref<1024x16xf32, #tpu.memory_space<vmem>>, vector<256x16xf32>
    tpu.vector_store %arg11[%c256_28, %c0_29], %30 {strides = array<i32>} : memref<1024x16xf32, #tpu.memory_space<vmem>>, vector<256x16xf32>,
    %c512 = arith.constant 512 : index
    %c0_30 = arith.constant 0 : index
    %32 = vector.load %arg5[%c512, %c0_30] : memref<1024x128xf32, #tpu.memory_space<vmem>>, vector<256x128xf32>
    %cst_31 = arith.constant dense<0.000000e+00> : vector<256x16xf32>
    %33 = tpu.matmul %32, %21, %cst_31 {dimension_numbers = #tpu.dot_dimension_numbers<[1], [0], [0], [1], [0, 0, 1, 1], [], []>} : vector<256x128xf32>, vector<128x16xf32>, vector<256x16xf32> -> vector<256x16xf32>
    %c512_32 = arith.constant 512 : index
    %c0_33 = arith.constant 0 : index
    %34 = vector.load %arg11[%c512_32, %c0_33] : memref<1024x16xf32, #tpu.memory_space<vmem>>, vector<256x16xf32>
    %35 = arith.maximumf %34, %33 : vector<256x16xf32>
    %c512_34 = arith.constant 512 : index
    %c0_35 = arith.constant 0 : index
    %36 = vector.load %arg11[%c512_34, %c0_35] : memref<1024x16xf32, #tpu.memory_space<vmem>>, vector<256x16xf32>
    tpu.vector_store %arg11[%c512_34, %c0_35], %35 {strides = array<i32>} : memref<1024x16xf32, #tpu.memory_space<vmem>>, vector<256x16xf32>,
    %c768 = arith.constant 768 : index
    %c0_36 = arith.constant 0 : index
    %37 = vector.load %arg5[%c768, %c0_36] : memref<1024x128xf32, #tpu.memory_space<vmem>>, vector<256x128xf32>
    %cst_37 = arith.constant dense<0.000000e+00> : vector<256x16xf32>
    %38 = tpu.matmul %37, %21, %cst_37 {dimension_numbers = #tpu.dot_dimension_numbers<[1], [0], [0], [1], [0, 0, 1, 1], [], []>} : vector<256x128xf32>, vector<128x16xf32>, vector<256x16xf32> -> vector<256x16xf32>
    %c768_38 = arith.constant 768 : index
    %c0_39 = arith.constant 0 : index
    %39 = vector.load %arg11[%c768_38, %c0_39] : memref<1024x16xf32, #tpu.memory_space<vmem>>, vector<256x16xf32>
    %40 = arith.maximumf %39, %38 : vector<256x16xf32>
    %c768_40 = arith.constant 768 : index
    %c0_41 = arith.constant 0 : index
    %41 = vector.load %arg11[%c768_40, %c0_41] : memref<1024x16xf32, #tpu.memory_space<vmem>>, vector<256x16xf32>
    tpu.vector_store %arg11[%c768_40, %c0_41], %40 {strides = array<i32>} : memref<1024x16xf32, #tpu.memory_space<vmem>>, vector<256x16xf32>,
    %c0_i32_42 = arith.constant 0 : i32
    %42 = arith.cmpi eq, %arg1, %c0_i32_42 : i32
    %43 = arith.extui %42 : i1 to i32
    %c0_i32_43 = arith.constant 0 : i32
    %44 = arith.cmpi ne, %43, %c0_i32_43 : i32
    scf.if %44 {
      %c0_44 = arith.constant 0 : index
      %c0_45 = arith.constant 0 : index
      %45 = vector.load %arg11[%c0_44, %c0_45] : memref<1024x16xf32, #tpu.memory_space<vmem>>, vector<1024x16xf32>
      %cst_46 = arith.constant dense<0xFF800000> : vector<1024xf32>
      %46 = vector.multi_reduction <maximumf>, %45, %cst_46 [1] : vector<1024x16xf32> to vector<1024xf32>
      %c0_47 = arith.constant 0 : index
      %c0_48 = arith.constant 0 : index
      %47 = vector.load %arg8[%c0_47, %c0_48] : memref<1x1024xf32, #tpu.memory_space<vmem>>, vector<1x1024xf32>
      %48 = vector.shape_cast %47 : vector<1x1024xf32> to vector<1024xf32>
      %49 = arith.addf %46, %48 : vector<1024xf32>
      %c0_49 = arith.constant 0 : index
      %c0_50 = arith.constant 0 : index
      %c0_51 = arith.constant 0 : index
      %50 = vector.load %arg9[%c0_49, %c0_50, %c0_51] : memref<1x1x1024xf32, #tpu.memory_space<vmem>>, vector<1x1x1024xf32>
      %51 = vector.shape_cast %50 : vector<1x1x1024xf32> to vector<1024xf32>
      %52 = vector.shape_cast %49 : vector<1024xf32> to vector<1x1x1024xf32>
      tpu.vector_store %arg9[%c0_49, %c0_50, %c0_51], %52 {strides = array<i32>} : memref<1x1x1024xf32, #tpu.memory_space<vmem>>, vector<1x1x1024xf32>,
    } else {
    }
    return
  }
  func.func @transform_0(%arg0: i32, %arg1: i32) -> (i32, i32, i32) {
    %c0_i32 = arith.constant 0 : i32
    %c0_i32_0 = arith.constant 0 : i32
    return %arg0, %c0_i32, %arg1 : i32, i32, i32
  }
  func.func @transform_1(%arg0: i32, %arg1: i32) -> (i32, i32) {
    %c0_i32 = arith.constant 0 : i32
    %c0_i32_0 = arith.constant 0 : i32
    %c0_i32_1 = arith.constant 0 : i32
    return %c0_i32, %c0_i32_0 : i32, i32
  }
  func.func @transform_2(%arg0: i32, %arg1: i32) -> (i32, i32) {
    %c0_i32 = arith.constant 0 : i32
    %c0_i32_0 = arith.constant 0 : i32
    %c0_i32_1 = arith.constant 0 : i32
    return %c0_i32, %c0_i32_0 : i32, i32
  }
  func.func @transform_3(%arg0: i32, %arg1: i32) -> (i32, i32) {
    %c0_i32 = arith.constant 0 : i32
    %c0_i32_0 = arith.constant 0 : i32
    %c0_i32_1 = arith.constant 0 : i32
    return %c0_i32, %c0_i32_0 : i32, i32
  }
  func.func @transform_4(%arg0: i32, %arg1: i32) -> (i32, i32) {
    %c0_i32 = arith.constant 0 : i32
    %c0_i32_0 = arith.constant 0 : i32
    %c0_i32_1 = arith.constant 0 : i32
    return %c0_i32, %c0_i32_0 : i32, i32
  }
  func.func @transform_5(%arg0: i32, %arg1: i32) -> (i32, i32) {
    %c0_i32 = arith.constant 0 : i32
    %c0_i32_0 = arith.constant 0 : i32
    %c0_i32_1 = arith.constant 0 : i32
    return %c0_i32, %c0_i32_0 : i32, i32
  }
  func.func @transform_6(%arg0: i32, %arg1: i32) -> (i32, i32) {
    %c0_i32 = arith.constant 0 : i32
    %c0_i32_0 = arith.constant 0 : i32
    %c0_i32_1 = arith.constant 0 : i32
    return %c0_i32, %c0_i32_0 : i32, i32
  }
  func.func @transform_7(%arg0: i32, %arg1: i32) -> (i32, i32, i32) {
    %c0_i32 = arith.constant 0 : i32
    %c0_i32_0 = arith.constant 0 : i32
    %c0_i32_1 = arith.constant 0 : i32
    return %arg0, %c0_i32, %c0_i32_0 : i32, i32, i32
  }
  func.func @transform_8(%arg0: i32, %arg1: i32) -> (i32, i32, i32) {
    %c0_i32 = arith.constant 0 : i32
    %c0_i32_0 = arith.constant 0 : i32
    return %arg0, %c0_i32, %arg1 : i32, i32, i32
  }
}

</mosaic_0001>

<bundles_post_ra>
// kernel: tpu_custom_call.1
= control target key start
LH: loop header
LB: loop body
LE: loop exit
PB: predicated region body
PF: predicated region fallthrough
CT: control target
= control target key end

     0   :  { %14 = vsyncpa [#allocation4], 0  ;;  %s24232_s0 = inlined_call_operand.vmem [shape: f32[2,6,16], index: 0, kind: input, shape index: {}]   ;;  %s24233_s1 = inlined_call_operand.vmem [shape: f32[64,6], index: 1, kind: input, shape index: {}]   ;;  %s24234_s2 = inlined_call_operand.vmem [shape: f32[128,64], index: 2, kind: input, shape index: {}]   ;;  %s24235_s3 = inlined_call_operand.hbm [shape: f32[1024,128], index: 3, kind: input, shape index: {}]   ;;  %s24236_s4 = inlined_call_operand.vmem [shape: f32[64,1], index: 4, kind: input, shape index: {}]   ;;  %s24237_s5 = inlined_call_operand.vmem [shape: f32[128,1], index: 5, kind: input, shape index: {}]   ;;  %s24238_s6 = inlined_call_operand.vmem [shape: f32[1,1024], index: 6, kind: input, shape index: {}]   ;;  %s24239_s7 = inlined_call_operand.hbm [shape: f32[2,1,1024], index: 7, kind: output, shape index: {0}]   ;;  %s24240_s8 = inlined_call_operand.vmem [shape: f32[2,64,16], index: 8, kind: output, shape index: {1}]  }
   0x1   :  { %15 = vsyncpa [#allocation5], 0 }
   0x2   :  { %17 = vsyncpa [#allocation5 + $0x1], 0  ;;  %s18823_s27 = smov 0   ;;  %s18825_s28 = smov 0  }
   0x3   :  { %s18827_s29 = smov 0   ;;  %s18829_s30 = smov 0  }
   0x4   :  { %s18831_s9 = smov 0   ;;  %s18833_s10 = smov 0  }
   0x5 LB: > { %s17659_s11 = sadd.s32 4294967295, %s18769_s10   ;;  %s17660_s12 = sadd.s32 4294967294, %s18769_s10   ;;  %s18769_s10 = sphi %s18833_s10, %s23_s10   ;;  %s18765_s9 = sphi %s18831_s9, %s25418_s9   ;;  %s18761_s30 = sphi %s18829_s30, %s25417_s30   ;;  %s18757_s29 = sphi %s18827_s29, %s25416_s29   ;;  %s18753_s28 = sphi %s18825_s28, %s25415_s28   ;;  %s18749_s27 = sphi %s18823_s27, %s25414_s27  }
   0x6   : > { %s35_s13 = sadd.s32 1, %s18765_s9  ;;  %s196_s14 = sadd.s32 1, %s18757_s29 }
   0x7   : > { %p37_p0 = scmp.ge.s32.totalorder %s35_s13, 2  ;;  %p206_p1 = scmp.ne.s32.totalorder %s18757_s29, %s18753_s28 }
   0x8   : > { %p207_p2 = scmp.eq.s32.totalorder %s17659_s11, 1  ;;  %p212_p3 = scmp.ne.s32.totalorder %s18753_s28, %s18749_s27 }
   0x9   : > { %s25420_s13 = smov (%p37_p0, %s35_s13), 0  ;;  %p213_p5 = scmp.eq.s32.totalorder %s17660_s12, 1 }
   0xa   : > { %p18863_p4 = por %p207_p2, %p206_p1  ;;  %s193_s16 = ssub.s32 %s18765_s9, %s25420_s13 }
   0xb   : > { %p17661_p6 = scmp.ge.s32.totalorder %s18769_s10, 1  ;;  %p194_p7 = scmp.eq.s32.totalorder %s193_s16, 0 }
   0xc   : > { %p18870_p8 = por %p213_p5, %p212_p3  ;;  %p248_p9 = scmp.lt.s32.totalorder %s18769_s10, 3 }
   0xd   : > { %s18876_s18 = scalar_select %p194_p7, %s18757_s29, %s196_s14  }
   0xe   : > { %p18878_p10 = pnand %p17661_p6, %p248_p9  ;;  %p18882_p11 = scmp.eq.s32.totalorder %s17659_s11, 0 }
   0xf   : > { %s18771_s21 = smov [#allocation3]  }
  0x10   : > { %p18595_p12 = pneg %p18878_p10  ;;  %s266_s22 = sshll.u32 %s18771_s21, 4  ;;  %s267_s22 = int_to_ptr.vmem [resolvable:$true] %s266_s22 }
  0x11   : > { %s18674_s23 = scalar_lea.vmem %s267_s22, 16384  ;;  %p18682_p5 = scmp.lt.s32.totalorder %s267_s22, %s267_s22 }
  0x12   : > { %p18596_p13 = pnand %p18882_p11, %p18595_p12  ;;  %p18675_p1 = scmp.ne.s32.totalorder %s267_s22, %s18674_s23 }
  0x13   : > { %p18683_p6 = scmp.lt.s32.totalorder %s18674_s23, %s18674_s23 }
  0x14   : > { %p18665_p0 = pneg %p18596_p13 }
  0x15   : > { %p18684_p7 = por %p18683_p6, %p18682_p5 }
  0x16   : > { %p18677_p2 = pnand %p18675_p1, %p18665_p0 }
  0x18   : > { %p18678_p3 = pneg %p18677_p2 }
  0x1a   : > { %p18685_p9 = pnand %p18684_p7, %p18678_p3 }
  0x1c   : > { %18688 = shalt.err (!%p18685_p9)
}
  0x1d   : > { %s18772_s24 = smov 128   ;;  %s18773_s25 = smov 8  }
  0x1e   : > { %18598 = dma.hbm_to_vmem [thread:$0]  (!%p18596_p13), %s24235_s3, 16384, %s267_s22, [#allocation4], %s18772_s24, %s18772_s24, %s18773_s25  }
  0x1f   : > { %301 = sbr.rel (%p18878_p10) target bundleno = 1857 (0x741), region = 48 }
  0x24   : > { %18740 = dma.done.wait (%p18882_p11), [#allocation4], 16384  }
  0x25   : > { %18742 = vsyncadd (%p18882_p11), [#allocation4], 4294950912  ;;  %p345_p12 = scmp.lt.s32.totalorder %s18761_s30, 1  ;;  %v18774_v0 = vmov 0   ;;  %vm575_vm0 = vcmask 1045504   ;;  %vm550_vm1 = vcmask 48128   ;;  %v24241_v35 = vlaneseq }
  0x26   : > { %18661 = vset.pattern.permute.xlu1 %v18774_v0  ;;  %18660 = vset.pattern.permute.xlu0 %v18774_v0  ;;  %v494_v2 = vld [vmem:[%s24233_s1] sm:$0xff]  ;;  %v495_v3 = vld [vmem:[%s24233_s1 + $0x8] sm:$0xff]  ;;  %v496_v4 = vld [vmem:[%s24233_s1 + $0x10] sm:$0xff]  ;;  %vm813_vm2 = vcmask 523264   ;;  %vm364_vm3 = vcmask 130048   ;;  %vm16811_vm4 = vcmask 130112  }
  0x27   : > { %s18901_s12 = scalar_select %p345_p12, %s18761_s30, 1  ;;  %18185 = vmatprep.mubr.msk.f32.mxu0 %vm550_vm1, %v494_v2  ;;  %v504_v5 = vld [vmem:[%s24236_s4 + $0x10] sm:$0xff]  ;;  %v502_v6 = vld [vmem:[%s24236_s4] sm:$0xff]  ;;  %v497_v7 = vld [vmem:[%s24233_s1 + $0x18] sm:$0xff]  ;;  %v19016_v36 = vshrl.u32 %v24241_v35, 7  ;;  %vm16818_vm5 = vcmask 195712  }
  0x28   : > { %522 = vperm.xlu1 %18661, %v504_v5   ;;  %v498_v8 = vld [vmem:[%s24233_s1 + $0x20] sm:$0xff]  ;;  %512 = vperm.xlu0 %18660, %v502_v6   ;;  %v505_v9 = vld [vmem:[%s24236_s4 + $0x18] sm:$0xff]  ;;  %v503_v10 = vld [vmem:[%s24236_s4 + $0x8] sm:$0xff]  ;;  %vm16825_vm6 = vcmask 261312   ;;  %vm16832_vm7 = vcmask 326912   ;;  %vm16839_vm8 = vcmask 392512  }
  0x29   : > { %s17667_s14 = sshll.u32 %s18901_s12, 3  ;;  %v499_v11 = vld [vmem:[%s24233_s1 + $0x28] sm:$0xff]  ;;  %v500_v12 = vld [vmem:[%s24233_s1 + $0x30] sm:$0xff]  ;;  %v506_v14 = vld [vmem:[%s24236_s4 + $0x20] sm:$0xff]  ;;  %24252 = vst [vmem:[#allocation9_spill] sm:$0xff] %v19016_v36  ;;  %v2954_v38 = vsub.s32 0, %v19016_v36 }
  0x2a   : > { %s351_s19 = scalar_lea.vmem %s24232_s0, %s17667_s14  ;;  %v507_v13 = vld [vmem:[%s24236_s4 + $0x28] sm:$0xff]  ;;  %v501_v15 = vld [vmem:[%s24233_s1 + $0x38] sm:$0xff]  ;;  %v508_v17 = vld [vmem:[%s24236_s4 + $0x30] sm:$0xff]  ;;  %s17956_s23 = sshll.u32 %s18901_s12, 6  ;;  %vm16846_vm9 = vcmask 458112   ;;  %vm16853_vm10 = vcmask 523712  }
  0x2b   : > { %v493_v1 = vld [vmem:[%s351_s19] sm:$0x3f]  ;;  %v509_v16 = vld [vmem:[%s24236_s4 + $0x38] sm:$0xff]  ;;  %v718_v18 = vld [vmem:[%s24237_s5 + $0x8] sm:$0xff]  ;;  %s19029_s26 = scalar_lea.vmem %s24240_s8, %s17956_s23  ;;  %vm16860_vm11 = vcmask 589312   ;;  %vm16867_vm12 = vcmask 654912  }
  0x2c   : > { %18183 = vmatprep.subr.msk.mxu0 %vm575_vm0, %v493_v1  ;;  %527 = vperm.xlu1 %18661, %v505_v9   ;;  %v717_v19 = vld [vmem:[%s24237_s5] sm:$0xff]  ;;  %v720_v20 = vld [vmem:[%s24237_s5 + $0x18] sm:$0xff]  ;;  %v719_v21 = vld [vmem:[%s24237_s5 + $0x10] sm:$0xff]  ;;  %vm16874_vm13 = vcmask 720512   ;;  %vm16881_vm14 = vcmask 786112   ;;  %vm16888_vm15 = vcmask 851712  }
  0x2d   : > { %18184 = vmatpush3.msk.msra.mxu0 %vm575_vm0, %v493_v1  ;;  %517 = vperm.xlu0 %18660, %v503_v10   ;;  %v722_v22 = vld [vmem:[%s24237_s5 + $0x28] sm:$0xff]  ;;  %v721_v23 = vld [vmem:[%s24237_s5 + $0x20] sm:$0xff]  ;;  %v724_v24 = vld [vmem:[%s24237_s5 + $0x38] sm:$0xff]  ;;  %vm16895_vm0 = vcmask 917312   ;;  %s332_s23 = sand.u32 1, %s18753_s28   ;;  %s17957_s25 = sshll.u32 %s18761_s30, 7 }
  0x2e   : > { %18186 = vmatmul.mubr.msk.f32.vlgmr.msra.gmra.mxu0 %vm550_vm1, %v495_v3  ;;  %v723_v25 = vld [vmem:[%s24237_s5 + $0x30] sm:$0xff]  ;;  %v726_v26 = vld [vmem:[%s24237_s5 + $0x48] sm:$0xff]  ;;  %v725_v27 = vld [vmem:[%s24237_s5 + $0x40] sm:$0xff]  ;;  %s17666_s24 = sshll.u32 %s332_s23, 3  ;;  %s17536_s16 = scalar_lea.hbm %s24239_s7, %s17957_s25 }
  0x2f   : > { %18188 = vmatprep.mubr.msk.f32.mxu0 %vm550_vm1, %v496_v4  ;;  %v728_v28 = vld [vmem:[%s24237_s5 + $0x58] sm:$0xff]  ;;  %v727_v29 = vld [vmem:[%s24237_s5 + $0x50] sm:$0xff]  ;;  %v730_v30 = vld [vmem:[%s24237_s5 + $0x68] sm:$0xff]  ;;  %s17516_s21 = scalar_lea.sflag [#allocation5], %s332_s23  ;;  %s18777_s30 = smov [#allocation6]  }
  0x30   : > { %537 = vperm.xlu1 %18661, %v507_v13   ;;  %v729_v31 = vld [vmem:[%s24237_s5 + $0x60] sm:$0xff]  ;;  %v732_v32 = vld [vmem:[%s24237_s5 + $0x78] sm:$0xff]  ;;  %v731_v33 = vld [vmem:[%s24237_s5 + $0x70] sm:$0xff]  ;;  %s18693_s22 = sshll.u32 %s18777_s30, 4  ;;  %s18694_s22 = int_to_ptr.vmem [resolvable:$false] %s18693_s22 }
  0x31   : > { %532 = vperm.xlu0 %18660, %v506_v14   ;;  %v701_v34 = vld [vmem:[%s24234_s2] sm:$0xff]  ;;  %v703_v9 = vld [vmem:[%s24234_s2 + $0x10] sm:$0xff]  ;;  %v704_v10 = vld [vmem:[%s24234_s2 + $0x18] sm:$0xff]  ;;  %s18695_s20 = scalar_lea.vmem %s18694_s22, 256 }
  0x32   : > { %18189 = vmatmul.mubr.msk.f32.gmra.mxu0 %vm550_vm1, %v497_v7  ;;  %18213 = vmatprep.mubr.msk.f32.mxu1 %vm813_vm2, %v701_v34  ;;  %v19021_v37 = vld [vmem:[%s24238_s6] sm:$0xff]  ;;  %v707_v13 = vld [vmem:[%s24234_s2 + $0x30] sm:$0xff]  ;;  %v708_v14 = vld [vmem:[%s24234_s2 + $0x38] sm:$0xff] }
  0x33   : > { %18191 = vmatprep.mubr.msk.f32.mxu0 %vm550_vm1, %v498_v8  ;;  %v2955_v39 = vrot.slane %v19021_v37, %v2954_v38  ;;  %v702_v8 = vld [vmem:[%s24234_s2 + $0x8] sm:$0xff]  ;;  %v2970_v38 = vsub.s32 4, %v19016_v36  ;;  %v19684_v35 = vld [vmem:[%s24238_s6] sm:$0xff] }
  0x34   : > { %547 = vperm.xlu1 %18661, %v509_v16   ;;  %v710_v16 = vld [vmem:[%s24234_s2 + $0x48] sm:$0xff] }
  0x35   : > { %542 = vperm.xlu0 %18660, %v508_v17   ;;  %v711_v17 = vld [vmem:[%s24234_s2 + $0x50] sm:$0xff] }
  0x36   : > { %18192 = vmatmul.mubr.msk.f32.gmra.mxu0 %vm550_vm1, %v499_v11  ;;  %v705_v11 = vld [vmem:[%s24234_s2 + $0x20] sm:$0xff] }
  0x37   : > { %18194 = vmatprep.mubr.msk.f32.mxu0 %vm550_vm1, %v500_v12  ;;  %v706_v12 = vld [vmem:[%s24234_s2 + $0x28] sm:$0xff] }
  0x38   : > { %740 = vperm.xlu1 %18661, %v718_v18   ;;  %v712_v18 = vld [vmem:[%s24234_s2 + $0x58] sm:$0xff] }
  0x39   : > { %735 = vperm.xlu0 %18660, %v717_v19   ;;  %v713_v19 = vld [vmem:[%s24234_s2 + $0x60] sm:$0xff] }
  0x3a   : > { %18195 = vmatmul.mubr.msk.f32.gmra.mxu0 %vm550_vm1, %v501_v15  ;;  %v709_v15 = vld [vmem:[%s24234_s2 + $0x40] sm:$0xff]  ;;  %vm16902_vm1 = vcmask 982912  }
  0x3c   : > { %750 = vperm.xlu1 %18661, %v720_v20   ;;  %v714_v20 = vld [vmem:[%s24234_s2 + $0x68] sm:$0xff] }
  0x3d   : > { %745 = vperm.xlu0 %18660, %v719_v21   ;;  %v715_v21 = vld [vmem:[%s24234_s2 + $0x70] sm:$0xff] }
  0x40   : > { %760 = vperm.xlu1 %18661, %v722_v22   ;;  %v716_v22 = vld [vmem:[%s24234_s2 + $0x78] sm:$0xff] }
  0x41   : > { %755 = vperm.xlu0 %18660, %v721_v23   ;;  %v2958_v23 = vsub.s32 1, %v19016_v36 }
  0x44   : > { %770 = vperm.xlu1 %18661, %v724_v24   ;;  %v2959_v24 = vrot.slane %v19021_v37, %v2958_v23 }
  0x45   : > { %765 = vperm.xlu0 %18660, %v723_v25   ;;  %v2962_v25 = vsub.s32 2, %v19016_v36 }
  0x48   : > { %780 = vperm.xlu1 %18661, %v726_v26   ;;  %v2963_v26 = vrot.slane %v19021_v37, %v2962_v25 }
  0x49   : > { %775 = vperm.xlu0 %18660, %v725_v27   ;;  %v1023_v27 = vld [vmem:[#allocation3] sm:$0xff] }
  0x4a   : > { %18269 = vmatprep.mubr.f32.mxu0 %v1023_v27 }
  0x4c   : > { %790 = vperm.xlu1 %18661, %v728_v28   ;;  %v1376_v28 = vld [vmem:[#allocation3 + $0x100] sm:$0xff] }
  0x4d   : > { %785 = vperm.xlu0 %18660, %v727_v29   ;;  %v2966_v29 = vsub.s32 3, %v19016_v36 }
  0x50   : > { %800 = vperm.xlu1 %18661, %v730_v30   ;;  %v2967_v30 = vrot.slane %v19021_v37, %v2966_v29 }
  0x51   : > { %795 = vperm.xlu0 %18660, %v729_v31  }
  0x54   : > { %810 = vperm.xlu1 %18661, %v732_v32  }
  0x55   : > { %805 = vperm.xlu0 %18660, %v731_v33  }
  0x58   : > { %2985 = vbcast.lane.b32.xlu1 %v2955_v39, 256 }
  0x59   : > { %2989 = vbcast.lane.b32.xlu0 %v2955_v39, 264 }
  0x5c   : > { %2993 = vbcast.lane.b32.xlu1 %v2955_v39, 272 }
  0x5d   : > { %3001 = vbcast.lane.b32.xlu0 %v2955_v39, 288 }
  0x60   : > { %2997 = vbcast.lane.b32.xlu1 %v2955_v39, 280 }
  0x61   : > { %3009 = vbcast.lane.b32.xlu0 %v2955_v39, 304 }
  0x64   : > { %3005 = vbcast.lane.b32.xlu1 %v2955_v39, 296 }
  0x65   : > { %3017 = vbcast.lane.b32.xlu0 %v2955_v39, 320 }
  0x68   : > { %3013 = vbcast.lane.b32.xlu1 %v2955_v39, 312 }
  0x69   : > { %3025 = vbcast.lane.b32.xlu0 %v2955_v39, 336 }
  0x6c   : > { %3021 = vbcast.lane.b32.xlu1 %v2955_v39, 328 }
  0x6d   : > { %3033 = vbcast.lane.b32.xlu0 %v2955_v39, 352 }
  0x70   : > { %3029 = vbcast.lane.b32.xlu1 %v2955_v39, 344 }
  0x71   : > { %3041 = vbcast.lane.b32.xlu0 %v2955_v39, 368 }
  0x74   : > { %3037 = vbcast.lane.b32.xlu1 %v2955_v39, 360 }
  0x75   : > { %3048 = vbcast.lane.b32.xlu0 %v2959_v24, 256 }
  0x78   : > { %3045 = vbcast.lane.b32.xlu1 %v2955_v39, 376 }
  0x79   : > { %3056 = vbcast.lane.b32.xlu0 %v2959_v24, 272 }
  0x7c   : > { %3052 = vbcast.lane.b32.xlu1 %v2959_v24, 264 }
  0x7d   : > { %3064 = vbcast.lane.b32.xlu0 %v2959_v24, 288 }
  0x80   : > { %3060 = vbcast.lane.b32.xlu1 %v2959_v24, 280 }
  0x81   : > { %3072 = vbcast.lane.b32.xlu0 %v2959_v24, 304 }
  0x84   : > { %3068 = vbcast.lane.b32.xlu1 %v2959_v24, 296 }
  0x85   : > { %3080 = vbcast.lane.b32.xlu0 %v2959_v24, 320 }
  0x88   : > { %3076 = vbcast.lane.b32.xlu1 %v2959_v24, 312 }
  0x89   : > { %3088 = vbcast.lane.b32.xlu0 %v2959_v24, 336 }
  0x8c   : > { %3084 = vbcast.lane.b32.xlu1 %v2959_v24, 328 }
  0x8d   : > { %3096 = vbcast.lane.b32.xlu0 %v2959_v24, 352 }
  0x90   : > { %3092 = vbcast.lane.b32.xlu1 %v2959_v24, 344 }
  0x91   : > { %3104 = vbcast.lane.b32.xlu0 %v2959_v24, 368 }
  0x94   : > { %3100 = vbcast.lane.b32.xlu1 %v2959_v24, 360 }
  0x95   : > { %3111 = vbcast.lane.b32.xlu0 %v2963_v26, 256 }
  0x98   : > { %3108 = vbcast.lane.b32.xlu1 %v2959_v24, 376 }
  0x99   : > { %3119 = vbcast.lane.b32.xlu0 %v2963_v26, 272 }
  0x9c   : > { %3115 = vbcast.lane.b32.xlu1 %v2963_v26, 264 }
  0x9d   : > { %3127 = vbcast.lane.b32.xlu0 %v2963_v26, 288 }
  0xa0   : > { %3123 = vbcast.lane.b32.xlu1 %v2963_v26, 280 }
  0xa1   : > { %3135 = vbcast.lane.b32.xlu0 %v2963_v26, 304 }
  0xa3   : > { %v523_v40 = vpop.permute.xlu1 %522  ;;  %v513_v41 = vpop.permute.xlu0 %512 }
  0xa4   : > { %3131 = vbcast.lane.b32.xlu1 %v2963_v26, 296 }
  0xa5   : > { %3143 = vbcast.lane.b32.xlu0 %v2963_v26, 320 }
  0xa7   : > { %v528_v42 = vpop.permute.xlu1 %527 }
  0xa8   : > { %v518_v43 = vpop.permute.xlu0 %517  ;;  %3139 = vbcast.lane.b32.xlu1 %v2963_v26, 312 }
  0xa9   : > { %3151 = vbcast.lane.b32.xlu0 %v2963_v26, 336 }
  0xab   : > { %v538_v52 = vpop.permute.xlu1 %537 }
  0xac   : > { %v533_v56 = vpop.permute.xlu0 %532  ;;  %3147 = vbcast.lane.b32.xlu1 %v2963_v26, 328 }
  0xad   : > { %3159 = vbcast.lane.b32.xlu0 %v2963_v26, 352 }
  0xaf   : > { %v548_v63 = vpop.permute.xlu1 %547 }
  0xb0   : > { %v543_v3 = vpop.permute.xlu0 %542  ;;  %3155 = vbcast.lane.b32.xlu1 %v2963_v26, 344 }
  0xb1   : > { %3167 = vbcast.lane.b32.xlu0 %v2963_v26, 368 }
  0xb3   : > { %v19113_v31 = vpop.permute.xlu1 %740 }
  0xb4   : > { %3163 = vbcast.lane.b32.xlu1 %v2963_v26, 360  ;;  %v19119_v34 = vpop.permute.xlu0 %735 }
  0xb5   : > { %3174 = vbcast.lane.b32.xlu0 %v2967_v30, 256 }
  0xb7   : > { %v19115_v32 = vpop.permute.xlu1 %750 }
  0xb8   : > { %3171 = vbcast.lane.b32.xlu1 %v2963_v26, 376 }
  0xb9   : > { %3182 = vbcast.lane.b32.xlu0 %v2967_v30, 272 }
  0xbb   : > { %v19117_v33 = vpop.permute.xlu1 %760 }
  0xbc   : > { %3178 = vbcast.lane.b32.xlu1 %v2967_v30, 264 }
  0xbd   : > { %3190 = vbcast.lane.b32.xlu0 %v2967_v30, 288 }
  0xbf   : > { %v19122_v39 = vpop.permute.xlu1 %770 }
  0xc0   : > { %3186 = vbcast.lane.b32.xlu1 %v2967_v30, 280 }
  0xc1   : > { %3198 = vbcast.lane.b32.xlu0 %v2967_v30, 304 }
  0xc4   : > { %3194 = vbcast.lane.b32.xlu1 %v2967_v30, 296 }
  0xc5   : > { %3206 = vbcast.lane.b32.xlu0 %v2967_v30, 320 }
  0xc8   : > { %3202 = vbcast.lane.b32.xlu1 %v2967_v30, 312 }
  0xc9   : > { %3214 = vbcast.lane.b32.xlu0 %v2967_v30, 336 }
  0xcc   : > { %3210 = vbcast.lane.b32.xlu1 %v2967_v30, 328 }
  0xcd   : > { %3222 = vbcast.lane.b32.xlu0 %v2967_v30, 352 }
  0xd0   : > { %3218 = vbcast.lane.b32.xlu1 %v2967_v30, 344 }
  0xd1   : > { %3230 = vbcast.lane.b32.xlu0 %v2967_v30, 368 }
  0xd4   : > { %3226 = vbcast.lane.b32.xlu1 %v2967_v30, 360 }
  0xd8   : > { %3234 = vbcast.lane.b32.xlu1 %v2967_v30, 376 }
  0xee   : > { %v18187_v44 = vpop.f32.mrf.mxu0 }
  0xef   : > { %v651_v45 = vadd.f32 %v18187_v44, %v518_v43 }
  0xf0   : > { %v645_v46 = vpop.f32.mrf.mxu0 }
  0xf1   : > { %v685_v47 = vmax.f32 %v651_v45, 0.0  ;;  %v646_v48 = vadd.f32 %v645_v46, %v513_v41  ;;  %v19125_v41 = vpop.permute.xlu0 %745 }
  0xf2   : > { %v18190_v49 = vpop.f32.mrf.mxu0 }
  0xf3   : > { %694 = vst.msk [vmem:[%s19029_s26 + $0x8] sm:$0xff] %vm364_vm3, %v685_v47  ;;  %v684_v50 = vmax.f32 %v646_v48, 0.0  ;;  %v661_v51 = vadd.f32 %v18190_v49, %v528_v42  ;;  %v19127_v42 = vpop.permute.xlu1 %780 }
  0xf4   : > { %v655_v53 = vpop.f32.mrf.mxu0 }
  0xf5   : > { %693 = vst.msk [vmem:[%s19029_s26] sm:$0xff] %vm364_vm3, %v684_v50  ;;  %v687_v54 = vmax.f32 %v661_v51, 0.0  ;;  %v656_v55 = vadd.f32 %v655_v53, %v523_v40  ;;  %v2971_v40 = vrot.slane %v19021_v37, %v2970_v38  ;;  %v19129_v43 = vpop.permute.xlu0 %755 }
  0xf6   : > { %v18193_v57 = vpop.f32.mrf.mxu0 }
  0xf7   : > { %696 = vst.msk [vmem:[%s19029_s26 + $0x18] sm:$0xff] %vm364_vm3, %v687_v54  ;;  %v686_v58 = vmax.f32 %v656_v55, 0.0  ;;  %v671_v59 = vadd.f32 %v18193_v57, %v538_v52  ;;  %3241 = vbcast.lane.b32.xlu1 %v2971_v40, 264  ;;  %3237 = vbcast.lane.b32.xlu0 %v2971_v40, 256  ;;  %v791_v46 = vpop.permute.xlu1 %790 }
  0xf8   : > { %v665_v60 = vpop.f32.mrf.mxu0 }
  0xf9   : > { %695 = vst.msk [vmem:[%s19029_s26 + $0x10] sm:$0xff] %vm364_vm3, %v686_v58  ;;  %v689_v61 = vmax.f32 %v671_v59, 0.0  ;;  %v666_v62 = vadd.f32 %v665_v60, %v533_v56  ;;  %v19137_v48 = vpop.permute.xlu0 %765 }
  0xfa   : > { %v18196_v0 = vpop.f32.mrf.mxu0 }
  0xfb   : > { %698 = vst.msk [vmem:[%s19029_s26 + $0x28] sm:$0xff] %vm364_vm3, %v689_v61  ;;  %v688_v1 = vmax.f32 %v666_v62, 0.0  ;;  %v681_v2 = vadd.f32 %v18196_v0, %v548_v63  ;;  %3249 = vbcast.lane.b32.xlu1 %v2971_v40, 280  ;;  %3245 = vbcast.lane.b32.xlu0 %v2971_v40, 272  ;;  %v801_v51 = vpop.permute.xlu1 %800  ;;  %v2974_v63 = vsub.s32 5, %v19016_v36 }
  0xfc   : > { %v675_v4 = vpop.f32.mrf.mxu0 }
  0xfd   : > { %697 = vst.msk [vmem:[%s19029_s26 + $0x20] sm:$0xff] %vm364_vm3, %v688_v1  ;;  %v691_v5 = vmax.f32 %v681_v2, 0.0  ;;  %v676_v6 = vadd.f32 %v675_v4, %v543_v3  ;;  %v776_v53 = vpop.permute.xlu0 %775  ;;  %v19153_v2 = vrot.slane %v19021_v37, %v2974_v63  ;;  %v18775_v63 = vmov -inf  }
  0xfe   : > { %366 = vst.msk [vmem:[#allocation2 + $0x8] sm:$0xff] %vm364_vm3, %v18775_v63  ;;  %365 = vst.msk [vmem:[#allocation2] sm:$0xff] %vm364_vm3, %v18775_v63 }
  0xff   : > { %700 = vst.msk [vmem:[%s19029_s26 + $0x38] sm:$0xff] %vm364_vm3, %v691_v5  ;;  %v690_v7 = vmax.f32 %v676_v6, 0.0  ;;  %18197 = vmatprep.subr.mxu1 %v691_v5  ;;  %3257 = vbcast.lane.b32.xlu1 %v2971_v40, 296  ;;  %v811_v56 = vpop.permute.xlu1 %810  ;;  %367 = vst.msk [vmem:[#allocation2 + $0x10] sm:$0xff] %vm364_vm3, %v18775_v63 }
 0x100   : > { %18198 = vmatpush3.msra.mxu1 %v691_v5  ;;  %3253 = vbcast.lane.b32.xlu0 %v2971_v40, 288  ;;  %368 = vst.msk [vmem:[#allocation2 + $0x18] sm:$0xff] %vm364_vm3, %v18775_v63  ;;  %369 = vst.msk [vmem:[#allocation2 + $0x20] sm:$0xff] %vm364_vm3, %v18775_v63 }
 0x101   : > { %699 = vst.msk [vmem:[%s19029_s26 + $0x30] sm:$0xff] %vm364_vm3, %v690_v7  ;;  %18199 = vmatprep.subr.mxu1 %v690_v7  ;;  %370 = vst.msk [vmem:[#allocation2 + $0x28] sm:$0xff] %vm364_vm3, %v18775_v63  ;;  %s334_s26 = scalar_lea.vmem [#allocation6], %s17666_s24 }
 0x102   : > { %18200 = vmatpush3.msra.mxu1 %v690_v7  ;;  %371 = vst.msk [vmem:[#allocation2 + $0x30] sm:$0xff] %vm364_vm3, %v18775_v63  ;;  %372 = vst.msk [vmem:[#allocation2 + $0x38] sm:$0xff] %vm364_vm3, %v18775_v63  ;;  %s17538_s12 = sshll.u32 %s334_s26, 4  ;;  %s17539_s12 = int_to_ptr.vmem [resolvable:$true] %s17538_s12 }
 0x103   : > { %18201 = vmatprep.subr.mxu1 %v689_v61  ;;  %3265 = vbcast.lane.b32.xlu1 %v2971_v40, 312  ;;  %373 = vst.msk [vmem:[#allocation2 + $0x40] sm:$0xff] %vm364_vm3, %v18775_v63  ;;  %374 = vst.msk [vmem:[#allocation2 + $0x48] sm:$0xff] %vm364_vm3, %v18775_v63  ;;  %s18689_s19 = scalar_lea.vmem %s17539_s12, 128  ;;  %p18696_p0 = scmp.lt.s32.totalorder %s17539_s12, %s18694_s22 }
 0x104   : > { %18202 = vmatpush3.msra.mxu1 %v689_v61  ;;  %3261 = vbcast.lane.b32.xlu0 %v2971_v40, 304  ;;  %v19149_v61 = vpop.permute.xlu1 %2985  ;;  %375 = vst.msk [vmem:[#allocation2 + $0x50] sm:$0xff] %vm364_vm3, %v18775_v63  ;;  %376 = vst.msk [vmem:[#allocation2 + $0x58] sm:$0xff] %vm364_vm3, %v18775_v63  ;;  %p18690_p10 = scmp.ne.s32.totalorder %s17539_s12, %s18689_s19  ;;  %p18697_p1 = scmp.lt.s32.totalorder %s18695_s20, %s18689_s19 }
 0x105   : > { %18203 = vmatprep.subr.mxu1 %v688_v1  ;;  %377 = vst.msk [vmem:[#allocation2 + $0x60] sm:$0xff] %vm364_vm3, %v18775_v63  ;;  %378 = vst.msk [vmem:[#allocation2 + $0x68] sm:$0xff] %vm364_vm3, %v18775_v63 }
 0x106   : > { %18204 = vmatpush3.msra.mxu1 %v688_v1  ;;  %379 = vst.msk [vmem:[#allocation2 + $0x70] sm:$0xff] %vm364_vm3, %v18775_v63  ;;  %380 = vst.msk [vmem:[#allocation2 + $0x78] sm:$0xff] %vm364_vm3, %v18775_v63  ;;  %p18691_p11 = pnand %p18690_p10, %p18863_p4  ;;  %p18698_p2 = por %p18697_p1, %p18696_p0 }
 0x107   : > { %18205 = vmatprep.subr.mxu1 %v687_v54  ;;  %3273 = vbcast.lane.b32.xlu1 %v2971_v40, 328  ;;  %381 = vst.msk [vmem:[#allocation2 + $0x80] sm:$0xff] %vm364_vm3, %v18775_v63  ;;  %382 = vst.msk [vmem:[#allocation2 + $0x88] sm:$0xff] %vm364_vm3, %v18775_v63 }
 0x108   : > { %18206 = vmatpush3.msra.mxu1 %v687_v54  ;;  %3269 = vbcast.lane.b32.xlu0 %v2971_v40, 320  ;;  %v19155_v4 = vpop.permute.xlu1 %2993  ;;  %383 = vst.msk [vmem:[#allocation2 + $0x90] sm:$0xff] %vm364_vm3, %v18775_v63  ;;  %384 = vst.msk [vmem:[#allocation2 + $0x98] sm:$0xff] %vm364_vm3, %v18775_v63  ;;  %p18692_p13 = pneg %p18691_p11 }
 0x109   : > { %18207 = vmatprep.subr.mxu1 %v686_v58  ;;  %385 = vst.msk [vmem:[#allocation2 + $0xa0] sm:$0xff] %vm364_vm3, %v18775_v63  ;;  %386 = vst.msk [vmem:[#allocation2 + $0xa8] sm:$0xff] %vm364_vm3, %v18775_v63 }
 0x10a   : > { %18208 = vmatpush3.msra.mxu1 %v686_v58  ;;  %v786_v58 = vpop.permute.xlu0 %785  ;;  %387 = vst.msk [vmem:[#allocation2 + $0xb0] sm:$0xff] %vm364_vm3, %v18775_v63  ;;  %388 = vst.msk [vmem:[#allocation2 + $0xb8] sm:$0xff] %vm364_vm3, %v18775_v63  ;;  %p18699_p3 = pnand %p18698_p2, %p18692_p13 }
 0x10b   : > { %18209 = vmatprep.subr.mxu1 %v685_v47  ;;  %3281 = vbcast.lane.b32.xlu1 %v2971_v40, 344  ;;  %389 = vst.msk [vmem:[#allocation2 + $0xc0] sm:$0xff] %vm364_vm3, %v18775_v63  ;;  %390 = vst.msk [vmem:[#allocation2 + $0xc8] sm:$0xff] %vm364_vm3, %v18775_v63 }
 0x10c   : > { %18210 = vmatpush3.msra.mxu1 %v685_v47  ;;  %3277 = vbcast.lane.b32.xlu0 %v2971_v40, 336  ;;  %391 = vst.msk [vmem:[#allocation2 + $0xd0] sm:$0xff] %vm364_vm3, %v18775_v63  ;;  %392 = vst.msk [vmem:[#allocation2 + $0xd8] sm:$0xff] %vm364_vm3, %v18775_v63 }
 0x10d   : > { %18211 = vmatprep.subr.mxu1 %v684_v50  ;;  %393 = vst.msk [vmem:[#allocation2 + $0xe0] sm:$0xff] %vm364_vm3, %v18775_v63  ;;  %394 = vst.msk [vmem:[#allocation2 + $0xe8] sm:$0xff] %vm364_vm3, %v18775_v63 }
 0x10e   : > { %18212 = vmatpush3.msra.mxu1 %v684_v50  ;;  %v796_v0 = vpop.permute.xlu0 %795  ;;  %395 = vst.msk [vmem:[#allocation2 + $0xf0] sm:$0xff] %vm364_vm3, %v18775_v63  ;;  %396 = vst.msk [vmem:[#allocation2 + $0xf8] sm:$0xff] %vm364_vm3, %v18775_v63 }
 0x10f   : > { %18214 = vmatmul.mubr.msk.f32.vlgmr.msra.gmra.mxu1 %vm813_vm2, %v702_v8  ;;  %3289 = vbcast.lane.b32.xlu1 %v2971_v40, 360  ;;  %397 = vst.msk [vmem:[#allocation2 + $0x100] sm:$0xff] %vm364_vm3, %v18775_v63  ;;  %398 = vst.msk [vmem:[#allocation2 + $0x108] sm:$0xff] %vm364_vm3, %v18775_v63 }
 0x110   : > { %18216 = vmatprep.mubr.msk.f32.mxu1 %vm813_vm2, %v703_v9  ;;  %3285 = vbcast.lane.b32.xlu0 %v2971_v40, 352  ;;  %399 = vst.msk [vmem:[#allocation2 + $0x110] sm:$0xff] %vm364_vm3, %v18775_v63  ;;  %400 = vst.msk [vmem:[#allocation2 + $0x118] sm:$0xff] %vm364_vm3, %v18775_v63 }
 0x111   : > { %401 = vst.msk [vmem:[#allocation2 + $0x120] sm:$0xff] %vm364_vm3, %v18775_v63  ;;  %402 = vst.msk [vmem:[#allocation2 + $0x128] sm:$0xff] %vm364_vm3, %v18775_v63 }
 0x112   : > { %v806_v6 = vpop.permute.xlu0 %805  ;;  %403 = vst.msk [vmem:[#allocation2 + $0x130] sm:$0xff] %vm364_vm3, %v18775_v63  ;;  %404 = vst.msk [vmem:[#allocation2 + $0x138] sm:$0xff] %vm364_vm3, %v18775_v63 }
 0x113   : > { %18217 = vmatmul.mubr.msk.f32.gmra.mxu1 %vm813_vm2, %v704_v10  ;;  %3297 = vbcast.lane.b32.xlu1 %v2971_v40, 376  ;;  %405 = vst.msk [vmem:[#allocation2 + $0x140] sm:$0xff] %vm364_vm3, %v18775_v63  ;;  %406 = vst.msk [vmem:[#allocation2 + $0x148] sm:$0xff] %vm364_vm3, %v18775_v63 }
 0x114   : > { %18219 = vmatprep.mubr.msk.f32.mxu1 %vm813_vm2, %v705_v11  ;;  %3293 = vbcast.lane.b32.xlu0 %v2971_v40, 368  ;;  %v19163_v11 = vpop.permute.xlu1 %2997  ;;  %407 = vst.msk [vmem:[#allocation2 + $0x150] sm:$0xff] %vm364_vm3, %v18775_v63  ;;  %408 = vst.msk [vmem:[#allocation2 + $0x158] sm:$0xff] %vm364_vm3, %v18775_v63 }
 0x115   : > { %409 = vst.msk [vmem:[#allocation2 + $0x160] sm:$0xff] %vm364_vm3, %v18775_v63  ;;  %410 = vst.msk [vmem:[#allocation2 + $0x168] sm:$0xff] %vm364_vm3, %v18775_v63 }
 0x116   : > { %411 = vst.msk [vmem:[#allocation2 + $0x170] sm:$0xff] %vm364_vm3, %v18775_v63  ;;  %412 = vst.msk [vmem:[#allocation2 + $0x178] sm:$0xff] %vm364_vm3, %v18775_v63 }
 0x117   : > { %18220 = vmatmul.mubr.msk.f32.gmra.mxu1 %vm813_vm2, %v706_v12  ;;  %3304 = vbcast.lane.b32.xlu1 %v19153_v2, 264  ;;  %413 = vst.msk [vmem:[#allocation2 + $0x180] sm:$0xff] %vm364_vm3, %v18775_v63  ;;  %414 = vst.msk [vmem:[#allocation2 + $0x188] sm:$0xff] %vm364_vm3, %v18775_v63 }
 0x118   : > { %18222 = vmatprep.mubr.msk.f32.mxu1 %vm813_vm2, %v707_v13  ;;  %3300 = vbcast.lane.b32.xlu0 %v19153_v2, 256  ;;  %415 = vst.msk [vmem:[#allocation2 + $0x190] sm:$0xff] %vm364_vm3, %v18775_v63  ;;  %416 = vst.msk [vmem:[#allocation2 + $0x198] sm:$0xff] %vm364_vm3, %v18775_v63 }
 0x119   : > { %417 = vst.msk [vmem:[#allocation2 + $0x1a0] sm:$0xff] %vm364_vm3, %v18775_v63  ;;  %418 = vst.msk [vmem:[#allocation2 + $0x1a8] sm:$0xff] %vm364_vm3, %v18775_v63 }
 0x11a   : > { %419 = vst.msk [vmem:[#allocation2 + $0x1b0] sm:$0xff] %vm364_vm3, %v18775_v63  ;;  %420 = vst.msk [vmem:[#allocation2 + $0x1b8] sm:$0xff] %vm364_vm3, %v18775_v63 }
 0x11b   : > { %18223 = vmatmul.mubr.msk.f32.gmra.mxu1 %vm813_vm2, %v708_v14  ;;  %3312 = vbcast.lane.b32.xlu1 %v19153_v2, 280  ;;  %v19169_v14 = vpop.permute.xlu0 %2989  ;;  %421 = vst.msk [vmem:[#allocation2 + $0x1c0] sm:$0xff] %vm364_vm3, %v18775_v63  ;;  %422 = vst.msk [vmem:[#allocation2 + $0x1c8] sm:$0xff] %vm364_vm3, %v18775_v63 }
 0x11c   : > { %18225 = vmatprep.mubr.msk.f32.mxu1 %vm813_vm2, %v709_v15  ;;  %3308 = vbcast.lane.b32.xlu0 %v19153_v2, 272  ;;  %423 = vst.msk [vmem:[#allocation2 + $0x1d0] sm:$0xff] %vm364_vm3, %v18775_v63  ;;  %424 = vst.msk [vmem:[#allocation2 + $0x1d8] sm:$0xff] %vm364_vm3, %v18775_v63 }
 0x11d   : > { %425 = vst.msk [vmem:[#allocation2 + $0x1e0] sm:$0xff] %vm364_vm3, %v18775_v63  ;;  %426 = vst.msk [vmem:[#allocation2 + $0x1e8] sm:$0xff] %vm364_vm3, %v18775_v63 }
 0x11e   : > { %427 = vst.msk [vmem:[#allocation2 + $0x1f0] sm:$0xff] %vm364_vm3, %v18775_v63  ;;  %428 = vst.msk [vmem:[#allocation2 + $0x1f8] sm:$0xff] %vm364_vm3, %v18775_v63 }
 0x11f   : > { %18226 = vmatmul.mubr.msk.f32.gmra.mxu1 %vm813_vm2, %v710_v16  ;;  %429 = vst.msk [vmem:[#allocation2 + $0x200] sm:$0xff] %vm364_vm3, %v18775_v63  ;;  %430 = vst.msk [vmem:[#allocation2 + $0x208] sm:$0xff] %vm364_vm3, %v18775_v63  ;;  %3320 = vbcast.lane.b32.xlu1 %v19153_v2, 296 }
 0x120   : > { %18228 = vmatprep.mubr.msk.f32.mxu1 %vm813_vm2, %v711_v17  ;;  %431 = vst.msk [vmem:[#allocation2 + $0x210] sm:$0xff] %vm364_vm3, %v18775_v63  ;;  %432 = vst.msk [vmem:[#allocation2 + $0x218] sm:$0xff] %vm364_vm3, %v18775_v63  ;;  %3316 = vbcast.lane.b32.xlu0 %v19153_v2, 288 }
 0x121   : > { %433 = vst.msk [vmem:[#allocation2 + $0x220] sm:$0xff] %vm364_vm3, %v18775_v63  ;;  %434 = vst.msk [vmem:[#allocation2 + $0x228] sm:$0xff] %vm364_vm3, %v18775_v63 }
 0x122   : > { %435 = vst.msk [vmem:[#allocation2 + $0x230] sm:$0xff] %vm364_vm3, %v18775_v63  ;;  %436 = vst.msk [vmem:[#allocation2 + $0x238] sm:$0xff] %vm364_vm3, %v18775_v63 }
 0x123   : > { %18229 = vmatmul.mubr.msk.f32.gmra.mxu1 %vm813_vm2, %v712_v18  ;;  %437 = vst.msk [vmem:[#allocation2 + $0x240] sm:$0xff] %vm364_vm3, %v18775_v63  ;;  %438 = vst.msk [vmem:[#allocation2 + $0x248] sm:$0xff] %vm364_vm3, %v18775_v63  ;;  %3328 = vbcast.lane.b32.xlu1 %v19153_v2, 312 }
 0x124   : > { %18231 = vmatprep.mubr.msk.f32.mxu1 %vm813_vm2, %v713_v19  ;;  %v19185_v19 = vpop.permute.xlu1 %3005  ;;  %439 = vst.msk [vmem:[#allocation2 + $0x250] sm:$0xff] %vm364_vm3, %v18775_v63  ;;  %440 = vst.msk [vmem:[#allocation2 + $0x258] sm:$0xff] %vm364_vm3, %v18775_v63  ;;  %3324 = vbcast.lane.b32.xlu0 %v19153_v2, 304 }
 0x125   : > { %441 = vst.msk [vmem:[#allocation2 + $0x260] sm:$0xff] %vm364_vm3, %v18775_v63  ;;  %442 = vst.msk [vmem:[#allocation2 + $0x268] sm:$0xff] %vm364_vm3, %v18775_v63 }
 0x126   : > { %443 = vst.msk [vmem:[#allocation2 + $0x270] sm:$0xff] %vm364_vm3, %v18775_v63  ;;  %444 = vst.msk [vmem:[#allocation2 + $0x278] sm:$0xff] %vm364_vm3, %v18775_v63 }
 0x127   : > { %18232 = vmatmul.mubr.msk.f32.gmra.mxu1 %vm813_vm2, %v714_v20  ;;  %445 = vst.msk [vmem:[#allocation2 + $0x280] sm:$0xff] %vm364_vm3, %v18775_v63  ;;  %446 = vst.msk [vmem:[#allocation2 + $0x288] sm:$0xff] %vm364_vm3, %v18775_v63  ;;  %3336 = vbcast.lane.b32.xlu1 %v19153_v2, 328 }
 0x128   : > { %18234 = vmatprep.mubr.msk.f32.mxu1 %vm813_vm2, %v715_v21  ;;  %v19210_v27 = vpop.permute.xlu1 %3013  ;;  %447 = vst.msk [vmem:[#allocation2 + $0x290] sm:$0xff] %vm364_vm3, %v18775_v63  ;;  %448 = vst.msk [vmem:[#allocation2 + $0x298] sm:$0xff] %vm364_vm3, %v18775_v63  ;;  %3332 = vbcast.lane.b32.xlu0 %v19153_v2, 320 }
 0x129   : > { %449 = vst.msk [vmem:[#allocation2 + $0x2a0] sm:$0xff] %vm364_vm3, %v18775_v63  ;;  %450 = vst.msk [vmem:[#allocation2 + $0x2a8] sm:$0xff] %vm364_vm3, %v18775_v63 }
 0x12a   : > { %451 = vst.msk [vmem:[#allocation2 + $0x2b0] sm:$0xff] %vm364_vm3, %v18775_v63  ;;  %452 = vst.msk [vmem:[#allocation2 + $0x2b8] sm:$0xff] %vm364_vm3, %v18775_v63 }
 0x12b   : > { %18235 = vmatmul.mubr.msk.f32.gmra.mxu1 %vm813_vm2, %v716_v22  ;;  %v19192_v22 = vpop.permute.xlu0 %3001  ;;  %453 = vst.msk [vmem:[#allocation2 + $0x2c0] sm:$0xff] %vm364_vm3, %v18775_v63  ;;  %454 = vst.msk [vmem:[#allocation2 + $0x2c8] sm:$0xff] %vm364_vm3, %v18775_v63  ;;  %3344 = vbcast.lane.b32.xlu1 %v19153_v2, 344  ;;  %vm16909_vm2 = vcmask 1048512  }
 0x12c   : > { %18349 = vmatprep.mubr.f32.mxu1 %v1376_v28  ;;  %455 = vst.msk [vmem:[#allocation2 + $0x2d0] sm:$0xff] %vm364_vm3, %v18775_v63  ;;  %456 = vst.msk [vmem:[#allocation2 + $0x2d8] sm:$0xff] %vm364_vm3, %v18775_v63  ;;  %3340 = vbcast.lane.b32.xlu0 %v19153_v2, 336 }
 0x12d   : > { %457 = vst.msk [vmem:[#allocation2 + $0x2e0] sm:$0xff] %vm364_vm3, %v18775_v63  ;;  %458 = vst.msk [vmem:[#allocation2 + $0x2e8] sm:$0xff] %vm364_vm3, %v18775_v63 }
 0x12e   : > { %459 = vst.msk [vmem:[#allocation2 + $0x2f0] sm:$0xff] %vm364_vm3, %v18775_v63  ;;  %460 = vst.msk [vmem:[#allocation2 + $0x2f8] sm:$0xff] %vm364_vm3, %v18775_v63 }
 0x12f   : > { %v19218_v30 = vpop.permute.xlu0 %3009  ;;  %461 = vst.msk [vmem:[#allocation2 + $0x300] sm:$0xff] %vm364_vm3, %v18775_v63  ;;  %462 = vst.msk [vmem:[#allocation2 + $0x308] sm:$0xff] %vm364_vm3, %v18775_v63  ;;  %3352 = vbcast.lane.b32.xlu1 %v19153_v2, 360 }
 0x130   : > { %463 = vst.msk [vmem:[#allocation2 + $0x310] sm:$0xff] %vm364_vm3, %v18775_v63  ;;  %464 = vst.msk [vmem:[#allocation2 + $0x318] sm:$0xff] %vm364_vm3, %v18775_v63  ;;  %3348 = vbcast.lane.b32.xlu0 %v19153_v2, 352 }
 0x131   : > { %465 = vst.msk [vmem:[#allocation2 + $0x320] sm:$0xff] %vm364_vm3, %v18775_v63  ;;  %466 = vst.msk [vmem:[#allocation2 + $0x328] sm:$0xff] %vm364_vm3, %v18775_v63 }
 0x132   : > { %467 = vst.msk [vmem:[#allocation2 + $0x330] sm:$0xff] %vm364_vm3, %v18775_v63  ;;  %468 = vst.msk [vmem:[#allocation2 + $0x338] sm:$0xff] %vm364_vm3, %v18775_v63 }
 0x133   : > { %469 = vst.msk [vmem:[#allocation2 + $0x340] sm:$0xff] %vm364_vm3, %v18775_v63  ;;  %470 = vst.msk [vmem:[#allocation2 + $0x348] sm:$0xff] %vm364_vm3, %v18775_v63  ;;  %3360 = vbcast.lane.b32.xlu1 %v19153_v2, 376 }
 0x134   : > { %471 = vst.msk [vmem:[#allocation2 + $0x350] sm:$0xff] %vm364_vm3, %v18775_v63  ;;  %472 = vst.msk [vmem:[#allocation2 + $0x358] sm:$0xff] %vm364_vm3, %v18775_v63  ;;  %3356 = vbcast.lane.b32.xlu0 %v19153_v2, 368  ;;  %v1730_v2 = vld [vmem:[#allocation3 + $0x208] sm:$0xff] }
 0x135   : > { %473 = vst.msk [vmem:[#allocation2 + $0x360] sm:$0xff] %vm364_vm3, %v18775_v63  ;;  %474 = vst.msk [vmem:[#allocation2 + $0x368] sm:$0xff] %vm364_vm3, %v18775_v63 }
 0x136   : > { %475 = vst.msk [vmem:[#allocation2 + $0x370] sm:$0xff] %vm364_vm3, %v18775_v63  ;;  %476 = vst.msk [vmem:[#allocation2 + $0x378] sm:$0xff] %vm364_vm3, %v18775_v63 }
 0x137   : > { %477 = vst.msk [vmem:[#allocation2 + $0x380] sm:$0xff] %vm364_vm3, %v18775_v63  ;;  %478 = vst.msk [vmem:[#allocation2 + $0x388] sm:$0xff] %vm364_vm3, %v18775_v63 }
 0x138   : > { %479 = vst.msk [vmem:[#allocation2 + $0x390] sm:$0xff] %vm364_vm3, %v18775_v63  ;;  %480 = vst.msk [vmem:[#allocation2 + $0x398] sm:$0xff] %vm364_vm3, %v18775_v63 }
 0x139   : > { %481 = vst.msk [vmem:[#allocation2 + $0x3a0] sm:$0xff] %vm364_vm3, %v18775_v63  ;;  %482 = vst.msk [vmem:[#allocation2 + $0x3a8] sm:$0xff] %vm364_vm3, %v18775_v63 }
 0x13a   : > { %483 = vst.msk [vmem:[#allocation2 + $0x3b0] sm:$0xff] %vm364_vm3, %v18775_v63  ;;  %484 = vst.msk [vmem:[#allocation2 + $0x3b8] sm:$0xff] %vm364_vm3, %v18775_v63 }
 0x13b   : > { %485 = vst.msk [vmem:[#allocation2 + $0x3c0] sm:$0xff] %vm364_vm3, %v18775_v63  ;;  %486 = vst.msk [vmem:[#allocation2 + $0x3c8] sm:$0xff] %vm364_vm3, %v18775_v63 }
 0x13c   : > { %487 = vst.msk [vmem:[#allocation2 + $0x3d0] sm:$0xff] %vm364_vm3, %v18775_v63  ;;  %488 = vst.msk [vmem:[#allocation2 + $0x3d8] sm:$0xff] %vm364_vm3, %v18775_v63 }
 0x13d   : > { %489 = vst.msk [vmem:[#allocation2 + $0x3e0] sm:$0xff] %vm364_vm3, %v18775_v63  ;;  %490 = vst.msk [vmem:[#allocation2 + $0x3e8] sm:$0xff] %vm364_vm3, %v18775_v63 }
 0x13e   : > { %491 = vst.msk [vmem:[#allocation2 + $0x3f0] sm:$0xff] %vm364_vm3, %v18775_v63  ;;  %492 = vst.msk [vmem:[#allocation2 + $0x3f8] sm:$0xff] %vm364_vm3, %v18775_v63 }
 0x1cf   : > { %v19131_v44 = vpop.f32.mrf.mxu1 }
 0x1d1   : > { %v19133_v45 = vpop.f32.mrf.mxu1 }
 0x1d3   : > { %v19135_v47 = vpop.f32.mrf.mxu1 }
 0x1d5   : > { %v19139_v49 = vpop.f32.mrf.mxu1 }
 0x1d7   : > { %v19141_v50 = vpop.f32.mrf.mxu1 }
 0x1d8   : > { %v954_v38 = vadd.f32 %v19141_v50, %v19117_v33  ;;  %v19238_v33 = vpop.permute.xlu1 %3021  ;;  %v939_v50 = vadd.f32 %v19139_v49, %v19125_v41  ;;  %v929_v49 = vadd.f32 %v19133_v45, %v19119_v34  ;;  %v1024_v45 = vld [vmem:[#allocation3 + $0x8] sm:$0xff] }
 0x1d9   : > { %v19143_v52 = vpop.f32.mrf.mxu1  ;;  %24253 = vst [vmem:[#allocation10_spill] sm:$0xff] %v19238_v33 }
 0x1da   : > { %v949_v40 = vadd.f32 %v19143_v52, %v19129_v43  ;;  %v19246_v43 = vpop.permute.xlu0 %3017  ;;  %v19270_v52 = vmax.f32 %v939_v50, 0.0  ;;  %v19284_v34 = vmax.f32 %v929_v49, 0.0  ;;  %v1036_v49 = vld [vmem:[#allocation3 + $0x68] sm:$0xff] }
 0x1db   : > { %v19145_v54 = vpop.f32.mrf.mxu1 }
 0x1dc   : > { %v964_v25 = vadd.f32 %v19145_v54, %v19122_v39  ;;  %v19266_v41 = vpop.permute.xlu1 %3029 }
 0x1dd   : > { %v19147_v55 = vpop.f32.mrf.mxu1  ;;  %24254 = vst [vmem:[#allocation11_spill] sm:$0xff] %v19266_v41 }
 0x1de   : > { %v959_v28 = vadd.f32 %v19147_v55, %v19137_v48  ;;  %v19224_v39 = vmax.f32 %v964_v25, 0.0  ;;  %v19242_v48 = vmax.f32 %v954_v38, 0.0  ;;  %v1033_v25 = vld [vmem:[#allocation3 + $0x50] sm:$0xff] }
 0x1df   : > { %v18227_v57 = vpop.f32.mrf.mxu1  ;;  %v1382_v38 = vld [vmem:[#allocation3 + $0x130] sm:$0xff] }
 0x1e0   : > { %v974_v20 = vadd.f32 %v18227_v57, %v19127_v42  ;;  %v19232_v42 = vmax.f32 %v959_v28, 0.0  ;;  %v19290_v54 = vpop.permute.xlu1 %3037  ;;  %v1026_v57 = vld [vmem:[#allocation3 + $0x18] sm:$0xff] }
 0x1e1   : > { %v968_v59 = vpop.f32.mrf.mxu1  ;;  %24255 = vst [vmem:[#allocation12_spill] sm:$0xff] %v19290_v54  ;;  %v1034_v28 = vld [vmem:[#allocation3 + $0x58] sm:$0xff] }
 0x1e2   : > { %v969_v23 = vadd.f32 %v968_v59, %v776_v53  ;;  %v19204_v26 = vmax.f32 %v974_v20, 0.0  ;;  %v1377_v53 = vld [vmem:[#allocation3 + $0x108] sm:$0xff]  ;;  %v19307_v59 = vld [vmem:[#allocation3 + $0x110] sm:$0xff] }
 0x1e3   : > { %v18230_v60 = vpop.f32.mrf.mxu1 }
 0x1e4   : > { %v984_v15 = vadd.f32 %v18230_v60, %v791_v46  ;;  %v19214_v29 = vmax.f32 %v969_v23, 0.0  ;;  %v944_v46 = vadd.f32 %v19135_v47, %v19115_v32  ;;  %v934_v32 = vadd.f32 %v19131_v44, %v19113_v31  ;;  %v19274_v31 = vpop.permute.xlu0 %3025 }
 0x1e5   : > { %v978_v62 = vpop.f32.mrf.mxu1 }
 0x1e6   : > { %v979_v17 = vadd.f32 %v978_v62, %v786_v58  ;;  %v19188_v21 = vmax.f32 %v984_v15, 0.0  ;;  %v19260_v47 = vmax.f32 %v944_v46, 0.0  ;;  %v19278_v44 = vmax.f32 %v934_v32, 0.0  ;;  %v19304_v58 = vpop.permute.xlu1 %3045  ;;  %v19314_v62 = vld [vmem:[#allocation3 + $0x118] sm:$0xff]  ;;  %v1031_v15 = vld [vmem:[#allocation3 + $0x40] sm:$0xff] }
 0x1e7   : > { %v18233_v1 = vpop.f32.mrf.mxu1  ;;  %24257 = vst [vmem:[#allocation14_spill] sm:$0xff] %v19304_v58  ;;  %v1383_v46 = vld [vmem:[#allocation3 + $0x138] sm:$0xff]  ;;  %v1035_v32 = vld [vmem:[#allocation3 + $0x60] sm:$0xff] }
 0x1e8   : > { %v994_v9 = vadd.f32 %v18233_v1, %v801_v51  ;;  %v19196_v24 = vmax.f32 %v979_v17, 0.0  ;;  %v19252_v51 = vmax.f32 %v949_v40, 0.0  ;;  %v19294_v55 = vpop.permute.xlu0 %3033  ;;  %v1028_v1 = vld [vmem:[#allocation3 + $0x28] sm:$0xff] }
 0x1e9   : > { %v988_v3 = vpop.f32.mrf.mxu1  ;;  %24256 = vst [vmem:[#allocation13_spill] sm:$0xff] %v19294_v55  ;;  %v1032_v17 = vld [vmem:[#allocation3 + $0x48] sm:$0xff] }
 0x1ea   : > { %v989_v12 = vadd.f32 %v988_v3, %v796_v0  ;;  %v19173_v16 = vmax.f32 %v994_v9, 0.0  ;;  %v1027_v0 = vld [vmem:[#allocation3 + $0x20] sm:$0xff]  ;;  %v19578_v3 = vpop.permute.xlu1 %3052 }
 0x1eb   : > { %v18236_v5 = vpop.f32.mrf.mxu1  ;;  %24259 = vst [vmem:[#allocation16_spill] sm:$0xff] %v19578_v3 }
 0x1ec   : > { %v1004_v7 = vadd.f32 %v18236_v5, %v811_v56  ;;  %v19179_v18 = vmax.f32 %v989_v12, 0.0  ;;  %v1025_v56 = vld [vmem:[#allocation3 + $0x10] sm:$0xff]  ;;  %v19309_v60 = vpop.permute.xlu0 %3041  ;;  %v1381_v12 = vld [vmem:[#allocation3 + $0x128] sm:$0xff] }
 0x1ed   : > { %v998_v8 = vpop.f32.mrf.mxu1  ;;  %24258 = vst [vmem:[#allocation15_spill] sm:$0xff] %v19309_v60 }
 0x1ee   : > { %v19161_v10 = vmax.f32 %v1004_v7, 0.0  ;;  %v999_v37 = vadd.f32 %v998_v8, %v806_v6  ;;  %v1029_v6 = vld [vmem:[#allocation3 + $0x30] sm:$0xff]  ;;  %v1030_v7 = vld [vmem:[#allocation3 + $0x38] sm:$0xff]  ;;  %v1380_v8 = vld [vmem:[#allocation3 + $0x120] sm:$0xff]  ;;  %v19591_v9 = vpop.permute.xlu1 %3060 }
 0x1ef   : > { %24261 = vst [vmem:[#allocation18_spill] sm:$0xff] %v19591_v9 }
 0x1f0   : > { %v19165_v13 = vmax.f32 %v999_v37, 0.0  ;;  %18237 = vmatprep.subr.mxu0 %v19161_v10  ;;  %18317 = vmatprep.subr.mxu1 %v19161_v10  ;;  %v19581_v5 = vpop.permute.xlu0 %3048 }
 0x1f1   : > { %18238 = vmatpush3.msra.mxu0 %v19161_v10  ;;  %18318 = vmatpush3.msra.mxu1 %v19161_v10  ;;  %24260 = vst [vmem:[#allocation17_spill] sm:$0xff] %v19581_v5 }
 0x1f2   : > { %18239 = vmatprep.subr.mxu0 %v19165_v13  ;;  %18319 = vmatprep.subr.mxu1 %v19165_v13  ;;  %v19603_v20 = vpop.permute.xlu1 %3068 }
 0x1f3   : > { %18240 = vmatpush3.msra.mxu0 %v19165_v13  ;;  %18320 = vmatpush3.msra.mxu1 %v19165_v13  ;;  %24263 = vst [vmem:[#allocation20_spill] sm:$0xff] %v19603_v20 }
 0x1f4   : > { %18241 = vmatprep.subr.mxu0 %v19173_v16  ;;  %18321 = vmatprep.subr.mxu1 %v19173_v16  ;;  %v19594_v37 = vpop.permute.xlu0 %3056 }
 0x1f5   : > { %18242 = vmatpush3.msra.mxu0 %v19173_v16  ;;  %18322 = vmatpush3.msra.mxu1 %v19173_v16  ;;  %24262 = vst [vmem:[#allocation19_spill] sm:$0xff] %v19594_v37 }
 0x1f6   : > { %18243 = vmatprep.subr.mxu0 %v19179_v18  ;;  %18323 = vmatprep.subr.mxu1 %v19179_v18  ;;  %v19616_v40 = vpop.permute.xlu1 %3076 }
 0x1f7   : > { %18244 = vmatpush3.msra.mxu0 %v19179_v18  ;;  %18324 = vmatpush3.msra.mxu1 %v19179_v18  ;;  %24265 = vst [vmem:[#allocation22_spill] sm:$0xff] %v19616_v40 }
 0x1f8   : > { %18245 = vmatprep.subr.mxu0 %v19188_v21  ;;  %18325 = vmatprep.subr.mxu1 %v19188_v21  ;;  %v19606_v23 = vpop.permute.xlu0 %3064 }
 0x1f9   : > { %18246 = vmatpush3.msra.mxu0 %v19188_v21  ;;  %18326 = vmatpush3.msra.mxu1 %v19188_v21  ;;  %24264 = vst [vmem:[#allocation21_spill] sm:$0xff] %v19606_v23 }
 0x1fa   : > { %18247 = vmatprep.subr.mxu0 %v19196_v24  ;;  %18327 = vmatprep.subr.mxu1 %v19196_v24 }
 0x1fb   : > { %18248 = vmatpush3.msra.mxu0 %v19196_v24  ;;  %18328 = vmatpush3.msra.mxu1 %v19196_v24 }
 0x1fc   : > { %18249 = vmatprep.subr.mxu0 %v19204_v26  ;;  %18329 = vmatprep.subr.mxu1 %v19204_v26  ;;  %v19620_v50 = vpop.permute.xlu0 %3072 }
 0x1fd   : > { %18250 = vmatpush3.msra.mxu0 %v19204_v26  ;;  %18330 = vmatpush3.msra.mxu1 %v19204_v26  ;;  %24266 = vst [vmem:[#allocation23_spill] sm:$0xff] %v19620_v50  ;;  %v1645_v50 = vld [vmem:[#allocation2 + $0x160] sm:$0xff] }
 0x1fe   : > { %18251 = vmatprep.subr.mxu0 %v19214_v29  ;;  %18331 = vmatprep.subr.mxu1 %v19214_v29 }
 0x1ff   : > { %18252 = vmatpush3.msra.mxu0 %v19214_v29  ;;  %18332 = vmatpush3.msra.mxu1 %v19214_v29 }
 0x200   : > { %18253 = vmatprep.subr.mxu0 %v19224_v39  ;;  %18333 = vmatprep.subr.mxu1 %v19224_v39 }
 0x201   : > { %18254 = vmatpush3.msra.mxu0 %v19224_v39  ;;  %18334 = vmatpush3.msra.mxu1 %v19224_v39 }
 0x202   : > { %18255 = vmatprep.subr.mxu0 %v19232_v42  ;;  %18335 = vmatprep.subr.mxu1 %v19232_v42 }
 0x203   : > { %18256 = vmatpush3.msra.mxu0 %v19232_v42  ;;  %18336 = vmatpush3.msra.mxu1 %v19232_v42 }
 0x204   : > { %18257 = vmatprep.subr.mxu0 %v19242_v48  ;;  %18337 = vmatprep.subr.mxu1 %v19242_v48 }
 0x205   : > { %18258 = vmatpush3.msra.mxu0 %v19242_v48  ;;  %18338 = vmatpush3.msra.mxu1 %v19242_v48 }
 0x206   : > { %18259 = vmatprep.subr.mxu0 %v19252_v51  ;;  %18339 = vmatprep.subr.mxu1 %v19252_v51 }
 0x207   : > { %18260 = vmatpush3.msra.mxu0 %v19252_v51  ;;  %18340 = vmatpush3.msra.mxu1 %v19252_v51 }
 0x208   : > { %18261 = vmatprep.subr.mxu0 %v19260_v47  ;;  %18341 = vmatprep.subr.mxu1 %v19260_v47 }
 0x209   : > { %18262 = vmatpush3.msra.mxu0 %v19260_v47  ;;  %18342 = vmatpush3.msra.mxu1 %v19260_v47 }
 0x20a   : > { %18263 = vmatprep.subr.mxu0 %v19270_v52  ;;  %18343 = vmatprep.subr.mxu1 %v19270_v52 }
 0x20b   : > { %18264 = vmatpush3.msra.mxu0 %v19270_v52  ;;  %18344 = vmatpush3.msra.mxu1 %v19270_v52 }
 0x20c   : > { %18265 = vmatprep.subr.mxu0 %v19278_v44  ;;  %18345 = vmatprep.subr.mxu1 %v19278_v44 }
 0x20d   : > { %18266 = vmatpush3.msra.mxu0 %v19278_v44  ;;  %18346 = vmatpush3.msra.mxu1 %v19278_v44 }
 0x20e   : > { %18267 = vmatprep.subr.mxu0 %v19284_v34  ;;  %18347 = vmatprep.subr.mxu1 %v19284_v34 }
 0x20f   : > { %18268 = vmatpush3.msra.mxu0 %v19284_v34  ;;  %18348 = vmatpush3.msra.mxu1 %v19284_v34 }
 0x210   : > { %18270 = vmatmul.mubr.f32.vlgmr.msra.gmra.mxu0 %v1024_v45  ;;  %18350 = vmatmul.mubr.f32.vlgmr.msra.gmra.mxu1 %v1377_v53  ;;  %v19628_v45 = vpop.permute.xlu1 %3084  ;;  %v1037_v53 = vld [vmem:[#allocation3 + $0x70] sm:$0xff] }
 0x211   : > { %18397 = vmatprep.subr.mxu0 %v19161_v10  ;;  %18557 = vmatprep.subr.mxu1 %v19161_v10  ;;  %24267 = vst [vmem:[#allocation24_spill] sm:$0xff] %v19628_v45  ;;  %v2106_v45 = vld [vmem:[#allocation3 + $0x3c0] sm:$0xff] }
 0x212   : > { %18398 = vmatpush3.msra.mxu0 %v19161_v10  ;;  %18573 = vmatpush3.msra.mxu1 %v19161_v10 }
 0x213   : > { %18399 = vmatprep.subr.mxu0 %v19165_v13  ;;  %18558 = vmatprep.subr.mxu1 %v19165_v13 }
 0x214   : > { %18272 = vmatprep.mubr.f32.mxu0 %v1025_v56  ;;  %18400 = vmatpush3.msra.mxu0 %v19165_v13  ;;  %v19632_v56 = vpop.permute.xlu0 %3080  ;;  %v19642_v63 = vpop.permute.xlu1 %3092 }
 0x215   : > { %18574 = vmatpush3.msra.mxu1 %v19165_v13  ;;  %18273 = vmatmul.mubr.f32.gmra.mxu0 %v1026_v57  ;;  %24268 = vst [vmem:[#allocation25_spill] sm:$0xff] %v19632_v56  ;;  %v1038_v57 = vld [vmem:[#allocation3 + $0x78] sm:$0xff]  ;;  %24269 = vst [vmem:[#allocation26_spill] sm:$0xff] %v19642_v63 }
 0x216   : > { %18401 = vmatprep.subr.mxu0 %v19173_v16  ;;  %18559 = vmatprep.subr.mxu1 %v19173_v16 }
 0x217   : > { %18352 = vmatprep.mubr.f32.mxu1 %v19307_v59  ;;  %18402 = vmatpush3.msra.mxu0 %v19173_v16  ;;  %v1384_v59 = vld [vmem:[#allocation3 + $0x140] sm:$0xff] }
 0x218   : > { %18575 = vmatpush3.msra.mxu1 %v19173_v16  ;;  %18403 = vmatprep.subr.mxu0 %v19179_v18 }
 0x219   : > { %18353 = vmatmul.mubr.f32.gmra.mxu1 %v19314_v62  ;;  %18560 = vmatprep.subr.mxu1 %v19179_v18  ;;  %v1385_v62 = vld [vmem:[#allocation3 + $0x148] sm:$0xff] }
 0x21a   : > { %18275 = vmatprep.mubr.f32.mxu0 %v1027_v0  ;;  %18404 = vmatpush3.msra.mxu0 %v19179_v18  ;;  %v1039_v0 = vld [vmem:[#allocation3 + $0x80] sm:$0xff] }
 0x21b   : > { %18576 = vmatpush3.msra.mxu1 %v19179_v18  ;;  %18276 = vmatmul.mubr.f32.gmra.mxu0 %v1028_v1  ;;  %v19645_v1 = vpop.permute.xlu0 %3088 }
 0x21c   : > { %18405 = vmatprep.subr.mxu0 %v19188_v21  ;;  %18561 = vmatprep.subr.mxu1 %v19188_v21  ;;  %24270 = vst [vmem:[#allocation27_spill] sm:$0xff] %v19645_v1 }
 0x21d   : > { %18406 = vmatpush3.msra.mxu0 %v19188_v21  ;;  %18577 = vmatpush3.msra.mxu1 %v19188_v21 }
 0x21e   : > { %18407 = vmatprep.subr.mxu0 %v19196_v24  ;;  %18562 = vmatprep.subr.mxu1 %v19196_v24 }
 0x21f   : > { %18278 = vmatprep.mubr.f32.mxu0 %v1029_v6  ;;  %18408 = vmatpush3.msra.mxu0 %v19196_v24  ;;  %v1040_v6 = vld [vmem:[#allocation3 + $0x88] sm:$0xff] }
 0x220   : > { %18578 = vmatpush3.msra.mxu1 %v19196_v24  ;;  %18279 = vmatmul.mubr.f32.gmra.mxu0 %v1030_v7  ;;  %v1041_v7 = vld [vmem:[#allocation3 + $0x90] sm:$0xff] }
 0x221   : > { %18409 = vmatprep.subr.mxu0 %v19204_v26  ;;  %18563 = vmatprep.subr.mxu1 %v19204_v26 }
 0x222   : > { %18355 = vmatprep.mubr.f32.mxu1 %v1380_v8  ;;  %18410 = vmatpush3.msra.mxu0 %v19204_v26  ;;  %v1386_v8 = vld [vmem:[#allocation3 + $0x150] sm:$0xff] }
 0x223   : > { %18579 = vmatpush3.msra.mxu1 %v19204_v26  ;;  %18411 = vmatprep.subr.mxu0 %v19214_v29 }
 0x224   : > { %18356 = vmatmul.mubr.f32.gmra.mxu1 %v1381_v12  ;;  %18564 = vmatprep.subr.mxu1 %v19214_v29  ;;  %v1387_v12 = vld [vmem:[#allocation3 + $0x158] sm:$0xff] }
 0x225   : > { %18281 = vmatprep.mubr.f32.mxu0 %v1031_v15  ;;  %18412 = vmatpush3.msra.mxu0 %v19214_v29  ;;  %v1042_v15 = vld [vmem:[#allocation3 + $0x98] sm:$0xff] }
 0x226   : > { %18580 = vmatpush3.msra.mxu1 %v19214_v29  ;;  %18282 = vmatmul.mubr.f32.gmra.mxu0 %v1032_v17  ;;  %v1388_v17 = vld [vmem:[#allocation3 + $0x160] sm:$0xff] }
 0x227   : > { %18413 = vmatprep.subr.mxu0 %v19224_v39  ;;  %18565 = vmatprep.subr.mxu1 %v19224_v39 }
 0x228   : > { %18414 = vmatpush3.msra.mxu0 %v19224_v39  ;;  %18581 = vmatpush3.msra.mxu1 %v19224_v39 }
 0x229   : > { %18415 = vmatprep.subr.mxu0 %v19232_v42  ;;  %18566 = vmatprep.subr.mxu1 %v19232_v42 }
 0x22a   : > { %18284 = vmatprep.mubr.f32.mxu0 %v1033_v25  ;;  %18416 = vmatpush3.msra.mxu0 %v19232_v42  ;;  %v19653_v25 = vpop.permute.xlu1 %3100 }
 0x22b   : > { %18582 = vmatpush3.msra.mxu1 %v19232_v42  ;;  %18285 = vmatmul.mubr.f32.gmra.mxu0 %v1034_v28  ;;  %24271 = vst [vmem:[#allocation28_spill] sm:$0xff] %v19653_v25  ;;  %v1043_v28 = vld [vmem:[#allocation3 + $0xa0] sm:$0xff] }
 0x22c   : > { %18417 = vmatprep.subr.mxu0 %v19242_v48  ;;  %18567 = vmatprep.subr.mxu1 %v19242_v48  ;;  %v1729_v25 = vld [vmem:[#allocation3 + $0x200] sm:$0xff] }
 0x22d   : > { %18358 = vmatprep.mubr.f32.mxu1 %v1382_v38  ;;  %18418 = vmatpush3.msra.mxu0 %v19242_v48  ;;  %v19656_v38 = vpop.permute.xlu0 %3096 }
 0x22e   : > { %18583 = vmatpush3.msra.mxu1 %v19242_v48  ;;  %18419 = vmatprep.subr.mxu0 %v19252_v51  ;;  %24272 = vst [vmem:[#allocation29_spill] sm:$0xff] %v19656_v38  ;;  %v1749_v38 = vld [vmem:[#allocation3 + $0x2a0] sm:$0xff] }
 0x22f   : > { %18359 = vmatmul.mubr.f32.gmra.mxu1 %v1383_v46  ;;  %18568 = vmatprep.subr.mxu1 %v19252_v51  ;;  %v1389_v46 = vld [vmem:[#allocation3 + $0x168] sm:$0xff] }
 0x230   : > { %18287 = vmatprep.mubr.f32.mxu0 %v1035_v32  ;;  %18420 = vmatpush3.msra.mxu0 %v19252_v51  ;;  %v1044_v32 = vld [vmem:[#allocation3 + $0xa8] sm:$0xff] }
 0x231   : > { %18584 = vmatpush3.msra.mxu1 %v19252_v51  ;;  %18288 = vmatmul.mubr.f32.gmra.mxu0 %v1036_v49  ;;  %v1390_v49 = vld [vmem:[#allocation3 + $0x170] sm:$0xff] }
 0x232   : > { %18421 = vmatprep.subr.mxu0 %v19260_v47  ;;  %18569 = vmatprep.subr.mxu1 %v19260_v47 }
 0x233   : > { %18422 = vmatpush3.msra.mxu0 %v19260_v47  ;;  %18585 = vmatpush3.msra.mxu1 %v19260_v47 }
 0x234   : > { %18423 = vmatprep.subr.mxu0 %v19270_v52  ;;  %18570 = vmatprep.subr.mxu1 %v19270_v52 }
 0x235   : > { %18290 = vmatprep.mubr.f32.mxu0 %v1037_v53  ;;  %18424 = vmatpush3.msra.mxu0 %v19270_v52  ;;  %v1045_v53 = vld [vmem:[#allocation3 + $0xb0] sm:$0xff] }
 0x236   : > { %18586 = vmatpush3.msra.mxu1 %v19270_v52  ;;  %18291 = vmatmul.mubr.f32.gmra.mxu0 %v1038_v57  ;;  %v19661_v57 = vpop.permute.xlu1 %3108 }
 0x237   : > { %18425 = vmatprep.subr.mxu0 %v19278_v44  ;;  %18571 = vmatprep.subr.mxu1 %v19278_v44  ;;  %24273 = vst [vmem:[#allocation30_spill] sm:$0xff] %v19661_v57 }
 0x238   : > { %18361 = vmatprep.mubr.f32.mxu1 %v1384_v59  ;;  %18426 = vmatpush3.msra.mxu0 %v19278_v44  ;;  %v1391_v59 = vld [vmem:[#allocation3 + $0x178] sm:$0xff] }
 0x239   : > { %18587 = vmatpush3.msra.mxu1 %v19278_v44  ;;  %18427 = vmatprep.subr.mxu0 %v19284_v34 }
 0x23a   : > { %18362 = vmatmul.mubr.f32.gmra.mxu1 %v1385_v62  ;;  %18572 = vmatprep.subr.mxu1 %v19284_v34  ;;  %v19663_v62 = vpop.permute.xlu0 %3104 }
 0x23b   : > { %18293 = vmatprep.mubr.f32.mxu0 %v1039_v0  ;;  %18428 = vmatpush3.msra.mxu0 %v19284_v34  ;;  %24274 = vst [vmem:[#allocation31_spill] sm:$0xff] %v19663_v62  ;;  %v1046_v0 = vld [vmem:[#allocation3 + $0xb8] sm:$0xff] }
 0x23c   : > { %18588 = vmatpush3.msra.mxu1 %v19284_v34  ;;  %18294 = vmatmul.mubr.f32.gmra.mxu0 %v1040_v6  ;;  %v1392_v6 = vld [vmem:[#allocation3 + $0x180] sm:$0xff] }
 0x23d   : > { %18477 = vmatprep.subr.mxu0 %v19161_v10  ;;  %18296 = vmatprep.mubr.f32.mxu0 %v1041_v7  ;;  %v1047_v7 = vld [vmem:[#allocation3 + $0xc0] sm:$0xff] }
 0x23e   : > { %18364 = vmatprep.mubr.f32.mxu1 %v1386_v8  ;;  %v1393_v8 = vld [vmem:[#allocation3 + $0x188] sm:$0xff] }
 0x23f   : > { %18365 = vmatmul.mubr.f32.gmra.mxu1 %v1387_v12  ;;  %v1048_v12 = vld [vmem:[#allocation3 + $0xc8] sm:$0xff] }
 0x240   : > { %18297 = vmatmul.mubr.f32.gmra.mxu0 %v1042_v15  ;;  %18367 = vmatprep.mubr.f32.mxu1 %v1388_v17  ;;  %v1394_v15 = vld [vmem:[#allocation3 + $0x190] sm:$0xff]  ;;  %v19667_v17 = vpop.permute.xlu1 %3115 }
 0x241   : > { %18299 = vmatprep.mubr.f32.mxu0 %v1043_v28  ;;  %v1049_v28 = vld [vmem:[#allocation3 + $0xd0] sm:$0xff] }
 0x243   : > { %18368 = vmatmul.mubr.f32.gmra.mxu1 %v1389_v46  ;;  %v19670_v46 = vpop.permute.xlu0 %3111 }
 0x244   : > { %18300 = vmatmul.mubr.f32.gmra.mxu0 %v1044_v32  ;;  %18370 = vmatprep.mubr.f32.mxu1 %v1390_v49  ;;  %v1395_v32 = vld [vmem:[#allocation3 + $0x198] sm:$0xff] }
 0x245   : > { %18302 = vmatprep.mubr.f32.mxu0 %v1045_v53  ;;  %v1050_v49 = vld [vmem:[#allocation3 + $0xd8] sm:$0xff]  ;;  %v1396_v53 = vld [vmem:[#allocation3 + $0x1a0] sm:$0xff] }
 0x247   : > { %18371 = vmatmul.mubr.f32.gmra.mxu1 %v1391_v59  ;;  %v1051_v59 = vld [vmem:[#allocation3 + $0xe0] sm:$0xff] }
 0x248   : > { %18303 = vmatmul.mubr.f32.gmra.mxu0 %v1046_v0  ;;  %18373 = vmatprep.mubr.f32.mxu1 %v1392_v6  ;;  %v2978_v0 = vsub.s32 6, %v19016_v36  ;;  %v19676_v6 = vpop.permute.xlu1 %3123 }
 0x249   : > { %18305 = vmatprep.mubr.f32.mxu0 %v1047_v7  ;;  %v1397_v7 = vld [vmem:[#allocation3 + $0x1a8] sm:$0xff] }
 0x24b   : > { %18374 = vmatmul.mubr.f32.gmra.mxu1 %v1393_v8  ;;  %v19678_v8 = vpop.permute.xlu0 %3119 }
 0x24c   : > { %18306 = vmatmul.mubr.f32.gmra.mxu0 %v1048_v12  ;;  %18376 = vmatprep.mubr.f32.mxu1 %v1394_v15  ;;  %v1052_v12 = vld [vmem:[#allocation3 + $0xe8] sm:$0xff]  ;;  %v1398_v15 = vld [vmem:[#allocation3 + $0x1b0] sm:$0xff]  ;;  %v19690_v57 = vpop.permute.xlu1 %3131 }
 0x24d   : > { %18308 = vmatprep.mubr.f32.mxu0 %v1049_v28  ;;  %v1053_v28 = vld [vmem:[#allocation3 + $0xf0] sm:$0xff] }
 0x24f   : > { %18377 = vmatmul.mubr.f32.gmra.mxu1 %v1395_v32  ;;  %v19687_v32 = vrot.slane %v19684_v35, %v2978_v0  ;;  %v19693_v62 = vpop.permute.xlu0 %3127  ;;  %v1401_v0 = vld [vmem:[#allocation3 + $0x1c8] sm:$0xff] }
 0x250   : > { %18309 = vmatmul.mubr.f32.gmra.mxu0 %v1050_v49  ;;  %18379 = vmatprep.mubr.f32.mxu1 %v1396_v53  ;;  %v1399_v49 = vld [vmem:[#allocation3 + $0x1b8] sm:$0xff] }
 0x251   : > { %18311 = vmatprep.mubr.f32.mxu0 %v1051_v59  ;;  %v1054_v53 = vld [vmem:[#allocation3 + $0xf8] sm:$0xff]  ;;  %v1400_v59 = vld [vmem:[#allocation3 + $0x1c0] sm:$0xff]  ;;  %3367 = vbcast.lane.b32.xlu1 %v19687_v32, 264 }
 0x252   : > { %3363 = vbcast.lane.b32.xlu0 %v19687_v32, 256 }
 0x253   : > { %18380 = vmatmul.mubr.f32.gmra.mxu1 %v1397_v7  ;;  %v1402_v7 = vld [vmem:[#allocation3 + $0x1d0] sm:$0xff] }
 0x254   : > { %18312 = vmatmul.mubr.f32.gmra.mxu0 %v1052_v12  ;;  %18382 = vmatprep.mubr.f32.mxu1 %v1398_v15  ;;  %v1731_v12 = vld [vmem:[#allocation3 + $0x210] sm:$0xff]  ;;  %v19698_v15 = vpop.permute.xlu1 %3139 }
 0x255   : > { %18314 = vmatprep.mubr.f32.mxu0 %v1053_v28  ;;  %3375 = vbcast.lane.b32.xlu1 %v19687_v32, 280  ;;  %v1403_v28 = vld [vmem:[#allocation3 + $0x1d8] sm:$0xff] }
 0x256   : > { %3371 = vbcast.lane.b32.xlu0 %v19687_v32, 272 }
 0x257   : > { %18383 = vmatmul.mubr.f32.gmra.mxu1 %v1399_v49  ;;  %v19700_v49 = vpop.permute.xlu0 %3135 }
 0x258   : > { %18315 = vmatmul.mubr.f32.gmra.mxu0 %v1054_v53  ;;  %18385 = vmatprep.mubr.f32.mxu1 %v1400_v59  ;;  %v1404_v53 = vld [vmem:[#allocation3 + $0x1e0] sm:$0xff]  ;;  %v1406_v59 = vld [vmem:[#allocation3 + $0x1f0] sm:$0xff] }
 0x259   : > { %18429 = vmatprep.mubr.f32.mxu0 %v1729_v25  ;;  %3383 = vbcast.lane.b32.xlu1 %v19687_v32, 296  ;;  %v1405_v25 = vld [vmem:[#allocation3 + $0x1e8] sm:$0xff] }
 0x25a   : > { %3379 = vbcast.lane.b32.xlu0 %v19687_v32, 288 }
 0x25b   : > { %18386 = vmatmul.mubr.f32.gmra.mxu1 %v1401_v0  ;;  %v19709_v0 = vpop.permute.xlu1 %3147 }
 0x25c   : > { %18430 = vmatmul.mubr.f32.vlgmr.msra.gmra.mxu0 %v1730_v2  ;;  %18388 = vmatprep.mubr.f32.mxu1 %v1402_v7  ;;  %24275 = vst [vmem:[#allocation32_spill] sm:$0xff] %v19709_v0  ;;  %v2085_v7 = vld [vmem:[#allocation3 + $0x318] sm:$0xff] }
 0x25d   : > { %18478 = vmatpush3.msra.mxu0 %v19161_v10  ;;  %18432 = vmatprep.mubr.f32.mxu0 %v1731_v12  ;;  %v19712_v10 = vpop.permute.xlu0 %3143 }
 0x25e   : > { %18479 = vmatprep.subr.mxu0 %v19165_v13  ;;  %3391 = vbcast.lane.b32.xlu1 %v19687_v32, 312 }
 0x25f   : > { %18480 = vmatpush3.msra.mxu0 %v19165_v13  ;;  %18389 = vmatmul.mubr.f32.gmra.mxu1 %v1403_v28  ;;  %v1407_v13 = vld [vmem:[#allocation3 + $0x1f8] sm:$0xff]  ;;  %v19722_v2 = vpop.permute.xlu1 %3155 }
 0x260   : > { %18481 = vmatprep.subr.mxu0 %v19173_v16  ;;  %18391 = vmatprep.mubr.f32.mxu1 %v1404_v53  ;;  %24276 = vst [vmem:[#allocation33_spill] sm:$0xff] %v19722_v2  ;;  %v1734_v53 = vld [vmem:[#allocation3 + $0x228] sm:$0xff] }
 0x261   : > { %18482 = vmatpush3.msra.mxu0 %v19173_v16  ;;  %3387 = vbcast.lane.b32.xlu0 %v19687_v32, 304  ;;  %v2084_v16 = vld [vmem:[#allocation3 + $0x310] sm:$0xff] }
 0x262   : > { %18483 = vmatprep.subr.mxu0 %v19179_v18  ;;  %3399 = vbcast.lane.b32.xlu1 %v19687_v32, 328 }
 0x263   : > { %18484 = vmatpush3.msra.mxu0 %v19179_v18  ;;  %18392 = vmatmul.mubr.f32.gmra.mxu1 %v1405_v25  ;;  %v19725_v18 = vpop.permute.xlu0 %3151  ;;  %v19734_v12 = vpop.permute.xlu1 %3163 }
 0x264   : > { %18485 = vmatprep.subr.mxu0 %v19188_v21  ;;  %18394 = vmatprep.mubr.f32.mxu1 %v1406_v59  ;;  %24277 = vst [vmem:[#allocation34_spill] sm:$0xff] %v19725_v18  ;;  %24278 = vst [vmem:[#allocation35_spill] sm:$0xff] %v19734_v12 }
 0x265   : > { %18486 = vmatpush3.msra.mxu0 %v19188_v21  ;;  %3395 = vbcast.lane.b32.xlu0 %v19687_v32, 320  ;;  %v1732_v21 = vld [vmem:[#allocation3 + $0x218] sm:$0xff] }
 0x266   : > { %18487 = vmatprep.subr.mxu0 %v19196_v24  ;;  %3407 = vbcast.lane.b32.xlu1 %v19687_v32, 344 }
 0x267   : > { %18488 = vmatpush3.msra.mxu0 %v19196_v24  ;;  %18395 = vmatmul.mubr.f32.gmra.mxu1 %v1407_v13  ;;  %v2086_v24 = vld [vmem:[#allocation3 + $0x320] sm:$0xff]  ;;  %v19738_v28 = vpop.permute.xlu0 %3159  ;;  %v2089_v13 = vld [vmem:[#allocation3 + $0x338] sm:$0xff] }
 0x268   : > { %18489 = vmatprep.subr.mxu0 %v19204_v26  ;;  %18512 = vmatprep.mubr.f32.mxu1 %v2084_v16  ;;  %24279 = vst [vmem:[#allocation36_spill] sm:$0xff] %v19738_v28 }
 0x269   : > { %18490 = vmatpush3.msra.mxu0 %v19204_v26  ;;  %3403 = vbcast.lane.b32.xlu0 %v19687_v32, 336  ;;  %v2087_v26 = vld [vmem:[#allocation3 + $0x328] sm:$0xff] }
 0x26a   : > { %18491 = vmatprep.subr.mxu0 %v19214_v29  ;;  %18433 = vmatmul.mubr.f32.gmra.mxu0 %v1732_v21  ;;  %v1738_v21 = vld [vmem:[#allocation3 + $0x248] sm:$0xff] }
 0x26b   : > { %18492 = vmatpush3.msra.mxu0 %v19214_v29  ;;  %18513 = vmatmul.mubr.f32.vlgmr.msra.gmra.mxu1 %v2085_v7  ;;  %v2982_v29 = vsub.s32 7, %v19016_v36  ;;  %v19755_v59 = vpop.permute.xlu0 %3167  ;;  %v1737_v7 = vld [vmem:[#allocation3 + $0x240] sm:$0xff] }
 0x26c   : > { %18493 = vmatprep.subr.mxu0 %v19224_v39  ;;  %3415 = vbcast.lane.b32.xlu1 %v19687_v32, 360  ;;  %24281 = vst [vmem:[#allocation38_spill] sm:$0xff] %v19755_v59 }
 0x26d   : > { %18494 = vmatpush3.msra.mxu0 %v19224_v39  ;;  %18515 = vmatprep.mubr.f32.mxu1 %v2086_v24  ;;  %v1733_v39 = vld [vmem:[#allocation3 + $0x220] sm:$0xff]  ;;  %v19749_v25 = vrot.slane %v19684_v35, %v2982_v29  ;;  %v1735_v35 = vld [vmem:[#allocation3 + $0x230] sm:$0xff]  ;;  %v2093_v24 = vld [vmem:[#allocation3 + $0x358] sm:$0xff] }
 0x26e   : > { %18495 = vmatprep.subr.mxu0 %v19232_v42  ;;  %3411 = vbcast.lane.b32.xlu0 %v19687_v32, 352  ;;  %v1739_v29 = vld [vmem:[#allocation3 + $0x250] sm:$0xff] }
 0x26f   : > { %18496 = vmatpush3.msra.mxu0 %v19232_v42  ;;  %18516 = vmatmul.mubr.f32.gmra.mxu1 %v2087_v26  ;;  %v19752_v42 = vpop.permute.xlu1 %3171  ;;  %v19768_v16 = vpop.permute.xlu0 %3174 }
 0x270   : > { %18497 = vmatprep.subr.mxu0 %v19242_v48  ;;  %3423 = vbcast.lane.b32.xlu1 %v19687_v32, 376  ;;  %24280 = vst [vmem:[#allocation37_spill] sm:$0xff] %v19752_v42  ;;  %24283 = vst [vmem:[#allocation40_spill] sm:$0xff] %v19768_v16 }
 0x271   : > { %18498 = vmatpush3.msra.mxu0 %v19242_v48  ;;  %18435 = vmatprep.mubr.f32.mxu0 %v1733_v39  ;;  %v2088_v48 = vld [vmem:[#allocation3 + $0x330] sm:$0xff] }
 0x272   : > { %18499 = vmatprep.subr.mxu0 %v19252_v51  ;;  %18436 = vmatmul.mubr.f32.gmra.mxu0 %v1734_v53  ;;  %v1740_v53 = vld [vmem:[#allocation3 + $0x258] sm:$0xff] }
 0x273   : > { %18500 = vmatpush3.msra.mxu0 %v19252_v51  ;;  %3419 = vbcast.lane.b32.xlu0 %v19687_v32, 368  ;;  %v19764_v51 = vpop.permute.xlu1 %3178  ;;  %v2090_v32 = vld [vmem:[#allocation3 + $0x340] sm:$0xff]  ;;  %v19776_v39 = vpop.permute.xlu0 %3182 }
 0x274   : > { %18501 = vmatprep.subr.mxu0 %v19260_v47  ;;  %3430 = vbcast.lane.b32.xlu1 %v19749_v25, 264  ;;  %24282 = vst [vmem:[#allocation39_spill] sm:$0xff] %v19764_v51  ;;  %24285 = vst [vmem:[#allocation42_spill] sm:$0xff] %v19776_v39 }
 0x275   : > { %18502 = vmatpush3.msra.mxu0 %v19260_v47  ;;  %18518 = vmatprep.mubr.f32.mxu1 %v2088_v48  ;;  %v1736_v47 = vld [vmem:[#allocation3 + $0x238] sm:$0xff]  ;;  %v2095_v48 = vld [vmem:[#allocation3 + $0x368] sm:$0xff] }
 0x276   : > { %18503 = vmatprep.subr.mxu0 %v19270_v52  ;;  %18519 = vmatmul.mubr.f32.gmra.mxu1 %v2089_v13  ;;  %v1741_v13 = vld [vmem:[#allocation3 + $0x260] sm:$0xff] }
 0x277   : > { %18504 = vmatpush3.msra.mxu0 %v19270_v52  ;;  %3426 = vbcast.lane.b32.xlu0 %v19749_v25, 256  ;;  %v2091_v52 = vld [vmem:[#allocation3 + $0x348] sm:$0xff]  ;;  %v19774_v26 = vpop.permute.xlu1 %3186 }
 0x278   : > { %18505 = vmatprep.subr.mxu0 %v19278_v44  ;;  %3438 = vbcast.lane.b32.xlu1 %v19749_v25, 280  ;;  %24284 = vst [vmem:[#allocation41_spill] sm:$0xff] %v19774_v26 }
 0x279   : > { %18506 = vmatpush3.msra.mxu0 %v19278_v44  ;;  %18438 = vmatprep.mubr.f32.mxu0 %v1735_v35  ;;  %v2092_v44 = vld [vmem:[#allocation3 + $0x350] sm:$0xff] }
 0x27a   : > { %18507 = vmatprep.subr.mxu0 %v19284_v34  ;;  %18439 = vmatmul.mubr.f32.gmra.mxu0 %v1736_v47  ;;  %v2096_v35 = vld [vmem:[#allocation3 + $0x370] sm:$0xff] }
 0x27b   : > { %18508 = vmatpush3.msra.mxu0 %v19284_v34  ;;  %18521 = vmatprep.mubr.f32.mxu1 %v2090_v32  ;;  %v2094_v34 = vld [vmem:[#allocation3 + $0x360] sm:$0xff]  ;;  %v19780_v47 = vpop.permute.xlu1 %3194  ;;  %v1742_v32 = vld [vmem:[#allocation3 + $0x268] sm:$0xff] }
 0x27c   : > { %3434 = vbcast.lane.b32.xlu0 %v19749_v25, 272  ;;  %18522 = vmatmul.mubr.f32.gmra.mxu1 %v2091_v52  ;;  %24286 = vst [vmem:[#allocation43_spill] sm:$0xff] %v19780_v47  ;;  %v19783_v52 = vpop.permute.xlu0 %3190 }
 0x27d   : > { %3446 = vbcast.lane.b32.xlu1 %v19749_v25, 296  ;;  %18441 = vmatprep.mubr.f32.mxu0 %v1737_v7  ;;  %24287 = vst [vmem:[#allocation44_spill] sm:$0xff] %v19783_v52  ;;  %v2097_v7 = vld [vmem:[#allocation3 + $0x378] sm:$0xff] }
 0x27e   : > { %18524 = vmatprep.mubr.f32.mxu1 %v2092_v44  ;;  %18442 = vmatmul.mubr.f32.gmra.mxu0 %v1738_v21  ;;  %v1743_v44 = vld [vmem:[#allocation3 + $0x270] sm:$0xff]  ;;  %v2098_v21 = vld [vmem:[#allocation3 + $0x380] sm:$0xff] }
 0x27f   : > { %18444 = vmatprep.mubr.f32.mxu0 %v1739_v29  ;;  %v2099_v29 = vld [vmem:[#allocation3 + $0x388] sm:$0xff] }
 0x280   : > { %3442 = vbcast.lane.b32.xlu0 %v19749_v25, 288  ;;  %18525 = vmatmul.mubr.f32.gmra.mxu1 %v2093_v24  ;;  %v1744_v24 = vld [vmem:[#allocation3 + $0x278] sm:$0xff] }
 0x281   : > { %3454 = vbcast.lane.b32.xlu1 %v19749_v25, 312  ;;  %18527 = vmatprep.mubr.f32.mxu1 %v2094_v34  ;;  %v19788_v34 = vpop.permute.xlu1 %3202 }
 0x282   : > { %18445 = vmatmul.mubr.f32.gmra.mxu0 %v1740_v53  ;;  %24288 = vst [vmem:[#allocation45_spill] sm:$0xff] %v19788_v34  ;;  %v1745_v53 = vld [vmem:[#allocation3 + $0x280] sm:$0xff]  ;;  %v2108_v34 = vld [vmem:[#allocation3 + $0x3d0] sm:$0xff] }
 0x283   : > { %18447 = vmatprep.mubr.f32.mxu0 %v1741_v13  ;;  %v2100_v13 = vld [vmem:[#allocation3 + $0x390] sm:$0xff] }
 0x284   : > { %3450 = vbcast.lane.b32.xlu0 %v19749_v25, 304  ;;  %18528 = vmatmul.mubr.f32.gmra.mxu1 %v2095_v48  ;;  %v19790_v48 = vpop.permute.xlu0 %3198 }
 0x285   : > { %3462 = vbcast.lane.b32.xlu1 %v19749_v25, 328  ;;  %18530 = vmatprep.mubr.f32.mxu1 %v2096_v35  ;;  %24289 = vst [vmem:[#allocation46_spill] sm:$0xff] %v19790_v48  ;;  %v1746_v35 = vld [vmem:[#allocation3 + $0x288] sm:$0xff]  ;;  %v19794_v63 = vpop.permute.xlu1 %3210 }
 0x286   : > { %18448 = vmatmul.mubr.f32.gmra.mxu0 %v1742_v32  ;;  %v2101_v32 = vld [vmem:[#allocation3 + $0x398] sm:$0xff]  ;;  %24290 = vst [vmem:[#allocation47_spill] sm:$0xff] %v19794_v63  ;;  %v1751_v63 = vld [vmem:[#allocation3 + $0x2b0] sm:$0xff] }
 0x287   : > { %18450 = vmatprep.mubr.f32.mxu0 %v1743_v44  ;;  %v2102_v44 = vld [vmem:[#allocation3 + $0x3a0] sm:$0xff] }
 0x288   : > { %3458 = vbcast.lane.b32.xlu0 %v19749_v25, 320  ;;  %18531 = vmatmul.mubr.f32.gmra.mxu1 %v2097_v7  ;;  %v1747_v7 = vld [vmem:[#allocation3 + $0x290] sm:$0xff] }
 0x289   : > { %3470 = vbcast.lane.b32.xlu1 %v19749_v25, 344  ;;  %18533 = vmatprep.mubr.f32.mxu1 %v2098_v21  ;;  %v1748_v21 = vld [vmem:[#allocation3 + $0x298] sm:$0xff] }
 0x28a   : > { %18451 = vmatmul.mubr.f32.gmra.mxu0 %v1744_v24  ;;  %v19797_v24 = vpop.permute.xlu0 %3206 }
 0x28b   : > { %18453 = vmatprep.mubr.f32.mxu0 %v1745_v53  ;;  %24291 = vst [vmem:[#allocation48_spill] sm:$0xff] %v19797_v24  ;;  %v2104_v53 = vld [vmem:[#allocation3 + $0x3b0] sm:$0xff] }
 0x28c   : > { %3466 = vbcast.lane.b32.xlu0 %v19749_v25, 336  ;;  %18534 = vmatmul.mubr.f32.gmra.mxu1 %v2099_v29  ;;  %v2103_v29 = vld [vmem:[#allocation3 + $0x3a8] sm:$0xff] }
 0x28d   : > { %3478 = vbcast.lane.b32.xlu1 %v19749_v25, 360  ;;  %18536 = vmatprep.mubr.f32.mxu1 %v2100_v13  ;;  %v1750_v13 = vld [vmem:[#allocation3 + $0x2a8] sm:$0xff] }
 0x28e   : > { %18454 = vmatmul.mubr.f32.gmra.mxu0 %v1746_v35  ;;  %v2105_v35 = vld [vmem:[#allocation3 + $0x3b8] sm:$0xff]  ;;  %v19803_v1 = vpop.permute.xlu0 %3214 }
 0x28f   : > { %18456 = vmatprep.mubr.f32.mxu0 %v1747_v7  ;;  %24293 = vst [vmem:[#allocation50_spill] sm:$0xff] %v19803_v1  ;;  %v1752_v7 = vld [vmem:[#allocation3 + $0x2b8] sm:$0xff]  ;;  %v2110_v1 = vld [vmem:[#allocation3 + $0x3e0] sm:$0xff] }
 0x290   : > { %3474 = vbcast.lane.b32.xlu0 %v19749_v25, 352  ;;  %18537 = vmatmul.mubr.f32.gmra.mxu1 %v2101_v32  ;;  %v19801_v32 = vpop.permute.xlu1 %3218 }
 0x291   : > { %3486 = vbcast.lane.b32.xlu1 %v19749_v25, 376  ;;  %18539 = vmatprep.mubr.f32.mxu1 %v2102_v44  ;;  %24292 = vst [vmem:[#allocation49_spill] sm:$0xff] %v19801_v32  ;;  %v2107_v44 = vld [vmem:[#allocation3 + $0x3c8] sm:$0xff]  ;;  %v1755_v32 = vld [vmem:[#allocation3 + $0x2d0] sm:$0xff] }
 0x292   : > { %18457 = vmatmul.mubr.f32.gmra.mxu0 %v1748_v21  ;;  %v1753_v21 = vld [vmem:[#allocation3 + $0x2c0] sm:$0xff] }
 0x293   : > { %18459 = vmatprep.mubr.f32.mxu0 %v1749_v38  ;;  %v1754_v38 = vld [vmem:[#allocation3 + $0x2c8] sm:$0xff] }
 0x294   : > { %3482 = vbcast.lane.b32.xlu0 %v19749_v25, 368  ;;  %18540 = vmatmul.mubr.f32.gmra.mxu1 %v2103_v29  ;;  %v19805_v25 = vpop.permute.xlu1 %3226  ;;  %v19807_v29 = vpop.permute.xlu0 %3222 }
 0x295   : > { %18542 = vmatprep.mubr.f32.mxu1 %v2104_v53  ;;  %24294 = vst [vmem:[#allocation51_spill] sm:$0xff] %v19805_v25  ;;  %24295 = vst [vmem:[#allocation52_spill] sm:$0xff] %v19807_v29  ;;  %v2109_v53 = vld [vmem:[#allocation3 + $0x3d8] sm:$0xff] }
 0x296   : > { %18460 = vmatmul.mubr.f32.gmra.mxu0 %v1750_v13  ;;  %v1757_v13 = vld [vmem:[#allocation3 + $0x2e0] sm:$0xff] }
 0x297   : > { %18462 = vmatprep.mubr.f32.mxu0 %v1751_v63  ;;  %v1756_v63 = vld [vmem:[#allocation3 + $0x2d8] sm:$0xff] }
 0x298   : > { %18543 = vmatmul.mubr.f32.gmra.mxu1 %v2105_v35  ;;  %v19809_v35 = vpop.permute.xlu1 %3234  ;;  %v19811_v25 = vpop.permute.xlu0 %3230 }
 0x299   : > { %18545 = vmatprep.mubr.f32.mxu1 %v2106_v45  ;;  %v2111_v45 = vld [vmem:[#allocation3 + $0x3e8] sm:$0xff]  ;;  %24296 = vst [vmem:[#allocation53_spill] sm:$0xff] %v19809_v35  ;;  %24297 = vst [vmem:[#allocation54_spill] sm:$0xff] %v19811_v25 }
 0x29a   : > { %18463 = vmatmul.mubr.f32.gmra.mxu0 %v1752_v7  ;;  %v2112_v7 = vld [vmem:[#allocation3 + $0x3f0] sm:$0xff]  ;;  %v2083_v35 = vld [vmem:[#allocation3 + $0x308] sm:$0xff] }
 0x29b   : > { %18465 = vmatprep.mubr.f32.mxu0 %v1753_v21  ;;  %v1759_v21 = vld [vmem:[#allocation3 + $0x2f0] sm:$0xff] }
 0x29c   : > { %18546 = vmatmul.mubr.f32.gmra.mxu1 %v2107_v44  ;;  %v1758_v44 = vld [vmem:[#allocation3 + $0x2e8] sm:$0xff] }
 0x29d   : > { %18548 = vmatprep.mubr.f32.mxu1 %v2108_v34  ;;  %v2113_v34 = vld [vmem:[#allocation3 + $0x3f8] sm:$0xff] }
 0x29e   : > { %18466 = vmatmul.mubr.f32.gmra.mxu0 %v1754_v38  ;;  %v19813_v38 = vpop.permute.xlu1 %3241 }
 0x29f   : > { %18468 = vmatprep.mubr.f32.mxu0 %v1755_v32  ;;  %24298 = vst [vmem:[#allocation55_spill] sm:$0xff] %v19813_v38  ;;  %v19815_v32 = vpop.permute.xlu0 %3237 }
 0x2a0   : > { %18549 = vmatmul.mubr.f32.gmra.mxu1 %v2109_v53  ;;  %24299 = vst [vmem:[#allocation56_spill] sm:$0xff] %v19815_v32  ;;  %v2082_v53 = vld [vmem:[#allocation3 + $0x300] sm:$0xff] }
 0x2a1   : > { %18551 = vmatprep.mubr.f32.mxu1 %v2110_v1  ;;  %v1760_v1 = vld [vmem:[#allocation3 + $0x2f8] sm:$0xff]  ;;  %v1633_v32 = vld [vmem:[#allocation2 + $0x100] sm:$0xff] }
 0x2a2   : > { %18469 = vmatmul.mubr.f32.gmra.mxu0 %v1756_v63  ;;  %v19817_v25 = vpop.permute.xlu1 %3249 }
 0x2a3   : > { %18471 = vmatprep.mubr.f32.mxu0 %v1757_v13  ;;  %24300 = vst [vmem:[#allocation57_spill] sm:$0xff] %v19817_v25  ;;  %v19819_v63 = vpop.permute.xlu0 %3245 }
 0x2a4   : > { %18552 = vmatmul.mubr.f32.gmra.mxu1 %v2111_v45  ;;  %24301 = vst [vmem:[#allocation58_spill] sm:$0xff] %v19819_v63 }
 0x2a5   : > { %18554 = vmatprep.mubr.f32.mxu1 %v2112_v7 }
 0x2a6   : > { %18472 = vmatmul.mubr.f32.gmra.mxu0 %v1758_v44  ;;  %v19821_v45 = vpop.permute.xlu1 %3257 }
 0x2a7   : > { %18474 = vmatprep.mubr.f32.mxu0 %v1759_v21  ;;  %24302 = vst [vmem:[#allocation59_spill] sm:$0xff] %v19821_v45  ;;  %v19823_v13 = vpop.permute.xlu0 %3253  ;;  %v1634_v45 = vld [vmem:[#allocation2 + $0x108] sm:$0xff] }
 0x2a8   : > { %18555 = vmatmul.mubr.f32.gmra.mxu1 %v2113_v34  ;;  %24303 = vst [vmem:[#allocation60_spill] sm:$0xff] %v19823_v13 }
 0x2aa   : > { %18475 = vmatmul.mubr.f32.gmra.mxu0 %v1760_v1  ;;  %v19825_v7 = vpop.permute.xlu1 %3265 }
 0x2ab   : > { %18509 = vmatprep.mubr.f32.mxu0 %v2082_v53  ;;  %24304 = vst [vmem:[#allocation61_spill] sm:$0xff] %v19825_v7  ;;  %v19827_v44 = vpop.permute.xlu0 %3261  ;;  %v1280_v7 = vld [vmem:[#allocation2] sm:$0xff] }
 0x2ac   : > { %24305 = vst [vmem:[#allocation62_spill] sm:$0xff] %v19827_v44 }
 0x2ae   : > { %18510 = vmatmul.mubr.f32.vlgmr.msra.gmra.mxu0 %v2083_v35  ;;  %v19829_v34 = vpop.permute.xlu1 %3273  ;;  %v1281_v35 = vld [vmem:[#allocation2 + $0x8] sm:$0xff] }
 0x2af   : > { %24306 = vst [vmem:[#allocation63_spill] sm:$0xff] %v19829_v34  ;;  %v19831_v21 = vpop.permute.xlu0 %3269 }
 0x2b0   : > { %24307 = vst [vmem:[#allocation64_spill] sm:$0xff] %v19831_v21  ;;  %v1283_v21 = vld [vmem:[#allocation2 + $0x18] sm:$0xff] }
 0x2b2   : > { %v19833_v1 = vpop.permute.xlu1 %3281 }
 0x2b3   : > { %24308 = vst [vmem:[#allocation65_spill] sm:$0xff] %v19833_v1  ;;  %v19835_v53 = vpop.permute.xlu0 %3277 }
 0x2b4   : > { %24309 = vst [vmem:[#allocation66_spill] sm:$0xff] %v19835_v53 }
 0x2b6   : > { %v19837_v25 = vpop.permute.xlu1 %3289 }
 0x2b7   : > { %24310 = vst [vmem:[#allocation67_spill] sm:$0xff] %v19837_v25  ;;  %v19839_v38 = vpop.permute.xlu0 %3285 }
 0x2b8   : > { %24311 = vst [vmem:[#allocation68_spill] sm:$0xff] %v19839_v38 }
 0x2ba   : > { %v19843_v25 = vpop.permute.xlu1 %3297 }
 0x2bb   : > { %24312 = vst [vmem:[#allocation69_spill] sm:$0xff] %v19843_v25  ;;  %v19845_v38 = vpop.permute.xlu0 %3293 }
 0x2bc   : > { %24313 = vst [vmem:[#allocation70_spill] sm:$0xff] %v19845_v38 }
 0x2d0   : > { %v18271_v63 = vpop.f32.mrf.mxu0  ;;  %v18351_v13 = vpop.f32.mrf.mxu1 }
 0x2d1   : > { %v1313_v29 = vmax.f32 %v1281_v35, %v18271_v63  ;;  %v1666_v44 = vmax.f32 %v1634_v45, %v18351_v13  ;;  %v1282_v63 = vld [vmem:[#allocation2 + $0x10] sm:$0xff]  ;;  %v1636_v13 = vld [vmem:[#allocation2 + $0x118] sm:$0xff] }
 0x2d2   : > { %v1474_v24 = vpop.f32.mrf.mxu1  ;;  %v1121_v34 = vpop.f32.mrf.mxu0 }
 0x2d3   : > { %1345 = vst.msk [vmem:[#allocation2 + $0x8] sm:$0xff] %vm364_vm3, %v1313_v29  ;;  %1698 = vst.msk [vmem:[#allocation2 + $0x108] sm:$0xff] %vm364_vm3, %v1666_v44  ;;  %v1665_v1 = vmax.f32 %v1633_v32, %v1474_v24  ;;  %v1312_v53 = vmax.f32 %v1280_v7, %v1121_v34  ;;  %v1635_v24 = vld [vmem:[#allocation2 + $0x110] sm:$0xff]  ;;  %v1285_v32 = vld [vmem:[#allocation2 + $0x28] sm:$0xff]  ;;  %v19850_v7 = vpop.permute.xlu1 %3304  ;;  %v19852_v34 = vpop.permute.xlu0 %3300 }
 0x2d4   : > { %24314 = vst [vmem:[#allocation71_spill] sm:$0xff] %v19850_v7  ;;  %24315 = vst [vmem:[#allocation72_spill] sm:$0xff] %v19852_v34 }
 0x2d5   : > { %1697 = vst.msk [vmem:[#allocation2 + $0x100] sm:$0xff] %vm364_vm3, %v1665_v1  ;;  %1344 = vst.msk [vmem:[#allocation2] sm:$0xff] %vm364_vm3, %v1312_v53  ;;  %v18274_v40 = vpop.f32.mrf.mxu0 }
 0x2d6   : > { %v1315_v45 = vmax.f32 %v1283_v21, %v18274_v40  ;;  %v1284_v40 = vld [vmem:[#allocation2 + $0x20] sm:$0xff] }
 0x2d7   : > { %v1131_v35 = vpop.f32.mrf.mxu0  ;;  %v19860_v47 = vpop.permute.xlu1 %3312 }
 0x2d8   : > { %1347 = vst.msk [vmem:[#allocation2 + $0x18] sm:$0xff] %vm364_vm3, %v1315_v45  ;;  %v1314_v29 = vmax.f32 %v1282_v63, %v1131_v35  ;;  %24316 = vst [vmem:[#allocation73_spill] sm:$0xff] %v19860_v47 }
 0x2d9   : > { %v18354_v44 = vpop.f32.mrf.mxu1 }
 0x2da   : > { %v1668_v25 = vmax.f32 %v1636_v13, %v18354_v44  ;;  %1346 = vst.msk [vmem:[#allocation2 + $0x10] sm:$0xff] %vm364_vm3, %v1314_v29  ;;  %v2471_v1 = vld [vmem:[#allocation2 + $0x108] sm:$0xff]  ;;  %v1287_v44 = vld [vmem:[#allocation2 + $0x38] sm:$0xff] }
 0x2db   : > { %v2439_v53 = vld [vmem:[#allocation2 + $0x8] sm:$0xff]  ;;  %v1484_v38 = vpop.f32.mrf.mxu1  ;;  %v18277_v56 = vpop.f32.mrf.mxu0  ;;  %v2665_v21 = vsel %vm364_vm3, %v2471_v1, -inf }
 0x2dc   : > { %v2569_v45 = vsel %vm364_vm3, %v2439_v53, -inf  ;;  %1700 = vst.msk [vmem:[#allocation2 + $0x118] sm:$0xff] %vm364_vm3, %v1668_v25  ;;  %v1667_v63 = vmax.f32 %v1635_v24, %v1484_v38  ;;  %v1317_v35 = vmax.f32 %v1285_v32, %v18277_v56  ;;  %2666 = vmax.xlane.f32.xlu0 %v2665_v21  ;;  %v2470_v7 = vld [vmem:[#allocation2 + $0x100] sm:$0xff]  ;;  %v1286_v38 = vld [vmem:[#allocation2 + $0x30] sm:$0xff]  ;;  %v19865_v24 = vpop.permute.xlu0 %3308 }
 0x2dd   : > { %2570 = vmax.xlane.f32.xlu1 %v2569_v45  ;;  %v2438_v34 = vld [vmem:[#allocation2] sm:$0xff]  ;;  %v1141_v13 = vpop.f32.mrf.mxu0  ;;  %v2662_v1 = vsel %vm364_vm3, %v2470_v7, -inf  ;;  %24317 = vst [vmem:[#allocation74_spill] sm:$0xff] %v19865_v24 }
 0x2de   : > { %1699 = vst.msk [vmem:[#allocation2 + $0x110] sm:$0xff] %vm364_vm3, %v1667_v63  ;;  %1349 = vst.msk [vmem:[#allocation2 + $0x28] sm:$0xff] %vm364_vm3, %v1317_v35  ;;  %v1316_v29 = vmax.f32 %v1284_v40, %v1141_v13  ;;  %v2566_v53 = vsel %vm364_vm3, %v2438_v34, -inf  ;;  %v1638_v40 = vld [vmem:[#allocation2 + $0x128] sm:$0xff]  ;;  %v1637_v34 = vld [vmem:[#allocation2 + $0x120] sm:$0xff] }
 0x2df   : > { %v2441_v25 = vld [vmem:[#allocation2 + $0x18] sm:$0xff]  ;;  %v1289_v13 = vld [vmem:[#allocation2 + $0x48] sm:$0xff]  ;;  %v1288_v24 = vld [vmem:[#allocation2 + $0x40] sm:$0xff] }
 0x2e0   : > { %1348 = vst.msk [vmem:[#allocation2 + $0x20] sm:$0xff] %vm364_vm3, %v1316_v29  ;;  %2567 = vmax.xlane.f32.xlu0 %v2566_v53  ;;  %v18280_v56 = vpop.f32.mrf.mxu0  ;;  %v2575_v21 = vsel %vm364_vm3, %v2441_v25, -inf }
 0x2e1   : > { %2663 = vmax.xlane.f32.xlu1 %v2662_v1  ;;  %v1319_v32 = vmax.f32 %v1287_v44, %v18280_v56  ;;  %v19869_v1 = vpop.permute.xlu1 %3320 }
 0x2e2   : > { %v1151_v45 = vpop.f32.mrf.mxu0  ;;  %24318 = vst [vmem:[#allocation75_spill] sm:$0xff] %v19869_v1 }
 0x2e3   : > { %1351 = vst.msk [vmem:[#allocation2 + $0x38] sm:$0xff] %vm364_vm3, %v1319_v32  ;;  %v1318_v63 = vmax.f32 %v1286_v38, %v1151_v45  ;;  %v2473_v7 = vld [vmem:[#allocation2 + $0x118] sm:$0xff]  ;;  %v19874_v32 = vpop.permute.xlu0 %3316 }
 0x2e4   : > { %v18357_v35 = vpop.f32.mrf.mxu1  ;;  %2576 = vmax.xlane.f32.xlu0 %v2575_v21  ;;  %v2671_v44 = vsel %vm364_vm3, %v2473_v7, -inf  ;;  %24319 = vst [vmem:[#allocation76_spill] sm:$0xff] %v19874_v32 }
 0x2e5   : > { %v1670_v29 = vmax.f32 %v1638_v40, %v18357_v35  ;;  %1350 = vst.msk [vmem:[#allocation2 + $0x30] sm:$0xff] %vm364_vm3, %v1318_v63  ;;  %v2472_v53 = vld [vmem:[#allocation2 + $0x110] sm:$0xff]  ;;  %v2443_v1 = vld [vmem:[#allocation2 + $0x28] sm:$0xff] }
 0x2e6   : > { %v1494_v56 = vpop.f32.mrf.mxu1  ;;  %v2668_v25 = vsel %vm364_vm3, %v2472_v53, -inf  ;;  %v18283_v47 = vpop.f32.mrf.mxu0  ;;  %v2440_v35 = vld [vmem:[#allocation2 + $0x10] sm:$0xff]  ;;  %v1291_v53 = vld [vmem:[#allocation2 + $0x58] sm:$0xff] }
 0x2e7   : > { %1702 = vst.msk [vmem:[#allocation2 + $0x128] sm:$0xff] %vm364_vm3, %v1670_v29  ;;  %v1669_v38 = vmax.f32 %v1637_v34, %v1494_v56  ;;  %2669 = vmax.xlane.f32.xlu1 %v2668_v25  ;;  %v2442_v21 = vld [vmem:[#allocation2 + $0x20] sm:$0xff]  ;;  %v1321_v40 = vmax.f32 %v1289_v13, %v18283_v47  ;;  %v2572_v34 = vsel %vm364_vm3, %v2440_v35, -inf  ;;  %v1290_v56 = vld [vmem:[#allocation2 + $0x50] sm:$0xff]  ;;  %v19882_v47 = vpop.permute.xlu1 %3328  ;;  %v1640_v25 = vld [vmem:[#allocation2 + $0x138] sm:$0xff] }
 0x2e8   : > { %v2578_v45 = vsel %vm364_vm3, %v2442_v21, -inf  ;;  %2672 = vmax.xlane.f32.xlu0 %v2671_v44  ;;  %v1161_v63 = vpop.f32.mrf.mxu0  ;;  %24320 = vst [vmem:[#allocation77_spill] sm:$0xff] %v19882_v47  ;;  %v19884_v44 = vpop.permute.xlu0 %3324  ;;  %v1292_v47 = vld [vmem:[#allocation2 + $0x60] sm:$0xff] }
 0x2e9   : > { %1701 = vst.msk [vmem:[#allocation2 + $0x120] sm:$0xff] %vm364_vm3, %v1669_v38  ;;  %1353 = vst.msk [vmem:[#allocation2 + $0x48] sm:$0xff] %vm364_vm3, %v1321_v40  ;;  %v1320_v7 = vmax.f32 %v1288_v24, %v1161_v63  ;;  %v2581_v38 = vsel %vm364_vm3, %v2443_v1, -inf  ;;  %v1639_v63 = vld [vmem:[#allocation2 + $0x130] sm:$0xff] }
 0x2ea   : > { %24321 = vst [vmem:[#allocation78_spill] sm:$0xff] %v19884_v44 }
 0x2eb   : > { %2579 = vmax.xlane.f32.xlu1 %v2578_v45  ;;  %1352 = vst.msk [vmem:[#allocation2 + $0x40] sm:$0xff] %vm364_vm3, %v1320_v7  ;;  %v18286_v29 = vpop.f32.mrf.mxu0  ;;  %v1293_v7 = vld [vmem:[#allocation2 + $0x68] sm:$0xff] }
 0x2ec   : > { %2573 = vmax.xlane.f32.xlu0 %v2572_v34  ;;  %v1323_v13 = vmax.f32 %v1291_v53, %v18286_v29  ;;  %v2444_v48 = vld [vmem:[#allocation2 + $0x30] sm:$0xff] }
 0x2ed   : > { %v1171_v21 = vpop.f32.mrf.mxu0 }
 0x2ee   : > { %1355 = vst.msk [vmem:[#allocation2 + $0x58] sm:$0xff] %vm364_vm3, %v1323_v13  ;;  %v1322_v24 = vmax.f32 %v1290_v56, %v1171_v21  ;;  %v2475_v40 = vld [vmem:[#allocation2 + $0x128] sm:$0xff]  ;;  %v19892_v13 = vpop.permute.xlu1 %3336  ;;  %v2445_v21 = vld [vmem:[#allocation2 + $0x38] sm:$0xff] }
 0x2ef   : > { %v18360_v45 = vpop.f32.mrf.mxu1  ;;  %v2677_v29 = vsel %vm364_vm3, %v2475_v40, -inf  ;;  %24322 = vst [vmem:[#allocation79_spill] sm:$0xff] %v19892_v13  ;;  %v1295_v40 = vld [vmem:[#allocation2 + $0x78] sm:$0xff] }
 0x2f0   : > { %v1672_v35 = vmax.f32 %v1640_v25, %v18360_v45  ;;  %v2474_v32 = vld [vmem:[#allocation2 + $0x120] sm:$0xff]  ;;  %2582 = vmax.xlane.f32.xlu0 %v2581_v38  ;;  %1354 = vst.msk [vmem:[#allocation2 + $0x50] sm:$0xff] %vm364_vm3, %v1322_v24  ;;  %v19894_v45 = vpop.permute.xlu0 %3332  ;;  %v2584_v38 = vsel %vm364_vm3, %v2444_v48, -inf }
 0x2f1   : > { %v1504_v53 = vpop.f32.mrf.mxu1  ;;  %v2674_v34 = vsel %vm364_vm3, %v2474_v32, -inf  ;;  %v18289_v1 = vpop.f32.mrf.mxu0  ;;  %24323 = vst [vmem:[#allocation80_spill] sm:$0xff] %v19894_v45 }
 0x2f2   : > { %1704 = vst.msk [vmem:[#allocation2 + $0x138] sm:$0xff] %vm364_vm3, %v1672_v35  ;;  %v1671_v56 = vmax.f32 %v1639_v63, %v1504_v53  ;;  %2675 = vmax.xlane.f32.xlu1 %v2674_v34  ;;  %v1325_v25 = vmax.f32 %v1293_v7, %v18289_v1  ;;  %v2587_v35 = vsel %vm364_vm3, %v2445_v21, -inf  ;;  %v1294_v53 = vld [vmem:[#allocation2 + $0x70] sm:$0xff]  ;;  %v1642_v34 = vld [vmem:[#allocation2 + $0x148] sm:$0xff]  ;;  %v19901_v1 = vpop.permute.xlu1 %3344 }
 0x2f3   : > { %v1181_v24 = vpop.f32.mrf.mxu0  ;;  %24324 = vst [vmem:[#allocation81_spill] sm:$0xff] %v19901_v1 }
 0x2f4   : > { %1703 = vst.msk [vmem:[#allocation2 + $0x130] sm:$0xff] %vm364_vm3, %v1671_v56  ;;  %2678 = vmax.xlane.f32.xlu0 %v2677_v29  ;;  %1357 = vst.msk [vmem:[#allocation2 + $0x68] sm:$0xff] %vm364_vm3, %v1325_v25  ;;  %v1324_v32 = vmax.f32 %v1292_v47, %v1181_v24  ;;  %v19903_v13 = vpop.permute.xlu0 %3340  ;;  %v1641_v25 = vld [vmem:[#allocation2 + $0x140] sm:$0xff]  ;;  %v1297_v24 = vld [vmem:[#allocation2 + $0x88] sm:$0xff] }
 0x2f5   : > { %24325 = vst [vmem:[#allocation82_spill] sm:$0xff] %v19903_v13  ;;  %v1296_v13 = vld [vmem:[#allocation2 + $0x80] sm:$0xff] }
 0x2f6   : > { %2585 = vmax.xlane.f32.xlu1 %v2584_v38  ;;  %1356 = vst.msk [vmem:[#allocation2 + $0x60] sm:$0xff] %vm364_vm3, %v1324_v32  ;;  %v18292_v63 = vpop.f32.mrf.mxu0  ;;  %v2447_v38 = vld [vmem:[#allocation2 + $0x48] sm:$0xff]  ;;  %v19911_v44 = vpop.permute.xlu1 %3352 }
 0x2f7   : > { %v1327_v7 = vmax.f32 %v1295_v40, %v18292_v63  ;;  %v2446_v40 = vld [vmem:[#allocation2 + $0x40] sm:$0xff]  ;;  %24326 = vst [vmem:[#allocation83_spill] sm:$0xff] %v19911_v44 }
 0x2f8   : > { %2588 = vmax.xlane.f32.xlu0 %v2587_v35  ;;  %v1191_v48 = vpop.f32.mrf.mxu0  ;;  %v19914_v20 = vpop.permute.xlu0 %3348 }
 0x2f9   : > { %v2477_v29 = vld [vmem:[#allocation2 + $0x138] sm:$0xff]  ;;  %1359 = vst.msk [vmem:[#allocation2 + $0x78] sm:$0xff] %vm364_vm3, %v1327_v7  ;;  %v1326_v47 = vmax.f32 %v1294_v53, %v1191_v48  ;;  %v2593_v48 = vsel %vm364_vm3, %v2447_v38, -inf  ;;  %24327 = vst [vmem:[#allocation84_spill] sm:$0xff] %v19914_v20  ;;  %v1298_v38 = vld [vmem:[#allocation2 + $0x90] sm:$0xff] }
 0x2fa   : > { %v18363_v56 = vpop.f32.mrf.mxu1  ;;  %v2683_v21 = vsel %vm364_vm3, %v2477_v29, -inf  ;;  %v1644_v7 = vld [vmem:[#allocation2 + $0x158] sm:$0xff] }
 0x2fb   : > { %v1674_v32 = vmax.f32 %v1642_v34, %v18363_v56  ;;  %v2476_v45 = vld [vmem:[#allocation2 + $0x130] sm:$0xff]  ;;  %1358 = vst.msk [vmem:[#allocation2 + $0x70] sm:$0xff] %vm364_vm3, %v1326_v47  ;;  %v2590_v34 = vsel %vm364_vm3, %v2446_v40, -inf  ;;  %v1299_v47 = vld [vmem:[#allocation2 + $0x98] sm:$0xff] }
 0x2fc   : > { %v1514_v63 = vpop.f32.mrf.mxu1  ;;  %v2680_v35 = vsel %vm364_vm3, %v2476_v45, -inf  ;;  %2684 = vmax.xlane.f32.xlu0 %v2683_v21  ;;  %v18295_v1 = vpop.f32.mrf.mxu0  ;;  %v1643_v21 = vld [vmem:[#allocation2 + $0x150] sm:$0xff] }
 0x2fd   : > { %1706 = vst.msk [vmem:[#allocation2 + $0x148] sm:$0xff] %vm364_vm3, %v1674_v32  ;;  %v1673_v53 = vmax.f32 %v1641_v25, %v1514_v63  ;;  %2681 = vmax.xlane.f32.xlu1 %v2680_v35  ;;  %v1329_v29 = vmax.f32 %v1297_v24, %v18295_v1  ;;  %v1646_v24 = vld [vmem:[#allocation2 + $0x168] sm:$0xff] }
 0x2fe   : > { %v1201_v56 = vpop.f32.mrf.mxu0 }
 0x2ff   : > { %1705 = vst.msk [vmem:[#allocation2 + $0x140] sm:$0xff] %vm364_vm3, %v1673_v53  ;;  %v18366_v45 = vpop.f32.mrf.mxu1  ;;  %1361 = vst.msk [vmem:[#allocation2 + $0x88] sm:$0xff] %vm364_vm3, %v1329_v29  ;;  %v1328_v25 = vmax.f32 %v1296_v13, %v1201_v56  ;;  %v1301_v53 = vld [vmem:[#allocation2 + $0xa8] sm:$0xff] }
 0x300   : > { %v1676_v32 = vmax.f32 %v1644_v7, %v18366_v45  ;;  %2594 = vmax.xlane.f32.xlu0 %v2593_v48  ;;  %v18298_v63 = vpop.f32.mrf.mxu0  ;;  %v19921_v7 = vpop.permute.xlu1 %3360  ;;  %v1300_v45 = vld [vmem:[#allocation2 + $0xa0] sm:$0xff] }
 0x301   : > { %v1524_v1 = vpop.f32.mrf.mxu1  ;;  %2591 = vmax.xlane.f32.xlu1 %v2590_v34  ;;  %1360 = vst.msk [vmem:[#allocation2 + $0x80] sm:$0xff] %vm364_vm3, %v1328_v25  ;;  %v1331_v40 = vmax.f32 %v1299_v47, %v18298_v63  ;;  %24328 = vst [vmem:[#allocation85_spill] sm:$0xff] %v19921_v7  ;;  %v2449_v34 = vld [vmem:[#allocation2 + $0x58] sm:$0xff]  ;;  %v19924_v47 = vpop.permute.xlu0 %3356  ;;  %v1647_v7 = vld [vmem:[#allocation2 + $0x170] sm:$0xff] }
 0x302   : > { %1708 = vst.msk [vmem:[#allocation2 + $0x158] sm:$0xff] %vm364_vm3, %v1676_v32  ;;  %v1675_v35 = vmax.f32 %v1643_v21, %v1524_v1  ;;  %v1211_v44 = vpop.f32.mrf.mxu0  ;;  %24329 = vst [vmem:[#allocation86_spill] sm:$0xff] %v19924_v47  ;;  %v1648_v32 = vld [vmem:[#allocation2 + $0x178] sm:$0xff]  ;;  %v2599_v47 = vsel %vm364_vm3, %v2449_v34, -inf }
 0x303   : > { %v18369_v20 = vpop.f32.mrf.mxu1  ;;  %1363 = vst.msk [vmem:[#allocation2 + $0x98] sm:$0xff] %vm364_vm3, %v1331_v40  ;;  %v1330_v13 = vmax.f32 %v1298_v38, %v1211_v44  ;;  %v2448_v38 = vld [vmem:[#allocation2 + $0x50] sm:$0xff] }
 0x304   : > { %1707 = vst.msk [vmem:[#allocation2 + $0x150] sm:$0xff] %vm364_vm3, %v1675_v35  ;;  %v1678_v48 = vmax.f32 %v1646_v24, %v18369_v20  ;;  %v2479_v29 = vld [vmem:[#allocation2 + $0x148] sm:$0xff]  ;;  %v18301_v56 = vpop.f32.mrf.mxu0  ;;  %v1303_v24 = vld [vmem:[#allocation2 + $0xb8] sm:$0xff]  ;;  %v19935_v26 = vpop.permute.xlu1 %3367 }
 0x305   : > { %v1534_v25 = vpop.f32.mrf.mxu1  ;;  %v2689_v21 = vsel %vm364_vm3, %v2479_v29, -inf  ;;  %1362 = vst.msk [vmem:[#allocation2 + $0x90] sm:$0xff] %vm364_vm3, %v1330_v13  ;;  %v1333_v63 = vmax.f32 %v1301_v53, %v18301_v56  ;;  %24330 = vst [vmem:[#allocation87_spill] sm:$0xff] %v19935_v26 }
 0x306   : > { %v2478_v1 = vld [vmem:[#allocation2 + $0x140] sm:$0xff]  ;;  %1710 = vst.msk [vmem:[#allocation2 + $0x168] sm:$0xff] %vm364_vm3, %v1678_v48  ;;  %v1677_v44 = vmax.f32 %v1645_v50, %v1534_v25  ;;  %2690 = vmax.xlane.f32.xlu0 %v2689_v21  ;;  %v1221_v20 = vpop.f32.mrf.mxu0  ;;  %v1302_v48 = vld [vmem:[#allocation2 + $0xb0] sm:$0xff]  ;;  %v2596_v50 = vsel %vm364_vm3, %v2448_v38, -inf  ;;  %v1650_v21 = vld [vmem:[#allocation2 + $0x188] sm:$0xff] }
 0x307   : > { %v2686_v40 = vsel %vm364_vm3, %v2478_v1, -inf  ;;  %v18372_v35 = vpop.f32.mrf.mxu1  ;;  %1365 = vst.msk [vmem:[#allocation2 + $0xa8] sm:$0xff] %vm364_vm3, %v1333_v63  ;;  %v1332_v29 = vmax.f32 %v1300_v45, %v1221_v20  ;;  %v1305_v63 = vld [vmem:[#allocation2 + $0xc8] sm:$0xff] }
 0x308   : > { %2687 = vmax.xlane.f32.xlu1 %v2686_v40  ;;  %1709 = vst.msk [vmem:[#allocation2 + $0x160] sm:$0xff] %vm364_vm3, %v1677_v44  ;;  %v1680_v53 = vmax.f32 %v1648_v32, %v18372_v35  ;;  %v18304_v13 = vpop.f32.mrf.mxu0  ;;  %v19938_v44 = vpop.permute.xlu0 %3363  ;;  %v1649_v40 = vld [vmem:[#allocation2 + $0x180] sm:$0xff] }
 0x309   : > { %v1544_v56 = vpop.f32.mrf.mxu1  ;;  %v2481_v25 = vld [vmem:[#allocation2 + $0x158] sm:$0xff]  ;;  %1364 = vst.msk [vmem:[#allocation2 + $0xa0] sm:$0xff] %vm364_vm3, %v1332_v29  ;;  %v1335_v1 = vmax.f32 %v1303_v24, %v18304_v13  ;;  %24331 = vst [vmem:[#allocation88_spill] sm:$0xff] %v19938_v44  ;;  %v2451_v29 = vld [vmem:[#allocation2 + $0x68] sm:$0xff] }
 0x30a   : > { %1712 = vst.msk [vmem:[#allocation2 + $0x178] sm:$0xff] %vm364_vm3, %v1680_v53  ;;  %v1679_v34 = vmax.f32 %v1647_v7, %v1544_v56  ;;  %2600 = vmax.xlane.f32.xlu0 %v2599_v47  ;;  %v1231_v45 = vpop.f32.mrf.mxu0  ;;  %v2695_v20 = vsel %vm364_vm3, %v2481_v25, -inf  ;;  %v1304_v7 = vld [vmem:[#allocation2 + $0xc0] sm:$0xff]  ;;  %v1652_v56 = vld [vmem:[#allocation2 + $0x198] sm:$0xff] }
 0x30b   : > { %v2480_v32 = vld [vmem:[#allocation2 + $0x150] sm:$0xff]  ;;  %v18375_v38 = vpop.f32.mrf.mxu1  ;;  %1367 = vst.msk [vmem:[#allocation2 + $0xb8] sm:$0xff] %vm364_vm3, %v1335_v1  ;;  %v1334_v35 = vmax.f32 %v1302_v48, %v1231_v45  ;;  %v2450_v25 = vld [vmem:[#allocation2 + $0x60] sm:$0xff] }
 0x30c   : > { %2597 = vmax.xlane.f32.xlu1 %v2596_v50  ;;  %1711 = vst.msk [vmem:[#allocation2 + $0x170] sm:$0xff] %vm364_vm3, %v1679_v34  ;;  %v1682_v24 = vmax.f32 %v1650_v21, %v18375_v38  ;;  %v18307_v53 = vpop.f32.mrf.mxu0  ;;  %v2692_v47 = vsel %vm364_vm3, %v2480_v32, -inf  ;;  %v1307_v50 = vld [vmem:[#allocation2 + $0xd8] sm:$0xff]  ;;  %v2605_v34 = vsel %vm364_vm3, %v2451_v29, -inf  ;;  %v1651_v45 = vld [vmem:[#allocation2 + $0x190] sm:$0xff]  ;;  %v19948_v32 = vpop.permute.xlu1 %3375  ;;  %v1654_v29 = vld [vmem:[#allocation2 + $0x1a8] sm:$0xff] }
 0x30d   : > { %v1554_v13 = vpop.f32.mrf.mxu1  ;;  %1366 = vst.msk [vmem:[#allocation2 + $0xb0] sm:$0xff] %vm364_vm3, %v1334_v35  ;;  %v1337_v26 = vmax.f32 %v1305_v63, %v18307_v53  ;;  %24332 = vst [vmem:[#allocation89_spill] sm:$0xff] %v19948_v32  ;;  %v2483_v63 = vld [vmem:[#allocation2 + $0x168] sm:$0xff]  ;;  %v1306_v53 = vld [vmem:[#allocation2 + $0xd0] sm:$0xff] }
 0x30e   : > { %2696 = vmax.xlane.f32.xlu0 %v2695_v20  ;;  %1714 = vst.msk [vmem:[#allocation2 + $0x188] sm:$0xff] %vm364_vm3, %v1682_v24  ;;  %v1681_v1 = vmax.f32 %v1649_v40, %v1554_v13  ;;  %v1241_v48 = vpop.f32.mrf.mxu0  ;;  %v19951_v24 = vpop.permute.xlu0 %3371  ;;  %v2602_v40 = vsel %vm364_vm3, %v2450_v25, -inf  ;;  %v2453_v25 = vld [vmem:[#allocation2 + $0x78] sm:$0xff] }
 0x30f   : > { %v18378_v21 = vpop.f32.mrf.mxu1  ;;  %1369 = vst.msk [vmem:[#allocation2 + $0xc8] sm:$0xff] %vm364_vm3, %v1337_v26  ;;  %v1336_v38 = vmax.f32 %v1304_v7, %v1241_v48  ;;  %24333 = vst [vmem:[#allocation90_spill] sm:$0xff] %v19951_v24  ;;  %v2482_v26 = vld [vmem:[#allocation2 + $0x160] sm:$0xff]  ;;  %v2452_v24 = vld [vmem:[#allocation2 + $0x70] sm:$0xff] }
 0x310   : > { %2693 = vmax.xlane.f32.xlu1 %v2692_v47  ;;  %1713 = vst.msk [vmem:[#allocation2 + $0x180] sm:$0xff] %vm364_vm3, %v1681_v1  ;;  %v1684_v35 = vmax.f32 %v1652_v56, %v18378_v21  ;;  %v18310_v20 = vpop.f32.mrf.mxu0  ;;  %v1309_v1 = vld [vmem:[#allocation2 + $0xe8] sm:$0xff]  ;;  %v2701_v56 = vsel %vm364_vm3, %v2483_v63, -inf  ;;  %v1653_v21 = vld [vmem:[#allocation2 + $0x1a0] sm:$0xff]  ;;  %v19961_v63 = vpop.permute.xlu1 %3383 }
 0x311   : > { %v1564_v13 = vpop.f32.mrf.mxu1  ;;  %1368 = vst.msk [vmem:[#allocation2 + $0xc0] sm:$0xff] %vm364_vm3, %v1336_v38  ;;  %v1339_v44 = vmax.f32 %v1307_v50, %v18310_v20  ;;  %v1308_v20 = vld [vmem:[#allocation2 + $0xe0] sm:$0xff]  ;;  %24334 = vst [vmem:[#allocation91_spill] sm:$0xff] %v19961_v63 }
 0x312   : > { %2606 = vmax.xlane.f32.xlu0 %v2605_v34  ;;  %1716 = vst.msk [vmem:[#allocation2 + $0x198] sm:$0xff] %vm364_vm3, %v1684_v35  ;;  %v1683_v7 = vmax.f32 %v1651_v45, %v1564_v13  ;;  %v1251_v47 = vpop.f32.mrf.mxu0  ;;  %v2698_v34 = vsel %vm364_vm3, %v2482_v26, -inf  ;;  %v1656_v45 = vld [vmem:[#allocation2 + $0x1b8] sm:$0xff]  ;;  %v1655_v26 = vld [vmem:[#allocation2 + $0x1b0] sm:$0xff] }
 0x313   : > { %v18381_v48 = vpop.f32.mrf.mxu1  ;;  %1371 = vst.msk [vmem:[#allocation2 + $0xd8] sm:$0xff] %vm364_vm3, %v1339_v44  ;;  %v1338_v32 = vmax.f32 %v1306_v53, %v1251_v47 }
 0x314   : > { %2603 = vmax.xlane.f32.xlu1 %v2602_v40  ;;  %1715 = vst.msk [vmem:[#allocation2 + $0x190] sm:$0xff] %vm364_vm3, %v1683_v7  ;;  %v1686_v38 = vmax.f32 %v1654_v29, %v18381_v48  ;;  %v18313_v50 = vpop.f32.mrf.mxu0  ;;  %v1311_v40 = vld [vmem:[#allocation2 + $0xf8] sm:$0xff]  ;;  %v19964_v7 = vpop.permute.xlu0 %3379  ;;  %v2611_v29 = vsel %vm364_vm3, %v2453_v25, -inf  ;;  %v2484_v25 = vld [vmem:[#allocation2 + $0x170] sm:$0xff] }
 0x315   : > { %v1574_v35 = vpop.f32.mrf.mxu1  ;;  %1370 = vst.msk [vmem:[#allocation2 + $0xd0] sm:$0xff] %vm364_vm3, %v1338_v32  ;;  %v1341_v13 = vmax.f32 %v1309_v1, %v18313_v50  ;;  %24335 = vst [vmem:[#allocation92_spill] sm:$0xff] %v19964_v7  ;;  %v2485_v32 = vld [vmem:[#allocation2 + $0x178] sm:$0xff]  ;;  %v1310_v50 = vld [vmem:[#allocation2 + $0xf0] sm:$0xff] }
 0x316   : > { %2702 = vmax.xlane.f32.xlu0 %v2701_v56  ;;  %1718 = vst.msk [vmem:[#allocation2 + $0x1a8] sm:$0xff] %vm364_vm3, %v1686_v38  ;;  %v1685_v44 = vmax.f32 %v1653_v21, %v1574_v35  ;;  %v1261_v53 = vpop.f32.mrf.mxu0  ;;  %v2608_v21 = vsel %vm364_vm3, %v2452_v24, -inf  ;;  %v1658_v35 = vld [vmem:[#allocation2 + $0x1c8] sm:$0xff]  ;;  %v19974_v24 = vpop.permute.xlu1 %3391 }
 0x317   : > { %v18384_v47 = vpop.f32.mrf.mxu1  ;;  %1373 = vst.msk [vmem:[#allocation2 + $0xe8] sm:$0xff] %vm364_vm3, %v1341_v13  ;;  %v1340_v48 = vmax.f32 %v1308_v20, %v1261_v53  ;;  %v2707_v53 = vsel %vm364_vm3, %v2485_v32, -inf  ;;  %24336 = vst [vmem:[#allocation93_spill] sm:$0xff] %v19974_v24  ;;  %v2455_v7 = vld [vmem:[#allocation2 + $0x88] sm:$0xff]  ;;  %v1660_v32 = vld [vmem:[#allocation2 + $0x1d8] sm:$0xff] }
 0x318   : > { %2699 = vmax.xlane.f32.xlu1 %v2698_v34  ;;  %1717 = vst.msk [vmem:[#allocation2 + $0x1a0] sm:$0xff] %vm364_vm3, %v1685_v44  ;;  %v1688_v1 = vmax.f32 %v1656_v45, %v18384_v47  ;;  %v18316_v56 = vpop.f32.mrf.mxu0  ;;  %v1987_v34 = vld [vmem:[#allocation2 + $0x208] sm:$0xff]  ;;  %v1657_v45 = vld [vmem:[#allocation2 + $0x1c0] sm:$0xff] }
 0x319   : > { %v1584_v38 = vpop.f32.mrf.mxu1  ;;  %1372 = vst.msk [vmem:[#allocation2 + $0xe0] sm:$0xff] %vm364_vm3, %v1340_v48  ;;  %v1343_v63 = vmax.f32 %v1311_v40, %v18316_v56  ;;  %v1986_v48 = vld [vmem:[#allocation2 + $0x200] sm:$0xff] }
 0x31a   : > { %2612 = vmax.xlane.f32.xlu0 %v2611_v29  ;;  %1720 = vst.msk [vmem:[#allocation2 + $0x1b8] sm:$0xff] %vm364_vm3, %v1688_v1  ;;  %v1687_v13 = vmax.f32 %v1655_v26, %v1584_v38  ;;  %v1271_v20 = vpop.f32.mrf.mxu0  ;;  %v19977_v1 = vpop.permute.xlu0 %3387  ;;  %v2704_v26 = vsel %vm364_vm3, %v2484_v25, -inf  ;;  %v2487_v25 = vld [vmem:[#allocation2 + $0x188] sm:$0xff] }
 0x31b   : > { %v18387_v44 = vpop.f32.mrf.mxu1  ;;  %1375 = vst.msk [vmem:[#allocation2 + $0xf8] sm:$0xff] %vm364_vm3, %v1343_v63  ;;  %v1342_v47 = vmax.f32 %v1310_v50, %v1271_v20  ;;  %24337 = vst [vmem:[#allocation94_spill] sm:$0xff] %v19977_v1  ;;  %v2454_v63 = vld [vmem:[#allocation2 + $0x80] sm:$0xff]  ;;  %v1659_v20 = vld [vmem:[#allocation2 + $0x1d0] sm:$0xff] }
 0x31c   : > { %2609 = vmax.xlane.f32.xlu1 %v2608_v21  ;;  %1719 = vst.msk [vmem:[#allocation2 + $0x1b0] sm:$0xff] %vm364_vm3, %v1687_v13  ;;  %v1690_v40 = vmax.f32 %v1658_v35, %v18387_v44  ;;  %v18431_v29 = vpop.f32.mrf.mxu0  ;;  %v2617_v13 = vsel %vm364_vm3, %v2455_v7, -inf }
 0x31d   : > { %v1594_v56 = vpop.f32.mrf.mxu1  ;;  %1374 = vst.msk [vmem:[#allocation2 + $0xf0] sm:$0xff] %vm364_vm3, %v1342_v47  ;;  %v2019_v38 = vmax.f32 %v1987_v34, %v18431_v29  ;;  %v2614_v34 = vsel %vm364_vm3, %v2454_v63, -inf }
 0x31e   : > { %2708 = vmax.xlane.f32.xlu0 %v2707_v53  ;;  %1722 = vst.msk [vmem:[#allocation2 + $0x1c8] sm:$0xff] %vm364_vm3, %v1690_v40  ;;  %v1689_v50 = vmax.f32 %v1657_v45, %v1594_v56  ;;  %v1827_v21 = vpop.f32.mrf.mxu0  ;;  %v1662_v53 = vld [vmem:[#allocation2 + $0x1e8] sm:$0xff]  ;;  %v19987_v45 = vpop.permute.xlu1 %3399  ;;  %v2486_v40 = vld [vmem:[#allocation2 + $0x180] sm:$0xff] }
 0x31f   : > { %v18390_v35 = vpop.f32.mrf.mxu1  ;;  %2051 = vst.msk [vmem:[#allocation2 + $0x208] sm:$0xff] %vm364_vm3, %v2019_v38  ;;  %v2018_v44 = vmax.f32 %v1986_v48, %v1827_v21  ;;  %24338 = vst [vmem:[#allocation95_spill] sm:$0xff] %v19987_v45  ;;  %v19990_v29 = vpop.permute.xlu0 %3395  ;;  %v2713_v48 = vsel %vm364_vm3, %v2487_v25, -inf  ;;  %v1661_v56 = vld [vmem:[#allocation2 + $0x1e0] sm:$0xff]  ;;  %v2710_v63 = vsel %vm364_vm3, %v2486_v40, -inf  ;;  %v1664_v21 = vld [vmem:[#allocation2 + $0x1f8] sm:$0xff] }
 0x320   : > { %2705 = vmax.xlane.f32.xlu1 %v2704_v26  ;;  %1721 = vst.msk [vmem:[#allocation2 + $0x1c0] sm:$0xff] %vm364_vm3, %v1689_v50  ;;  %v1692_v24 = vmax.f32 %v1660_v32, %v18390_v35  ;;  %24339 = vst [vmem:[#allocation96_spill] sm:$0xff] %v19990_v29  ;;  %v2457_v32 = vld [vmem:[#allocation2 + $0x98] sm:$0xff]  ;;  %v2456_v35 = vld [vmem:[#allocation2 + $0x90] sm:$0xff] }
 0x321   : > { %v1604_v47 = vpop.f32.mrf.mxu1  ;;  %2050 = vst.msk [vmem:[#allocation2 + $0x200] sm:$0xff] %vm364_vm3, %v2018_v44  ;;  %v1663_v44 = vld [vmem:[#allocation2 + $0x1f0] sm:$0xff]  ;;  %v2620_v40 = vsel %vm364_vm3, %v2456_v35, -inf }
 0x322   : > { %2618 = vmax.xlane.f32.xlu0 %v2617_v13  ;;  %1724 = vst.msk [vmem:[#allocation2 + $0x1d8] sm:$0xff] %vm364_vm3, %v1692_v24  ;;  %v1691_v7 = vmax.f32 %v1659_v20, %v1604_v47  ;;  %v2623_v13 = vsel %vm364_vm3, %v2457_v32, -inf  ;;  %v19997_v25 = vpop.permute.xlu1 %3407  ;;  %v1989_v32 = vld [vmem:[#allocation2 + $0x218] sm:$0xff] }
 0x323   : > { %v18393_v26 = vpop.f32.mrf.mxu1  ;;  %24340 = vst [vmem:[#allocation97_spill] sm:$0xff] %v19997_v25  ;;  %v2459_v25 = vld [vmem:[#allocation2 + $0xa8] sm:$0xff] }
 0x324   : > { %2615 = vmax.xlane.f32.xlu1 %v2614_v34  ;;  %1723 = vst.msk [vmem:[#allocation2 + $0x1d0] sm:$0xff] %vm364_vm3, %v1691_v7  ;;  %v1694_v38 = vmax.f32 %v1662_v53, %v18393_v26  ;;  %v2489_v34 = vld [vmem:[#allocation2 + $0x198] sm:$0xff]  ;;  %v20000_v53 = vpop.permute.xlu0 %3403  ;;  %v2488_v26 = vld [vmem:[#allocation2 + $0x190] sm:$0xff] }
 0x325   : > { %v1614_v50 = vpop.f32.mrf.mxu1  ;;  %24341 = vst [vmem:[#allocation98_spill] sm:$0xff] %v20000_v53  ;;  %v2716_v35 = vsel %vm364_vm3, %v2488_v26, -inf  ;;  %v2491_v26 = vld [vmem:[#allocation2 + $0x1a8] sm:$0xff] }
 0x326   : > { %2714 = vmax.xlane.f32.xlu0 %v2713_v48  ;;  %1726 = vst.msk [vmem:[#allocation2 + $0x1e8] sm:$0xff] %vm364_vm3, %v1694_v38  ;;  %v1693_v24 = vmax.f32 %v1661_v56, %v1614_v50  ;;  %v2342_v48 = vld [vmem:[#allocation2 + $0x318] sm:$0xff]  ;;  %v2719_v38 = vsel %vm364_vm3, %v2489_v34, -inf }
 0x327   : > { %v18396_v20 = vpop.f32.mrf.mxu1 }
 0x328   : > { %2711 = vmax.xlane.f32.xlu1 %v2710_v63  ;;  %1725 = vst.msk [vmem:[#allocation2 + $0x1e0] sm:$0xff] %vm364_vm3, %v1693_v24  ;;  %v1696_v47 = vmax.f32 %v1664_v21, %v18396_v20  ;;  %v2341_v63 = vld [vmem:[#allocation2 + $0x310] sm:$0xff] }
 0x329   : > { %v1624_v7 = vpop.f32.mrf.mxu1  ;;  %v1988_v20 = vld [vmem:[#allocation2 + $0x210] sm:$0xff] }
 0x32a   : > { %2624 = vmax.xlane.f32.xlu0 %v2623_v13  ;;  %1728 = vst.msk [vmem:[#allocation2 + $0x1f8] sm:$0xff] %vm364_vm3, %v1696_v47  ;;  %v1695_v56 = vmax.f32 %v1663_v44, %v1624_v7  ;;  %v18434_v24 = vpop.f32.mrf.mxu0  ;;  %v20007_v13 = vpop.permute.xlu1 %3415  ;;  %v2458_v47 = vld [vmem:[#allocation2 + $0xa0] sm:$0xff]  ;;  %v2344_v7 = vld [vmem:[#allocation2 + $0x328] sm:$0xff] }
 0x32b   : > { %v18514_v50 = vpop.f32.mrf.mxu1  ;;  %v2021_v53 = vmax.f32 %v1989_v32, %v18434_v24  ;;  %24342 = vst [vmem:[#allocation99_spill] sm:$0xff] %v20007_v13  ;;  %v1991_v24 = vld [vmem:[#allocation2 + $0x228] sm:$0xff] }
 0x32c   : > { %2621 = vmax.xlane.f32.xlu1 %v2620_v40  ;;  %1727 = vst.msk [vmem:[#allocation2 + $0x1f0] sm:$0xff] %vm364_vm3, %v1695_v56  ;;  %v2374_v21 = vmax.f32 %v2342_v48, %v18514_v50  ;;  %v1837_v34 = vpop.f32.mrf.mxu0  ;;  %v20010_v40 = vpop.permute.xlu0 %3411  ;;  %v2629_v56 = vsel %vm364_vm3, %v2459_v25, -inf  ;;  %v2343_v50 = vld [vmem:[#allocation2 + $0x320] sm:$0xff]  ;;  %v2725_v25 = vsel %vm364_vm3, %v2491_v26, -inf  ;;  %v2346_v26 = vld [vmem:[#allocation2 + $0x338] sm:$0xff] }
 0x32d   : > { %v2190_v45 = vpop.f32.mrf.mxu1  ;;  %24343 = vst [vmem:[#allocation100_spill] sm:$0xff] %v20010_v40  ;;  %2053 = vst.msk [vmem:[#allocation2 + $0x218] sm:$0xff] %vm364_vm3, %v2021_v53  ;;  %v2020_v48 = vmax.f32 %v1988_v20, %v1837_v34  ;;  %v1990_v34 = vld [vmem:[#allocation2 + $0x220] sm:$0xff] }
 0x32e   : > { %2720 = vmax.xlane.f32.xlu0 %v2719_v38  ;;  %2406 = vst.msk [vmem:[#allocation2 + $0x318] sm:$0xff] %vm364_vm3, %v2374_v21  ;;  %v2373_v44 = vmax.f32 %v2341_v63, %v2190_v45  ;;  %v2626_v38 = vsel %vm364_vm3, %v2458_v47, -inf  ;;  %v2490_v63 = vld [vmem:[#allocation2 + $0x1a0] sm:$0xff]  ;;  %v20019_v20 = vpop.permute.xlu1 %3423 }
 0x32f   : > { %v18517_v32 = vpop.f32.mrf.mxu1  ;;  %2052 = vst.msk [vmem:[#allocation2 + $0x210] sm:$0xff] %vm364_vm3, %v2020_v48  ;;  %24344 = vst [vmem:[#allocation101_spill] sm:$0xff] %v20019_v20  ;;  %v2722_v47 = vsel %vm364_vm3, %v2490_v63, -inf }
 0x330   : > { %2717 = vmax.xlane.f32.xlu1 %v2716_v35  ;;  %2405 = vst.msk [vmem:[#allocation2 + $0x310] sm:$0xff] %vm364_vm3, %v2373_v44  ;;  %v2376_v45 = vmax.f32 %v2344_v7, %v18517_v32  ;;  %v2461_v35 = vld [vmem:[#allocation2 + $0xb8] sm:$0xff]  ;;  %v20021_v13 = vpop.permute.xlu0 %3419 }
 0x331   : > { %v2200_v21 = vpop.f32.mrf.mxu1  ;;  %24345 = vst [vmem:[#allocation102_spill] sm:$0xff] %v20021_v13  ;;  %v2635_v32 = vsel %vm364_vm3, %v2461_v35, -inf }
 0x332   : > { %2630 = vmax.xlane.f32.xlu0 %v2629_v56  ;;  %2408 = vst.msk [vmem:[#allocation2 + $0x328] sm:$0xff] %vm364_vm3, %v2376_v45  ;;  %v2375_v53 = vmax.f32 %v2343_v50, %v2200_v21  ;;  %v18437_v44 = vpop.f32.mrf.mxu0  ;;  %v2460_v56 = vld [vmem:[#allocation2 + $0xb0] sm:$0xff] }
 0x333   : > { %v2023_v7 = vmax.f32 %v1991_v24, %v18437_v44  ;;  %v2345_v21 = vld [vmem:[#allocation2 + $0x330] sm:$0xff]  ;;  %v2632_v20 = vsel %vm364_vm3, %v2460_v56, -inf  ;;  %v1993_v44 = vld [vmem:[#allocation2 + $0x238] sm:$0xff] }
 0x334   : > { %2627 = vmax.xlane.f32.xlu1 %v2626_v38  ;;  %2407 = vst.msk [vmem:[#allocation2 + $0x320] sm:$0xff] %vm364_vm3, %v2375_v53  ;;  %v1847_v48 = vpop.f32.mrf.mxu0  ;;  %v2493_v38 = vld [vmem:[#allocation2 + $0x1b8] sm:$0xff]  ;;  %v20029_v53 = vpop.permute.xlu1 %3430  ;;  %v2492_v24 = vld [vmem:[#allocation2 + $0x1b0] sm:$0xff] }
 0x335   : > { %2055 = vst.msk [vmem:[#allocation2 + $0x228] sm:$0xff] %vm364_vm3, %v2023_v7  ;;  %v2022_v50 = vmax.f32 %v1990_v34, %v1847_v48  ;;  %24346 = vst [vmem:[#allocation103_spill] sm:$0xff] %v20029_v53  ;;  %v20031_v13 = vpop.permute.xlu0 %3426  ;;  %v2731_v35 = vsel %vm364_vm3, %v2493_v38, -inf  ;;  %v2463_v7 = vld [vmem:[#allocation2 + $0xc8] sm:$0xff]  ;;  %v1992_v48 = vld [vmem:[#allocation2 + $0x230] sm:$0xff] }
 0x336   : > { %2726 = vmax.xlane.f32.xlu0 %v2725_v25  ;;  %v18520_v45 = vpop.f32.mrf.mxu1  ;;  %24347 = vst [vmem:[#allocation104_spill] sm:$0xff] %v20031_v13  ;;  %v2462_v53 = vld [vmem:[#allocation2 + $0xc0] sm:$0xff]  ;;  %v1995_v38 = vld [vmem:[#allocation2 + $0x248] sm:$0xff] }
 0x337   : > { %2054 = vst.msk [vmem:[#allocation2 + $0x220] sm:$0xff] %vm364_vm3, %v2022_v50  ;;  %v2378_v63 = vmax.f32 %v2346_v26, %v18520_v45  ;;  %v2728_v26 = vsel %vm364_vm3, %v2492_v24, -inf  ;;  %v2347_v45 = vld [vmem:[#allocation2 + $0x340] sm:$0xff]  ;;  %v2495_v24 = vld [vmem:[#allocation2 + $0x1c8] sm:$0xff] }
 0x338   : > { %2723 = vmax.xlane.f32.xlu1 %v2722_v47  ;;  %v2210_v25 = vpop.f32.mrf.mxu1  ;;  %v2348_v47 = vld [vmem:[#allocation2 + $0x348] sm:$0xff]  ;;  %v20039_v29 = vpop.permute.xlu1 %3438 }
 0x339   : > { %2410 = vst.msk [vmem:[#allocation2 + $0x338] sm:$0xff] %vm364_vm3, %v2378_v63  ;;  %v2377_v34 = vmax.f32 %v2345_v21, %v2210_v25  ;;  %v2641_v63 = vsel %vm364_vm3, %v2463_v7, -inf  ;;  %v2350_v25 = vld [vmem:[#allocation2 + $0x358] sm:$0xff]  ;;  %24348 = vst [vmem:[#allocation105_spill] sm:$0xff] %v20039_v29 }
 0x33a   : > { %2636 = vmax.xlane.f32.xlu0 %v2635_v32  ;;  %v18440_v56 = vpop.f32.mrf.mxu0  ;;  %v1997_v29 = vld [vmem:[#allocation2 + $0x258] sm:$0xff] }
 0x33b   : > { %2409 = vst.msk [vmem:[#allocation2 + $0x330] sm:$0xff] %vm364_vm3, %v2377_v34  ;;  %v2025_v50 = vmax.f32 %v1993_v44, %v18440_v56  ;;  %v1994_v56 = vld [vmem:[#allocation2 + $0x240] sm:$0xff] }
 0x33c   : > { %2633 = vmax.xlane.f32.xlu1 %v2632_v20  ;;  %v18523_v32 = vpop.f32.mrf.mxu1  ;;  %v1857_v13 = vpop.f32.mrf.mxu0 }
 0x33d   : > { %v2380_v40 = vmax.f32 %v2348_v47, %v18523_v32  ;;  %2057 = vst.msk [vmem:[#allocation2 + $0x238] sm:$0xff] %vm364_vm3, %v2025_v50  ;;  %v2024_v20 = vmax.f32 %v1992_v48, %v1857_v13  ;;  %v2638_v47 = vsel %vm364_vm3, %v2462_v53, -inf  ;;  %v2349_v13 = vld [vmem:[#allocation2 + $0x350] sm:$0xff]  ;;  %v2494_v48 = vld [vmem:[#allocation2 + $0x1c0] sm:$0xff]  ;;  %v2465_v53 = vld [vmem:[#allocation2 + $0xd8] sm:$0xff] }
 0x33e   : > { %2732 = vmax.xlane.f32.xlu0 %v2731_v35  ;;  %v2220_v21 = vpop.f32.mrf.mxu1  ;;  %v18443_v34 = vpop.f32.mrf.mxu0 }
 0x33f   : > { %2412 = vst.msk [vmem:[#allocation2 + $0x348] sm:$0xff] %vm364_vm3, %v2380_v40  ;;  %v2379_v44 = vmax.f32 %v2347_v45, %v2220_v21  ;;  %v20042_v35 = vpop.permute.xlu0 %3434  ;;  %2056 = vst.msk [vmem:[#allocation2 + $0x230] sm:$0xff] %vm364_vm3, %v2024_v20  ;;  %v2027_v7 = vmax.f32 %v1995_v38, %v18443_v34  ;;  %v2737_v40 = vsel %vm364_vm3, %v2495_v24, -inf  ;;  %v1996_v34 = vld [vmem:[#allocation2 + $0x250] sm:$0xff]  ;;  %v20052_v24 = vpop.permute.xlu1 %3446 }
 0x340   : > { %2729 = vmax.xlane.f32.xlu1 %v2728_v26  ;;  %24349 = vst [vmem:[#allocation106_spill] sm:$0xff] %v20042_v35  ;;  %v18526_v50 = vpop.f32.mrf.mxu1  ;;  %v1867_v26 = vpop.f32.mrf.mxu0  ;;  %v2352_v35 = vld [vmem:[#allocation2 + $0x368] sm:$0xff]  ;;  %24350 = vst [vmem:[#allocation107_spill] sm:$0xff] %v20052_v24  ;;  %v1998_v24 = vld [vmem:[#allocation2 + $0x260] sm:$0xff] }
 0x341   : > { %2411 = vst.msk [vmem:[#allocation2 + $0x340] sm:$0xff] %vm364_vm3, %v2379_v44  ;;  %v2382_v32 = vmax.f32 %v2350_v25, %v18526_v50  ;;  %2059 = vst.msk [vmem:[#allocation2 + $0x248] sm:$0xff] %vm364_vm3, %v2027_v7  ;;  %v2026_v45 = vmax.f32 %v1994_v56, %v1867_v26  ;;  %v2351_v50 = vld [vmem:[#allocation2 + $0x360] sm:$0xff]  ;;  %v2464_v7 = vld [vmem:[#allocation2 + $0xd0] sm:$0xff] }
 0x342   : > { %2642 = vmax.xlane.f32.xlu0 %v2641_v63  ;;  %v2230_v21 = vpop.f32.mrf.mxu1  ;;  %v18446_v20 = vpop.f32.mrf.mxu0  ;;  %v2734_v63 = vsel %vm364_vm3, %v2494_v48, -inf  ;;  %v1999_v26 = vld [vmem:[#allocation2 + $0x268] sm:$0xff] }
 0x343   : > { %2414 = vst.msk [vmem:[#allocation2 + $0x358] sm:$0xff] %vm364_vm3, %v2382_v32  ;;  %v2381_v38 = vmax.f32 %v2349_v13, %v2230_v21  ;;  %2058 = vst.msk [vmem:[#allocation2 + $0x240] sm:$0xff] %vm364_vm3, %v2026_v45  ;;  %v2029_v25 = vmax.f32 %v1997_v29, %v18446_v20  ;;  %v20055_v32 = vpop.permute.xlu0 %3442  ;;  %v2647_v13 = vsel %vm364_vm3, %v2465_v53, -inf  ;;  %v2354_v29 = vld [vmem:[#allocation2 + $0x378] sm:$0xff]  ;;  %v2496_v53 = vld [vmem:[#allocation2 + $0x1d0] sm:$0xff] }
 0x344   : > { %2639 = vmax.xlane.f32.xlu1 %v2638_v47  ;;  %v18529_v44 = vpop.f32.mrf.mxu1  ;;  %v1877_v56 = vpop.f32.mrf.mxu0  ;;  %24351 = vst [vmem:[#allocation108_spill] sm:$0xff] %v20055_v32  ;;  %v2497_v21 = vld [vmem:[#allocation2 + $0x1d8] sm:$0xff]  ;;  %v2353_v32 = vld [vmem:[#allocation2 + $0x370] sm:$0xff] }
 0x345   : > { %2413 = vst.msk [vmem:[#allocation2 + $0x350] sm:$0xff] %vm364_vm3, %v2381_v38  ;;  %v2384_v47 = vmax.f32 %v2352_v35, %v18529_v44  ;;  %2061 = vst.msk [vmem:[#allocation2 + $0x258] sm:$0xff] %vm364_vm3, %v2029_v25  ;;  %v2028_v48 = vmax.f32 %v1996_v34, %v1877_v56  ;;  %v2644_v38 = vsel %vm364_vm3, %v2464_v7, -inf  ;;  %v2743_v56 = vsel %vm364_vm3, %v2497_v21, -inf  ;;  %v20065_v7 = vpop.permute.xlu1 %3454 }
 0x346   : > { %2738 = vmax.xlane.f32.xlu0 %v2737_v40  ;;  %v2240_v45 = vpop.f32.mrf.mxu1  ;;  %v18449_v40 = vpop.f32.mrf.mxu0  ;;  %24352 = vst [vmem:[#allocation109_spill] sm:$0xff] %v20065_v7  ;;  %v2003_v7 = vld [vmem:[#allocation2 + $0x288] sm:$0xff] }
 0x347   : > { %2416 = vst.msk [vmem:[#allocation2 + $0x368] sm:$0xff] %vm364_vm3, %v2384_v47  ;;  %v2383_v20 = vmax.f32 %v2351_v50, %v2240_v45  ;;  %2060 = vst.msk [vmem:[#allocation2 + $0x250] sm:$0xff] %vm364_vm3, %v2028_v48  ;;  %v2031_v35 = vmax.f32 %v1999_v26, %v18449_v40  ;;  %v2356_v45 = vld [vmem:[#allocation2 + $0x388] sm:$0xff]  ;;  %v2000_v40 = vld [vmem:[#allocation2 + $0x270] sm:$0xff] }
 0x348   : > { %2735 = vmax.xlane.f32.xlu1 %v2734_v63  ;;  %v18532_v44 = vpop.f32.mrf.mxu1  ;;  %v1887_v34 = vpop.f32.mrf.mxu0  ;;  %v2001_v63 = vld [vmem:[#allocation2 + $0x278] sm:$0xff]  ;;  %v2467_v26 = vld [vmem:[#allocation2 + $0xe8] sm:$0xff] }
 0x349   : > { %2415 = vst.msk [vmem:[#allocation2 + $0x360] sm:$0xff] %vm364_vm3, %v2383_v20  ;;  %v2386_v25 = vmax.f32 %v2354_v29, %v18532_v44  ;;  %2063 = vst.msk [vmem:[#allocation2 + $0x268] sm:$0xff] %vm364_vm3, %v2031_v35  ;;  %v2030_v50 = vmax.f32 %v1998_v24, %v1887_v34  ;;  %v20068_v20 = vpop.permute.xlu0 %3450  ;;  %v2740_v29 = vsel %vm364_vm3, %v2496_v53, -inf  ;;  %v2355_v24 = vld [vmem:[#allocation2 + $0x380] sm:$0xff]  ;;  %v2499_v53 = vld [vmem:[#allocation2 + $0x1e8] sm:$0xff] }
 0x34a   : > { %2648 = vmax.xlane.f32.xlu0 %v2647_v13  ;;  %v2250_v47 = vpop.f32.mrf.mxu1  ;;  %v18452_v13 = vpop.f32.mrf.mxu0  ;;  %24353 = vst [vmem:[#allocation110_spill] sm:$0xff] %v20068_v20  ;;  %v2466_v44 = vld [vmem:[#allocation2 + $0xe0] sm:$0xff]  ;;  %v2358_v20 = vld [vmem:[#allocation2 + $0x398] sm:$0xff] }
 0x34b   : > { %2418 = vst.msk [vmem:[#allocation2 + $0x378] sm:$0xff] %vm364_vm3, %v2386_v25  ;;  %v2385_v48 = vmax.f32 %v2353_v32, %v2250_v47  ;;  %2062 = vst.msk [vmem:[#allocation2 + $0x260] sm:$0xff] %vm364_vm3, %v2030_v50  ;;  %v2033_v21 = vmax.f32 %v2001_v63, %v18452_v13  ;;  %v2653_v32 = vsel %vm364_vm3, %v2467_v26, -inf  ;;  %v2002_v13 = vld [vmem:[#allocation2 + $0x280] sm:$0xff]  ;;  %v20078_v26 = vpop.permute.xlu1 %3462 }
 0x34c   : > { %2645 = vmax.xlane.f32.xlu1 %v2644_v38  ;;  %v18535_v35 = vpop.f32.mrf.mxu1  ;;  %v1897_v38 = vpop.f32.mrf.mxu0  ;;  %24354 = vst [vmem:[#allocation111_spill] sm:$0xff] %v20078_v26 }
 0x34d   : > { %2417 = vst.msk [vmem:[#allocation2 + $0x370] sm:$0xff] %vm364_vm3, %v2385_v48  ;;  %v2388_v34 = vmax.f32 %v2356_v45, %v18535_v35  ;;  %2065 = vst.msk [vmem:[#allocation2 + $0x278] sm:$0xff] %vm364_vm3, %v2033_v21  ;;  %v2032_v25 = vmax.f32 %v2000_v40, %v1897_v38  ;;  %v2357_v35 = vld [vmem:[#allocation2 + $0x390] sm:$0xff]  ;;  %v2498_v21 = vld [vmem:[#allocation2 + $0x1e0] sm:$0xff]  ;;  %v20081_v38 = vpop.permute.xlu0 %3458 }
 0x34e   : > { %2744 = vmax.xlane.f32.xlu0 %v2743_v56  ;;  %v2260_v47 = vpop.f32.mrf.mxu1  ;;  %v18455_v50 = vpop.f32.mrf.mxu0  ;;  %v2650_v56 = vsel %vm364_vm3, %v2466_v44, -inf  ;;  %24355 = vst [vmem:[#allocation112_spill] sm:$0xff] %v20081_v38  ;;  %v2545_v38 = vld [vmem:[#allocation2 + $0x358] sm:$0xff]  ;;  %v2547_v9 = vld [vmem:[#allocation2 + $0x368] sm:$0xff]  ;;  %v2512_v51 = vld [vmem:[#allocation2 + $0x250] sm:$0xff] }
 0x34f   : > { %2420 = vst.msk [vmem:[#allocation2 + $0x388] sm:$0xff] %vm364_vm3, %v2388_v34  ;;  %v2387_v63 = vmax.f32 %v2355_v24, %v2260_v47  ;;  %2064 = vst.msk [vmem:[#allocation2 + $0x270] sm:$0xff] %vm364_vm3, %v2032_v25  ;;  %v2035_v45 = vmax.f32 %v2003_v7, %v18455_v50  ;;  %v2749_v24 = vsel %vm364_vm3, %v2499_v53, -inf  ;;  %v2469_v7 = vld [vmem:[#allocation2 + $0xf8] sm:$0xff]  ;;  %v2004_v50 = vld [vmem:[#allocation2 + $0x290] sm:$0xff] }
 0x350   : > { %2741 = vmax.xlane.f32.xlu1 %v2740_v29  ;;  %v18538_v48 = vpop.f32.mrf.mxu1  ;;  %v1907_v40 = vpop.f32.mrf.mxu0  ;;  %v2005_v53 = vld [vmem:[#allocation2 + $0x298] sm:$0xff] }
 0x351   : > { %2419 = vst.msk [vmem:[#allocation2 + $0x380] sm:$0xff] %vm364_vm3, %v2387_v63  ;;  %v2390_v29 = vmax.f32 %v2358_v20, %v18538_v48  ;;  %2067 = vst.msk [vmem:[#allocation2 + $0x288] sm:$0xff] %vm364_vm3, %v2035_v45  ;;  %v2034_v44 = vmax.f32 %v2002_v13, %v1907_v40  ;;  %v2468_v63 = vld [vmem:[#allocation2 + $0xf0] sm:$0xff]  ;;  %v2359_v13 = vld [vmem:[#allocation2 + $0x3a0] sm:$0xff]  ;;  %v20090_v26 = vpop.permute.xlu0 %3466 }
 0x352   : > { %2654 = vmax.xlane.f32.xlu0 %v2653_v32  ;;  %v2270_v34 = vpop.f32.mrf.mxu1  ;;  %v18458_v47 = vpop.f32.mrf.mxu0  ;;  %v2746_v32 = vsel %vm364_vm3, %v2498_v21, -inf  ;;  %24356 = vst [vmem:[#allocation113_spill] sm:$0xff] %v20090_v26  ;;  %v2538_v26 = vld [vmem:[#allocation2 + $0x320] sm:$0xff]  ;;  %v2549_v39 = vld [vmem:[#allocation2 + $0x378] sm:$0xff] }
 0x353   : > { %2422 = vst.msk [vmem:[#allocation2 + $0x398] sm:$0xff] %vm364_vm3, %v2390_v29  ;;  %v2389_v25 = vmax.f32 %v2357_v35, %v2270_v34  ;;  %2066 = vst.msk [vmem:[#allocation2 + $0x280] sm:$0xff] %vm364_vm3, %v2034_v44  ;;  %v2037_v48 = vmax.f32 %v2005_v53, %v18458_v47  ;;  %v2501_v35 = vld [vmem:[#allocation2 + $0x1f8] sm:$0xff]  ;;  %v20092_v21 = vpop.permute.xlu1 %3470  ;;  %v2656_v44 = vsel %vm364_vm3, %v2468_v63, -inf  ;;  %v20180_v12 = vsel %vm364_vm3, %v2549_v39, -inf }
 0x354   : > { %2651 = vmax.xlane.f32.xlu1 %v2650_v56  ;;  %v18541_v20 = vpop.f32.mrf.mxu1  ;;  %v1917_v45 = vpop.f32.mrf.mxu0  ;;  %v2659_v56 = vsel %vm364_vm3, %v2469_v7, -inf  ;;  %24357 = vst [vmem:[#allocation114_spill] sm:$0xff] %v20092_v21  ;;  %v2755_v7 = vsel %vm364_vm3, %v2501_v35, -inf  ;;  %v2517_v37 = vld [vmem:[#allocation2 + $0x278] sm:$0xff] }
 0x355   : > { %2421 = vst.msk [vmem:[#allocation2 + $0x390] sm:$0xff] %vm364_vm3, %v2389_v25  ;;  %v2036_v40 = vmax.f32 %v2004_v50, %v1917_v45  ;;  %2069 = vst.msk [vmem:[#allocation2 + $0x298] sm:$0xff] %vm364_vm3, %v2037_v48  ;;  %v2503_v25 = vld [vmem:[#allocation2 + $0x208] sm:$0xff]  ;;  %v2502_v50 = vld [vmem:[#allocation2 + $0x200] sm:$0xff]  ;;  %v20100_v45 = vpop.permute.xlu0 %3474  ;;  %v20187_v60 = vsel %vm364_vm3, %v2517_v37, -inf }
 0x356   : > { %2750 = vmax.xlane.f32.xlu0 %v2749_v24  ;;  %v2280_v29 = vpop.f32.mrf.mxu1  ;;  %v2500_v24 = vld [vmem:[#allocation2 + $0x1f0] sm:$0xff]  ;;  %v18461_v53 = vpop.f32.mrf.mxu0  ;;  %24358 = vst [vmem:[#allocation115_spill] sm:$0xff] %v20100_v45  ;;  %v2758_v35 = vsel %vm364_vm3, %v2502_v50, -inf  ;;  %v2551_v59 = vld [vmem:[#allocation2 + $0x388] sm:$0xff] }
 0x357   : > { %v2391_v34 = vmax.f32 %v2359_v13, %v2280_v29  ;;  %2068 = vst.msk [vmem:[#allocation2 + $0x290] sm:$0xff] %vm364_vm3, %v2036_v40  ;;  %v2752_v47 = vsel %vm364_vm3, %v2500_v24, -inf  ;;  %v20102_v63 = vpop.permute.xlu1 %3478  ;;  %v2761_v13 = vsel %vm364_vm3, %v2503_v25, -inf  ;;  %v2006_v29 = vld [vmem:[#allocation2 + $0x2a0] sm:$0xff]  ;;  %v2504_v50 = vld [vmem:[#allocation2 + $0x210] sm:$0xff]  ;;  %v20204_v37 = vsel %vm364_vm3, %v2551_v59, -inf }
 0x358   : > { %2747 = vmax.xlane.f32.xlu1 %v2746_v32  ;;  %v2360_v32 = vld [vmem:[#allocation2 + $0x3a8] sm:$0xff]  ;;  %24359 = vst [vmem:[#allocation116_spill] sm:$0xff] %v20102_v63  ;;  %v1927_v40 = vpop.f32.mrf.mxu0  ;;  %v2516_v16 = vld [vmem:[#allocation2 + $0x270] sm:$0xff] }
 0x359   : > { %2423 = vst.msk [vmem:[#allocation2 + $0x3a0] sm:$0xff] %vm364_vm3, %v2391_v34  ;;  %v2392_v48 = vmax.f32 %v2360_v32, %v18541_v20  ;;  %v2038_v34 = vmax.f32 %v2006_v29, %v1927_v40  ;;  %v20109_v63 = vpop.permute.xlu0 %3482  ;;  %v2007_v40 = vld [vmem:[#allocation2 + $0x2a8] sm:$0xff]  ;;  %v20191_v39 = vsel %vm364_vm3, %v2516_v16, -inf }
 0x35a   : > { %2660 = vmax.xlane.f32.xlu0 %v2659_v56  ;;  %v2537_v56 = vld [vmem:[#allocation2 + $0x318] sm:$0xff]  ;;  %24360 = vst [vmem:[#allocation117_spill] sm:$0xff] %v20109_v63  ;;  %v2039_v45 = vmax.f32 %v2007_v40, %v18461_v53  ;;  %v2519_v41 = vld [vmem:[#allocation2 + $0x288] sm:$0xff] }
 0x35b   : > { %2424 = vst.msk [vmem:[#allocation2 + $0x3a8] sm:$0xff] %vm364_vm3, %v2392_v48  ;;  %v2863_v24 = vsel %vm364_vm3, %v2537_v56, -inf  ;;  %2070 = vst.msk [vmem:[#allocation2 + $0x2a0] sm:$0xff] %vm364_vm3, %v2038_v34  ;;  %v20111_v20 = vpop.permute.xlu1 %3486  ;;  %v20114_v48 = vpop.f32.mrf.mxu1  ;;  %v2539_v56 = vld [vmem:[#allocation2 + $0x328] sm:$0xff]  ;;  %v2764_v34 = vsel %vm364_vm3, %v2504_v50, -inf  ;;  %v2506_v50 = vld [vmem:[#allocation2 + $0x220] sm:$0xff] }
 0x35c   : > { %2657 = vmax.xlane.f32.xlu1 %v2656_v44  ;;  %v2536_v44 = vld [vmem:[#allocation2 + $0x310] sm:$0xff]  ;;  %24361 = vst [vmem:[#allocation118_spill] sm:$0xff] %v20111_v20  ;;  %24362 = vst [vmem:[#allocation119_spill] sm:$0xff] %v20114_v48 }
 0x35d   : > { %v2860_v25 = vsel %vm364_vm3, %v2536_v44, -inf  ;;  %v2290_v29 = vpop.f32.mrf.mxu1  ;;  %2071 = vst.msk [vmem:[#allocation2 + $0x2a8] sm:$0xff] %vm364_vm3, %v2039_v45 }
 0x35e   : > { %2756 = vmax.xlane.f32.xlu0 %v2755_v7  ;;  %v2505_v7 = vld [vmem:[#allocation2 + $0x218] sm:$0xff]  ;;  %v2520_v2 = vld [vmem:[#allocation2 + $0x290] sm:$0xff] }
 0x360   : > { %2753 = vmax.xlane.f32.xlu1 %v2752_v47  ;;  %v18776_v47 = vmov 1966171168  }
 0x361   : > { %v3874_v32 = vunpack.c.l.s4 %v18776_v47  ;;  %v2866_v47 = vsel %vm364_vm3, %v2538_v26, -inf }
 0x362   : > { %2762 = vmax.xlane.f32.xlu0 %v2761_v13  ;;  %v2767_v13 = vsel %vm364_vm3, %v2505_v7, -inf }
 0x363   : > { %v3875_v63 = vunpack.c.0.s8 %v3874_v32 }
 0x364   : > { %2759 = vmax.xlane.f32.xlu1 %v2758_v35  ;;  %v2361_v35 = vld [vmem:[#allocation2 + $0x3b0] sm:$0xff] }
 0x365   : > { %v2667_v21 = vpop.xlane.xlu0 %2666  ;;  %v2393_v44 = vmax.f32 %v2361_v35, %v2290_v29  ;;  %v20124_v32 = vsub.s32 %v3875_v63, %v19016_v36  ;;  %v2509_v29 = vld [vmem:[#allocation2 + $0x238] sm:$0xff]  ;;  %v2543_v35 = vld [vmem:[#allocation2 + $0x348] sm:$0xff]  ;;  %v2544_v36 = vld [vmem:[#allocation2 + $0x350] sm:$0xff] }
 0x366   : > { %2864 = vmax.xlane.f32.xlu0 %v2863_v24  ;;  %v2571_v20 = vpop.xlane.xlu1 %2570  ;;  %v2869_v24 = vsel %vm364_vm3, %v2539_v56, -inf  ;;  %v3649_v7 = vadd.f32 %v19667_v17, %v2667_v21  ;;  %v2540_v56 = vld [vmem:[#allocation2 + $0x330] sm:$0xff]  ;;  %v2542_v21 = vld [vmem:[#allocation2 + $0x340] sm:$0xff]  ;;  %v20137_v52 = vsel %vm364_vm3, %v2543_v35, -inf }
 0x367   : > { %2425 = vst.msk [vmem:[#allocation2 + $0x3b0] sm:$0xff] %vm364_vm3, %v2393_v44  ;;  %v3617_v53 = vadd.f32 %v19169_v14, %v2571_v20  ;;  %v2508_v17 = vld [vmem:[#allocation2 + $0x230] sm:$0xff]  ;;  %v2511_v44 = vld [vmem:[#allocation2 + $0x248] sm:$0xff]  ;;  %v2770_v14 = vsel %vm364_vm3, %v2506_v50, -inf  ;;  %v2872_v1 = vsel %vm364_vm3, %v2540_v56, -inf }
 0x368   : > { %2861 = vmax.xlane.f32.xlu1 %v2860_v25  ;;  %v2507_v25 = vld [vmem:[#allocation2 + $0x228] sm:$0xff]  ;;  %v20129_v26 = vrot.slane %v3649_v7, %v20124_v32  ;;  %v2776_v50 = vsel %vm364_vm3, %v2508_v17, -inf  ;;  %v20155_v17 = vsel %vm364_vm3, %v2545_v38, -inf  ;;  %v20167_v38 = vsel %vm364_vm3, %v2512_v51, -inf  ;;  %v2552_v51 = vld [vmem:[#allocation2 + $0x390] sm:$0xff] }
 0x369   : > { %v2773_v45 = vsel %vm364_vm3, %v2507_v25, -inf  ;;  %v3921_v63 = vcombine.high %v3617_v53, %v3617_v53  ;;  %v3928_v23 = vrot.slane %v3617_v53, %v20124_v32  ;;  %v2515_v56 = vld [vmem:[#allocation2 + $0x268] sm:$0xff]  ;;  %v20152_v53 = vsel %vm364_vm3, %v2544_v36, -inf }
 0x36a   : > { %2768 = vmax.xlane.f32.xlu0 %v2767_v13  ;;  %v2541_v13 = vld [vmem:[#allocation2 + $0x338] sm:$0xff]  ;;  %v2664_v40 = vpop.xlane.xlu1 %2663  ;;  %v20173_v58 = vsel %vm364_vm3, %v2515_v56, -inf  ;;  %v5512_v16 = vrot.slane %v20129_v26, %v20124_v32 }
 0x36b   : > { %v2875_v20 = vsel %vm364_vm3, %v2541_v13, -inf  ;;  %v3648_v25 = vadd.f32 %v19670_v46, %v2664_v40  ;;  %v20142_v13 = vsel %vm364_vm3, %v2542_v21, -inf  ;;  %v20145_v46 = vsel %vm364_vm3, %v2511_v44, -inf  ;;  %v2546_v40 = vld [vmem:[#allocation2 + $0x360] sm:$0xff] }
 0x36c   : > { %2765 = vmax.xlane.f32.xlu1 %v2764_v34  ;;  %v5489_v34 = vcombine.high %v3649_v7, %v3649_v7  ;;  %v2513_v7 = vld [vmem:[#allocation2 + $0x258] sm:$0xff]  ;;  %v2514_v21 = vld [vmem:[#allocation2 + $0x260] sm:$0xff]  ;;  %v5504_v44 = vcombine.high %v20129_v26, %v20129_v26  ;;  %v3935_v3 = vrot.slane %v3921_v63, %v20124_v32  ;;  %v20170_v42 = vsel %vm364_vm3, %v2546_v40, -inf }
 0x36d   : > { %v5440_v36 = vcombine.high %v3648_v25, %v3648_v25  ;;  %v2550_v63 = vld [vmem:[#allocation2 + $0x380] sm:$0xff]  ;;  %v5447_v40 = vrot.slane %v3648_v25, %v20124_v32 }
 0x36e   : > { %2870 = vmax.xlane.f32.xlu0 %v2869_v24  ;;  %v2510_v24 = vld [vmem:[#allocation2 + $0x240] sm:$0xff] }
 0x36f   : > { %v20149_v35 = vsel %vm364_vm3, %v2510_v24, -inf  ;;  %v20164_v24 = vsel %vm364_vm3, %v2547_v9, -inf  ;;  %v20177_v9 = vsel %vm364_vm3, %v2514_v21, -inf  ;;  %v20194_v21 = vsel %vm364_vm3, %v2550_v63, -inf }
 0x370   : > { %2867 = vmax.xlane.f32.xlu1 %v2866_v47  ;;  %v2779_v47 = vsel %vm364_vm3, %v2509_v29, -inf  ;;  %v2568_v29 = vpop.xlane.xlu0 %2567  ;;  %v2670_v48 = vpop.xlane.xlu1 %2669  ;;  %v5454_v25 = vrot.slane %v5440_v36, %v20124_v32  ;;  %v3944_v36 = vrot.slane %v3928_v23, %v20124_v32 }
 0x371   : > { %v3616_v5 = vadd.f32 %v19149_v61, %v2568_v29  ;;  %v5526_v61 = vrot.slane %v5504_v44, %v20124_v32  ;;  %v3937_v29 = vcombine.high %v3935_v3, %v3935_v3  ;;  %v3650_v28 = vadd.f32 %v19678_v8, %v2670_v48 }
 0x372   : > { %2774 = vmax.xlane.f32.xlu0 %v2773_v45  ;;  %v5503_v45 = vrot.slane %v5489_v34, %v20124_v32  ;;  %v20161_v34 = vsel %vm364_vm3, %v2513_v7, -inf  ;;  %v3936_v7 = vcombine.high %v3928_v23, %v3928_v23  ;;  %v3951_v8 = vrot.slane %v3935_v3, %v20124_v32 }
 0x373   : > { %v3872_v63 = vcombine.high %v3616_v5, %v3616_v5  ;;  %v11761_v59 = vcombine.low %v5512_v16, %v5526_v61  ;;  %v17761_v55 = vcombine.high %v5512_v16, %v5526_v61  ;;  %v3965_v0 = vrot.slane %v3937_v29, %v20124_v32 }
 0x374   : > { %2771 = vmax.xlane.f32.xlu1 %v2770_v14  ;;  %v2548_v14 = vld [vmem:[#allocation2 + $0x370] sm:$0xff]  ;;  %v5505_v54 = vcombine.high %v5503_v45, %v5503_v45  ;;  %v3958_v44 = vrot.slane %v3936_v7, %v20124_v32  ;;  %v3879_v26 = vrot.slane %v3616_v5, %v20124_v32  ;;  %v2577_v7 = vpop.xlane.xlu0 %2576  ;;  %v5519_v18 = vrot.slane %v5503_v45, %v20124_v32 }
 0x375   : > { %v20184_v56 = vsel %vm364_vm3, %v2548_v14, -inf  ;;  %v20201_v14 = vsel %vm364_vm3, %v2552_v51, -inf  ;;  %v20213_v51 = vsel %vm364_vm3, %v2520_v2, -inf  ;;  %v5456_v48 = vcombine.high %v5454_v25, %v5454_v25 }
 0x376   : > { %2876 = vmax.xlane.f32.xlu0 %v2875_v20  ;;  %v2518_v20 = vld [vmem:[#allocation2 + $0x280] sm:$0xff]  ;;  %v10193_v23 = vcombine.low %v3944_v36, %v3958_v44  ;;  %v17697_v2 = vcombine.high %v3944_v36, %v3958_v44  ;;  %v5538_v61 = vcombine.high %v3650_v28, %v3650_v28  ;;  %v3619_v33 = vadd.f32 %v19163_v11, %v2577_v7 }
 0x377   : > { %v20228_v3 = vrot.slane %v11761_v59, %v20124_v32  ;;  %v3887_v45 = vcombine.high %v3879_v26, %v3879_v26  ;;  %v17698_v44 = vcombine.high %v3951_v8, %v3965_v0  ;;  %v5484_v36 = vrot.slane %v5456_v48, %v20124_v32 }
 0x378   : > { %2873 = vmax.xlane.f32.xlu1 %v2872_v1  ;;  %v20198_v1 = vsel %vm364_vm3, %v2518_v20, -inf  ;;  %v5455_v20 = vcombine.high %v5447_v40, %v5447_v40  ;;  %v20238_v11 = vrot.slane %v10193_v23, %v20124_v32  ;;  %v4019_v7 = vcombine.high %v3619_v33, %v3619_v33 }
 0x37a   : > { %2780 = vmax.xlane.f32.xlu0 %v2779_v47  ;;  %v5533_v47 = vrot.slane %v5505_v54, %v20124_v32  ;;  %v20221_v54 = vsel %vm364_vm3, %v2519_v41, -inf  ;;  %v5477_v5 = vrot.slane %v5455_v20, %v20124_v32  ;;  %v10195_v41 = vcombine.low %v3951_v8, %v3965_v0 }
 0x37b   : > { %v5552_v20 = vrot.slane %v5538_v61, %v20124_v32  ;;  %v5470_v0 = vrot.slane %v5454_v25, %v20124_v32  ;;  %v4026_v8 = vrot.slane %v3619_v33, %v20124_v32  ;;  %v20262_v33 = vrot.slane %v17698_v44, %v20124_v32 }
 0x37c   : > { %2777 = vmax.xlane.f32.xlu1 %v2776_v50  ;;  %v3886_v50 = vrot.slane %v3872_v63, %v20124_v32  ;;  %v11763_v16 = vcombine.low %v5519_v18, %v5533_v47  ;;  %v17762_v29 = vcombine.high %v5519_v18, %v5533_v47  ;;  %v5463_v63 = vrot.slane %v5447_v40, %v20124_v32  ;;  %v2580_v47 = vpop.xlane.xlu1 %2579 }
 0x37d   : > { %v5545_v18 = vrot.slane %v3650_v28, %v20124_v32  ;;  %v3620_v48 = vadd.f32 %v19192_v22, %v2580_v47  ;;  %v11714_v25 = vcombine.low %v5470_v0, %v5484_v36 }
 0x37e   : > { %2882 = vmax.xlane.f32.xlu0 %v20137_v52  ;;  %v20231_v52 = vrot.slane %v17761_v55, %v20124_v32  ;;  %v3888_v55 = vcombine.high %v3886_v50, %v3886_v50  ;;  %v11712_v59 = vcombine.low %v5463_v63, %v5477_v5  ;;  %v17759_v40 = vcombine.high %v5463_v63, %v5477_v5  ;;  %v2673_v63 = vpop.xlane.xlu0 %2672 }
 0x37f   : > { %v20247_v28 = vrot.slane %v11763_v16, %v20124_v32  ;;  %v20253_v23 = vrot.slane %v17762_v29, %v20124_v32  ;;  %v5553_v61 = vcombine.high %v5545_v18, %v5545_v18  ;;  %v3895_v16 = vrot.slane %v3879_v26, %v20124_v32 }
 0x380   : > { %2879 = vmax.xlane.f32.xlu1 %v20142_v13  ;;  %v20241_v13 = vrot.slane %v17697_v2, %v20124_v32  ;;  %v20256_v2 = vrot.slane %v10195_v41, %v20124_v32  ;;  %v3916_v5 = vrot.slane %v3888_v55, %v20124_v32  ;;  %v20265_v22 = vrot.slane %v11712_v59, %v20124_v32 }
 0x381   : > { %v20268_v29 = vrot.slane %v17759_v40, %v20124_v32  ;;  %v4033_v41 = vrot.slane %v4019_v7, %v20124_v32  ;;  %v4068_v47 = vcombine.high %v3620_v48, %v3620_v48  ;;  %v4075_v44 = vrot.slane %v3620_v48, %v20124_v32 }
 0x382   : > { %2786 = vmax.xlane.f32.xlu0 %v20145_v46  ;;  %v3909_v46 = vrot.slane %v3887_v45, %v20124_v32  ;;  %v5554_v45 = vcombine.high %v5552_v20, %v5552_v20  ;;  %24363 = vst [vmem:[#allocation120_spill] sm:$0xff] %v20265_v22  ;;  %v3651_v59 = vadd.f32 %v19676_v6, %v2673_v63  ;;  %v2676_v22 = vpop.xlane.xlu1 %2675 }
 0x383   : > { %24364 = vst [vmem:[#allocation121_spill] sm:$0xff] %v20268_v29  ;;  %v20278_v40 = vrot.slane %v11714_v25, %v20124_v32  ;;  %v4035_v48 = vcombine.high %v4033_v41, %v4033_v41  ;;  %v4082_v25 = vrot.slane %v4068_v47, %v20124_v32 }
 0x384   : > { %2783 = vmax.xlane.f32.xlu1 %v20149_v35  ;;  %v17760_v35 = vcombine.high %v5470_v0, %v5484_v36  ;;  %v10144_v26 = vcombine.low %v3895_v16, %v3909_v46  ;;  %v4034_v36 = vcombine.high %v4026_v8, %v4026_v8  ;;  %v17695_v55 = vcombine.high %v3895_v16, %v3909_v46 }
 0x385   : > { %v5575_v0 = vrot.slane %v5553_v61, %v20124_v32  ;;  %24365 = vst [vmem:[#allocation122_spill] sm:$0xff] %v20278_v40  ;;  %v5582_v7 = vrot.slane %v5554_v45, %v20124_v32  ;;  %v5561_v46 = vrot.slane %v5545_v18, %v20124_v32  ;;  %v5568_v61 = vrot.slane %v5552_v20, %v20124_v32 }
 0x386   : > { %2888 = vmax.xlane.f32.xlu0 %v20155_v17  ;;  %v3902_v17 = vrot.slane %v3886_v50, %v20124_v32  ;;  %v20288_v6 = vrot.slane %v10144_v26, %v20124_v32  ;;  %v20294_v16 = vrot.slane %v17695_v55, %v20124_v32  ;;  %v4083_v45 = vcombine.high %v4075_v44, %v4075_v44  ;;  %v2574_v26 = vpop.xlane.xlu0 %2573 }
 0x387   : > { %v5587_v18 = vcombine.high %v3651_v59, %v3651_v59  ;;  %v11812_v63 = vcombine.low %v5568_v61, %v5582_v7  ;;  %v5594_v47 = vrot.slane %v3651_v59, %v20124_v32 }
 0x388   : > { %2885 = vmax.xlane.f32.xlu1 %v20152_v53  ;;  %v20281_v53 = vrot.slane %v17760_v35, %v20124_v32  ;;  %v10146_v50 = vcombine.low %v3902_v17, %v3916_v5  ;;  %v17696_v29 = vcombine.high %v3902_v17, %v3916_v5  ;;  %v3652_v35 = vadd.f32 %v19693_v62, %v2676_v22 }
 0x389   : > { %v11810_v5 = vcombine.low %v5561_v46, %v5575_v0  ;;  %v4042_v17 = vrot.slane %v4026_v8, %v20124_v32  ;;  %v17764_v62 = vcombine.high %v5568_v61, %v5582_v7  ;;  %v4063_v22 = vrot.slane %v4035_v48, %v20124_v32 }
 0x38a   : > { %2792 = vmax.xlane.f32.xlu0 %v20161_v34  ;;  %v4056_v34 = vrot.slane %v4034_v36, %v20124_v32  ;;  %v20298_v20 = vrot.slane %v10146_v50, %v20124_v32  ;;  %v20302_v36 = vrot.slane %v17696_v29, %v20124_v32  ;;  %v4084_v50 = vcombine.high %v4082_v25, %v4082_v25 }
 0x38b   : > { %v5636_v40 = vcombine.high %v3652_v35, %v3652_v35  ;;  %v4105_v8 = vrot.slane %v4083_v45, %v20124_v32  ;;  %v5601_v29 = vrot.slane %v5587_v18, %v20124_v32  ;;  %v3618_v7 = vadd.f32 %v19155_v4, %v2574_v26 }
 0x38c   : > { %2789 = vmax.xlane.f32.xlu1 %v20167_v38  ;;  %v17763_v38 = vcombine.high %v5561_v46, %v5575_v0  ;;  %v10291_v55 = vcombine.low %v4042_v17, %v4056_v34  ;;  %v20309_v0 = vrot.slane %v11810_v5, %v20124_v32  ;;  %v5643_v46 = vrot.slane %v3652_v35, %v20124_v32 }
 0x38d   : > { %v4091_v5 = vrot.slane %v4075_v44, %v20124_v32  ;;  %v5602_v45 = vcombine.high %v5594_v47, %v5594_v47  ;;  %v20325_v4 = vrot.slane %v17764_v62, %v20124_v32  ;;  %v4112_v18 = vrot.slane %v4084_v50, %v20124_v32  ;;  %v2583_v50 = vpop.xlane.xlu0 %2582 }
 0x38e   : > { %2894 = vmax.xlane.f32.xlu0 %v20164_v24  ;;  %v4049_v24 = vrot.slane %v4033_v41, %v20124_v32  ;;  %24366 = vst [vmem:[#allocation123_spill] sm:$0xff] %v20309_v0  ;;  %v20316_v59 = vrot.slane %v17763_v38, %v20124_v32  ;;  %v17701_v41 = vcombine.high %v4042_v17, %v4056_v34  ;;  %v2586_v0 = vpop.xlane.xlu1 %2585 }
 0x38f   : > { %24369 = vst [vmem:[#allocation126_spill] sm:$0xff] %v20325_v4  ;;  %v5650_v34 = vrot.slane %v5636_v40, %v20124_v32  ;;  %v10340_v38 = vcombine.low %v4091_v5, %v4105_v8  ;;  %v17703_v35 = vcombine.high %v4091_v5, %v4105_v8  ;;  %v3970_v17 = vcombine.high %v3618_v7, %v3618_v7 }
 0x390   : > { %2891 = vmax.xlane.f32.xlu1 %v20170_v42  ;;  %24367 = vst [vmem:[#allocation124_spill] sm:$0xff] %v20316_v59  ;;  %v20319_v42 = vrot.slane %v11812_v63, %v20124_v32  ;;  %v10293_v61 = vcombine.low %v4049_v24, %v4063_v22  ;;  %v17702_v48 = vcombine.high %v4049_v24, %v4063_v22  ;;  %v24394_v59 = vld [vmem:[#allocation34_spill] sm:$0xff] }
 0x391   : > { %v5603_v63 = vcombine.high %v5601_v29, %v5601_v29  ;;  %v20334_v44 = vrot.slane %v17701_v41, %v20124_v32  ;;  %v5651_v26 = vcombine.high %v5643_v46, %v5643_v46  ;;  %v3622_v62 = vadd.f32 %v19218_v30, %v2586_v0 }
 0x392   : > { %2798 = vmax.xlane.f32.xlu0 %v20173_v58  ;;  %24368 = vst [vmem:[#allocation125_spill] sm:$0xff] %v20319_v42  ;;  %v20328_v58 = vrot.slane %v10291_v55, %v20124_v32  ;;  %v20339_v22 = vrot.slane %v10293_v61, %v20124_v32  ;;  %v20342_v24 = vrot.slane %v17702_v48, %v20124_v32 }
 0x393   : > { %v5624_v40 = vrot.slane %v5602_v45, %v20124_v32  ;;  %v3977_v55 = vrot.slane %v3618_v7, %v20124_v32  ;;  %v5652_v41 = vcombine.high %v5650_v34, %v5650_v34  ;;  %v20349_v30 = vrot.slane %v10340_v38, %v20124_v32 }
 0x394   : > { %2795 = vmax.xlane.f32.xlu1 %v20177_v9  ;;  %v4098_v9 = vrot.slane %v4082_v25, %v20124_v32  ;;  %v5610_v25 = vrot.slane %v5594_v47, %v20124_v32  ;;  %v20352_v0 = vrot.slane %v17703_v35, %v20124_v32  ;;  %v5631_v61 = vrot.slane %v5603_v63, %v20124_v32 }
 0x395   : > { %24370 = vst [vmem:[#allocation127_spill] sm:$0xff] %v20349_v30  ;;  %v3984_v48 = vrot.slane %v3970_v17, %v20124_v32  ;;  %v5617_v7 = vrot.slane %v5601_v29, %v20124_v32  ;;  %v4166_v5 = vcombine.high %v3622_v62, %v3622_v62  ;;  %v3621_v47 = vadd.f32 %v19185_v19, %v2583_v50  ;;  %v2682_v50 = vpop.xlane.xlu1 %2681 }
 0x396   : > { %2900 = vmax.xlane.f32.xlu0 %v20180_v12  ;;  %v10342_v12 = vcombine.low %v4098_v9, %v4112_v18  ;;  %v17704_v8 = vcombine.high %v4098_v9, %v4112_v18  ;;  %24371 = vst [vmem:[#allocation128_spill] sm:$0xff] %v20352_v0  ;;  %v11859_v45 = vcombine.low %v5610_v25, %v5624_v40 }
 0x397   : > { %v17765_v18 = vcombine.high %v5610_v25, %v5624_v40  ;;  %v3985_v38 = vcombine.high %v3977_v55, %v3977_v55  ;;  %v4173_v9 = vrot.slane %v3622_v62, %v20124_v32  ;;  %v5680_v29 = vrot.slane %v5652_v41, %v20124_v32 }
 0x398   : > { %2897 = vmax.xlane.f32.xlu1 %v20184_v56  ;;  %v5673_v56 = vrot.slane %v5651_v26, %v20124_v32  ;;  %v20363_v35 = vrot.slane %v10342_v12, %v20124_v32  ;;  %v20366_v63 = vrot.slane %v17704_v8, %v20124_v32  ;;  %v11861_v17 = vcombine.low %v5617_v7, %v5631_v61 }
 0x399   : > { %v17766_v26 = vcombine.high %v5617_v7, %v5631_v61  ;;  %v5666_v19 = vrot.slane %v5650_v34, %v20124_v32  ;;  %v3986_v40 = vcombine.high %v3984_v48, %v3984_v48  ;;  %v4180_v12 = vrot.slane %v4166_v5, %v20124_v32 }
 0x39a   : > { %2804 = vmax.xlane.f32.xlu0 %v20187_v60  ;;  %24372 = vst [vmem:[#allocation129_spill] sm:$0xff] %v20363_v35  ;;  %24373 = vst [vmem:[#allocation130_spill] sm:$0xff] %v20366_v63  ;;  %v5659_v60 = vrot.slane %v5643_v46, %v20124_v32  ;;  %v4117_v25 = vcombine.high %v3621_v47, %v3621_v47  ;;  %v20374_v8 = vrot.slane %v11859_v45, %v20124_v32 }
 0x39b   : > { %v20377_v46 = vrot.slane %v17765_v18, %v20124_v32  ;;  %v4007_v41 = vrot.slane %v3985_v38, %v20124_v32  ;;  %v4181_v61 = vcombine.high %v4173_v9, %v4173_v9  ;;  %v11910_v34 = vcombine.low %v5666_v19, %v5680_v29 }
 0x39c   : > { %2801 = vmax.xlane.f32.xlu1 %v20191_v39  ;;  %v11908_v62 = vcombine.low %v5659_v60, %v5673_v56  ;;  %v17767_v39 = vcombine.high %v5659_v60, %v5673_v56  ;;  %v17768_v7 = vcombine.high %v5666_v19, %v5680_v29  ;;  %v3654_v56 = vadd.f32 %v19700_v49, %v2682_v50  ;;  %v2679_v60 = vpop.xlane.xlu0 %2678 }
 0x39d   : > { %v20384_v5 = vrot.slane %v11861_v17, %v20124_v32  ;;  %v20387_v45 = vrot.slane %v17766_v26, %v20124_v32  ;;  %v3993_v18 = vrot.slane %v3977_v55, %v20124_v32  ;;  %v4014_v38 = vrot.slane %v3986_v40, %v20124_v32 }
 0x39e   : > { %2906 = vmax.xlane.f32.xlu0 %v20204_v37  ;;  %v4124_v37 = vrot.slane %v3621_v47, %v20124_v32  ;;  %v20396_v47 = vrot.slane %v17767_v39, %v20124_v32  ;;  %v4182_v49 = vcombine.high %v4180_v12, %v4180_v12  ;;  %v4131_v29 = vrot.slane %v4117_v25, %v20124_v32  ;;  %v2592_v39 = vpop.xlane.xlu1 %2591 }
 0x39f   : > { %v4000_v17 = vrot.slane %v3984_v48, %v20124_v32  ;;  %v10242_v19 = vcombine.low %v3993_v18, %v4007_v41  ;;  %v4203_v26 = vrot.slane %v4181_v61, %v20124_v32  ;;  %v3653_v55 = vadd.f32 %v19690_v57, %v2679_v60 }
 0x3a0   : > { %2903 = vmax.xlane.f32.xlu1 %v20194_v21  ;;  %v20393_v21 = vrot.slane %v11908_v62, %v20124_v32  ;;  %24375 = vst [vmem:[#allocation132_spill] sm:$0xff] %v20396_v47  ;;  %v17699_v40 = vcombine.high %v3993_v18, %v4007_v41  ;;  %v4132_v50 = vcombine.high %v4124_v37, %v4124_v37 }
 0x3a1   : > { %v5734_v62 = vcombine.high %v3654_v56, %v3654_v56  ;;  %v17700_v47 = vcombine.high %v4000_v17, %v4014_v38  ;;  %v4189_v25 = vrot.slane %v4173_v9, %v20124_v32  ;;  %v5741_v48 = vrot.slane %v3654_v56, %v20124_v32 }
 0x3a2   : > { %2810 = vmax.xlane.f32.xlu0 %v20221_v54  ;;  %24374 = vst [vmem:[#allocation131_spill] sm:$0xff] %v20393_v21  ;;  %v20404_v54 = vrot.slane %v11910_v34, %v20124_v32  ;;  %v10244_v21 = vcombine.low %v4000_v17, %v4014_v38  ;;  %v20409_v35 = vrot.slane %v17768_v7, %v20124_v32 }
 0x3a3   : > { %v4196_v57 = vrot.slane %v4180_v12, %v20124_v32  ;;  %v4133_v61 = vcombine.high %v4131_v29, %v4131_v29  ;;  %v20414_v34 = vrot.slane %v10242_v19, %v20124_v32  ;;  %v10438_v41 = vcombine.low %v4189_v25, %v4203_v26 }
 0x3a4   : > { %2807 = vmax.xlane.f32.xlu1 %v20198_v1  ;;  %24376 = vst [vmem:[#allocation133_spill] sm:$0xff] %v20404_v54  ;;  %24377 = vst [vmem:[#allocation134_spill] sm:$0xff] %v20409_v35  ;;  %v4210_v1 = vrot.slane %v4182_v49, %v20124_v32  ;;  %v5685_v60 = vcombine.high %v3653_v55, %v3653_v55  ;;  %v3624_v18 = vadd.f32 %v19246_v43, %v2592_v39  ;;  %v2589_v43 = vpop.xlane.xlu0 %2588 }
 0x3a5   : > { %24378 = vst [vmem:[#allocation135_spill] sm:$0xff] %v20414_v34  ;;  %v20419_v9 = vrot.slane %v17699_v40, %v20124_v32  ;;  %v17707_v56 = vcombine.high %v4189_v25, %v4203_v26  ;;  %v4154_v7 = vrot.slane %v4132_v50, %v20124_v32  ;;  %v5748_v12 = vrot.slane %v5734_v62, %v20124_v32  ;;  %v2521_v34 = vld [vmem:[#allocation2 + $0x298] sm:$0xff] }
 0x3a6   : > { %v20424_v38 = vrot.slane %v10244_v21, %v20124_v32  ;;  %v20427_v49 = vrot.slane %v17700_v47, %v20124_v32  ;;  %v5749_v17 = vcombine.high %v5741_v48, %v5741_v48  ;;  %v5692_v19 = vrot.slane %v3653_v55, %v20124_v32 }
 0x3a7   : > { %24379 = vst [vmem:[#allocation136_spill] sm:$0xff] %v20419_v9  ;;  %v10440_v39 = vcombine.low %v4196_v57, %v4210_v1  ;;  %v4140_v40 = vrot.slane %v4124_v37, %v20124_v32  ;;  %v4161_v26 = vrot.slane %v4133_v61, %v20124_v32  ;;  %v20433_v50 = vrot.slane %v10438_v41, %v20124_v32 }
 0x3a8   : > { %2909 = vmax.xlane.f32.xlu1 %v20201_v14  ;;  %24380 = vst [vmem:[#allocation137_spill] sm:$0xff] %v20424_v38  ;;  %24381 = vst [vmem:[#allocation138_spill] sm:$0xff] %v20427_v49  ;;  %v17708_v14 = vcombine.high %v4196_v57, %v4210_v1  ;;  %v4147_v62 = vrot.slane %v4131_v29, %v20124_v32  ;;  %v5699_v21 = vrot.slane %v5685_v60, %v20124_v32  ;;  %v2688_v57 = vpop.xlane.xlu1 %2687 }
 0x3a9   : > { %24382 = vst [vmem:[#allocation139_spill] sm:$0xff] %v20433_v50  ;;  %v4264_v25 = vcombine.high %v3624_v18, %v3624_v18  ;;  %v10389_v47 = vcombine.low %v4140_v40, %v4154_v7  ;;  %v17705_v54 = vcombine.high %v4140_v40, %v4154_v7  ;;  %v5750_v55 = vcombine.high %v5748_v12, %v5748_v12 }
 0x3aa   : > { %v3623_v35 = vadd.f32 %v19210_v27, %v2589_v43  ;;  %v20440_v37 = vrot.slane %v17707_v56, %v20124_v32  ;;  %v5771_v1 = vrot.slane %v5749_v17, %v20124_v32  ;;  %v5700_v61 = vcombine.high %v5692_v19, %v5692_v19 }
 0x3ab   : > { %v4271_v41 = vrot.slane %v3624_v18, %v20124_v32  ;;  %v20445_v29 = vrot.slane %v10440_v39, %v20124_v32  ;;  %v20448_v60 = vrot.slane %v17708_v14, %v20124_v32  ;;  %v17706_v7 = vcombine.high %v4147_v62, %v4161_v26 }
 0x3ac   : > { %2813 = vmax.xlane.f32.xlu1 %v20213_v51  ;;  %24383 = vst [vmem:[#allocation140_spill] sm:$0xff] %v20440_v37  ;;  %v10391_v51 = vcombine.low %v4147_v62, %v4161_v26  ;;  %v5757_v40 = vrot.slane %v5741_v48, %v20124_v32  ;;  %v5701_v27 = vcombine.high %v5699_v21, %v5699_v21 }
 0x3ad   : > { %24384 = vst [vmem:[#allocation141_spill] sm:$0xff] %v20445_v29  ;;  %24385 = vst [vmem:[#allocation142_spill] sm:$0xff] %v20448_v60  ;;  %v4278_v43 = vrot.slane %v4264_v25, %v20124_v32  ;;  %v3656_v56 = vadd.f32 %v19712_v10, %v2688_v57  ;;  %v20454_v17 = vrot.slane %v10389_v47, %v20124_v32 }
 0x3ae   : > { %v20457_v18 = vrot.slane %v17705_v54, %v20124_v32  ;;  %v5778_v39 = vrot.slane %v5750_v55, %v20124_v32  ;;  %v4215_v29 = vcombine.high %v3623_v35, %v3623_v35  ;;  %v12006_v14 = vcombine.low %v5757_v40, %v5771_v1 }
 0x3af   : > { %v17771_v60 = vcombine.high %v5757_v40, %v5771_v1  ;;  %v5722_v26 = vrot.slane %v5700_v61, %v20124_v32  ;;  %v4279_v62 = vcombine.high %v4271_v41, %v4271_v41  ;;  %v20462_v48 = vrot.slane %v10391_v51, %v20124_v32  ;;  %v2685_v1 = vpop.xlane.xlu0 %2684 }
 0x3b0   : > { %v20465_v25 = vrot.slane %v17706_v7, %v20124_v32  ;;  %v5764_v10 = vrot.slane %v5748_v12, %v20124_v32  ;;  %v4222_v47 = vrot.slane %v3623_v35, %v20124_v32  ;;  %v5708_v54 = vrot.slane %v5692_v19, %v20124_v32 }
 0x3b1   : > { %v5729_v55 = vrot.slane %v5701_v27, %v20124_v32  ;;  %v4280_v57 = vcombine.high %v4278_v43, %v4278_v43  ;;  %v5832_v50 = vcombine.high %v3656_v56, %v3656_v56  ;;  %v5715_v37 = vrot.slane %v5699_v21, %v20124_v32 }
 0x3b2   : > { %v12008_v40 = vcombine.low %v5764_v10, %v5778_v39  ;;  %v17772_v61 = vcombine.high %v5764_v10, %v5778_v39  ;;  %v4229_v51 = vrot.slane %v4215_v29, %v20124_v32  ;;  %v20474_v7 = vrot.slane %v12006_v14, %v20124_v32  ;;  %v2598_v39 = vpop.xlane.xlu1 %2597 }
 0x3b3   : > { %v20477_v12 = vrot.slane %v17771_v60, %v20124_v32  ;;  %v11957_v35 = vcombine.low %v5708_v54, %v5722_v26  ;;  %v4301_v19 = vrot.slane %v4279_v62, %v20124_v32  ;;  %v17769_v63 = vcombine.high %v5708_v54, %v5722_v26 }
 0x3b4   : > { %24386 = vst [vmem:[#allocation143_spill] sm:$0xff] %v20474_v7  ;;  %v4230_v27 = vcombine.high %v4222_v47, %v4222_v47  ;;  %v5839_v30 = vrot.slane %v3656_v56, %v20124_v32  ;;  %v3655_v0 = vadd.f32 %v19698_v15, %v2685_v1  ;;  %v11959_v10 = vcombine.low %v5715_v37, %v5729_v55 }
 0x3b5   : > { %24387 = vst [vmem:[#allocation144_spill] sm:$0xff] %v20477_v12  ;;  %v4287_v21 = vrot.slane %v4271_v41, %v20124_v32  ;;  %v4308_v29 = vrot.slane %v4280_v57, %v20124_v32  ;;  %v5846_v14 = vrot.slane %v5832_v50, %v20124_v32  ;;  %v20486_v60 = vrot.slane %v12008_v40, %v20124_v32 }
 0x3b6   : > { %v20489_v7 = vrot.slane %v17772_v61, %v20124_v32  ;;  %v17770_v26 = vcombine.high %v5715_v37, %v5729_v55  ;;  %v4231_v62 = vcombine.high %v4229_v51, %v4229_v51  ;;  %v4294_v56 = vrot.slane %v4278_v43, %v20124_v32  ;;  %v2694_v42 = vpop.xlane.xlu1 %2693 }
 0x3b7   : > { %24388 = vst [vmem:[#allocation145_spill] sm:$0xff] %v20486_v60  ;;  %v10536_v54 = vcombine.low %v4287_v21, %v4301_v19  ;;  %v17711_v15 = vcombine.high %v4287_v21, %v4301_v19  ;;  %v3626_v1 = vadd.f32 %v19274_v31, %v2598_v39  ;;  %v20494_v41 = vrot.slane %v11957_v35, %v20124_v32 }
 0x3b8   : > { %24389 = vst [vmem:[#allocation146_spill] sm:$0xff] %v20489_v7  ;;  %v4252_v57 = vrot.slane %v4230_v27, %v20124_v32  ;;  %v5847_v50 = vcombine.high %v5839_v30, %v5839_v30  ;;  %v5783_v12 = vcombine.high %v3655_v0, %v3655_v0  ;;  %v20498_v40 = vrot.slane %v17769_v63, %v20124_v32  ;;  %v2595_v27 = vpop.xlane.xlu0 %2594 }
 0x3b9   : > { %v20501_v61 = vrot.slane %v11959_v10, %v20124_v32  ;;  %v10538_v37 = vcombine.low %v4294_v56, %v4308_v29  ;;  %v5848_v55 = vcombine.high %v5846_v14, %v5846_v14  ;;  %v20504_v43 = vrot.slane %v17770_v26, %v20124_v32 }
 0x3ba   : > { %v4238_v31 = vrot.slane %v4222_v47, %v20124_v32  ;;  %v4259_v35 = vrot.slane %v4231_v62, %v20124_v32  ;;  %v5790_v19 = vrot.slane %v3655_v0, %v20124_v32  ;;  %v17712_v39 = vcombine.high %v4294_v56, %v4308_v29  ;;  %v24393_v56 = vld [vmem:[#allocation10_spill] sm:$0xff] }
 0x3bb   : > { %v20510_v21 = vrot.slane %v10536_v54, %v20124_v32  ;;  %v20513_v63 = vrot.slane %v17711_v15, %v20124_v32  ;;  %v4362_v10 = vcombine.high %v3626_v1, %v3626_v1  ;;  %v4245_v60 = vrot.slane %v4229_v51, %v20124_v32 }
 0x3bc   : > { %v10487_v7 = vcombine.low %v4238_v31, %v4252_v57  ;;  %v5869_v26 = vrot.slane %v5847_v50, %v20124_v32  ;;  %v5797_v47 = vrot.slane %v5783_v12, %v20124_v32  ;;  %v20519_v62 = vrot.slane %v10538_v37, %v20124_v32 }
 0x3bd   : > { %24390 = vst [vmem:[#allocation147_spill] sm:$0xff] %v20510_v21  ;;  %24391 = vst [vmem:[#allocation148_spill] sm:$0xff] %v20513_v63  ;;  %v5876_v0 = vrot.slane %v5848_v55, %v20124_v32  ;;  %v4369_v29 = vrot.slane %v3626_v1, %v20124_v32  ;;  %v3625_v54 = vadd.f32 %v24393_v56, %v2595_v27 }
 0x3be   : > { %24392 = vst [vmem:[#allocation149_spill] sm:$0xff] %v20519_v62  ;;  %v17709_v15 = vcombine.high %v4238_v31, %v4252_v57  ;;  %v10489_v21 = vcombine.low %v4245_v60, %v4259_v35  ;;  %v5855_v63 = vrot.slane %v5839_v30, %v20124_v32  ;;  %v5798_v51 = vcombine.high %v5790_v19, %v5790_v19  ;;  %v2691_v62 = vpop.xlane.xlu0 %2690 }
 0x3bf   : > { %v17710_v4 = vcombine.high %v4245_v60, %v4259_v35  ;;  %v5862_v50 = vrot.slane %v5846_v14, %v20124_v32  ;;  %v4376_v12 = vrot.slane %v4362_v10, %v20124_v32  ;;  %v3658_v38 = vadd.f32 %v24394_v59, %v2694_v42 }
 0x3c0   : > { %v20529_v37 = vrot.slane %v17712_v39, %v20124_v32  ;;  %v20532_v55 = vrot.slane %v10487_v7, %v20124_v32  ;;  %v12104_v1 = vcombine.low %v5855_v63, %v5869_v26  ;;  %v5799_v27 = vcombine.high %v5797_v47, %v5797_v47 }
 0x3c1   : > { %v17775_v57 = vcombine.high %v5855_v63, %v5869_v26  ;;  %v12106_v31 = vcombine.low %v5862_v50, %v5876_v0  ;;  %v4377_v56 = vcombine.high %v4369_v29, %v4369_v29  ;;  %v4313_v30 = vcombine.high %v3625_v54, %v3625_v54 }
 0x3c2   : > { %24395 = vst [vmem:[#allocation10_spill] sm:$0xff] %v20529_v37  ;;  %24396 = vst [vmem:[#allocation34_spill] sm:$0xff] %v20532_v55  ;;  %v20535_v60 = vrot.slane %v17709_v15, %v20124_v32  ;;  %v20538_v14 = vrot.slane %v10489_v21, %v20124_v32  ;;  %v5820_v59 = vrot.slane %v5798_v51, %v20124_v32 }
 0x3c3   : > { %v4320_v42 = vrot.slane %v3625_v54, %v20124_v32  ;;  %v20543_v35 = vrot.slane %v17710_v4, %v20124_v32  ;;  %v5806_v7 = vrot.slane %v5790_v19, %v20124_v32  ;;  %v4378_v39 = vcombine.high %v4376_v12, %v4376_v12 }
 0x3c4   : > { %24397 = vst [vmem:[#allocation150_spill] sm:$0xff] %v20535_v60  ;;  %24398 = vst [vmem:[#allocation151_spill] sm:$0xff] %v20538_v14  ;;  %v5930_v63 = vcombine.high %v3658_v38, %v3658_v38  ;;  %v17776_v10 = vcombine.high %v5862_v50, %v5876_v0  ;;  %v20547_v26 = vrot.slane %v12104_v1, %v20124_v32 }
 0x3c5   : > { %24399 = vst [vmem:[#allocation152_spill] sm:$0xff] %v20543_v35  ;;  %v5813_v15 = vrot.slane %v5797_v47, %v20124_v32  ;;  %v5827_v21 = vrot.slane %v5799_v27, %v20124_v32  ;;  %v20552_v51 = vrot.slane %v17775_v57, %v20124_v32  ;;  %v20555_v54 = vrot.slane %v12106_v31, %v20124_v32 }
 0x3c6   : > { %24400 = vst [vmem:[#allocation153_spill] sm:$0xff] %v20547_v26  ;;  %v4399_v4 = vrot.slane %v4377_v56, %v20124_v32  ;;  %v4327_v19 = vrot.slane %v4313_v30, %v20124_v32  ;;  %v12055_v37 = vcombine.low %v5806_v7, %v5820_v59  ;;  %v17773_v0 = vcombine.high %v5806_v7, %v5820_v59  ;;  %v2604_v26 = vpop.xlane.xlu1 %2603 }
 0x3c7   : > { %24401 = vst [vmem:[#allocation154_spill] sm:$0xff] %v20552_v51  ;;  %24402 = vst [vmem:[#allocation155_spill] sm:$0xff] %v20555_v54  ;;  %v4328_v50 = vcombine.high %v4320_v42, %v4320_v42  ;;  %v5937_v1 = vrot.slane %v3658_v38, %v20124_v32  ;;  %v4385_v47 = vrot.slane %v4369_v29, %v20124_v32  ;;  %v24403_v51 = vld [vmem:[#allocation32_spill] sm:$0xff]  ;;  %v24405_v38 = vld [vmem:[#allocation13_spill] sm:$0xff] }
 0x3c8   : > { %v4406_v27 = vrot.slane %v4378_v39, %v20124_v32  ;;  %v5944_v57 = vrot.slane %v5930_v63, %v20124_v32  ;;  %v3657_v14 = vadd.f32 %v24403_v51, %v2691_v62  ;;  %v20565_v31 = vrot.slane %v17776_v10, %v20124_v32 }
 0x3c9   : > { %v12057_v56 = vcombine.low %v5813_v15, %v5827_v21  ;;  %v17774_v54 = vcombine.high %v5813_v15, %v5827_v21  ;;  %v4392_v30 = vrot.slane %v4376_v12, %v20124_v32  ;;  %v10634_v59 = vcombine.low %v4385_v47, %v4399_v4  ;;  %v2601_v12 = vpop.xlane.xlu0 %2600 }
 0x3ca   : > { %24404 = vst [vmem:[#allocation32_spill] sm:$0xff] %v20565_v31  ;;  %v17715_v7 = vcombine.high %v4385_v47, %v4399_v4  ;;  %v4329_v35 = vcombine.high %v4327_v19, %v4327_v19  ;;  %v3628_v55 = vadd.f32 %v24405_v38, %v2604_v26  ;;  %v20570_v29 = vrot.slane %v12055_v37, %v20124_v32 }
 0x3cb   : > { %v20573_v39 = vrot.slane %v17773_v0, %v20124_v32  ;;  %v4350_v62 = vrot.slane %v4328_v50, %v20124_v32  ;;  %v5945_v63 = vcombine.high %v5937_v1, %v5937_v1  ;;  %v10636_v10 = vcombine.low %v4392_v30, %v4406_v27 }
 0x3cc   : > { %24406 = vst [vmem:[#allocation13_spill] sm:$0xff] %v20570_v29  ;;  %v5946_v51 = vcombine.high %v5944_v57, %v5944_v57  ;;  %v5881_v31 = vcombine.high %v3657_v14, %v3657_v14  ;;  %v5888_v15 = vrot.slane %v3657_v14, %v20124_v32  ;;  %v20578_v21 = vrot.slane %v12057_v56, %v20124_v32 }
 0x3cd   : > { %24407 = vst [vmem:[#allocation156_spill] sm:$0xff] %v20573_v39  ;;  %v20581_v26 = vrot.slane %v17774_v54, %v20124_v32  ;;  %v17716_v37 = vcombine.high %v4392_v30, %v4406_v27  ;;  %v4336_v4 = vrot.slane %v4320_v42, %v20124_v32  ;;  %v20585_v0 = vrot.slane %v10634_v59, %v20124_v32 }
 0x3ce   : > { %24408 = vst [vmem:[#allocation157_spill] sm:$0xff] %v20578_v21  ;;  %v20588_v50 = vrot.slane %v17715_v7, %v20124_v32  ;;  %v4357_v47 = vrot.slane %v4329_v35, %v20124_v32  ;;  %v4460_v38 = vcombine.high %v3628_v55, %v3628_v55  ;;  %v4343_v14 = vrot.slane %v4327_v19, %v20124_v32  ;;  %v24412_v21 = vld [vmem:[#allocation11_spill] sm:$0xff]  ;;  %v2700_v7 = vpop.xlane.xlu1 %2699 }
 0x3cf   : > { %24409 = vst [vmem:[#allocation158_spill] sm:$0xff] %v20581_v26  ;;  %24410 = vst [vmem:[#allocation159_spill] sm:$0xff] %v20585_v0  ;;  %v10585_v29 = vcombine.low %v4336_v4, %v4350_v62  ;;  %v5967_v56 = vrot.slane %v5945_v63, %v20124_v32  ;;  %v3627_v54 = vadd.f32 %v24412_v21, %v2601_v12 }
 0x3d0   : > { %24411 = vst [vmem:[#allocation160_spill] sm:$0xff] %v20588_v50  ;;  %v20595_v27 = vrot.slane %v10636_v10, %v20124_v32  ;;  %v5974_v42 = vrot.slane %v5946_v51, %v20124_v32  ;;  %v5895_v30 = vrot.slane %v5881_v31, %v20124_v32  ;;  %v5896_v59 = vcombine.high %v5888_v15, %v5888_v15 }
 0x3d1   : > { %v20600_v0 = vrot.slane %v17716_v37, %v20124_v32  ;;  %v17713_v35 = vcombine.high %v4336_v4, %v4350_v62  ;;  %v5953_v19 = vrot.slane %v5937_v1, %v20124_v32  ;;  %v4467_v50 = vrot.slane %v3628_v55, %v20124_v32  ;;  %v2697_v4 = vpop.xlane.xlu0 %2696 }
 0x3d2   : > { %24413 = vst [vmem:[#allocation11_spill] sm:$0xff] %v20595_v27  ;;  %v10587_v63 = vcombine.low %v4343_v14, %v4357_v47  ;;  %v17714_v26 = vcombine.high %v4343_v14, %v4357_v47  ;;  %v5960_v12 = vrot.slane %v5944_v57, %v20124_v32  ;;  %v4474_v10 = vrot.slane %v4460_v38, %v20124_v32  ;;  %v24416_v27 = vld [vmem:[#allocation36_spill] sm:$0xff] }
 0x3d3   : > { %24414 = vst [vmem:[#allocation161_spill] sm:$0xff] %v20600_v0  ;;  %v20607_v51 = vrot.slane %v10585_v29, %v20124_v32  ;;  %v12202_v31 = vcombine.low %v5953_v19, %v5967_v56  ;;  %v4411_v21 = vcombine.high %v3627_v54, %v3627_v54  ;;  %v3660_v39 = vadd.f32 %v24416_v27, %v2700_v7 }
 0x3d4   : > { %v17779_v37 = vcombine.high %v5953_v19, %v5967_v56  ;;  %v12204_v0 = vcombine.low %v5960_v12, %v5974_v42  ;;  %v5897_v62 = vcombine.high %v5895_v30, %v5895_v30  ;;  %v5918_v1 = vrot.slane %v5896_v59, %v20124_v32  ;;  %v24421_v19 = vld [vmem:[#allocation33_spill] sm:$0xff] }
 0x3d5   : > { %24415 = vst [vmem:[#allocation162_spill] sm:$0xff] %v20607_v51  ;;  %v20612_v55 = vrot.slane %v17713_v35, %v20124_v32  ;;  %v17780_v47 = vcombine.high %v5960_v12, %v5974_v42  ;;  %v4475_v57 = vcombine.high %v4467_v50, %v4467_v50  ;;  %v4418_v38 = vrot.slane %v3627_v54, %v20124_v32 }
 0x3d6   : > { %v20616_v29 = vrot.slane %v10587_v63, %v20124_v32  ;;  %v20619_v14 = vrot.slane %v17714_v26, %v20124_v32  ;;  %v5904_v56 = vrot.slane %v5888_v15, %v20124_v32  ;;  %v4476_v27 = vcombine.high %v4474_v10, %v4474_v10 }
 0x3d7   : > { %24417 = vst [vmem:[#allocation36_spill] sm:$0xff] %v20612_v55  ;;  %v20623_v7 = vrot.slane %v12202_v31, %v20124_v32  ;;  %v4425_v59 = vrot.slane %v4411_v21, %v20124_v32  ;;  %v6028_v35 = vcombine.high %v3660_v39, %v3660_v39  ;;  %v3659_v42 = vadd.f32 %v24421_v19, %v2697_v4  ;;  %v2610_v21 = vpop.xlane.xlu1 %2609 }
 0x3d8   : > { %24418 = vst [vmem:[#allocation163_spill] sm:$0xff] %v20616_v29  ;;  %24419 = vst [vmem:[#allocation164_spill] sm:$0xff] %v20619_v14  ;;  %v20628_v12 = vrot.slane %v17779_v37, %v20124_v32  ;;  %v20631_v54 = vrot.slane %v12204_v0, %v20124_v32  ;;  %v5925_v26 = vrot.slane %v5897_v62, %v20124_v32 }
 0x3d9   : > { %24420 = vst [vmem:[#allocation165_spill] sm:$0xff] %v20623_v7  ;;  %v12153_v63 = vcombine.low %v5904_v56, %v5918_v1  ;;  %v20635_v15 = vrot.slane %v17780_v47, %v20124_v32  ;;  %v17777_v29 = vcombine.high %v5904_v56, %v5918_v1  ;;  %v4497_v31 = vrot.slane %v4475_v57, %v20124_v32  ;;  %v24426_v56 = vld [vmem:[#allocation15_spill] sm:$0xff] }
 0x3da   : > { %24422 = vst [vmem:[#allocation33_spill] sm:$0xff] %v20628_v12  ;;  %24423 = vst [vmem:[#allocation166_spill] sm:$0xff] %v20631_v54  ;;  %v4426_v7 = vcombine.high %v4418_v38, %v4418_v38  ;;  %v5911_v14 = vrot.slane %v5895_v30, %v20124_v32  ;;  %v4483_v4 = vrot.slane %v4467_v50, %v20124_v32  ;;  %v2362_v30 = vld [vmem:[#allocation2 + $0x3b8] sm:$0xff] }
 0x3db   : > { %24424 = vst [vmem:[#allocation167_spill] sm:$0xff] %v20635_v15  ;;  %v4504_v37 = vrot.slane %v4476_v27, %v20124_v32  ;;  %v6035_v0 = vrot.slane %v3660_v39, %v20124_v32  ;;  %v4490_v19 = vrot.slane %v4474_v10, %v20124_v32  ;;  %v4427_v62 = vcombine.high %v4425_v59, %v4425_v59 }
 0x3dc   : > { %v6042_v54 = vrot.slane %v6028_v35, %v20124_v32  ;;  %v5979_v47 = vcombine.high %v3659_v42, %v3659_v42  ;;  %v12155_v15 = vcombine.low %v5911_v14, %v5925_v26  ;;  %v17778_v1 = vcombine.high %v5911_v14, %v5925_v26 }
 0x3dd   : > { %v20645_v57 = vrot.slane %v12153_v63, %v20124_v32  ;;  %v3630_v12 = vadd.f32 %v24426_v56, %v2610_v21  ;;  %v20649_v50 = vrot.slane %v17777_v29, %v20124_v32  ;;  %v10732_v27 = vcombine.low %v4483_v4, %v4497_v31  ;;  %v2607_v21 = vpop.xlane.xlu0 %2606  ;;  %v24428_v56 = vld [vmem:[#allocation119_spill] sm:$0xff] }
 0x3de   : > { %v4448_v39 = vrot.slane %v4426_v7, %v20124_v32  ;;  %v5986_v10 = vrot.slane %v3659_v42, %v20124_v32  ;;  %v17719_v51 = vcombine.high %v4483_v4, %v4497_v31  ;;  %v10734_v55 = vcombine.low %v4490_v19, %v4504_v37 }
 0x3df   : > { %24425 = vst [vmem:[#allocation168_spill] sm:$0xff] %v20645_v57  ;;  %24427 = vst [vmem:[#allocation15_spill] sm:$0xff] %v20649_v50  ;;  %v4434_v35 = vrot.slane %v4418_v38, %v20124_v32  ;;  %v6043_v60 = vcombine.high %v6035_v0, %v6035_v0  ;;  %v4455_v14 = vrot.slane %v4427_v62, %v20124_v32 }
 0x3e0   : > { %v6044_v26 = vcombine.high %v6042_v54, %v6042_v54  ;;  %v5993_v63 = vrot.slane %v5979_v47, %v20124_v32  ;;  %v2394_v57 = vmax.f32 %v2362_v30, %v24428_v56  ;;  %v20658_v29 = vrot.slane %v12155_v15, %v20124_v32  ;;  %v24433_v56 = vld [vmem:[#allocation12_spill] sm:$0xff] }
 0x3e1   : > { %v20661_v7 = vrot.slane %v17778_v1, %v20124_v32  ;;  %v17720_v42 = vcombine.high %v4490_v19, %v4504_v37  ;;  %v4558_v31 = vcombine.high %v3630_v12, %v3630_v12  ;;  %v20664_v4 = vrot.slane %v10732_v27, %v20124_v32 }
 0x3e2   : > { %24429 = vst [vmem:[#allocation119_spill] sm:$0xff] %v20658_v29  ;;  %v4441_v38 = vrot.slane %v4425_v59, %v20124_v32  ;;  %v10683_v62 = vcombine.low %v4434_v35, %v4448_v39  ;;  %v5994_v50 = vcombine.high %v5986_v10, %v5986_v10  ;;  %2426 = vst.msk [vmem:[#allocation2 + $0x3b8] sm:$0xff] %vm364_vm3, %v2394_v57  ;;  %v2703_v29 = vpop.xlane.xlu0 %2702 }
 0x3e3   : > { %24430 = vst [vmem:[#allocation169_spill] sm:$0xff] %v20661_v7  ;;  %24431 = vst [vmem:[#allocation170_spill] sm:$0xff] %v20664_v4  ;;  %v20669_v47 = vrot.slane %v17719_v51, %v20124_v32  ;;  %v17717_v30 = vcombine.high %v4434_v35, %v4448_v39  ;;  %v6065_v15 = vrot.slane %v6043_v60, %v20124_v32 }
 0x3e4   : > { %v3629_v1 = vadd.f32 %v24433_v56, %v2607_v21  ;;  %v20674_v37 = vrot.slane %v10734_v55, %v20124_v32  ;;  %v10685_v19 = vcombine.low %v4441_v38, %v4455_v14  ;;  %v6072_v27 = vrot.slane %v6044_v26, %v20124_v32  ;;  %v2706_v56 = vpop.xlane.xlu1 %2705 }
 0x3e5   : > { %24432 = vst [vmem:[#allocation171_spill] sm:$0xff] %v20669_v47  ;;  %v5995_v4 = vcombine.high %v5993_v63, %v5993_v63  ;;  %v20678_v59 = vrot.slane %v17720_v42, %v20124_v32  ;;  %v6051_v57 = vrot.slane %v6035_v0, %v20124_v32  ;;  %v4565_v51 = vrot.slane %v3630_v12, %v20124_v32  ;;  %v18464_v0 = vpop.f32.mrf.mxu0 }
 0x3e6   : > { %24434 = vst [vmem:[#allocation12_spill] sm:$0xff] %v20674_v37  ;;  %v4572_v39 = vrot.slane %v4558_v31, %v20124_v32  ;;  %v17718_v35 = vcombine.high %v4441_v38, %v4455_v14  ;;  %v20684_v60 = vrot.slane %v10683_v62, %v20124_v32  ;;  %v6058_v55 = vrot.slane %v6042_v54, %v20124_v32 }
 0x3e7   : > { %24435 = vst [vmem:[#allocation172_spill] sm:$0xff] %v20678_v59  ;;  %v6016_v21 = vrot.slane %v5994_v50, %v20124_v32  ;;  %v20689_v26 = vrot.slane %v17717_v30, %v20124_v32  ;;  %v12300_v42 = vcombine.low %v6051_v57, %v6065_v15  ;;  %v17783_v37 = vcombine.high %v6051_v57, %v6065_v15  ;;  %v24439_v50 = vld [vmem:[#allocation38_spill] sm:$0xff] }
 0x3e8   : > { %24436 = vst [vmem:[#allocation173_spill] sm:$0xff] %v20684_v60  ;;  %v4509_v59 = vcombine.high %v3629_v1, %v3629_v1  ;;  %v20692_v12 = vrot.slane %v10685_v19, %v20124_v32  ;;  %v12302_v31 = vcombine.low %v6058_v55, %v6072_v27  ;;  %v6002_v14 = vrot.slane %v5986_v10, %v20124_v32 }
 0x3e9   : > { %24437 = vst [vmem:[#allocation174_spill] sm:$0xff] %v20689_v26  ;;  %v6023_v38 = vrot.slane %v5995_v4, %v20124_v32  ;;  %v17784_v62 = vcombine.high %v6058_v55, %v6072_v27  ;;  %v4573_v54 = vcombine.high %v4565_v51, %v4565_v51  ;;  %v4574_v47 = vcombine.high %v4572_v39, %v4572_v39  ;;  %v2009_v55 = vld [vmem:[#allocation2 + $0x2b8] sm:$0xff]  ;;  %v24444_v26 = vld [vmem:[#allocation35_spill] sm:$0xff] }
 0x3ea   : > { %24438 = vst [vmem:[#allocation175_spill] sm:$0xff] %v20692_v12  ;;  %v3662_v60 = vadd.f32 %v24439_v50, %v2706_v56  ;;  %v20698_v30 = vrot.slane %v17718_v35, %v20124_v32  ;;  %v6009_v15 = vrot.slane %v5993_v63, %v20124_v32  ;;  %v12251_v57 = vcombine.low %v6002_v14, %v6016_v21  ;;  %v1937_v56 = vpop.f32.mrf.mxu0  ;;  %v2008_v50 = vld [vmem:[#allocation2 + $0x2b0] sm:$0xff] }
 0x3eb   : > { %v4516_v19 = vrot.slane %v3629_v1, %v20124_v32  ;;  %v20703_v12 = vrot.slane %v12300_v42, %v20124_v32  ;;  %v20706_v10 = vrot.slane %v17783_v37, %v20124_v32  ;;  %v17781_v4 = vcombine.high %v6002_v14, %v6016_v21 }
 0x3ec   : > { %24440 = vst [vmem:[#allocation38_spill] sm:$0xff] %v20698_v30  ;;  %v4523_v27 = vrot.slane %v4509_v59, %v20124_v32  ;;  %v20710_v35 = vrot.slane %v12302_v31, %v20124_v32  ;;  %v12253_v30 = vcombine.low %v6009_v15, %v6023_v38  ;;  %v17782_v63 = vcombine.high %v6009_v15, %v6023_v38 }
 0x3ed   : > { %24441 = vst [vmem:[#allocation176_spill] sm:$0xff] %v20703_v12  ;;  %24442 = vst [vmem:[#allocation177_spill] sm:$0xff] %v20706_v10  ;;  %v3661_v7 = vadd.f32 %v24444_v26, %v2703_v29  ;;  %v20714_v1 = vrot.slane %v17784_v62, %v20124_v32  ;;  %v4595_v42 = vrot.slane %v4573_v54, %v20124_v32  ;;  %v2616_v26 = vpop.xlane.xlu1 %2615  ;;  %v2554_v62 = vld [vmem:[#allocation2 + $0x3a0] sm:$0xff] }
 0x3ee   : > { %24443 = vst [vmem:[#allocation178_spill] sm:$0xff] %v20710_v35  ;;  %v4602_v37 = vrot.slane %v4574_v47, %v20124_v32  ;;  %v6126_v21 = vcombine.high %v3662_v60, %v3662_v60  ;;  %v20719_v59 = vrot.slane %v12251_v57, %v20124_v32  ;;  %v4524_v14 = vcombine.high %v4516_v19, %v4516_v19  ;;  %v2553_v35 = vld [vmem:[#allocation2 + $0x398] sm:$0xff] }
 0x3ef   : > { %24445 = vst [vmem:[#allocation35_spill] sm:$0xff] %v20714_v1  ;;  %v2041_v12 = vmax.f32 %v2009_v55, %v18464_v0  ;;  %v2040_v10 = vmax.f32 %v2008_v50, %v1937_v56  ;;  %v4581_v31 = vrot.slane %v4565_v51, %v20124_v32  ;;  %v4588_v38 = vrot.slane %v4572_v39, %v20124_v32  ;;  %v18547_v56 = vpop.f32.mrf.mxu1  ;;  %v2522_v50 = vld [vmem:[#allocation2 + $0x2a0] sm:$0xff]  ;;  %v24450_v1 = vld [vmem:[#allocation17_spill] sm:$0xff] }
 0x3f0   : > { %24446 = vst [vmem:[#allocation179_spill] sm:$0xff] %v20719_v59  ;;  %v4525_v15 = vcombine.high %v4523_v27, %v4523_v27  ;;  %v6133_v29 = vrot.slane %v3662_v60, %v20124_v32  ;;  %v20725_v54 = vrot.slane %v17781_v4, %v20124_v32  ;;  %v20728_v47 = vrot.slane %v12253_v30, %v20124_v32  ;;  %v2613_v59 = vpop.xlane.xlu0 %2612 }
 0x3f1   : > { %v20731_v57 = vrot.slane %v17782_v63, %v20124_v32  ;;  %v6077_v0 = vcombine.high %v3661_v7, %v3661_v7  ;;  %2073 = vst.msk [vmem:[#allocation2 + $0x2b8] sm:$0xff] %vm364_vm3, %v2041_v12  ;;  %2072 = vst.msk [vmem:[#allocation2 + $0x2b0] sm:$0xff] %vm364_vm3, %v2040_v10  ;;  %v10830_v51 = vcombine.low %v4581_v31, %v4595_v42  ;;  %v2911_v63 = vsel %vm364_vm3, %v2553_v35, -inf }
 0x3f2   : > { %24447 = vst [vmem:[#allocation180_spill] sm:$0xff] %v20725_v54  ;;  %24448 = vst [vmem:[#allocation181_spill] sm:$0xff] %v20728_v47  ;;  %v17723_v39 = vcombine.high %v4581_v31, %v4595_v42  ;;  %v10832_v60 = vcombine.low %v4588_v38, %v4602_v37  ;;  %v6140_v55 = vrot.slane %v6126_v21, %v20124_v32  ;;  %v2914_v47 = vsel %vm364_vm3, %v2554_v62, -inf  ;;  %v2300_v62 = vpop.f32.mrf.mxu1 }
 0x3f3   : > { %24449 = vst [vmem:[#allocation182_spill] sm:$0xff] %v20731_v57  ;;  %v4546_v4 = vrot.slane %v4524_v14, %v20124_v32  ;;  %v3632_v30 = vadd.f32 %v24450_v1, %v2616_v26  ;;  %v4553_v57 = vrot.slane %v4525_v15, %v20124_v32  ;;  %v6141_v12 = vcombine.high %v6133_v29, %v6133_v29 }
 0x3f4   : > { %v6084_v10 = vrot.slane %v3661_v7, %v20124_v32  ;;  %2915 = vmax.xlane.f32.xlu1 %v2914_v47  ;;  %2912 = vmax.xlane.f32.xlu0 %v2911_v63  ;;  %v17724_v42 = vcombine.high %v4588_v38, %v4602_v37  ;;  %v4532_v21 = vrot.slane %v4516_v19, %v20124_v32  ;;  %v2818_v14 = vsel %vm364_vm3, %v2522_v50, -inf  ;;  %v2364_v7 = vld [vmem:[#allocation2 + $0x3c8] sm:$0xff]  ;;  %v2363_v47 = vld [vmem:[#allocation2 + $0x3c0] sm:$0xff] }
 0x3f5   : > { %v6091_v31 = vrot.slane %v6077_v0, %v20124_v32  ;;  %v20746_v1 = vrot.slane %v10830_v51, %v20124_v32  ;;  %v20749_v35 = vrot.slane %v17723_v39, %v20124_v32  ;;  %v4539_v15 = vrot.slane %v4523_v27, %v20124_v32  ;;  %v24454_v0 = vld [vmem:[#allocation14_spill] sm:$0xff] }
 0x3f6   : > { %v6142_v26 = vcombine.high %v6140_v55, %v6140_v55  ;;  %v20753_v37 = vrot.slane %v10832_v60, %v20124_v32  ;;  %v10781_v19 = vcombine.low %v4532_v21, %v4546_v4  ;;  %v4656_v38 = vcombine.high %v3632_v30, %v3632_v30 }
 0x3f7   : > { %24451 = vst [vmem:[#allocation17_spill] sm:$0xff] %v20746_v1  ;;  %24452 = vst [vmem:[#allocation183_spill] sm:$0xff] %v20749_v35  ;;  %v3631_v63 = vadd.f32 %v24454_v0, %v2613_v59  ;;  %v17721_v50 = vcombine.high %v4532_v21, %v4546_v4  ;;  %v10783_v54 = vcombine.low %v4539_v15, %v4553_v57  ;;  %v2712_v4 = vpop.xlane.xlu1 %2711 }
 0x3f8   : > { %24453 = vst [vmem:[#allocation184_spill] sm:$0xff] %v20753_v37  ;;  %v6163_v51 = vrot.slane %v6141_v12, %v20124_v32  ;;  %v6092_v1 = vcombine.high %v6084_v10, %v6084_v10  ;;  %2819 = vmax.xlane.f32.xlu1 %v2818_v14  ;;  %v6093_v39 = vcombine.high %v6091_v31, %v6091_v31 }
 0x3f9   : > { %v4663_v27 = vrot.slane %v3632_v30, %v20124_v32  ;;  %v2396_v35 = vmax.f32 %v2364_v7, %v18547_v56  ;;  %v2395_v49 = vmax.f32 %v2363_v47, %v2300_v62  ;;  %v20759_v9 = vrot.slane %v17724_v42, %v20124_v32  ;;  %v24458_v7 = vld [vmem:[#allocation40_spill] sm:$0xff] }
 0x3fa   : > { %v6149_v60 = vrot.slane %v6133_v29, %v20124_v32  ;;  %v6156_v37 = vrot.slane %v6140_v55, %v20124_v32  ;;  %v6170_v59 = vrot.slane %v6142_v26, %v20124_v32  ;;  %v17722_v21 = vcombine.high %v4539_v15, %v4553_v57 }
 0x3fb   : > { %24455 = vst [vmem:[#allocation14_spill] sm:$0xff] %v20759_v9  ;;  %v20765_v12 = vrot.slane %v10781_v19, %v20124_v32  ;;  %v4670_v14 = vrot.slane %v4656_v38, %v20124_v32  ;;  %v4607_v30 = vcombine.high %v3631_v63, %v3631_v63  ;;  %2428 = vst.msk [vmem:[#allocation2 + $0x3c8] sm:$0xff] %vm364_vm3, %v2396_v35  ;;  %v2815_v42 = vsel %vm364_vm3, %v2521_v34, -inf }
 0x3fc   : > { %2427 = vst.msk [vmem:[#allocation2 + $0x3c0] sm:$0xff] %vm364_vm3, %v2395_v49  ;;  %v20771_v56 = vrot.slane %v17721_v50, %v20124_v32  ;;  %v12398_v29 = vcombine.low %v6149_v60, %v6163_v51  ;;  %v6114_v55 = vrot.slane %v6092_v1, %v20124_v32  ;;  %v20776_v57 = vrot.slane %v10783_v54, %v20124_v32  ;;  %v2709_v54 = vpop.xlane.xlu0 %2708 }
 0x3fd   : > { %24456 = vst [vmem:[#allocation185_spill] sm:$0xff] %v20765_v12  ;;  %v6121_v15 = vrot.slane %v6093_v39, %v20124_v32  ;;  %v4671_v26 = vcombine.high %v4663_v27, %v4663_v27  ;;  %v3664_v62 = vadd.f32 %v24458_v7, %v2712_v4  ;;  %2816 = vmax.xlane.f32.xlu0 %v2815_v42 }
 0x3fe   : > { %24457 = vst [vmem:[#allocation186_spill] sm:$0xff] %v20776_v57  ;;  %v17787_v35 = vcombine.high %v6149_v60, %v6163_v51  ;;  %v12400_v47 = vcombine.low %v6156_v37, %v6170_v59  ;;  %v6100_v49 = vrot.slane %v6084_v10, %v20124_v32  ;;  %v4614_v19 = vrot.slane %v3631_v63, %v20124_v32 }
 0x3ff   : > { %v17788_v38 = vcombine.high %v6156_v37, %v6170_v59  ;;  %v6107_v1 = vrot.slane %v6091_v31, %v20124_v32  ;;  %v4672_v0 = vcombine.high %v4670_v14, %v4670_v14  ;;  %v4621_v34 = vrot.slane %v4607_v30, %v20124_v32  ;;  %v18467_v37 = vpop.f32.mrf.mxu0 }
 0x400   : > { %v20785_v50 = vrot.slane %v17722_v21, %v20124_v32  ;;  %v20788_v39 = vrot.slane %v12398_v29, %v20124_v32  ;;  %v12349_v4 = vcombine.low %v6100_v49, %v6114_v55  ;;  %v17785_v51 = vcombine.high %v6100_v49, %v6114_v55  ;;  %v24463_v21 = vld [vmem:[#allocation37_spill] sm:$0xff] }
 0x401   : > { %v12351_v60 = vcombine.low %v6107_v1, %v6121_v15  ;;  %v17786_v42 = vcombine.high %v6107_v1, %v6121_v15  ;;  %v4693_v10 = vrot.slane %v4671_v26, %v20124_v32  ;;  %v6224_v63 = vcombine.high %v3664_v62, %v3664_v62  ;;  %v2011_v26 = vld [vmem:[#allocation2 + $0x2c8] sm:$0xff] }
 0x402   : > { %24459 = vst [vmem:[#allocation40_spill] sm:$0xff] %v20785_v50  ;;  %24460 = vst [vmem:[#allocation187_spill] sm:$0xff] %v20788_v39  ;;  %v20792_v31 = vrot.slane %v17787_v35, %v20124_v32  ;;  %v20795_v59 = vrot.slane %v12400_v47, %v20124_v32  ;;  %v4622_v30 = vcombine.high %v4614_v19, %v4614_v19 }
 0x403   : > { %v3663_v7 = vadd.f32 %v24463_v21, %v2709_v54  ;;  %v20799_v29 = vrot.slane %v17788_v38, %v20124_v32  ;;  %v4679_v55 = vrot.slane %v4663_v27, %v20124_v32  ;;  %v4700_v15 = vrot.slane %v4672_v0, %v20124_v32  ;;  %v1947_v21 = vpop.f32.mrf.mxu0 }
 0x404   : > { %24461 = vst [vmem:[#allocation188_spill] sm:$0xff] %v20792_v31  ;;  %24462 = vst [vmem:[#allocation189_spill] sm:$0xff] %v20795_v59  ;;  %v4623_v49 = vcombine.high %v4621_v34, %v4621_v34  ;;  %v20804_v1 = vrot.slane %v12349_v4, %v20124_v32  ;;  %v20807_v35 = vrot.slane %v17785_v51, %v20124_v32  ;;  %v2556_v4 = vld [vmem:[#allocation2 + $0x3b0] sm:$0xff] }
 0x405   : > { %24464 = vst [vmem:[#allocation37_spill] sm:$0xff] %v20799_v29  ;;  %v4686_v47 = vrot.slane %v4670_v14, %v20124_v32  ;;  %v6231_v59 = vrot.slane %v3664_v62, %v20124_v32  ;;  %v20812_v54 = vrot.slane %v12351_v60, %v20124_v32  ;;  %v20815_v38 = vrot.slane %v17786_v42, %v20124_v32  ;;  %v2010_v29 = vld [vmem:[#allocation2 + $0x2c0] sm:$0xff]  ;;  %v2622_v14 = vpop.xlane.xlu1 %2621 }
 0x406   : > { %24465 = vst [vmem:[#allocation190_spill] sm:$0xff] %v20804_v1  ;;  %24466 = vst [vmem:[#allocation191_spill] sm:$0xff] %v20807_v35  ;;  %v10928_v27 = vcombine.low %v4679_v55, %v4693_v10  ;;  %v6238_v0 = vrot.slane %v6224_v63, %v20124_v32  ;;  %v4630_v39 = vrot.slane %v4614_v19, %v20124_v32  ;;  %v2619_v63 = vpop.xlane.xlu0 %2618  ;;  %v2920_v19 = vsel %vm364_vm3, %v2556_v4, -inf  ;;  %v18550_v4 = vpop.f32.mrf.mxu1 }
 0x407   : > { %24467 = vst [vmem:[#allocation192_spill] sm:$0xff] %v20812_v54  ;;  %24468 = vst [vmem:[#allocation193_spill] sm:$0xff] %v20815_v38  ;;  %v4644_v51 = vrot.slane %v4622_v30, %v20124_v32  ;;  %v6175_v31 = vcombine.high %v3663_v7, %v3663_v7  ;;  %v2043_v9 = vmax.f32 %v2011_v26, %v18467_v37  ;;  %v2555_v54 = vld [vmem:[#allocation2 + $0x3a8] sm:$0xff]  ;;  %2921 = vmax.xlane.f32.xlu1 %v2920_v19 }
 0x408   : > { %v17727_v62 = vcombine.high %v4679_v55, %v4693_v10  ;;  %v10930_v1 = vcombine.low %v4686_v47, %v4700_v15  ;;  %v4651_v60 = vrot.slane %v4623_v49, %v20124_v32  ;;  %v6182_v42 = vrot.slane %v3663_v7, %v20124_v32  ;;  %v24470_v55 = vld [vmem:[#allocation19_spill] sm:$0xff]  ;;  %v2366_v49 = vld [vmem:[#allocation2 + $0x3d8] sm:$0xff] }
 0x409   : > { %v17728_v38 = vcombine.high %v4686_v47, %v4700_v15  ;;  %v6239_v35 = vcombine.high %v6231_v59, %v6231_v59  ;;  %2075 = vst.msk [vmem:[#allocation2 + $0x2c8] sm:$0xff] %vm364_vm3, %v2043_v9  ;;  %v2042_v57 = vmax.f32 %v2010_v29, %v1947_v21  ;;  %v20825_v30 = vrot.slane %v10928_v27, %v20124_v32  ;;  %v24472_v21 = vld [vmem:[#allocation16_spill] sm:$0xff] }
 0x40a   : > { %v4637_v37 = vrot.slane %v4621_v34, %v20124_v32  ;;  %v6240_v10 = vcombine.high %v6238_v0, %v6238_v0  ;;  %v3634_v26 = vadd.f32 %v24470_v55, %v2622_v14  ;;  %v10879_v7 = vcombine.low %v4630_v39, %v4644_v51 }
 0x40b   : > { %24469 = vst [vmem:[#allocation194_spill] sm:$0xff] %v20825_v30  ;;  %v17725_v50 = vcombine.high %v4630_v39, %v4644_v51  ;;  %v6189_v15 = vrot.slane %v6175_v31, %v20124_v32  ;;  %2074 = vst.msk [vmem:[#allocation2 + $0x2c0] sm:$0xff] %vm364_vm3, %v2042_v57  ;;  %v2917_v9 = vsel %vm364_vm3, %v2555_v54, -inf  ;;  %v20833_v29 = vrot.slane %v17727_v62, %v20124_v32 }
 0x40c   : > { %v10881_v47 = vcombine.low %v4637_v37, %v4651_v60  ;;  %v6190_v27 = vcombine.high %v6182_v42, %v6182_v42  ;;  %v3633_v34 = vadd.f32 %v24472_v21, %v2619_v63  ;;  %2918 = vmax.xlane.f32.xlu0 %v2917_v9  ;;  %v20837_v14 = vrot.slane %v10930_v1, %v20124_v32 }
 0x40d   : > { %24471 = vst [vmem:[#allocation19_spill] sm:$0xff] %v20833_v29  ;;  %v17726_v19 = vcombine.high %v4637_v37, %v4651_v60  ;;  %v6261_v39 = vrot.slane %v6239_v35, %v20124_v32  ;;  %v2398_v31 = vmax.f32 %v2366_v49, %v18550_v4  ;;  %v20841_v57 = vrot.slane %v17728_v38, %v20124_v32  ;;  %v2365_v49 = vld [vmem:[#allocation2 + $0x3d0] sm:$0xff] }
 0x40e   : > { %24473 = vst [vmem:[#allocation16_spill] sm:$0xff] %v20837_v14  ;;  %v6268_v54 = vrot.slane %v6240_v10, %v20124_v32  ;;  %v4754_v51 = vcombine.high %v3634_v26, %v3634_v26  ;;  %v4761_v62 = vrot.slane %v3634_v26, %v20124_v32  ;;  %v20846_v55 = vrot.slane %v10879_v7, %v20124_v32  ;;  %v2310_v26 = vpop.f32.mrf.mxu1  ;;  %v2524_v7 = vld [vmem:[#allocation2 + $0x2b0] sm:$0xff] }
 0x40f   : > { %24474 = vst [vmem:[#allocation195_spill] sm:$0xff] %v20841_v57  ;;  %v20849_v63 = vrot.slane %v17725_v50, %v20124_v32  ;;  %v6247_v1 = vrot.slane %v6231_v59, %v20124_v32  ;;  %v6191_v60 = vcombine.high %v6189_v15, %v6189_v15  ;;  %2430 = vst.msk [vmem:[#allocation2 + $0x3d8] sm:$0xff] %vm364_vm3, %v2398_v31  ;;  %v2523_v57 = vld [vmem:[#allocation2 + $0x2a8] sm:$0xff] }
 0x410   : > { %24475 = vst [vmem:[#allocation196_spill] sm:$0xff] %v20846_v55  ;;  %v20854_v35 = vrot.slane %v10881_v47, %v20124_v32  ;;  %v6254_v38 = vrot.slane %v6238_v0, %v20124_v32  ;;  %v6212_v37 = vrot.slane %v6190_v27, %v20124_v32  ;;  %v4705_v10 = vcombine.high %v3633_v34, %v3633_v34  ;;  %v2718_v0 = vpop.xlane.xlu1 %2717 }
 0x411   : > { %24476 = vst [vmem:[#allocation197_spill] sm:$0xff] %v20849_v63  ;;  %v20859_v9 = vrot.slane %v17726_v19, %v20124_v32  ;;  %v12496_v50 = vcombine.low %v6247_v1, %v6261_v39  ;;  %v17791_v21 = vcombine.high %v6247_v1, %v6261_v39  ;;  %v6198_v59 = vrot.slane %v6182_v42, %v20124_v32 }
 0x412   : > { %24477 = vst [vmem:[#allocation198_spill] sm:$0xff] %v20854_v35  ;;  %v12498_v4 = vcombine.low %v6254_v38, %v6268_v54  ;;  %v4768_v31 = vrot.slane %v4754_v51, %v20124_v32  ;;  %v4769_v47 = vcombine.high %v4761_v62, %v4761_v62  ;;  %v4712_v14 = vrot.slane %v3633_v34, %v20124_v32  ;;  %v18470_v35 = vpop.f32.mrf.mxu0  ;;  %v2715_v51 = vpop.xlane.xlu0 %2714 }
 0x413   : > { %24478 = vst [vmem:[#allocation199_spill] sm:$0xff] %v20859_v9  ;;  %v17792_v27 = vcombine.high %v6254_v38, %v6268_v54  ;;  %v20865_v30 = vrot.slane %v6191_v60, %v20124_v32  ;;  %v2397_v29 = vmax.f32 %v2365_v49, %v2310_v26  ;;  %v2824_v19 = vsel %vm364_vm3, %v2524_v7, -inf  ;;  %v24481_v60 = vld [vmem:[#allocation42_spill] sm:$0xff] }
 0x414   : > { %v6205_v39 = vrot.slane %v6189_v15, %v20124_v32  ;;  %v12447_v1 = vcombine.low %v6198_v59, %v6212_v37  ;;  %v17789_v42 = vcombine.high %v6198_v59, %v6212_v37  ;;  %v4719_v9 = vrot.slane %v4705_v10, %v20124_v32  ;;  %2825 = vmax.xlane.f32.xlu1 %v2824_v19  ;;  %v2013_v7 = vld [vmem:[#allocation2 + $0x2d8] sm:$0xff]  ;;  %v1957_v19 = vpop.f32.mrf.mxu0 }
 0x415   : > { %v20871_v34 = vrot.slane %v12496_v50, %v20124_v32  ;;  %v20874_v54 = vrot.slane %v17791_v21, %v20124_v32  ;;  %v3666_v38 = vadd.f32 %v24481_v60, %v2718_v0  ;;  %2429 = vst.msk [vmem:[#allocation2 + $0x3d0] sm:$0xff] %vm364_vm3, %v2397_v29  ;;  %v2821_v26 = vsel %vm364_vm3, %v2523_v57, -inf  ;;  %v24484_v0 = vld [vmem:[#allocation39_spill] sm:$0xff]  ;;  %v2012_v57 = vld [vmem:[#allocation2 + $0x2d0] sm:$0xff] }
 0x416   : > { %v20880_v15 = vrot.slane %v12498_v4, %v20124_v32  ;;  %v4770_v37 = vcombine.high %v4768_v31, %v4768_v31  ;;  %v4791_v10 = vrot.slane %v4769_v47, %v20124_v32  ;;  %v4720_v49 = vcombine.high %v4712_v14, %v4712_v14  ;;  %2822 = vmax.xlane.f32.xlu0 %v2821_v26 }
 0x417   : > { %24479 = vst [vmem:[#allocation200_spill] sm:$0xff] %v20871_v34  ;;  %24480 = vst [vmem:[#allocation201_spill] sm:$0xff] %v20874_v54  ;;  %v20884_v50 = vrot.slane %v17792_v27, %v20124_v32  ;;  %v12449_v21 = vcombine.low %v6205_v39, %v20865_v30  ;;  %v4777_v59 = vrot.slane %v4761_v62, %v20124_v32  ;;  %v2557_v27 = vld [vmem:[#allocation2 + $0x3b8] sm:$0xff] }
 0x418   : > { %24482 = vst [vmem:[#allocation42_spill] sm:$0xff] %v20880_v15  ;;  %v3665_v29 = vadd.f32 %v24484_v0, %v2715_v51  ;;  %v17790_v4 = vcombine.high %v6205_v39, %v20865_v30  ;;  %v20891_v60 = vrot.slane %v12447_v1, %v20124_v32  ;;  %v20894_v47 = vrot.slane %v17789_v42, %v20124_v32  ;;  %v2558_v15 = vld [vmem:[#allocation2 + $0x3c0] sm:$0xff]  ;;  %v2628_v39 = vpop.xlane.xlu1 %2627 }
 0x419   : > { %24483 = vst [vmem:[#allocation202_spill] sm:$0xff] %v20884_v50  ;;  %v4721_v26 = vcombine.high %v4719_v9, %v4719_v9  ;;  %v4784_v50 = vrot.slane %v4768_v31, %v20124_v32  ;;  %v6322_v34 = vcombine.high %v3666_v38, %v3666_v38  ;;  %v6329_v62 = vrot.slane %v3666_v38, %v20124_v32 }
 0x41a   : > { %24485 = vst [vmem:[#allocation39_spill] sm:$0xff] %v20891_v60  ;;  %24486 = vst [vmem:[#allocation203_spill] sm:$0xff] %v20894_v47  ;;  %v2045_v54 = vmax.f32 %v2013_v7, %v18470_v35  ;;  %v4798_v51 = vrot.slane %v4770_v37, %v20124_v32  ;;  %v11026_v0 = vcombine.low %v4777_v59, %v4791_v10  ;;  %v2526_v60 = vld [vmem:[#allocation2 + $0x2c0] sm:$0xff]  ;;  %v2926_v47 = vsel %vm364_vm3, %v2558_v15, -inf  ;;  %v24487_v7 = vld [vmem:[#allocation21_spill] sm:$0xff] }
 0x41b   : > { %v4742_v30 = vrot.slane %v4720_v49, %v20124_v32  ;;  %v2044_v1 = vmax.f32 %v2012_v57, %v1957_v19  ;;  %v6273_v55 = vcombine.high %v3665_v29, %v3665_v29  ;;  %v6280_v42 = vrot.slane %v3665_v29, %v20124_v32  ;;  %2927 = vmax.xlane.f32.xlu1 %v2926_v47  ;;  %v2625_v19 = vpop.xlane.xlu0 %2624 }
 0x41c   : > { %2077 = vst.msk [vmem:[#allocation2 + $0x2d8] sm:$0xff] %vm364_vm3, %v2045_v54  ;;  %v2923_v31 = vsel %vm364_vm3, %v2557_v27, -inf  ;;  %v17731_v63 = vcombine.high %v4777_v59, %v4791_v10  ;;  %v4728_v35 = vrot.slane %v4712_v14, %v20124_v32  ;;  %v4749_v38 = vrot.slane %v4721_v26, %v20124_v32  ;;  %v18553_v27 = vpop.f32.mrf.mxu1 }
 0x41d   : > { %2076 = vst.msk [vmem:[#allocation2 + $0x2d0] sm:$0xff] %vm364_vm3, %v2044_v1  ;;  %2924 = vmax.xlane.f32.xlu0 %v2923_v31  ;;  %v6336_v37 = vrot.slane %v6322_v34, %v20124_v32  ;;  %v6337_v49 = vcombine.high %v6329_v62, %v6329_v62  ;;  %v3636_v29 = vadd.f32 %v24487_v7, %v2628_v39  ;;  %v2830_v54 = vsel %vm364_vm3, %v2526_v60, -inf  ;;  %v24491_v31 = vld [vmem:[#allocation18_spill] sm:$0xff] }
 0x41e   : > { %v20911_v15 = vrot.slane %v12449_v21, %v20124_v32  ;;  %v11028_v10 = vcombine.low %v4784_v50, %v4798_v51  ;;  %v17732_v59 = vcombine.high %v4784_v50, %v4798_v51  ;;  %v4735_v14 = vrot.slane %v4719_v9, %v20124_v32 }
 0x41f   : > { %v20915_v57 = vrot.slane %v17790_v4, %v20124_v32  ;;  %v10977_v47 = vcombine.low %v4728_v35, %v4742_v30  ;;  %v6287_v26 = vrot.slane %v6273_v55, %v20124_v32  ;;  %v6288_v34 = vcombine.high %v6280_v42, %v6280_v42  ;;  %2831 = vmax.xlane.f32.xlu1 %v2830_v54 }
 0x420   : > { %24488 = vst [vmem:[#allocation21_spill] sm:$0xff] %v20911_v15  ;;  %v20919_v39 = vrot.slane %v11026_v0, %v20124_v32  ;;  %v17729_v1 = vcombine.high %v4728_v35, %v4742_v30  ;;  %v10979_v60 = vcombine.low %v4735_v14, %v4749_v38  ;;  %v3635_v21 = vadd.f32 %v24491_v31, %v2625_v19  ;;  %v2368_v31 = vld [vmem:[#allocation2 + $0x3e8] sm:$0xff] }
 0x421   : > { %24489 = vst [vmem:[#allocation204_spill] sm:$0xff] %v20915_v57  ;;  %v20923_v50 = vrot.slane %v17731_v63, %v20124_v32  ;;  %v6338_v9 = vcombine.high %v6336_v37, %v6336_v37  ;;  %v6359_v4 = vrot.slane %v6337_v49, %v20124_v32  ;;  %v4852_v51 = vcombine.high %v3636_v29, %v3636_v29  ;;  %v2320_v49 = vpop.f32.mrf.mxu1 }
 0x422   : > { %24490 = vst [vmem:[#allocation205_spill] sm:$0xff] %v20919_v39  ;;  %v20927_v7 = vrot.slane %v11028_v10, %v20124_v32  ;;  %v20930_v55 = vrot.slane %v17732_v59, %v20124_v32  ;;  %v17730_v0 = vcombine.high %v4735_v14, %v4749_v38  ;;  %v4859_v30 = vrot.slane %v3636_v29, %v20124_v32  ;;  %v2367_v39 = vld [vmem:[#allocation2 + $0x3e0] sm:$0xff] }
 0x423   : > { %24492 = vst [vmem:[#allocation18_spill] sm:$0xff] %v20923_v50  ;;  %v20934_v35 = vrot.slane %v10977_v47, %v20124_v32  ;;  %v6345_v19 = vrot.slane %v6329_v62, %v20124_v32  ;;  %v6289_v63 = vcombine.high %v6287_v26, %v6287_v26  ;;  %v6310_v54 = vrot.slane %v6288_v34, %v20124_v32 }
 0x424   : > { %24493 = vst [vmem:[#allocation206_spill] sm:$0xff] %v20927_v7  ;;  %24494 = vst [vmem:[#allocation207_spill] sm:$0xff] %v20930_v55  ;;  %v20939_v10 = vrot.slane %v17729_v1, %v20124_v32  ;;  %v20942_v59 = vrot.slane %v10979_v60, %v20124_v32  ;;  %v6296_v38 = vrot.slane %v6280_v42, %v20124_v32  ;;  %v2724_v55 = vpop.xlane.xlu1 %2723  ;;  %v2525_v1 = vld [vmem:[#allocation2 + $0x2b8] sm:$0xff] }
 0x425   : > { %24495 = vst [vmem:[#allocation208_spill] sm:$0xff] %v20934_v35  ;;  %v4803_v29 = vcombine.high %v3635_v21, %v3635_v21  ;;  %v6366_v14 = vrot.slane %v6338_v9, %v20124_v32  ;;  %v12594_v47 = vcombine.low %v6345_v19, %v6359_v4  ;;  %v17795_v7 = vcombine.high %v6345_v19, %v6359_v4 }
 0x426   : > { %24496 = vst [vmem:[#allocation209_spill] sm:$0xff] %v20939_v10  ;;  %24497 = vst [vmem:[#allocation210_spill] sm:$0xff] %v20942_v59  ;;  %v4866_v62 = vrot.slane %v4852_v51, %v20124_v32  ;;  %v4867_v34 = vcombine.high %v4859_v30, %v4859_v30  ;;  %v4810_v50 = vrot.slane %v3635_v21, %v20124_v32  ;;  %v24499_v59 = vld [vmem:[#allocation44_spill] sm:$0xff]  ;;  %v2721_v21 = vpop.xlane.xlu0 %2720 }
 0x427   : > { %v2400_v35 = vmax.f32 %v2368_v31, %v18553_v27  ;;  %v2399_v15 = vmax.f32 %v2367_v39, %v2320_v49  ;;  %v20949_v10 = vrot.slane %v17730_v0, %v20124_v32  ;;  %v6352_v60 = vrot.slane %v6336_v37, %v20124_v32  ;;  %v18473_v27 = vpop.f32.mrf.mxu0  ;;  %v2015_v31 = vld [vmem:[#allocation2 + $0x2e8] sm:$0xff] }
 0x428   : > { %v20953_v42 = vrot.slane %v6289_v63, %v20124_v32  ;;  %v12545_v9 = vcombine.low %v6296_v38, %v6310_v54  ;;  %v6303_v4 = vrot.slane %v6287_v26, %v20124_v32  ;;  %v17793_v19 = vcombine.high %v6296_v38, %v6310_v54  ;;  %v24503_v38 = vld [vmem:[#allocation41_spill] sm:$0xff] }
 0x429   : > { %24498 = vst [vmem:[#allocation211_spill] sm:$0xff] %v20949_v10  ;;  %v4817_v51 = vrot.slane %v4803_v29, %v20124_v32  ;;  %v3668_v57 = vadd.f32 %v24499_v59, %v2724_v55  ;;  %2432 = vst.msk [vmem:[#allocation2 + $0x3e8] sm:$0xff] %vm364_vm3, %v2400_v35  ;;  %v12596_v39 = vcombine.low %v6352_v60, %v6366_v14  ;;  %v2827_v63 = vsel %vm364_vm3, %v2525_v1, -inf }
 0x42a   : > { %2431 = vst.msk [vmem:[#allocation2 + $0x3e0] sm:$0xff] %vm364_vm3, %v2399_v15  ;;  %v17796_v0 = vcombine.high %v6352_v60, %v6366_v14  ;;  %v4868_v37 = vcombine.high %v4866_v62, %v4866_v62  ;;  %v20962_v49 = vrot.slane %v12594_v47, %v20124_v32  ;;  %v20965_v26 = vrot.slane %v17795_v7, %v20124_v32  ;;  %v1967_v7 = vpop.f32.mrf.mxu0 }
 0x42b   : > { %v4889_v55 = vrot.slane %v4867_v34, %v20124_v32  ;;  %v4818_v54 = vcombine.high %v4810_v50, %v4810_v50  ;;  %2828 = vmax.xlane.f32.xlu0 %v2827_v63  ;;  %v12547_v35 = vcombine.low %v6303_v4, %v20953_v42  ;;  %v17794_v15 = vcombine.high %v6303_v4, %v20953_v42  ;;  %v2559_v34 = vld [vmem:[#allocation2 + $0x3c8] sm:$0xff]  ;;  %v2634_v4 = vpop.xlane.xlu1 %2633 }
 0x42c   : > { %24500 = vst [vmem:[#allocation44_spill] sm:$0xff] %v20962_v49  ;;  %24501 = vst [vmem:[#allocation212_spill] sm:$0xff] %v20965_v26  ;;  %v20971_v59 = vrot.slane %v12545_v9, %v20124_v32  ;;  %v3667_v29 = vadd.f32 %v24503_v38, %v2721_v21  ;;  %v4875_v14 = vrot.slane %v4859_v30, %v20124_v32  ;;  %v2014_v49 = vld [vmem:[#allocation2 + $0x2e0] sm:$0xff]  ;;  %v2560_v26 = vld [vmem:[#allocation2 + $0x3d0] sm:$0xff]  ;;  %v18476_v12 = vpop.f32.mrf.mxu0 }
 0x42d   : > { %v4819_v47 = vcombine.high %v4817_v51, %v4817_v51  ;;  %v6420_v1 = vcombine.high %v3668_v57, %v3668_v57  ;;  %v2047_v60 = vmax.f32 %v2015_v31, %v18473_v27  ;;  %v20976_v63 = vrot.slane %v12596_v39, %v20124_v32 }
 0x42e   : > { %24502 = vst [vmem:[#allocation213_spill] sm:$0xff] %v20971_v59  ;;  %v20979_v10 = vrot.slane %v17796_v0, %v20124_v32  ;;  %v20982_v42 = vrot.slane %v17793_v19, %v20124_v32  ;;  %v4896_v9 = vrot.slane %v4868_v37, %v20124_v32  ;;  %v4882_v30 = vrot.slane %v4866_v62, %v20124_v32  ;;  %v24507_v62 = vld [vmem:[#allocation23_spill] sm:$0xff] }
 0x42f   : > { %24504 = vst [vmem:[#allocation41_spill] sm:$0xff] %v20976_v63  ;;  %v11124_v21 = vcombine.low %v4875_v14, %v4889_v55  ;;  %v4840_v27 = vrot.slane %v4818_v54, %v20124_v32  ;;  %v6427_v31 = vrot.slane %v3668_v57, %v20124_v32  ;;  %2079 = vst.msk [vmem:[#allocation2 + $0x2e8] sm:$0xff] %vm364_vm3, %v2047_v60  ;;  %v2932_v0 = vsel %vm364_vm3, %v2560_v26, -inf }
 0x430   : > { %24505 = vst [vmem:[#allocation214_spill] sm:$0xff] %v20979_v10  ;;  %24506 = vst [vmem:[#allocation215_spill] sm:$0xff] %v20982_v42  ;;  %v6371_v39 = vcombine.high %v3667_v29, %v3667_v29  ;;  %v2046_v38 = vmax.f32 %v2014_v49, %v1967_v7  ;;  %v2929_v63 = vsel %vm364_vm3, %v2559_v34, -inf  ;;  %v4826_v19 = vrot.slane %v4810_v50, %v20124_v32  ;;  %v2631_v34 = vpop.xlane.xlu0 %2630 }
 0x431   : > { %v4847_v37 = vrot.slane %v4819_v47, %v20124_v32  ;;  %v6434_v10 = vrot.slane %v6420_v1, %v20124_v32  ;;  %v3638_v59 = vadd.f32 %v24507_v62, %v2634_v4  ;;  %2933 = vmax.xlane.f32.xlu1 %v2932_v0  ;;  %v17735_v54 = vcombine.high %v4875_v14, %v4889_v55 }
 0x432   : > { %v11126_v42 = vcombine.low %v4882_v30, %v4896_v9  ;;  %v4833_v57 = vrot.slane %v4817_v51, %v20124_v32  ;;  %v6378_v60 = vrot.slane %v3667_v29, %v20124_v32  ;;  %2078 = vst.msk [vmem:[#allocation2 + $0x2e0] sm:$0xff] %vm364_vm3, %v2046_v38  ;;  %2930 = vmax.xlane.f32.xlu0 %v2929_v63  ;;  %v24513_v38 = vld [vmem:[#allocation20_spill] sm:$0xff] }
 0x433   : > { %v17736_v49 = vcombine.high %v4882_v30, %v4896_v9  ;;  %v11075_v26 = vcombine.low %v4826_v19, %v4840_v27  ;;  %v17733_v7 = vcombine.high %v4826_v19, %v4840_v27  ;;  %v6435_v50 = vcombine.high %v6427_v31, %v6427_v31  ;;  %v18556_v9 = vpop.f32.mrf.mxu1 }
 0x434   : > { %v20999_v47 = vrot.slane %v12547_v35, %v20124_v32  ;;  %v21002_v1 = vrot.slane %v17794_v15, %v20124_v32  ;;  %v21005_v55 = vrot.slane %v11124_v21, %v20124_v32  ;;  %v6385_v51 = vrot.slane %v6371_v39, %v20124_v32 }
 0x435   : > { %v11077_v29 = vcombine.low %v4833_v57, %v4847_v37  ;;  %v17734_v14 = vcombine.high %v4833_v57, %v4847_v37  ;;  %v6436_v4 = vcombine.high %v6434_v10, %v6434_v10  ;;  %v4950_v63 = vcombine.high %v3638_v59, %v3638_v59  ;;  %v2370_v37 = vld [vmem:[#allocation2 + $0x3f8] sm:$0xff] }
 0x436   : > { %24508 = vst [vmem:[#allocation23_spill] sm:$0xff] %v20999_v47  ;;  %24509 = vst [vmem:[#allocation216_spill] sm:$0xff] %v21002_v1  ;;  %v21009_v30 = vrot.slane %v17735_v54, %v20124_v32  ;;  %v21012_v27 = vrot.slane %v11126_v42, %v20124_v32  ;;  %v6386_v35 = vcombine.high %v6378_v60, %v6378_v60 }
 0x437   : > { %24510 = vst [vmem:[#allocation217_spill] sm:$0xff] %v21005_v55  ;;  %v3637_v15 = vadd.f32 %v24513_v38, %v2631_v34  ;;  %v21016_v0 = vrot.slane %v17736_v49, %v20124_v32  ;;  %v21019_v21 = vrot.slane %v11075_v26, %v20124_v32  ;;  %v21022_v39 = vrot.slane %v17733_v7, %v20124_v32  ;;  %v2330_v38 = vpop.f32.mrf.mxu1  ;;  %v2730_v55 = vpop.xlane.xlu1 %2729 }
 0x438   : > { %24511 = vst [vmem:[#allocation218_spill] sm:$0xff] %v21009_v30  ;;  %24512 = vst [vmem:[#allocation219_spill] sm:$0xff] %v21012_v27  ;;  %v6457_v19 = vrot.slane %v6435_v50, %v20124_v32  ;;  %v6443_v62 = vrot.slane %v6427_v31, %v20124_v32  ;;  %v6450_v42 = vrot.slane %v6434_v10, %v20124_v32  ;;  %v2369_v50 = vld [vmem:[#allocation2 + $0x3f0] sm:$0xff] }
 0x439   : > { %24514 = vst [vmem:[#allocation20_spill] sm:$0xff] %v21016_v0  ;;  %24515 = vst [vmem:[#allocation220_spill] sm:$0xff] %v21019_v21  ;;  %v6387_v54 = vcombine.high %v6385_v51, %v6385_v51  ;;  %v4957_v57 = vrot.slane %v3638_v59, %v20124_v32  ;;  %v21029_v34 = vrot.slane %v11077_v29, %v20124_v32  ;;  %v2528_v27 = vld [vmem:[#allocation2 + $0x2d0] sm:$0xff]  ;;  %v2727_v21 = vpop.xlane.xlu0 %2726 }
 0x43a   : > { %24516 = vst [vmem:[#allocation221_spill] sm:$0xff] %v21022_v39  ;;  %v21032_v49 = vrot.slane %v17734_v14, %v20124_v32  ;;  %v6464_v26 = vrot.slane %v6436_v4, %v20124_v32  ;;  %v4964_v7 = vrot.slane %v4950_v63, %v20124_v32  ;;  %v6394_v31 = vrot.slane %v6378_v60, %v20124_v32 }
 0x43b   : > { %24517 = vst [vmem:[#allocation222_spill] sm:$0xff] %v21029_v34  ;;  %v6408_v10 = vrot.slane %v6386_v35, %v20124_v32  ;;  %v4901_v0 = vcombine.high %v3637_v15, %v3637_v15  ;;  %v2402_v59 = vmax.f32 %v2370_v37, %v18556_v9  ;;  %v12692_v30 = vcombine.low %v6443_v62, %v6457_v19  ;;  %v24519_v9 = vld [vmem:[#allocation46_spill] sm:$0xff] }
 0x43c   : > { %24518 = vst [vmem:[#allocation223_spill] sm:$0xff] %v21032_v49  ;;  %v17799_v29 = vcombine.high %v6443_v62, %v6457_v19  ;;  %v6401_v34 = vrot.slane %v6385_v51, %v20124_v32  ;;  %v4908_v14 = vrot.slane %v3637_v15, %v20124_v32  ;;  %v2527_v49 = vld [vmem:[#allocation2 + $0x2c8] sm:$0xff]  ;;  %v6415_v4 = vrot.slane %v6387_v54, %v20124_v32  ;;  %v2017_v19 = vld [vmem:[#allocation2 + $0x2f8] sm:$0xff] }
 0x43d   : > { %v4965_v63 = vcombine.high %v4957_v57, %v4957_v57  ;;  %2434 = vst.msk [vmem:[#allocation2 + $0x3f8] sm:$0xff] %vm364_vm3, %v2402_v59  ;;  %v2401_v39 = vmax.f32 %v2369_v50, %v2330_v38  ;;  %v2836_v60 = vsel %vm364_vm3, %v2528_v27, -inf  ;;  %v12694_v35 = vcombine.low %v6450_v42, %v6464_v26 }
 0x43e   : > { %v17800_v47 = vcombine.high %v6450_v42, %v6464_v26  ;;  %v4966_v1 = vcombine.high %v4964_v7, %v4964_v7  ;;  %v3670_v37 = vadd.f32 %v24519_v9, %v2730_v55  ;;  %2837 = vmax.xlane.f32.xlu1 %v2836_v60  ;;  %v12643_v51 = vcombine.low %v6394_v31, %v6408_v10  ;;  %v24522_v26 = vld [vmem:[#allocation43_spill] sm:$0xff] }
 0x43f   : > { %v17797_v62 = vcombine.high %v6394_v31, %v6408_v10  ;;  %v4915_v15 = vrot.slane %v4901_v0, %v20124_v32  ;;  %2433 = vst.msk [vmem:[#allocation2 + $0x3f0] sm:$0xff] %vm364_vm3, %v2401_v39  ;;  %v2833_v54 = vsel %vm364_vm3, %v2527_v49, -inf  ;;  %v21048_v38 = vrot.slane %v12692_v30, %v20124_v32  ;;  %v2562_v9 = vld [vmem:[#allocation2 + $0x3e0] sm:$0xff] }
 0x440   : > { %v21051_v27 = vrot.slane %v17799_v29, %v20124_v32  ;;  %v4916_v42 = vcombine.high %v4908_v14, %v4908_v14  ;;  %v3669_v55 = vadd.f32 %v24522_v26, %v2727_v21  ;;  %2834 = vmax.xlane.f32.xlu0 %v2833_v54  ;;  %v12645_v50 = vcombine.low %v6401_v34, %v6415_v4 }
 0x441   : > { %24520 = vst [vmem:[#allocation46_spill] sm:$0xff] %v21048_v38  ;;  %v17798_v59 = vcombine.high %v6401_v34, %v6415_v4  ;;  %v4987_v31 = vrot.slane %v4965_v63, %v20124_v32  ;;  %v2049_v0 = vmax.f32 %v2017_v19, %v18476_v12  ;;  %v21056_v39 = vrot.slane %v12694_v35, %v20124_v32  ;;  %v1977_v12 = vpop.f32.mrf.mxu0  ;;  %v2016_v35 = vld [vmem:[#allocation2 + $0x2f0] sm:$0xff] }
 0x442   : > { %24521 = vst [vmem:[#allocation224_spill] sm:$0xff] %v21051_v27  ;;  %v21059_v49 = vrot.slane %v17800_v47, %v20124_v32  ;;  %v4994_v30 = vrot.slane %v4966_v1, %v20124_v32  ;;  %v6518_v10 = vcombine.high %v3670_v37, %v3670_v37  ;;  %v21063_v29 = vrot.slane %v12643_v51, %v20124_v32 }
 0x443   : > { %24523 = vst [vmem:[#allocation43_spill] sm:$0xff] %v21056_v39  ;;  %v21066_v21 = vrot.slane %v17797_v62, %v20124_v32  ;;  %v4973_v34 = vrot.slane %v4957_v57, %v20124_v32  ;;  %v4917_v4 = vcombine.high %v4915_v15, %v4915_v15  ;;  %2081 = vst.msk [vmem:[#allocation2 + $0x2f8] sm:$0xff] %vm364_vm3, %v2049_v0  ;;  %v2640_v0 = vpop.xlane.xlu1 %2639  ;;  %v2938_v38 = vsel %vm364_vm3, %v2562_v9, -inf }
 0x444   : > { %24524 = vst [vmem:[#allocation225_spill] sm:$0xff] %v21059_v49  ;;  %24525 = vst [vmem:[#allocation226_spill] sm:$0xff] %v21063_v29  ;;  %v4980_v63 = vrot.slane %v4964_v7, %v20124_v32  ;;  %v4938_v47 = vrot.slane %v4916_v42, %v20124_v32  ;;  %v6525_v60 = vrot.slane %v3670_v37, %v20124_v32  ;;  %v2561_v37 = vld [vmem:[#allocation2 + $0x3d8] sm:$0xff]  ;;  %2939 = vmax.xlane.f32.xlu1 %v2938_v38  ;;  %v2340_v38 = vld [vmem:[#allocation2 + $0x308] sm:$0xff] }
 0x445   : > { %v6469_v1 = vcombine.high %v3669_v55, %v3669_v55  ;;  %v21074_v19 = vrot.slane %v12645_v50, %v20124_v32  ;;  %v21077_v51 = vrot.slane %v17798_v59, %v20124_v32  ;;  %v11222_v57 = vcombine.low %v4973_v34, %v4987_v31  ;;  %v18511_v59 = vpop.f32.mrf.mxu0 }
 0x446   : > { %v4924_v62 = vrot.slane %v4908_v14, %v20124_v32  ;;  %v17739_v54 = vcombine.high %v4973_v34, %v4987_v31  ;;  %v11224_v26 = vcombine.low %v4980_v63, %v4994_v30  ;;  %v6532_v7 = vrot.slane %v6518_v10, %v20124_v32  ;;  %v2637_v10 = vpop.xlane.xlu0 %2636 }
 0x447   : > { %24526 = vst [vmem:[#allocation227_spill] sm:$0xff] %v21074_v19  ;;  %24527 = vst [vmem:[#allocation228_spill] sm:$0xff] %v21077_v51  ;;  %v6476_v42 = vrot.slane %v3669_v55, %v20124_v32  ;;  %v17740_v39 = vcombine.high %v4980_v63, %v4994_v30  ;;  %v21083_v49 = vrot.slane %v4917_v4, %v20124_v32  ;;  %v24529_v63 = vld [vmem:[#allocation25_spill] sm:$0xff] }
 0x448   : > { %v2048_v50 = vmax.f32 %v2016_v35, %v1977_v12  ;;  %v21087_v27 = vrot.slane %v4915_v15, %v20124_v32  ;;  %v11173_v14 = vcombine.low %v4924_v62, %v4938_v47  ;;  %v6533_v31 = vcombine.high %v6525_v60, %v6525_v60 }
 0x449   : > { %v6483_v34 = vrot.slane %v6469_v1, %v20124_v32  ;;  %v21091_v55 = vrot.slane %v11222_v57, %v20124_v32  ;;  %v17737_v30 = vcombine.high %v4924_v62, %v4938_v47  ;;  %v3640_v4 = vadd.f32 %v24529_v63, %v2640_v0  ;;  %v24533_v0 = vld [vmem:[#allocation22_spill] sm:$0xff] }
 0x44a   : > { %2080 = vst.msk [vmem:[#allocation2 + $0x2f0] sm:$0xff] %vm364_vm3, %v2048_v50  ;;  %v2935_v12 = vsel %vm364_vm3, %v2561_v37, -inf  ;;  %v21097_v35 = vrot.slane %v17739_v54, %v20124_v32  ;;  %v21100_v15 = vrot.slane %v11224_v26, %v20124_v32  ;;  %v6534_v9 = vcombine.high %v6532_v7, %v6532_v7  ;;  %v2180_v50 = vpop.f32.mrf.mxu0  ;;  %v2339_v54 = vld [vmem:[#allocation2 + $0x300] sm:$0xff] }
 0x44b   : > { %24528 = vst [vmem:[#allocation229_spill] sm:$0xff] %v21091_v55  ;;  %v6484_v1 = vcombine.high %v6476_v42, %v6476_v42  ;;  %2936 = vmax.xlane.f32.xlu0 %v2935_v12  ;;  %v21103_v57 = vrot.slane %v17740_v39, %v20124_v32  ;;  %v11175_v47 = vcombine.low %v21087_v27, %v21083_v49  ;;  %v2530_v39 = vld [vmem:[#allocation2 + $0x2e0] sm:$0xff] }
 0x44c   : > { %24530 = vst [vmem:[#allocation25_spill] sm:$0xff] %v21097_v35  ;;  %24531 = vst [vmem:[#allocation230_spill] sm:$0xff] %v21100_v15  ;;  %v6541_v62 = vrot.slane %v6525_v60, %v20124_v32  ;;  %v3639_v37 = vadd.f32 %v24533_v0, %v2637_v10  ;;  %v17738_v26 = vcombine.high %v21087_v27, %v21083_v49  ;;  %v2736_v49 = vpop.xlane.xlu1 %2735 }
 0x44d   : > { %24532 = vst [vmem:[#allocation231_spill] sm:$0xff] %v21103_v57  ;;  %v21112_v63 = vrot.slane %v11173_v14, %v20124_v32  ;;  %v6555_v12 = vrot.slane %v6533_v31, %v20124_v32  ;;  %v6485_v15 = vcombine.high %v6483_v34, %v6483_v34  ;;  %v2529_v57 = vld [vmem:[#allocation2 + $0x2d8] sm:$0xff]  ;;  %v21116_v55 = vrot.slane %v17737_v30, %v20124_v32 }
 0x44e   : > { %v6548_v60 = vrot.slane %v6532_v7, %v20124_v32  ;;  %v5048_v35 = vcombine.high %v3640_v4, %v3640_v4  ;;  %v2372_v10 = vmax.f32 %v2340_v38, %v18511_v59  ;;  %v6562_v0 = vrot.slane %v6534_v9, %v20124_v32  ;;  %v24536_v38 = vld [vmem:[#allocation48_spill] sm:$0xff] }
 0x44f   : > { %24534 = vst [vmem:[#allocation22_spill] sm:$0xff] %v21112_v63  ;;  %24535 = vst [vmem:[#allocation232_spill] sm:$0xff] %v21116_v55  ;;  %v6506_v19 = vrot.slane %v6484_v1, %v20124_v32  ;;  %v5055_v27 = vrot.slane %v3640_v4, %v20124_v32  ;;  %v2371_v14 = vmax.f32 %v2339_v54, %v2180_v50  ;;  %v2564_v63 = vld [vmem:[#allocation2 + $0x3f0] sm:$0xff]  ;;  %v2842_v30 = vsel %vm364_vm3, %v2530_v39, -inf  ;;  %v2733_v50 = vpop.xlane.xlu0 %2732 }
 0x450   : > { %v4999_v31 = vcombine.high %v3639_v37, %v3639_v37  ;;  %v5006_v51 = vrot.slane %v3639_v37, %v20124_v32  ;;  %2404 = vst.msk [vmem:[#allocation2 + $0x308] sm:$0xff] %vm364_vm3, %v2372_v10  ;;  %v2839_v7 = vsel %vm364_vm3, %v2529_v57, -inf  ;;  %v12790_v55 = vcombine.low %v6541_v62, %v6555_v12  ;;  %2843 = vmax.xlane.f32.xlu1 %v2842_v30 }
 0x451   : > { %v17803_v59 = vcombine.high %v6541_v62, %v6555_v12  ;;  %v6513_v9 = vrot.slane %v6485_v15, %v20124_v32  ;;  %2403 = vst.msk [vmem:[#allocation2 + $0x300] sm:$0xff] %vm364_vm3, %v2371_v14  ;;  %2840 = vmax.xlane.f32.xlu0 %v2839_v7  ;;  %v6492_v4 = vrot.slane %v6476_v42, %v20124_v32  ;;  %v2944_v54 = vsel %vm364_vm3, %v2564_v63, -inf  ;;  %v24539_v7 = vld [vmem:[#allocation45_spill] sm:$0xff] }
 0x452   : > { %v5062_v1 = vrot.slane %v5048_v35, %v20124_v32  ;;  %v3672_v37 = vadd.f32 %v24536_v38, %v2736_v49  ;;  %v12792_v39 = vcombine.low %v6548_v60, %v6562_v0  ;;  %v17804_v10 = vcombine.high %v6548_v60, %v6562_v0 }
 0x453   : > { %v6499_v57 = vrot.slane %v6483_v34, %v20124_v32  ;;  %v5063_v62 = vcombine.high %v5055_v27, %v5055_v27  ;;  %v21134_v15 = vrot.slane %v11175_v47, %v20124_v32  ;;  %v12741_v12 = vcombine.low %v6492_v4, %v6506_v19 }
 0x454   : > { %v5013_v14 = vrot.slane %v4999_v31, %v20124_v32  ;;  %v5014_v30 = vcombine.high %v5006_v51, %v5006_v51  ;;  %v21138_v42 = vrot.slane %v17738_v26, %v20124_v32  ;;  %v17801_v35 = vcombine.high %v6492_v4, %v6506_v19  ;;  %2945 = vmax.xlane.f32.xlu1 %v2944_v54  ;;  %v2646_v4 = vpop.xlane.xlu1 %2645 }
 0x455   : > { %24537 = vst [vmem:[#allocation48_spill] sm:$0xff] %v21134_v15  ;;  %v12743_v49 = vcombine.low %v6499_v57, %v6513_v9  ;;  %v3671_v38 = vadd.f32 %v24539_v7, %v2733_v50  ;;  %v21142_v63 = vrot.slane %v12790_v55, %v20124_v32  ;;  %v21145_v34 = vrot.slane %v17803_v59, %v20124_v32  ;;  %v2563_v7 = vld [vmem:[#allocation2 + $0x3e8] sm:$0xff] }
 0x456   : > { %24538 = vst [vmem:[#allocation233_spill] sm:$0xff] %v21138_v42  ;;  %v5064_v47 = vcombine.high %v5062_v1, %v5062_v1  ;;  %v6616_v60 = vcombine.high %v3672_v37, %v3672_v37  ;;  %v21148_v0 = vrot.slane %v12792_v39, %v20124_v32  ;;  %v21151_v31 = vrot.slane %v17804_v10, %v20124_v32  ;;  %v24568_v42 = vld [vmem:[#allocation26_spill] sm:$0xff] }
 0x457   : > { %24540 = vst [vmem:[#allocation45_spill] sm:$0xff] %v21142_v63  ;;  %24541 = vst [vmem:[#allocation234_spill] sm:$0xff] %v21145_v34  ;;  %v5085_v19 = vrot.slane %v5063_v62, %v20124_v32  ;;  %v6623_v26 = vrot.slane %v3672_v37, %v20124_v32  ;;  %v17802_v50 = vcombine.high %v6499_v57, %v6513_v9 }
 0x458   : > { %24542 = vst [vmem:[#allocation235_spill] sm:$0xff] %v21148_v0  ;;  %24543 = vst [vmem:[#allocation236_spill] sm:$0xff] %v21151_v31  ;;  %v21156_v55 = vrot.slane %v12741_v12, %v20124_v32  ;;  %v5015_v54 = vcombine.high %v5013_v14, %v5013_v14  ;;  %v5036_v59 = vrot.slane %v5014_v30, %v20124_v32  ;;  %v24547_v12 = vld [vmem:[#allocation27_spill] sm:$0xff] }
 0x459   : > { %v21160_v63 = vrot.slane %v17801_v35, %v20124_v32  ;;  %v21163_v39 = vrot.slane %v12743_v49, %v20124_v32  ;;  %v5071_v10 = vrot.slane %v5055_v27, %v20124_v32  ;;  %v6567_v62 = vcombine.high %v3671_v38, %v3671_v38 }
 0x45a   : > { %24544 = vst [vmem:[#allocation237_spill] sm:$0xff] %v21156_v55  ;;  %v5092_v37 = vrot.slane %v5064_v47, %v20124_v32  ;;  %v5022_v9 = vrot.slane %v5006_v51, %v20124_v32  ;;  %v6630_v57 = vrot.slane %v6616_v60, %v20124_v32  ;;  %v3642_v0 = vadd.f32 %v24547_v12, %v2646_v4 }
 0x45b   : > { %24545 = vst [vmem:[#allocation238_spill] sm:$0xff] %v21160_v63  ;;  %24546 = vst [vmem:[#allocation239_spill] sm:$0xff] %v21163_v39  ;;  %v11320_v31 = vcombine.low %v5071_v10, %v5085_v19  ;;  %v17743_v30 = vcombine.high %v5071_v10, %v5085_v19  ;;  %v6631_v34 = vcombine.high %v6623_v26, %v6623_v26  ;;  %v2941_v35 = vsel %vm364_vm3, %v2563_v7, -inf  ;;  %v2643_v63 = vpop.xlane.xlu0 %2642 }
 0x45c   : > { %v5078_v55 = vrot.slane %v5062_v1, %v20124_v32  ;;  %v5043_v49 = vrot.slane %v5015_v54, %v20124_v32  ;;  %v11271_v39 = vcombine.low %v5022_v9, %v5036_v59  ;;  %v6574_v27 = vrot.slane %v3671_v38, %v20124_v32  ;;  %2942 = vmax.xlane.f32.xlu0 %v2941_v35  ;;  %v24551_v35 = vld [vmem:[#allocation24_spill] sm:$0xff] }
 0x45d   : > { %v21175_v51 = vrot.slane %v17802_v50, %v20124_v32  ;;  %v5029_v47 = vrot.slane %v5013_v14, %v20124_v32  ;;  %v17741_v60 = vcombine.high %v5022_v9, %v5036_v59  ;;  %v6581_v19 = vrot.slane %v6567_v62, %v20124_v32  ;;  %v2742_v9 = vpop.xlane.xlu1 %2741 }
 0x45e   : > { %v11322_v4 = vcombine.low %v5078_v55, %v5092_v37  ;;  %v17744_v10 = vcombine.high %v5078_v55, %v5092_v37  ;;  %v6632_v7 = vcombine.high %v6630_v57, %v6630_v57  ;;  %v5146_v12 = vcombine.high %v3642_v0, %v3642_v0 }
 0x45f   : > { %24548 = vst [vmem:[#allocation27_spill] sm:$0xff] %v21175_v51  ;;  %v21180_v1 = vrot.slane %v11320_v31, %v20124_v32  ;;  %v21183_v54 = vrot.slane %v17743_v30, %v20124_v32  ;;  %v6653_v38 = vrot.slane %v6631_v34, %v20124_v32  ;;  %v3641_v50 = vadd.f32 %v24551_v35, %v2643_v63  ;;  %v2532_v30 = vld [vmem:[#allocation2 + $0x2f0] sm:$0xff] }
 0x460   : > { %v11273_v51 = vcombine.low %v5029_v47, %v5043_v49  ;;  %v17742_v15 = vcombine.high %v5029_v47, %v5043_v49  ;;  %v21188_v14 = vrot.slane %v11271_v39, %v20124_v32  ;;  %v6582_v59 = vcombine.high %v6574_v27, %v6574_v27 }
 0x461   : > { %24549 = vst [vmem:[#allocation240_spill] sm:$0xff] %v21180_v1  ;;  %24550 = vst [vmem:[#allocation241_spill] sm:$0xff] %v21183_v54  ;;  %v21191_v55 = vrot.slane %v17741_v60, %v20124_v32  ;;  %v6639_v62 = vrot.slane %v6623_v26, %v20124_v32  ;;  %v6583_v31 = vcombine.high %v6581_v19, %v6581_v19  ;;  %v2531_v1 = vld [vmem:[#allocation2 + $0x2e8] sm:$0xff]  ;;  %v24556_v54 = vld [vmem:[#allocation50_spill] sm:$0xff] }
 0x462   : > { %24552 = vst [vmem:[#allocation24_spill] sm:$0xff] %v21188_v14  ;;  %v5153_v37 = vrot.slane %v3642_v0, %v20124_v32  ;;  %v21196_v34 = vrot.slane %v11322_v4, %v20124_v32  ;;  %v21199_v63 = vrot.slane %v17744_v10, %v20124_v32  ;;  %v6660_v39 = vrot.slane %v6632_v7, %v20124_v32 }
 0x463   : > { %24553 = vst [vmem:[#allocation242_spill] sm:$0xff] %v21191_v55  ;;  %v5160_v49 = vrot.slane %v5146_v12, %v20124_v32  ;;  %v6646_v47 = vrot.slane %v6630_v57, %v20124_v32  ;;  %v12888_v60 = vcombine.low %v6639_v62, %v6653_v38  ;;  %v17807_v26 = vcombine.high %v6639_v62, %v6653_v38 }
 0x464   : > { %24554 = vst [vmem:[#allocation243_spill] sm:$0xff] %v21196_v34  ;;  %24555 = vst [vmem:[#allocation244_spill] sm:$0xff] %v21199_v63  ;;  %v5097_v35 = vcombine.high %v3641_v50, %v3641_v50  ;;  %v6604_v0 = vrot.slane %v6582_v59, %v20124_v32  ;;  %v3674_v14 = vadd.f32 %v24556_v54, %v2742_v9  ;;  %v2848_v55 = vsel %vm364_vm3, %v2532_v30, -inf  ;;  %v2739_v63 = vpop.xlane.xlu0 %2738 }
 0x465   : > { %v2845_v4 = vsel %vm364_vm3, %v2531_v1, -inf  ;;  %v21209_v10 = vrot.slane %v11273_v51, %v20124_v32  ;;  %v6611_v7 = vrot.slane %v6583_v31, %v20124_v32  ;;  %v5161_v34 = vcombine.high %v5153_v37, %v5153_v37  ;;  %2849 = vmax.xlane.f32.xlu1 %v2848_v55 }
 0x466   : > { %v5104_v12 = vrot.slane %v3641_v50, %v20124_v32  ;;  %v12890_v57 = vcombine.low %v6646_v47, %v6660_v39  ;;  %v17808_v38 = vcombine.high %v6646_v47, %v6660_v39  ;;  %v6590_v62 = vrot.slane %v6574_v27, %v20124_v32  ;;  %2846 = vmax.xlane.f32.xlu0 %v2845_v4  ;;  %v2534_v27 = vld [vmem:[#allocation2 + $0x300] sm:$0xff] }
 0x467   : > { %24557 = vst [vmem:[#allocation50_spill] sm:$0xff] %v21209_v10  ;;  %v5162_v59 = vcombine.high %v5160_v49, %v5160_v49  ;;  %v21215_v54 = vrot.slane %v17742_v15, %v20124_v32  ;;  %v21218_v1 = vrot.slane %v12888_v60, %v20124_v32  ;;  %v6597_v51 = vrot.slane %v6581_v19, %v20124_v32  ;;  %v24561_v15 = vld [vmem:[#allocation47_spill] sm:$0xff] }
 0x468   : > { %v5111_v31 = vrot.slane %v5097_v35, %v20124_v32  ;;  %v21223_v50 = vrot.slane %v17807_v26, %v20124_v32  ;;  %v12839_v55 = vcombine.low %v6590_v62, %v6604_v0  ;;  %v17805_v9 = vcombine.high %v6590_v62, %v6604_v0 }
 0x469   : > { %24558 = vst [vmem:[#allocation245_spill] sm:$0xff] %v21215_v54  ;;  %24559 = vst [vmem:[#allocation246_spill] sm:$0xff] %v21218_v1  ;;  %v6714_v30 = vcombine.high %v3674_v14, %v3674_v14  ;;  %v12841_v39 = vcombine.low %v6597_v51, %v6611_v7  ;;  %v5183_v47 = vrot.slane %v5161_v34, %v20124_v32  ;;  %v2565_v34 = vld [vmem:[#allocation2 + $0x3f8] sm:$0xff] }
 0x46a   : > { %24560 = vst [vmem:[#allocation247_spill] sm:$0xff] %v21223_v50  ;;  %v5112_v4 = vcombine.high %v5104_v12, %v5104_v12  ;;  %v3673_v10 = vadd.f32 %v24561_v15, %v2739_v63  ;;  %v21228_v60 = vrot.slane %v12890_v57, %v20124_v32  ;;  %v21231_v19 = vrot.slane %v17808_v38, %v20124_v32 }
 0x46b   : > { %v5190_v35 = vrot.slane %v5162_v59, %v20124_v32  ;;  %v6721_v26 = vrot.slane %v3674_v14, %v20124_v32  ;;  %v17806_v1 = vcombine.high %v6597_v51, %v6611_v7  ;;  %v5169_v0 = vrot.slane %v5153_v37, %v20124_v32  ;;  %v2652_v59 = vpop.xlane.xlu1 %2651 }
 0x46c   : > { %24562 = vst [vmem:[#allocation47_spill] sm:$0xff] %v21228_v60  ;;  %24563 = vst [vmem:[#allocation248_spill] sm:$0xff] %v21231_v19  ;;  %v5113_v62 = vcombine.high %v5111_v31, %v5111_v31  ;;  %v2854_v50 = vsel %vm364_vm3, %v2534_v27, -inf  ;;  %v21238_v54 = vrot.slane %v12839_v55, %v20124_v32  ;;  %v21241_v63 = vrot.slane %v17805_v9, %v20124_v32  ;;  %v2649_v60 = vpop.xlane.xlu0 %2648  ;;  %v2533_v19 = vld [vmem:[#allocation2 + $0x2f8] sm:$0xff] }
 0x46d   : > { %v5176_v57 = vrot.slane %v5160_v49, %v20124_v32  ;;  %v6728_v38 = vrot.slane %v6714_v30, %v20124_v32  ;;  %2855 = vmax.xlane.f32.xlu1 %v2854_v50  ;;  %v21246_v14 = vrot.slane %v12841_v39, %v20124_v32  ;;  %v11418_v37 = vcombine.low %v5169_v0, %v5183_v47 }
 0x46e   : > { %24564 = vst [vmem:[#allocation249_spill] sm:$0xff] %v21238_v54  ;;  %24565 = vst [vmem:[#allocation250_spill] sm:$0xff] %v21241_v63  ;;  %v5134_v7 = vrot.slane %v5112_v4, %v20124_v32  ;;  %v6665_v51 = vcombine.high %v3673_v10, %v3673_v10  ;;  %v17747_v27 = vcombine.high %v5169_v0, %v5183_v47  ;;  %v2947_v9 = vsel %vm364_vm3, %v2565_v34, -inf  ;;  %v24567_v54 = vld [vmem:[#allocation29_spill] sm:$0xff] }
 0x46f   : > { %24566 = vst [vmem:[#allocation251_spill] sm:$0xff] %v21246_v14  ;;  %v11420_v15 = vcombine.low %v5176_v57, %v5190_v35  ;;  %v6729_v55 = vcombine.high %v6721_v26, %v6721_v26  ;;  %v5120_v49 = vrot.slane %v5104_v12, %v20124_v32  ;;  %v5141_v30 = vrot.slane %v5113_v62, %v20124_v32 }
 0x470   : > { %v6672_v50 = vrot.slane %v3673_v10, %v20124_v32  ;;  %v3644_v39 = vadd.f32 %v24567_v54, %v2652_v59  ;;  %2948 = vmax.xlane.f32.xlu0 %v2947_v9  ;;  %v21255_v14 = vrot.slane %v17806_v1, %v20124_v32  ;;  %v17748_v4 = vcombine.high %v5176_v57, %v5190_v35 }
 0x471   : > { %v5127_v47 = vrot.slane %v5111_v31, %v20124_v32  ;;  %v6730_v0 = vcombine.high %v6728_v38, %v6728_v38  ;;  %v11369_v63 = vcombine.low %v5120_v49, %v5134_v7  ;;  %v6679_v34 = vrot.slane %v6665_v51, %v20124_v32  ;;  %v2748_v51 = vpop.xlane.xlu1 %2747 }
 0x472   : > { %v3643_v29 = vadd.f32 %v24568_v42, %v2649_v60  ;;  %v2851_v12 = vsel %vm364_vm3, %v2533_v19, -inf  ;;  %v21262_v62 = vrot.slane %v11418_v37, %v20124_v32  ;;  %v21265_v10 = vrot.slane %v17747_v27, %v20124_v32 }
 0x473   : > { %v21268_v54 = vrot.slane %v11420_v15, %v20124_v32  ;;  %v6751_v1 = vrot.slane %v6729_v55, %v20124_v32  ;;  %v17745_v31 = vcombine.high %v5120_v49, %v5134_v7  ;;  %v11371_v35 = vcombine.low %v5127_v47, %v5141_v30 }
 0x474   : > { %24569 = vst [vmem:[#allocation29_spill] sm:$0xff] %v21262_v62  ;;  %24570 = vst [vmem:[#allocation26_spill] sm:$0xff] %v21265_v10  ;;  %v6680_v57 = vcombine.high %v6672_v50, %v6672_v50  ;;  %v5244_v59 = vcombine.high %v3644_v39, %v3644_v39  ;;  %2852 = vmax.xlane.f32.xlu0 %v2851_v12  ;;  %v17746_v42 = vcombine.high %v5127_v47, %v5141_v30  ;;  %v24574_v12 = vld [vmem:[#allocation52_spill] sm:$0xff] }
 0x475   : > { %24571 = vst [vmem:[#allocation252_spill] sm:$0xff] %v21268_v54  ;;  %v6737_v60 = vrot.slane %v6721_v26, %v20124_v32  ;;  %v6758_v19 = vrot.slane %v6730_v0, %v20124_v32  ;;  %v5251_v37 = vrot.slane %v3644_v39, %v20124_v32  ;;  %v21275_v27 = vrot.slane %v17748_v4, %v20124_v32 }
 0x476   : > { %v21278_v15 = vrot.slane %v11369_v63, %v20124_v32  ;;  %v6681_v55 = vcombine.high %v6679_v34, %v6679_v34  ;;  %v5195_v7 = vcombine.high %v3643_v29, %v3643_v29  ;;  %v6744_v9 = vrot.slane %v6728_v38, %v20124_v32  ;;  %v2745_v63 = vpop.xlane.xlu0 %2744 }
 0x477   : > { %24572 = vst [vmem:[#allocation253_spill] sm:$0xff] %v21275_v27  ;;  %v12986_v49 = vcombine.low %v6737_v60, %v6751_v1  ;;  %v17811_v54 = vcombine.high %v6737_v60, %v6751_v1  ;;  %v3676_v30 = vadd.f32 %v24574_v12, %v2748_v51  ;;  %v21283_v26 = vrot.slane %v17745_v31, %v20124_v32 }
 0x478   : > { %24573 = vst [vmem:[#allocation254_spill] sm:$0xff] %v21278_v15  ;;  %v21286_v47 = vrot.slane %v11371_v35, %v20124_v32  ;;  %v6702_v39 = vrot.slane %v6680_v57, %v20124_v32  ;;  %v5258_v4 = vrot.slane %v5244_v59, %v20124_v32  ;;  %v21291_v0 = vrot.slane %v17746_v42, %v20124_v32  ;;  %v24580_v42 = vld [vmem:[#allocation49_spill] sm:$0xff] }
 0x479   : > { %24575 = vst [vmem:[#allocation52_spill] sm:$0xff] %v21283_v26  ;;  %v12988_v27 = vcombine.low %v6744_v9, %v6758_v19  ;;  %v5259_v38 = vcombine.high %v5251_v37, %v5251_v37  ;;  %v5202_v1 = vrot.slane %v3643_v29, %v20124_v32  ;;  %v17812_v60 = vcombine.high %v6744_v9, %v6758_v19 }
 0x47a   : > { %24576 = vst [vmem:[#allocation255_spill] sm:$0xff] %v21286_v47  ;;  %24577 = vst [vmem:[#allocation256_spill] sm:$0xff] %v21291_v0  ;;  %v6688_v51 = vrot.slane %v6672_v50, %v20124_v32  ;;  %v6709_v31 = vrot.slane %v6681_v55, %v20124_v32  ;;  %v5209_v35 = vrot.slane %v5195_v7, %v20124_v32 }
 0x47b   : > { %v21298_v12 = vrot.slane %v12986_v49, %v20124_v32  ;;  %v21301_v57 = vrot.slane %v17811_v54, %v20124_v32  ;;  %v6812_v59 = vcombine.high %v3676_v30, %v3676_v30  ;;  %v3675_v62 = vadd.f32 %v24580_v42, %v2745_v63  ;;  %v2658_v49 = vpop.xlane.xlu1 %2657 }
 0x47c   : > { %v6695_v10 = vrot.slane %v6679_v34, %v20124_v32  ;;  %v12937_v47 = vcombine.low %v6688_v51, %v6702_v39  ;;  %v17809_v29 = vcombine.high %v6688_v51, %v6702_v39  ;;  %v5260_v19 = vcombine.high %v5258_v4, %v5258_v4  ;;  %v2535_v34 = vld [vmem:[#allocation2 + $0x308] sm:$0xff] }
 0x47d   : > { %24578 = vst [vmem:[#allocation257_spill] sm:$0xff] %v21298_v12  ;;  %24579 = vst [vmem:[#allocation258_spill] sm:$0xff] %v21301_v57  ;;  %v21306_v50 = vrot.slane %v12988_v27, %v20124_v32  ;;  %v5281_v55 = vrot.slane %v5259_v38, %v20124_v32  ;;  %v5210_v7 = vcombine.high %v5202_v1, %v5202_v1 }
 0x47e   : > { %v6819_v9 = vrot.slane %v3676_v30, %v20124_v32  ;;  %v21311_v54 = vrot.slane %v17812_v60, %v20124_v32  ;;  %v12939_v12 = vcombine.low %v6695_v10, %v6709_v31  ;;  %v5267_v63 = vrot.slane %v5251_v37, %v20124_v32 }
 0x47f   : > { %24581 = vst [vmem:[#allocation49_spill] sm:$0xff] %v21306_v50  ;;  %v5211_v42 = vcombine.high %v5209_v35, %v5209_v35  ;;  %v17810_v57 = vcombine.high %v6695_v10, %v6709_v31  ;;  %v5274_v39 = vrot.slane %v5258_v4, %v20124_v32  ;;  %v6826_v27 = vrot.slane %v6812_v59, %v20124_v32  ;;  %v24585_v50 = vld [vmem:[#allocation31_spill] sm:$0xff] }
 0x480   : > { %24582 = vst [vmem:[#allocation259_spill] sm:$0xff] %v21311_v54  ;;  %v6763_v51 = vcombine.high %v3675_v62, %v3675_v62  ;;  %v21317_v38 = vrot.slane %v12937_v47, %v20124_v32  ;;  %v21320_v30 = vrot.slane %v17809_v29, %v20124_v32  ;;  %v5288_v60 = vrot.slane %v5260_v19, %v20124_v32  ;;  %v2655_v29 = vpop.xlane.xlu0 %2654 }
 0x481   : > { %v3646_v54 = vadd.f32 %v24585_v50, %v2658_v49  ;;  %v11516_v0 = vcombine.low %v5267_v63, %v5281_v55  ;;  %v5232_v37 = vrot.slane %v5210_v7, %v20124_v32  ;;  %v6827_v15 = vcombine.high %v6819_v9, %v6819_v9 }
 0x482   : > { %24583 = vst [vmem:[#allocation260_spill] sm:$0xff] %v21317_v38  ;;  %24584 = vst [vmem:[#allocation261_spill] sm:$0xff] %v21320_v30  ;;  %v2857_v10 = vsel %vm364_vm3, %v2535_v34, -inf  ;;  %v21327_v4 = vrot.slane %v12939_v12, %v20124_v32  ;;  %v17751_v31 = vcombine.high %v5267_v63, %v5281_v55  ;;  %v5239_v47 = vrot.slane %v5211_v42, %v20124_v32  ;;  %v24589_v42 = vld [vmem:[#allocation28_spill] sm:$0xff] }
 0x483   : > { %v6770_v59 = vrot.slane %v3675_v62, %v20124_v32  ;;  %2858 = vmax.xlane.f32.xlu0 %v2857_v10  ;;  %v21332_v19 = vrot.slane %v17810_v57, %v20124_v32  ;;  %v5218_v50 = vrot.slane %v5202_v1, %v20124_v32  ;;  %v6828_v49 = vcombine.high %v6826_v27, %v6826_v27 }
 0x484   : > { %24586 = vst [vmem:[#allocation31_spill] sm:$0xff] %v21327_v4  ;;  %v6777_v7 = vrot.slane %v6763_v51, %v20124_v32  ;;  %v11518_v38 = vcombine.low %v5274_v39, %v5288_v60  ;;  %v17752_v34 = vcombine.high %v5274_v39, %v5288_v60  ;;  %v5225_v12 = vrot.slane %v5209_v35, %v20124_v32 }
 0x485   : > { %24587 = vst [vmem:[#allocation262_spill] sm:$0xff] %v21332_v19  ;;  %v5342_v4 = vcombine.high %v3646_v54, %v3646_v54  ;;  %v21338_v55 = vrot.slane %v11516_v0, %v20124_v32  ;;  %v11467_v63 = vcombine.low %v5218_v50, %v5232_v37  ;;  %v6849_v62 = vrot.slane %v6827_v15, %v20124_v32 }
 0x486   : > { %v3645_v10 = vadd.f32 %v24589_v42, %v2655_v29  ;;  %v17749_v57 = vcombine.high %v5218_v50, %v5232_v37  ;;  %v11469_v19 = vcombine.low %v5225_v12, %v5239_v47  ;;  %v6835_v1 = vrot.slane %v6819_v9, %v20124_v32 }
 0x487   : > { %24588 = vst [vmem:[#allocation263_spill] sm:$0xff] %v21338_v55  ;;  %v6778_v30 = vcombine.high %v6770_v59, %v6770_v59  ;;  %v17750_v26 = vcombine.high %v5225_v12, %v5239_v47  ;;  %v6856_v51 = vrot.slane %v6828_v49, %v20124_v32  ;;  %v6779_v39 = vcombine.high %v6777_v7, %v6777_v7 }
 0x488   : > { %v5349_v35 = vrot.slane %v3646_v54, %v20124_v32  ;;  %v21346_v60 = vrot.slane %v17751_v31, %v20124_v32  ;;  %v21349_v0 = vrot.slane %v11518_v38, %v20124_v32  ;;  %v21352_v15 = vrot.slane %v17752_v34, %v20124_v32  ;;  %v2754_v34 = vpop.xlane.xlu1 %2753 }
 0x489   : > { %v5356_v37 = vrot.slane %v5342_v4, %v20124_v32  ;;  %v21356_v9 = vrot.slane %v11467_v63, %v20124_v32  ;;  %v6842_v47 = vrot.slane %v6826_v27, %v20124_v32  ;;  %v13084_v29 = vcombine.low %v6835_v1, %v6849_v62  ;;  %v2751_v27 = vpop.xlane.xlu0 %2750 }
 0x48a   : > { %24590 = vst [vmem:[#allocation28_spill] sm:$0xff] %v21346_v60  ;;  %24591 = vst [vmem:[#allocation264_spill] sm:$0xff] %v21349_v0  ;;  %v5293_v50 = vcombine.high %v3645_v10, %v3645_v10  ;;  %v21360_v54 = vrot.slane %v17749_v57, %v20124_v32  ;;  %v21363_v31 = vrot.slane %v11469_v19, %v20124_v32 }
 0x48b   : > { %24592 = vst [vmem:[#allocation265_spill] sm:$0xff] %v21352_v15  ;;  %v17815_v38 = vcombine.high %v6835_v1, %v6849_v62  ;;  %v6800_v49 = vrot.slane %v6778_v30, %v20124_v32  ;;  %v21367_v12 = vrot.slane %v17750_v26, %v20124_v32  ;;  %v13086_v4 = vcombine.low %v6842_v47, %v6856_v51  ;;  %v24596_v26 = vld [vmem:[#allocation54_spill] sm:$0xff] }
 0x48c   : > { %24593 = vst [vmem:[#allocation266_spill] sm:$0xff] %v21363_v31  ;;  %v6807_v63 = vrot.slane %v6779_v39, %v20124_v32  ;;  %v5357_v42 = vcombine.high %v5349_v35, %v5349_v35  ;;  %v17816_v0 = vcombine.high %v6842_v47, %v6856_v51  ;;  %v6786_v15 = vrot.slane %v6770_v59, %v20124_v32  ;;  %v24598_v51 = vld [vmem:[#allocation51_spill] sm:$0xff] }
 0x48d   : > { %24594 = vst [vmem:[#allocation267_spill] sm:$0xff] %v21367_v12  ;;  %v5358_v57 = vcombine.high %v5356_v37, %v5356_v37  ;;  %v5300_v55 = vrot.slane %v3645_v10, %v20124_v32  ;;  %v21373_v19 = vrot.slane %v13084_v29, %v20124_v32  ;;  %v6793_v30 = vrot.slane %v6777_v7, %v20124_v32 }
 0x48e   : > { %v5307_v62 = vrot.slane %v5293_v50, %v20124_v32  ;;  %v3678_v1 = vadd.f32 %v24596_v26, %v2754_v34  ;;  %v21379_v60 = vrot.slane %v17815_v38, %v20124_v32  ;;  %v13035_v39 = vcombine.low %v6786_v15, %v6800_v49  ;;  %v2760_v26 = vpop.xlane.xlu1 %2759 }
 0x48f   : > { %24595 = vst [vmem:[#allocation268_spill] sm:$0xff] %v21373_v19  ;;  %v17813_v31 = vcombine.high %v6786_v15, %v6800_v49  ;;  %v3677_v47 = vadd.f32 %v24598_v51, %v2751_v27  ;;  %v21383_v59 = vrot.slane %v13086_v4, %v20124_v32  ;;  %v13037_v10 = vcombine.low %v6793_v30, %v6807_v63 }
 0x490   : > { %24597 = vst [vmem:[#allocation54_spill] sm:$0xff] %v21379_v60  ;;  %v17814_v12 = vcombine.high %v6793_v30, %v6807_v63  ;;  %v5379_v29 = vrot.slane %v5357_v42, %v20124_v32  ;;  %v21387_v7 = vrot.slane %v17816_v0, %v20124_v32  ;;  %v5386_v50 = vrot.slane %v5358_v57, %v20124_v32 }
 0x491   : > { %24599 = vst [vmem:[#allocation51_spill] sm:$0xff] %v21383_v59  ;;  %v5308_v34 = vcombine.high %v5300_v55, %v5300_v55  ;;  %v10226_v38 = vcombine.low %v20256_v2, %v20262_v33  ;;  %v5365_v15 = vrot.slane %v5349_v35, %v20124_v32  ;;  %v5309_v49 = vcombine.high %v5307_v62, %v5307_v62 }
 0x492   : > { %24600 = vst [vmem:[#allocation269_spill] sm:$0xff] %v21387_v7  ;;  %v6910_v27 = vcombine.high %v3678_v1, %v3678_v1  ;;  %v10225_v4 = vcombine.low %v20238_v11, %v20241_v13  ;;  %v21396_v63 = vrot.slane %v13035_v39, %v20124_v32  ;;  %v5372_v0 = vrot.slane %v5356_v37, %v20124_v32  ;;  %v24602_v11 = vld [vmem:[#allocation56_spill] sm:$0xff] }
 0x493   : > { %v6917_v42 = vrot.slane %v3678_v1, %v20124_v32  ;;  %v6861_v57 = vcombine.high %v3677_v47, %v3677_v47  ;;  %v21401_v30 = vrot.slane %v17813_v31, %v20124_v32  ;;  %v21404_v2 = vrot.slane %v13037_v10, %v20124_v32 }
 0x494   : > { %v11614_v33 = vcombine.low %v5365_v15, %v5379_v29  ;;  %v17755_v35 = vcombine.high %v5365_v15, %v5379_v29  ;;  %v11616_v51 = vcombine.low %v5372_v0, %v5386_v50  ;;  %v5330_v59 = vrot.slane %v5308_v34, %v20124_v32 }
 0x495   : > { %24601 = vst [vmem:[#allocation270_spill] sm:$0xff] %v21404_v2  ;;  %v3680_v13 = vadd.f32 %v24602_v11, %v2760_v26  ;;  %v10240_v39 = vrot.slane %v10226_v38, %v20124_v32  ;;  %v21410_v37 = vrot.slane %v17814_v12, %v20124_v32  ;;  %v5337_v1 = vrot.slane %v5309_v49, %v20124_v32  ;;  %v2661_v38 = vpop.xlane.xlu0 %2660 }
 0x496   : > { %v6924_v31 = vrot.slane %v6910_v27, %v20124_v32  ;;  %v10233_v7 = vrot.slane %v10225_v4, %v20124_v32  ;;  %v5316_v10 = vrot.slane %v5300_v55, %v20124_v32  ;;  %v6925_v19 = vcombine.high %v6917_v42, %v6917_v42 }
 0x497   : > { %v6868_v29 = vrot.slane %v3677_v47, %v20124_v32  ;;  %v6875_v34 = vrot.slane %v6861_v57, %v20124_v32  ;;  %v17756_v15 = vcombine.high %v5372_v0, %v5386_v50  ;;  %v21419_v26 = vrot.slane %v11614_v33, %v20124_v32 }
 0x498   : > { %v5323_v12 = vrot.slane %v5307_v62, %v20124_v32  ;;  %v10241_v11 = vcombine.low %v10233_v7, %v10240_v39  ;;  %v21423_v49 = vrot.slane %v17755_v35, %v20124_v32  ;;  %v21426_v27 = vrot.slane %v11616_v51, %v20124_v32  ;;  %v24606_v62 = vld [vmem:[#allocation30_spill] sm:$0xff] }
 0x499   : > { %24603 = vst [vmem:[#allocation56_spill] sm:$0xff] %v21419_v26  ;;  %v11565_v55 = vcombine.low %v5316_v10, %v5330_v59  ;;  %v7008_v4 = vcombine.high %v3680_v13, %v3680_v13  ;;  %v17753_v60 = vcombine.high %v5316_v10, %v5330_v59  ;;  %v6926_v57 = vcombine.high %v6924_v31, %v6924_v31 }
 0x49a   : > { %24604 = vst [vmem:[#allocation271_spill] sm:$0xff] %v21423_v49  ;;  %24605 = vst [vmem:[#allocation272_spill] sm:$0xff] %v21426_v27  ;;  %v11567_v47 = vcombine.low %v5323_v12, %v5337_v1  ;;  %v17754_v2 = vcombine.high %v5323_v12, %v5337_v1  ;;  %16420 = vperm.xlu1 %18661, %v10241_v11   ;;  %v6947_v50 = vrot.slane %v6925_v19, %v20124_v32  ;;  %v2862_v12 = vpop.xlane.xlu1 %2861  ;;  %v24610_v11 = vld [vmem:[#allocation90_spill] sm:$0xff] }
 0x49b   : > { %v6876_v0 = vcombine.high %v6868_v29, %v6868_v29  ;;  %v6877_v33 = vcombine.high %v6875_v34, %v6875_v34  ;;  %v3647_v26 = vadd.f32 %v24606_v62, %v2661_v38  ;;  %v21431_v7 = vrot.slane %v17756_v15, %v20124_v32 }
 0x49c   : > { %v7015_v35 = vrot.slane %v3680_v13, %v20124_v32  ;;  %v11793_v51 = vcombine.low %v20228_v3, %v20231_v52  ;;  %v11794_v59 = vcombine.low %v20247_v28, %v20253_v23  ;;  %v21439_v39 = vrot.slane %v11565_v55, %v20124_v32 }
 0x49d   : > { %24607 = vst [vmem:[#allocation30_spill] sm:$0xff] %v21431_v7  ;;  %v6933_v19 = vrot.slane %v6917_v42, %v20124_v32  ;;  %v6940_v1 = vrot.slane %v6924_v31, %v20124_v32  ;;  %v7022_v10 = vrot.slane %v7008_v4, %v20124_v32  ;;  %v21445_v15 = vrot.slane %v17753_v60, %v20124_v32 }
 0x49e   : > { %v21448_v13 = vrot.slane %v11567_v47, %v20124_v32  ;;  %v21451_v3 = vrot.slane %v17754_v2, %v20124_v32  ;;  %v6954_v52 = vrot.slane %v6926_v57, %v20124_v32  ;;  %v6898_v23 = vrot.slane %v6876_v0, %v20124_v32  ;;  %v2757_v57 = vpop.xlane.xlu0 %2756 }
 0x49f   : > { %v13182_v28 = vcombine.low %v6933_v19, %v6947_v50  ;;  %v6905_v42 = vrot.slane %v6877_v33, %v20124_v32  ;;  %v5391_v31 = vcombine.high %v3647_v26, %v3647_v26  ;;  %v7023_v38 = vcombine.high %v7015_v35, %v7015_v35 }
 0x4a0   : > { %24608 = vst [vmem:[#allocation273_spill] sm:$0xff] %v21448_v13  ;;  %24609 = vst [vmem:[#allocation274_spill] sm:$0xff] %v21451_v3  ;;  %v3714_v55 = vadd.f32 %v24610_v11, %v2862_v12  ;;  %v11801_v60 = vrot.slane %v11793_v51, %v20124_v32  ;;  %v11808_v4 = vrot.slane %v11794_v59, %v20124_v32 }
 0x4a1   : > { %v17819_v47 = vcombine.high %v6933_v19, %v6947_v50  ;;  %v6884_v62 = vrot.slane %v6868_v29, %v20124_v32  ;;  %v7024_v2 = vcombine.high %v7022_v10, %v7022_v10  ;;  %v5398_v27 = vrot.slane %v3647_v26, %v20124_v32  ;;  %v24612_v19 = vld [vmem:[#allocation53_spill] sm:$0xff] }
 0x4a2   : > { %v13184_v7 = vcombine.low %v6940_v1, %v6954_v52  ;;  %v17820_v49 = vcombine.high %v6940_v1, %v6954_v52  ;;  %v6891_v0 = vrot.slane %v6875_v34, %v20124_v32  ;;  %v11809_v33 = vcombine.low %v11801_v60, %v11808_v4 }
 0x4a3   : > { %v21463_v13 = vrot.slane %v13182_v28, %v20124_v32  ;;  %v13133_v12 = vcombine.low %v6884_v62, %v6898_v23  ;;  %v17817_v11 = vcombine.high %v6884_v62, %v6898_v23  ;;  %v5405_v51 = vrot.slane %v5391_v31, %v20124_v32  ;;  %v2766_v62 = vpop.xlane.xlu1 %2765 }
 0x4a4   : > { %v13135_v59 = vcombine.low %v6891_v0, %v6905_v42  ;;  %v7045_v50 = vrot.slane %v7023_v38, %v20124_v32  ;;  %v8674_v29 = vcombine.high %v3714_v55, %v3714_v55  ;;  %v3679_v3 = vadd.f32 %v24612_v19, %v2757_v57  ;;  %16516 = vperm.xlu1 %18661, %v11809_v33   ;;  %v24616_v19 = vld [vmem:[#allocation58_spill] sm:$0xff] }
 0x4a5   : > { %24611 = vst [vmem:[#allocation90_spill] sm:$0xff] %v21463_v13  ;;  %v21469_v26 = vrot.slane %v17819_v47, %v20124_v32  ;;  %v17818_v1 = vcombine.high %v6891_v0, %v6905_v42  ;;  %v7052_v34 = vrot.slane %v7024_v2, %v20124_v32  ;;  %v5406_v52 = vcombine.high %v5398_v27, %v5398_v27 }
 0x4a6   : > { %v21473_v28 = vrot.slane %v13184_v7, %v20124_v32  ;;  %v21476_v23 = vrot.slane %v17820_v49, %v20124_v32  ;;  %v7031_v31 = vrot.slane %v7015_v35, %v20124_v32  ;;  %v8681_v38 = vrot.slane %v3714_v55, %v20124_v32 }
 0x4a7   : > { %24613 = vst [vmem:[#allocation53_spill] sm:$0xff] %v21469_v26  ;;  %v21481_v60 = vrot.slane %v13133_v12, %v20124_v32  ;;  %v21484_v4 = vrot.slane %v17817_v11, %v20124_v32  ;;  %v7038_v42 = vrot.slane %v7022_v10, %v20124_v32  ;;  %v5407_v47 = vcombine.high %v5405_v51, %v5405_v51 }
 0x4a8   : > { %24614 = vst [vmem:[#allocation275_spill] sm:$0xff] %v21473_v28  ;;  %24615 = vst [vmem:[#allocation276_spill] sm:$0xff] %v21476_v23  ;;  %v21488_v7 = vrot.slane %v13135_v59, %v20124_v32  ;;  %v13280_v2 = vcombine.low %v7031_v31, %v7045_v50  ;;  %v8688_v49 = vrot.slane %v8674_v29, %v20124_v32 }
 0x4a9   : > { %v6959_v57 = vcombine.high %v3679_v3, %v3679_v3  ;;  %v21492_v35 = vrot.slane %v17818_v1, %v20124_v32  ;;  %v17823_v55 = vcombine.high %v7031_v31, %v7045_v50  ;;  %v13282_v0 = vcombine.low %v7038_v42, %v7052_v34 }
 0x4aa   : > { %v5428_v33 = vrot.slane %v5406_v52, %v20124_v32  ;;  %v17824_v12 = vcombine.high %v7038_v42, %v7052_v34  ;;  %v8689_v11 = vcombine.high %v8681_v38, %v8681_v38  ;;  %v6966_v10 = vrot.slane %v3679_v3, %v20124_v32  ;;  %v2763_v52 = vpop.xlane.xlu0 %2762 }
 0x4ab   : > { %v3682_v28 = vadd.f32 %v24616_v19, %v2766_v62  ;;  %v5414_v59 = vrot.slane %v5398_v27, %v20124_v32  ;;  %v5421_v23 = vrot.slane %v5405_v51, %v20124_v32  ;;  %v5435_v29 = vrot.slane %v5407_v47, %v20124_v32 }
 0x4ac   : > { %v10324_v1 = vcombine.low %v20339_v22, %v20342_v24  ;;  %v21503_v50 = vrot.slane %v13280_v2, %v20124_v32  ;;  %v8690_v31 = vcombine.high %v8688_v49, %v8688_v49  ;;  %v6973_v34 = vrot.slane %v6959_v57, %v20124_v32 }
 0x4ad   : > { %v10323_v3 = vcombine.low %v20328_v58, %v20334_v44  ;;  %v21509_v42 = vrot.slane %v17823_v55, %v20124_v32  ;;  %v21512_v27 = vrot.slane %v13282_v0, %v20124_v32  ;;  %v11663_v51 = vcombine.low %v5414_v59, %v5428_v33 }
 0x4ae   : > { %24617 = vst [vmem:[#allocation58_spill] sm:$0xff] %v21503_v50  ;;  %v17757_v47 = vcombine.high %v5414_v59, %v5428_v33  ;;  %v21515_v22 = vrot.slane %v17824_v12, %v20124_v32  ;;  %v8711_v24 = vrot.slane %v8689_v11, %v20124_v32  ;;  %v6974_v62 = vcombine.high %v6966_v10, %v6966_v10  ;;  %v24621_v50 = vld [vmem:[#allocation55_spill] sm:$0xff] }
 0x4af   : > { %24618 = vst [vmem:[#allocation277_spill] sm:$0xff] %v21509_v42  ;;  %24619 = vst [vmem:[#allocation278_spill] sm:$0xff] %v21512_v27  ;;  %v7106_v2 = vcombine.high %v3682_v28, %v3682_v28  ;;  %v11665_v57 = vcombine.low %v5421_v23, %v5435_v29  ;;  %v17758_v19 = vcombine.high %v5421_v23, %v5435_v29 }
 0x4b0   : > { %24620 = vst [vmem:[#allocation279_spill] sm:$0xff] %v21515_v22  ;;  %v3681_v13 = vadd.f32 %v24621_v50, %v2763_v52  ;;  %v10338_v58 = vrot.slane %v10324_v1, %v20124_v32  ;;  %v8697_v44 = vrot.slane %v8681_v38, %v20124_v32  ;;  %v8718_v55 = vrot.slane %v8690_v31, %v20124_v32  ;;  %v2868_v22 = vpop.xlane.xlu1 %2867 }
 0x4b1   : > { %v6975_v0 = vcombine.high %v6973_v34, %v6973_v34  ;;  %v10331_v33 = vrot.slane %v10323_v3, %v20124_v32  ;;  %v21524_v12 = vrot.slane %v11663_v51, %v20124_v32  ;;  %v21527_v11 = vrot.slane %v17757_v47, %v20124_v32 }
 0x4b2   : > { %v8704_v59 = vrot.slane %v8688_v49, %v20124_v32  ;;  %v7113_v23 = vrot.slane %v3682_v28, %v20124_v32  ;;  %v14946_v29 = vcombine.low %v8697_v44, %v8711_v24  ;;  %v6996_v1 = vrot.slane %v6974_v62, %v20124_v32 }
 0x4b3   : > { %v7120_v38 = vrot.slane %v7106_v2, %v20124_v32  ;;  %v10339_v50 = vcombine.low %v10331_v33, %v10338_v58  ;;  %v21534_v31 = vrot.slane %v11665_v57, %v20124_v32  ;;  %v17891_v52 = vcombine.high %v8697_v44, %v8711_v24 }
 0x4b4   : > { %v7057_v3 = vcombine.high %v3681_v13, %v3681_v13  ;;  %v7064_v51 = vrot.slane %v3681_v13, %v20124_v32  ;;  %v21538_v47 = vrot.slane %v17758_v19, %v20124_v32  ;;  %v14948_v27 = vcombine.low %v8704_v59, %v8718_v55 }
 0x4b5   : > { %v6982_v49 = vrot.slane %v6966_v10, %v20124_v32  ;;  %v7003_v28 = vrot.slane %v6975_v0, %v20124_v32  ;;  %16426 = vperm.xlu1 %18661, %v10339_v50   ;;  %v6989_v62 = vrot.slane %v6973_v34, %v20124_v32  ;;  %v7121_v2 = vcombine.high %v7113_v23, %v7113_v23  ;;  %v2865_v10 = vpop.xlane.xlu0 %2864  ;;  %v24624_v50 = vld [vmem:[#allocation92_spill] sm:$0xff] }
 0x4b6   : > { %v11891_v57 = vcombine.low %v20374_v8, %v20377_v46  ;;  %v11892_v24 = vcombine.low %v20384_v5, %v20387_v45  ;;  %v17892_v13 = vcombine.high %v8704_v59, %v8718_v55  ;;  %v21548_v19 = vrot.slane %v14946_v29, %v20124_v32  ;;  %v24626_v59 = vld [vmem:[#allocation89_spill] sm:$0xff] }
 0x4b7   : > { %v13231_v58 = vcombine.low %v6982_v49, %v6996_v1  ;;  %v7122_v44 = vcombine.high %v7120_v38, %v7120_v38  ;;  %v21551_v0 = vrot.slane %v17891_v52, %v20124_v32  ;;  %v7071_v33 = vrot.slane %v7057_v3, %v20124_v32 }
 0x4b8   : > { %24622 = vst [vmem:[#allocation55_spill] sm:$0xff] %v21548_v19  ;;  %v7072_v34 = vcombine.high %v7064_v51, %v7064_v51  ;;  %v3716_v42 = vadd.f32 %v24624_v50, %v2868_v22  ;;  %v21556_v8 = vrot.slane %v14948_v27, %v20124_v32  ;;  %v17821_v46 = vcombine.high %v6982_v49, %v6996_v1 }
 0x4b9   : > { %24623 = vst [vmem:[#allocation280_spill] sm:$0xff] %v21551_v0  ;;  %v13233_v5 = vcombine.low %v6989_v62, %v7003_v28  ;;  %v17822_v45 = vcombine.high %v6989_v62, %v7003_v28  ;;  %v7143_v55 = vrot.slane %v7121_v2, %v20124_v32  ;;  %v3715_v29 = vadd.f32 %v24626_v59, %v2865_v10  ;;  %v2772_v59 = vpop.xlane.xlu1 %2771 }
 0x4ba   : > { %24625 = vst [vmem:[#allocation92_spill] sm:$0xff] %v21556_v8  ;;  %v11899_v19 = vrot.slane %v11891_v57, %v20124_v32  ;;  %v11906_v52 = vrot.slane %v11892_v24, %v20124_v32  ;;  %v21563_v0 = vrot.slane %v17892_v13, %v20124_v32  ;;  %v21566_v3 = vrot.slane %v13231_v58, %v20124_v32 }
 0x4bb   : > { %v7129_v27 = vrot.slane %v7113_v23, %v20124_v32  ;;  %v7150_v22 = vrot.slane %v7122_v44, %v20124_v32  ;;  %v7073_v1 = vcombine.high %v7071_v33, %v7071_v33  ;;  %v7094_v49 = vrot.slane %v7072_v34, %v20124_v32 }
 0x4bc   : > { %24627 = vst [vmem:[#allocation89_spill] sm:$0xff] %v21563_v0  ;;  %v8772_v28 = vcombine.high %v3716_v42, %v3716_v42  ;;  %v11907_v62 = vcombine.low %v11899_v19, %v11906_v52  ;;  %v21572_v2 = vrot.slane %v17821_v46, %v20124_v32  ;;  %v21575_v57 = vrot.slane %v13233_v5, %v20124_v32 }
 0x4bd   : > { %v7136_v24 = vrot.slane %v7120_v38, %v20124_v32  ;;  %v8779_v13 = vrot.slane %v3716_v42, %v20124_v32  ;;  %v21580_v58 = vrot.slane %v17822_v45, %v20124_v32  ;;  %v13378_v23 = vcombine.low %v7129_v27, %v7143_v55 }
 0x4be   : > { %v7080_v44 = vrot.slane %v7064_v51, %v20124_v32  ;;  %v8723_v10 = vcombine.high %v3715_v29, %v3715_v29  ;;  %16522 = vperm.xlu1 %18661, %v11907_v62   ;;  %v17827_v34 = vcombine.high %v7129_v27, %v7143_v55  ;;  %v10176_v50 = vcombine.low %v20288_v6, %v20294_v16 }
 0x4bf   : > { %v13380_v19 = vcombine.low %v7136_v24, %v7150_v22  ;;  %v10177_v46 = vcombine.low %v20298_v20, %v20302_v36  ;;  %v17828_v5 = vcombine.high %v7136_v24, %v7150_v22  ;;  %v7101_v38 = vrot.slane %v7073_v1, %v20124_v32  ;;  %v24631_v1 = vld [vmem:[#allocation60_spill] sm:$0xff] }
 0x4c0   : > { %v13329_v42 = vcombine.low %v7080_v44, %v7094_v49  ;;  %v8786_v45 = vrot.slane %v8772_v28, %v20124_v32  ;;  %v8787_v52 = vcombine.high %v8779_v13, %v8779_v13  ;;  %v8730_v51 = vrot.slane %v3715_v29, %v20124_v32 }
 0x4c1   : > { %v10184_v62 = vrot.slane %v10176_v50, %v20124_v32  ;;  %v10191_v55 = vrot.slane %v10177_v46, %v20124_v32  ;;  %v21593_v27 = vrot.slane %v13378_v23, %v20124_v32  ;;  %v7087_v6 = vrot.slane %v7071_v33, %v20124_v32  ;;  %v2769_v46 = vpop.xlane.xlu0 %2768 }
 0x4c2   : > { %v17825_v16 = vcombine.high %v7080_v44, %v7094_v49  ;;  %v8737_v20 = vrot.slane %v8723_v10, %v20124_v32  ;;  %v21598_v36 = vrot.slane %v17827_v34, %v20124_v32  ;;  %v21601_v22 = vrot.slane %v13380_v19, %v20124_v32 }
 0x4c3   : > { %24628 = vst [vmem:[#allocation281_spill] sm:$0xff] %v21593_v27  ;;  %v3684_v29 = vadd.f32 %v24631_v1, %v2772_v59  ;;  %v10192_v28 = vcombine.low %v10184_v62, %v10191_v55  ;;  %v21605_v24 = vrot.slane %v17828_v5, %v20124_v32  ;;  %v13331_v50 = vcombine.low %v7087_v6, %v7101_v38 }
 0x4c4   : > { %24629 = vst [vmem:[#allocation282_spill] sm:$0xff] %v21598_v36  ;;  %24630 = vst [vmem:[#allocation283_spill] sm:$0xff] %v21601_v22  ;;  %v8788_v23 = vcombine.high %v8786_v45, %v8786_v45  ;;  %v10421_v33 = vcombine.low %v20454_v17, %v20457_v18  ;;  %v17826_v49 = vcombine.high %v7087_v6, %v7101_v38  ;;  %v24633_v18 = vld [vmem:[#allocation57_spill] sm:$0xff]  ;;  %v24635_v6 = vld [vmem:[#allocation120_spill] sm:$0xff] }
 0x4c5   : > { %24632 = vst [vmem:[#allocation60_spill] sm:$0xff] %v21605_v24  ;;  %v21610_v44 = vrot.slane %v13329_v42, %v20124_v32  ;;  %v8809_v10 = vrot.slane %v8787_v52, %v20124_v32  ;;  %v8738_v34 = vcombine.high %v8730_v51, %v8730_v51  ;;  %16417 = vperm.xlu0 %18660, %v10192_v28   ;;  %v24634_v42 = vld [vmem:[#allocation121_spill] sm:$0xff]  ;;  %v2874_v24 = vpop.xlane.xlu1 %2873 }
 0x4c6   : > { %v21614_v19 = vrot.slane %v17825_v16, %v20124_v32  ;;  %v8795_v5 = vrot.slane %v8779_v13, %v20124_v32  ;;  %v8739_v59 = vcombine.high %v8737_v20, %v8737_v20  ;;  %v10422_v62 = vcombine.low %v20462_v48, %v20465_v25 }
 0x4c7   : > { %v8802_v55 = vrot.slane %v8786_v45, %v20124_v32  ;;  %v7204_v17 = vcombine.high %v3684_v29, %v3684_v29  ;;  %v3683_v38 = vadd.f32 %v24633_v18, %v2769_v46  ;;  %v11744_v1 = vcombine.low %v24635_v6, %v24634_v42  ;;  %v24636_v45 = vld [vmem:[#allocation122_spill] sm:$0xff] }
 0x4c8   : > { %v8816_v52 = vrot.slane %v8788_v23, %v20124_v32  ;;  %v7211_v28 = vrot.slane %v3684_v29, %v20124_v32  ;;  %v10429_v16 = vrot.slane %v10421_v33, %v20124_v32  ;;  %v10436_v13 = vrot.slane %v10422_v62, %v20124_v32 }
 0x4c9   : > { %v21628_v22 = vrot.slane %v13331_v50, %v20124_v32  ;;  %v15044_v48 = vcombine.low %v8795_v5, %v8809_v10  ;;  %v8760_v25 = vrot.slane %v8738_v34, %v20124_v32  ;;  %v11745_v46 = vcombine.low %v24636_v45, %v20281_v53  ;;  %v2871_v45 = vpop.xlane.xlu0 %2870 }
 0x4ca   : > { %v17895_v18 = vcombine.high %v8795_v5, %v8809_v10  ;;  %v8746_v42 = vrot.slane %v8730_v51, %v20124_v32  ;;  %v8767_v23 = vrot.slane %v8739_v59, %v20124_v32  ;;  %v10437_v6 = vcombine.low %v10429_v16, %v10436_v13  ;;  %v24638_v16 = vld [vmem:[#allocation94_spill] sm:$0xff] }
 0x4cb   : > { %v7218_v29 = vrot.slane %v7204_v17, %v20124_v32  ;;  %v7155_v33 = vcombine.high %v3683_v38, %v3683_v38  ;;  %v11752_v62 = vrot.slane %v11744_v1, %v20124_v32  ;;  %v11759_v50 = vrot.slane %v11745_v46, %v20124_v32 }
 0x4cc   : > { %v15046_v27 = vcombine.low %v8802_v55, %v8816_v52  ;;  %v17896_v36 = vcombine.high %v8802_v55, %v8816_v52  ;;  %v8753_v34 = vrot.slane %v8737_v20, %v20124_v32  ;;  %v7219_v8 = vcombine.high %v7211_v28, %v7211_v28  ;;  %16432 = vperm.xlu1 %18661, %v10437_v6  }
 0x4cd   : > { %v21640_v53 = vrot.slane %v17826_v49, %v20124_v32  ;;  %v14995_v51 = vcombine.low %v8746_v42, %v8760_v25  ;;  %v7162_v10 = vrot.slane %v3683_v38, %v20124_v32  ;;  %v11760_v5 = vcombine.low %v11752_v62, %v11759_v50 }
 0x4ce   : > { %v21644_v59 = vrot.slane %v15044_v48, %v20124_v32  ;;  %v17893_v17 = vcombine.high %v8746_v42, %v8760_v25  ;;  %v14997_v1 = vcombine.low %v8753_v34, %v8767_v23  ;;  %v3718_v13 = vadd.f32 %v24638_v16, %v2874_v24  ;;  %v2778_v16 = vpop.xlane.xlu1 %2777 }
 0x4cf   : > { %v21648_v55 = vrot.slane %v17895_v18, %v20124_v32  ;;  %v17894_v20 = vcombine.high %v8753_v34, %v8767_v23  ;;  %v7220_v52 = vcombine.high %v7218_v29, %v7218_v29  ;;  %v7169_v49 = vrot.slane %v7155_v33, %v20124_v32  ;;  %16513 = vperm.xlu0 %18660, %v11760_v5   ;;  %v24643_v23 = vld [vmem:[#allocation91_spill] sm:$0xff] }
 0x4d0   : > { %24637 = vst [vmem:[#allocation57_spill] sm:$0xff] %v21644_v59  ;;  %v21652_v46 = vrot.slane %v15046_v27, %v20124_v32  ;;  %v21655_v38 = vrot.slane %v17896_v36, %v20124_v32  ;;  %v7241_v48 = vrot.slane %v7219_v8, %v20124_v32  ;;  %v11989_v24 = vcombine.low %v20494_v41, %v20498_v40 }
 0x4d1   : > { %24639 = vst [vmem:[#allocation121_spill] sm:$0xff] %v21648_v55  ;;  %v21661_v25 = vrot.slane %v14995_v51, %v20124_v32  ;;  %v7227_v18 = vrot.slane %v7211_v28, %v20124_v32  ;;  %v7170_v42 = vcombine.high %v7162_v10, %v7162_v10  ;;  %v3717_v6 = vadd.f32 %v24643_v23, %v2871_v45  ;;  %v24650_v23 = vld [vmem:[#allocation137_spill] sm:$0xff] }
 0x4d2   : > { %24640 = vst [vmem:[#allocation120_spill] sm:$0xff] %v21652_v46  ;;  %24641 = vst [vmem:[#allocation122_spill] sm:$0xff] %v21655_v38  ;;  %v21666_v33 = vrot.slane %v17893_v17, %v20124_v32  ;;  %v21669_v27 = vrot.slane %v14997_v1, %v20124_v32  ;;  %v8870_v36 = vcombine.high %v3718_v13, %v3718_v13 }
 0x4d3   : > { %24642 = vst [vmem:[#allocation94_spill] sm:$0xff] %v21661_v25  ;;  %v11990_v8 = vcombine.low %v20501_v61, %v20504_v43  ;;  %v21674_v41 = vrot.slane %v17894_v20, %v20124_v32  ;;  %v7234_v40 = vrot.slane %v7218_v29, %v20124_v32  ;;  %v7248_v28 = vrot.slane %v7220_v52, %v20124_v32  ;;  %v24647_v61 = vld [vmem:[#allocation136_spill] sm:$0xff]  ;;  %v24648_v43 = vld [vmem:[#allocation135_spill] sm:$0xff]  ;;  %v24649_v20 = vld [vmem:[#allocation138_spill] sm:$0xff] }
 0x4d4   : > { %24644 = vst [vmem:[#allocation91_spill] sm:$0xff] %v21666_v33  ;;  %24645 = vst [vmem:[#allocation284_spill] sm:$0xff] %v21669_v27  ;;  %v7171_v62 = vcombine.high %v7169_v49, %v7169_v49  ;;  %v13476_v50 = vcombine.low %v7227_v18, %v7241_v48  ;;  %v8877_v34 = vrot.slane %v3718_v13, %v20124_v32 }
 0x4d5   : > { %24646 = vst [vmem:[#allocation285_spill] sm:$0xff] %v21674_v41  ;;  %v11997_v51 = vrot.slane %v11989_v24, %v20124_v32  ;;  %v12004_v5 = vrot.slane %v11990_v8, %v20124_v32  ;;  %v7192_v17 = vrot.slane %v7170_v42, %v20124_v32  ;;  %v8821_v1 = vcombine.high %v3717_v6, %v3717_v6  ;;  %v24989_v41 = vld [vmem:[#allocation43_spill] sm:$0xff] }
 0x4d6   : > { %v10274_v45 = vcombine.low %v24648_v43, %v24647_v61  ;;  %v10275_v29 = vcombine.low %v24650_v23, %v24649_v20  ;;  %v17831_v46 = vcombine.high %v7227_v18, %v7241_v48  ;;  %v7178_v52 = vrot.slane %v7162_v10, %v20124_v32  ;;  %v24652_v43 = vld [vmem:[#allocation62_spill] sm:$0xff] }
 0x4d7   : > { %v8884_v38 = vrot.slane %v8870_v36, %v20124_v32  ;;  %v12005_v13 = vcombine.low %v11997_v51, %v12004_v5  ;;  %v13478_v59 = vcombine.low %v7234_v40, %v7248_v28  ;;  %v17832_v24 = vcombine.high %v7234_v40, %v7248_v28 }
 0x4d8   : > { %v7185_v8 = vrot.slane %v7169_v49, %v20124_v32  ;;  %v7199_v42 = vrot.slane %v7171_v62, %v20124_v32  ;;  %v21691_v55 = vrot.slane %v13476_v50, %v20124_v32  ;;  %v8885_v0 = vcombine.high %v8877_v34, %v8877_v34  ;;  %v24654_v62 = vld [vmem:[#allocation150_spill] sm:$0xff] }
 0x4d9   : > { %v8828_v61 = vrot.slane %v3717_v6, %v20124_v32  ;;  %v3686_v20 = vadd.f32 %v24652_v43, %v2778_v16  ;;  %16528 = vperm.xlu1 %18661, %v12005_v13   ;;  %v13427_v48 = vcombine.low %v7178_v52, %v7192_v17  ;;  %v8835_v10 = vrot.slane %v8821_v1, %v20124_v32  ;;  %v24655_v50 = vld [vmem:[#allocation34_spill] sm:$0xff]  ;;  %v2775_v13 = vpop.xlane.xlu0 %2774  ;;  %v24659_v43 = vld [vmem:[#allocation151_spill] sm:$0xff] }
 0x4da   : > { %24651 = vst [vmem:[#allocation136_spill] sm:$0xff] %v21691_v55  ;;  %v10282_v18 = vrot.slane %v10274_v45, %v20124_v32  ;;  %v10289_v36 = vrot.slane %v10275_v29, %v20124_v32  ;;  %v21699_v49 = vrot.slane %v17831_v46, %v20124_v32  ;;  %v17829_v40 = vcombine.high %v7178_v52, %v7192_v17  ;;  %v24658_v46 = vld [vmem:[#allocation152_spill] sm:$0xff] }
 0x4db   : > { %v8886_v28 = vcombine.high %v8884_v38, %v8884_v38  ;;  %v10519_v51 = vcombine.low %v24655_v50, %v24654_v62  ;;  %v21704_v6 = vrot.slane %v13478_v59, %v20124_v32  ;;  %v21707_v5 = vrot.slane %v17832_v24, %v20124_v32 }
 0x4dc   : > { %24653 = vst [vmem:[#allocation135_spill] sm:$0xff] %v21699_v49  ;;  %v13429_v16 = vcombine.low %v7185_v8, %v7199_v42  ;;  %v10290_v1 = vcombine.low %v10282_v18, %v10289_v36  ;;  %v8907_v45 = vrot.slane %v8885_v0, %v20124_v32  ;;  %v8836_v23 = vcombine.high %v8828_v61, %v8828_v61 }
 0x4dd   : > { %24656 = vst [vmem:[#allocation138_spill] sm:$0xff] %v21704_v6  ;;  %24657 = vst [vmem:[#allocation137_spill] sm:$0xff] %v21707_v5  ;;  %v7302_v29 = vcombine.high %v3686_v20, %v3686_v20  ;;  %v10520_v17 = vcombine.low %v24659_v43, %v24658_v46  ;;  %v17830_v52 = vcombine.high %v7185_v8, %v7199_v42  ;;  %v24662_v42 = vld [vmem:[#allocation59_spill] sm:$0xff]  ;;  %v24663_v46 = vld [vmem:[#allocation124_spill] sm:$0xff] }
 0x4de   : > { %v21713_v55 = vrot.slane %v13427_v48, %v20124_v32  ;;  %v8893_v59 = vrot.slane %v8877_v34, %v20124_v32  ;;  %v8837_v62 = vcombine.high %v8835_v10, %v8835_v10  ;;  %16423 = vperm.xlu0 %18660, %v10290_v1   ;;  %v8914_v24 = vrot.slane %v8886_v28, %v20124_v32  ;;  %v24664_v43 = vld [vmem:[#allocation123_spill] sm:$0xff]  ;;  %v24666_v5 = vld [vmem:[#allocation126_spill] sm:$0xff] }
 0x4df   : > { %v7309_v18 = vrot.slane %v3686_v20, %v20124_v32  ;;  %v10527_v0 = vrot.slane %v10519_v51, %v20124_v32  ;;  %v10534_v36 = vrot.slane %v10520_v17, %v20124_v32  ;;  %v21721_v50 = vrot.slane %v17829_v40, %v20124_v32 }
 0x4e0   : > { %24660 = vst [vmem:[#allocation62_spill] sm:$0xff] %v21713_v55  ;;  %v8900_v8 = vrot.slane %v8884_v38, %v20124_v32  ;;  %v3685_v48 = vadd.f32 %v24662_v42, %v2775_v13  ;;  %v11842_v34 = vcombine.low %v24664_v43, %v24663_v46  ;;  %v15142_v6 = vcombine.low %v8893_v59, %v8907_v45  ;;  %v24667_v38 = vld [vmem:[#allocation125_spill] sm:$0xff] }
 0x4e1   : > { %24661 = vst [vmem:[#allocation150_spill] sm:$0xff] %v21721_v50  ;;  %v8858_v1 = vrot.slane %v8836_v23, %v20124_v32  ;;  %v7316_v28 = vrot.slane %v7302_v29, %v20124_v32  ;;  %v10535_v20 = vcombine.low %v10527_v0, %v10534_v36  ;;  %v21730_v51 = vrot.slane %v13429_v16, %v20124_v32  ;;  %v2880_v29 = vpop.xlane.xlu1 %2879 }
 0x4e2   : > { %v8844_v17 = vrot.slane %v8828_v61, %v20124_v32  ;;  %v8865_v40 = vrot.slane %v8837_v62, %v20124_v32  ;;  %v11843_v49 = vcombine.low %v24667_v38, %v24666_v5  ;;  %v17899_v13 = vcombine.high %v8893_v59, %v8907_v45  ;;  %v2877_v38 = vpop.xlane.xlu0 %2876 }
 0x4e3   : > { %24665 = vst [vmem:[#allocation34_spill] sm:$0xff] %v21730_v51  ;;  %v15144_v42 = vcombine.low %v8900_v8, %v8914_v24  ;;  %v8851_v46 = vrot.slane %v8835_v10, %v20124_v32  ;;  %v7317_v43 = vcombine.high %v7309_v18, %v7309_v18  ;;  %16438 = vperm.xlu1 %18661, %v10535_v20  }
 0x4e4   : > { %v17900_v23 = vcombine.high %v8900_v8, %v8914_v24  ;;  %v7253_v26 = vcombine.high %v3685_v48, %v3685_v48  ;;  %v11850_v0 = vrot.slane %v11842_v34, %v20124_v32  ;;  %v11857_v16 = vrot.slane %v11843_v49, %v20124_v32 }
 0x4e5   : > { %v21740_v61 = vrot.slane %v17830_v52, %v20124_v32  ;;  %v21743_v62 = vrot.slane %v15142_v6, %v20124_v32  ;;  %v15093_v5 = vcombine.low %v8844_v17, %v8858_v1  ;;  %v7318_v45 = vcombine.high %v7316_v28, %v7316_v28  ;;  %v24672_v52 = vld [vmem:[#allocation96_spill] sm:$0xff] }
 0x4e6   : > { %v17897_v59 = vcombine.high %v8844_v17, %v8858_v1  ;;  %v15095_v36 = vcombine.low %v8851_v46, %v8865_v40  ;;  %v7260_v10 = vrot.slane %v3685_v48, %v20124_v32  ;;  %v11858_v20 = vcombine.low %v11850_v0, %v11857_v16  ;;  %v24674_v48 = vld [vmem:[#allocation156_spill] sm:$0xff]  ;;  %v24675_v17 = vld [vmem:[#allocation13_spill] sm:$0xff]  ;;  %v24677_v16 = vld [vmem:[#allocation158_spill] sm:$0xff] }
 0x4e7   : > { %24668 = vst [vmem:[#allocation152_spill] sm:$0xff] %v21740_v61  ;;  %24669 = vst [vmem:[#allocation151_spill] sm:$0xff] %v21743_v62  ;;  %v21747_v24 = vrot.slane %v17899_v13, %v20124_v32  ;;  %v21750_v8 = vrot.slane %v15144_v42, %v20124_v32  ;;  %v7339_v49 = vrot.slane %v7317_v43, %v20124_v32  ;;  %v24703_v61 = vld [vmem:[#allocation133_spill] sm:$0xff] }
 0x4e8   : > { %v3720_v34 = vadd.f32 %v24672_v52, %v2880_v29  ;;  %v21755_v6 = vrot.slane %v17900_v23, %v20124_v32  ;;  %v17898_v62 = vcombine.high %v8851_v46, %v8865_v40  ;;  %v7267_v1 = vrot.slane %v7253_v26, %v20124_v32  ;;  %16519 = vperm.xlu0 %18660, %v11858_v20   ;;  %v24678_v29 = vld [vmem:[#allocation157_spill] sm:$0xff] }
 0x4e9   : > { %24670 = vst [vmem:[#allocation59_spill] sm:$0xff] %v21747_v24  ;;  %24671 = vst [vmem:[#allocation124_spill] sm:$0xff] %v21750_v8  ;;  %v12087_v0 = vcombine.low %v24675_v17, %v24674_v48  ;;  %v21761_v13 = vrot.slane %v15093_v5, %v20124_v32  ;;  %v7325_v42 = vrot.slane %v7309_v18, %v20124_v32  ;;  %v24681_v46 = vld [vmem:[#allocation93_spill] sm:$0xff]  ;;  %v2784_v24 = vpop.xlane.xlu1 %2783 }
 0x4ea   : > { %24673 = vst [vmem:[#allocation123_spill] sm:$0xff] %v21755_v6  ;;  %v7346_v43 = vrot.slane %v7318_v45, %v20124_v32  ;;  %v12088_v52 = vcombine.low %v24678_v29, %v24677_v16  ;;  %v21768_v23 = vrot.slane %v17897_v59, %v20124_v32  ;;  %v21771_v40 = vrot.slane %v15095_v36, %v20124_v32 }
 0x4eb   : > { %24676 = vst [vmem:[#allocation126_spill] sm:$0xff] %v21761_v13  ;;  %v7268_v26 = vcombine.high %v7260_v10, %v7260_v10  ;;  %v3719_v20 = vadd.f32 %v24681_v46, %v2877_v38  ;;  %v7332_v48 = vrot.slane %v7316_v28, %v20124_v32  ;;  %v13574_v5 = vcombine.low %v7325_v42, %v7339_v49  ;;  %v24683_v38 = vld [vmem:[#allocation128_spill] sm:$0xff]  ;;  %v24684_v46 = vld [vmem:[#allocation127_spill] sm:$0xff] }
 0x4ec   : > { %24679 = vst [vmem:[#allocation125_spill] sm:$0xff] %v21768_v23  ;;  %24680 = vst [vmem:[#allocation96_spill] sm:$0xff] %v21771_v40  ;;  %v8968_v17 = vcombine.high %v3720_v34, %v3720_v34  ;;  %v8975_v18 = vrot.slane %v3720_v34, %v20124_v32  ;;  %v17835_v8 = vcombine.high %v7325_v42, %v7339_v49  ;;  %v24685_v49 = vld [vmem:[#allocation130_spill] sm:$0xff]  ;;  %v24686_v42 = vld [vmem:[#allocation129_spill] sm:$0xff] }
 0x4ed   : > { %v7269_v45 = vcombine.high %v7267_v1, %v7267_v1  ;;  %v12095_v6 = vrot.slane %v12087_v0, %v20124_v32  ;;  %v12102_v16 = vrot.slane %v12088_v52, %v20124_v32  ;;  %v21779_v59 = vrot.slane %v17898_v62, %v20124_v32 }
 0x4ee   : > { %v13576_v36 = vcombine.low %v7332_v48, %v7346_v43  ;;  %v7276_v29 = vrot.slane %v7260_v10, %v20124_v32  ;;  %v10372_v28 = vcombine.low %v24684_v46, %v24683_v38  ;;  %v7290_v40 = vrot.slane %v7268_v26, %v20124_v32  ;;  %v24689_v26 = vld [vmem:[#allocation64_spill] sm:$0xff] }
 0x4ef   : > { %24682 = vst [vmem:[#allocation156_spill] sm:$0xff] %v21779_v59  ;;  %v8919_v13 = vcombine.high %v3719_v20, %v3719_v20  ;;  %v12103_v34 = vcombine.low %v12095_v6, %v12102_v16  ;;  %v10373_v23 = vcombine.low %v24686_v42, %v24685_v49  ;;  %v17836_v0 = vcombine.high %v7332_v48, %v7346_v43  ;;  %v24691_v49 = vld [vmem:[#allocation36_spill] sm:$0xff] }
 0x4f0   : > { %v21788_v52 = vrot.slane %v13574_v5, %v20124_v32  ;;  %v8982_v62 = vrot.slane %v8968_v17, %v20124_v32  ;;  %v8983_v59 = vcombine.high %v8975_v18, %v8975_v18  ;;  %v21792_v10 = vrot.slane %v17835_v8, %v20124_v32 }
 0x4f1   : > { %v7283_v51 = vrot.slane %v7267_v1, %v20124_v32  ;;  %v7297_v38 = vrot.slane %v7269_v45, %v20124_v32  ;;  %v3688_v46 = vadd.f32 %v24689_v26, %v2784_v24  ;;  %16534 = vperm.xlu1 %18661, %v12103_v34   ;;  %v21798_v6 = vrot.slane %v13576_v36, %v20124_v32  ;;  %v24692_v1 = vld [vmem:[#allocation162_spill] sm:$0xff]  ;;  %v24693_v26 = vld [vmem:[#allocation164_spill] sm:$0xff]  ;;  %v24694_v36 = vld [vmem:[#allocation163_spill] sm:$0xff] }
 0x4f2   : > { %24687 = vst [vmem:[#allocation13_spill] sm:$0xff] %v21788_v52  ;;  %24688 = vst [vmem:[#allocation158_spill] sm:$0xff] %v21792_v10  ;;  %v8926_v43 = vrot.slane %v3719_v20, %v20124_v32  ;;  %v10380_v48 = vrot.slane %v10372_v28, %v20124_v32  ;;  %v10387_v5 = vrot.slane %v10373_v23, %v20124_v32  ;;  %v2886_v10 = vpop.xlane.xlu1 %2885 }
 0x4f3   : > { %24690 = vst [vmem:[#allocation157_spill] sm:$0xff] %v21798_v6  ;;  %v13525_v17 = vcombine.low %v7276_v29, %v7290_v40  ;;  %v17833_v16 = vcombine.high %v7276_v29, %v7290_v40  ;;  %v8933_v8 = vrot.slane %v8919_v13, %v20124_v32  ;;  %v10617_v42 = vcombine.low %v24692_v1, %v24691_v49  ;;  %v2781_v40 = vpop.xlane.xlu0 %2780 }
 0x4f4   : > { %v8984_v45 = vcombine.high %v8982_v62, %v8982_v62  ;;  %v9005_v24 = vrot.slane %v8983_v59, %v20124_v32  ;;  %v10388_v34 = vcombine.low %v10380_v48, %v10387_v5  ;;  %v10618_v6 = vcombine.low %v24694_v36, %v24693_v26  ;;  %v24698_v36 = vld [vmem:[#allocation61_spill] sm:$0xff] }
 0x4f5   : > { %v21810_v20 = vrot.slane %v17836_v0, %v20124_v32  ;;  %v13527_v28 = vcombine.low %v7283_v51, %v7297_v38  ;;  %v8991_v23 = vrot.slane %v8975_v18, %v20124_v32  ;;  %v7400_v52 = vcombine.high %v3688_v46, %v3688_v46 }
 0x4f6   : > { %v8934_v29 = vcombine.high %v8926_v43, %v8926_v43  ;;  %v7407_v13 = vrot.slane %v3688_v46, %v20124_v32  ;;  %16429 = vperm.xlu0 %18660, %v10388_v34   ;;  %v10625_v49 = vrot.slane %v10617_v42, %v20124_v32  ;;  %v10632_v59 = vrot.slane %v10618_v6, %v20124_v32 }
 0x4f7   : > { %24695 = vst [vmem:[#allocation93_spill] sm:$0xff] %v21810_v20  ;;  %v17834_v48 = vcombine.high %v7283_v51, %v7297_v38  ;;  %v21817_v5 = vrot.slane %v13525_v17, %v20124_v32  ;;  %v21820_v0 = vrot.slane %v17833_v16, %v20124_v32  ;;  %v8935_v1 = vcombine.high %v8933_v8, %v8933_v8  ;;  %v24700_v38 = vld [vmem:[#allocation132_spill] sm:$0xff]  ;;  %v24701_v17 = vld [vmem:[#allocation131_spill] sm:$0xff] }
 0x4f8   : > { %v9012_v18 = vrot.slane %v8984_v45, %v20124_v32  ;;  %v15240_v26 = vcombine.low %v8991_v23, %v9005_v24  ;;  %v3687_v20 = vadd.f32 %v24698_v36, %v2781_v40  ;;  %v10633_v46 = vcombine.low %v10625_v49, %v10632_v59  ;;  %v24702_v45 = vld [vmem:[#allocation134_spill] sm:$0xff] }
 0x4f9   : > { %24696 = vst [vmem:[#allocation128_spill] sm:$0xff] %v21817_v5  ;;  %24697 = vst [vmem:[#allocation127_spill] sm:$0xff] %v21820_v0  ;;  %v21825_v34 = vrot.slane %v13527_v28, %v20124_v32  ;;  %v8998_v6 = vrot.slane %v8982_v62, %v20124_v32  ;;  %v7414_v51 = vrot.slane %v7400_v52, %v20124_v32  ;;  %v24705_v59 = vld [vmem:[#allocation98_spill] sm:$0xff] }
 0x4fa   : > { %v11940_v42 = vcombine.low %v24701_v17, %v24700_v38  ;;  %v17903_v16 = vcombine.high %v8991_v23, %v9005_v24  ;;  %v8956_v5 = vrot.slane %v8934_v29, %v20124_v32  ;;  %v7415_v0 = vcombine.high %v7407_v13, %v7407_v13  ;;  %16444 = vperm.xlu1 %18661, %v10633_v46  }
 0x4fb   : > { %24699 = vst [vmem:[#allocation130_spill] sm:$0xff] %v21825_v34  ;;  %v11941_v40 = vcombine.low %v24703_v61, %v24702_v45  ;;  %v21835_v49 = vrot.slane %v17834_v48, %v20124_v32  ;;  %v8942_v28 = vrot.slane %v8926_v43, %v20124_v32  ;;  %v8963_v62 = vrot.slane %v8935_v1, %v20124_v32 }
 0x4fc   : > { %v3722_v52 = vadd.f32 %v24705_v59, %v2886_v10  ;;  %v15242_v36 = vcombine.low %v8998_v6, %v9012_v18  ;;  %v17904_v34 = vcombine.high %v8998_v6, %v9012_v18  ;;  %v21841_v24 = vrot.slane %v15240_v26, %v20124_v32 }
 0x4fd   : > { %24704 = vst [vmem:[#allocation129_spill] sm:$0xff] %v21835_v49  ;;  %v7351_v23 = vcombine.high %v3687_v20, %v3687_v20  ;;  %v8949_v29 = vrot.slane %v8933_v8, %v20124_v32  ;;  %v7416_v46 = vcombine.high %v7414_v51, %v7414_v51  ;;  %v11948_v61 = vrot.slane %v11940_v42, %v20124_v32 }
 0x4fe   : > { %24706 = vst [vmem:[#allocation64_spill] sm:$0xff] %v21841_v24  ;;  %v11955_v48 = vrot.slane %v11941_v40, %v20124_v32  ;;  %v21847_v38 = vrot.slane %v17903_v16, %v20124_v32  ;;  %v15191_v43 = vcombine.low %v8942_v28, %v8956_v5  ;;  %v17901_v1 = vcombine.high %v8942_v28, %v8956_v5  ;;  %v24710_v28 = vld [vmem:[#allocation15_spill] sm:$0xff]  ;;  %v24719_v24 = vld [vmem:[#allocation140_spill] sm:$0xff] }
 0x4ff   : > { %v7437_v10 = vrot.slane %v7415_v0, %v20124_v32  ;;  %v15193_v17 = vcombine.low %v8949_v29, %v8963_v62  ;;  %v7358_v18 = vrot.slane %v3687_v20, %v20124_v32  ;;  %v9066_v26 = vcombine.high %v3722_v52, %v3722_v52  ;;  %v2883_v0 = vpop.xlane.xlu0 %2882  ;;  %v24711_v20 = vld [vmem:[#allocation168_spill] sm:$0xff] }
 0x500   : > { %24707 = vst [vmem:[#allocation36_spill] sm:$0xff] %v21847_v38  ;;  %v11956_v6 = vcombine.low %v11948_v61, %v11955_v48  ;;  %v21852_v45 = vrot.slane %v15242_v36, %v20124_v32  ;;  %v21855_v8 = vrot.slane %v17904_v34, %v20124_v32  ;;  %v7423_v42 = vrot.slane %v7407_v13, %v20124_v32  ;;  %v24712_v61 = vld [vmem:[#allocation169_spill] sm:$0xff]  ;;  %v24713_v48 = vld [vmem:[#allocation119_spill] sm:$0xff] }
 0x501   : > { %v7365_v16 = vrot.slane %v7351_v23, %v20124_v32  ;;  %v17902_v40 = vcombine.high %v8949_v29, %v8963_v62  ;;  %v21860_v5 = vrot.slane %v7416_v46, %v20124_v32  ;;  %v12185_v59 = vcombine.low %v24711_v20, %v24710_v28  ;;  %v2790_v28 = vpop.xlane.xlu1 %2789  ;;  %v24720_v38 = vld [vmem:[#allocation139_spill] sm:$0xff] }
 0x502   : > { %24708 = vst [vmem:[#allocation162_spill] sm:$0xff] %v21852_v45  ;;  %24709 = vst [vmem:[#allocation164_spill] sm:$0xff] %v21855_v8  ;;  %16525 = vperm.xlu0 %18660, %v11956_v6   ;;  %v12186_v36 = vcombine.low %v24713_v48, %v24712_v61  ;;  %v21867_v45 = vrot.slane %v15191_v43, %v20124_v32  ;;  %v21870_v34 = vrot.slane %v17901_v1, %v20124_v32  ;;  %v24717_v48 = vld [vmem:[#allocation95_spill] sm:$0xff] }
 0x503   : > { %v13672_v13 = vcombine.low %v7423_v42, %v7437_v10  ;;  %v9073_v62 = vrot.slane %v3722_v52, %v20124_v32  ;;  %v21874_v23 = vrot.slane %v15193_v17, %v20124_v32  ;;  %v7430_v29 = vrot.slane %v7414_v51, %v20124_v32  ;;  %v2787_v55 = vpop.xlane.xlu0 %2786 }
 0x504   : > { %24714 = vst [vmem:[#allocation163_spill] sm:$0xff] %v21867_v45  ;;  %24715 = vst [vmem:[#allocation61_spill] sm:$0xff] %v21870_v34  ;;  %v7366_v46 = vcombine.high %v7358_v18, %v7358_v18  ;;  %v9080_v6 = vrot.slane %v9066_v26, %v20124_v32  ;;  %v17839_v20 = vcombine.high %v7423_v42, %v7437_v10  ;;  %v24722_v42 = vld [vmem:[#allocation66_spill] sm:$0xff]  ;;  %v24724_v45 = vld [vmem:[#allocation141_spill] sm:$0xff] }
 0x505   : > { %24716 = vst [vmem:[#allocation132_spill] sm:$0xff] %v21874_v23  ;;  %v7367_v61 = vcombine.high %v7365_v16, %v7365_v16  ;;  %v3721_v43 = vadd.f32 %v24717_v48, %v2883_v0  ;;  %v12200_v8 = vrot.slane %v12186_v36, %v20124_v32  ;;  %v21881_v1 = vrot.slane %v17902_v40, %v20124_v32 }
 0x506   : > { %v13674_v52 = vcombine.low %v7430_v29, %v21860_v5  ;;  %v12193_v17 = vrot.slane %v12185_v59, %v20124_v32  ;;  %v10470_v51 = vcombine.low %v24720_v38, %v24719_v24  ;;  %v17840_v23 = vcombine.high %v7430_v29, %v21860_v5 }
 0x507   : > { %24718 = vst [vmem:[#allocation131_spill] sm:$0xff] %v21881_v1  ;;  %v21889_v26 = vrot.slane %v13672_v13, %v20124_v32  ;;  %v9081_v10 = vcombine.high %v9073_v62, %v9073_v62  ;;  %v3690_v0 = vadd.f32 %v24722_v42, %v2790_v28  ;;  %v7388_v36 = vrot.slane %v7366_v46, %v20124_v32  ;;  %v24723_v1 = vld [vmem:[#allocation142_spill] sm:$0xff] }
 0x508   : > { %v9082_v48 = vcombine.high %v9080_v6, %v9080_v6  ;;  %v12201_v40 = vcombine.low %v12193_v17, %v12200_v8  ;;  %v10471_v34 = vcombine.low %v24724_v45, %v24723_v1  ;;  %v21896_v59 = vrot.slane %v17839_v20, %v20124_v32  ;;  %v24726_v1 = vld [vmem:[#allocation174_spill] sm:$0xff]  ;;  %v24727_v20 = vld [vmem:[#allocation173_spill] sm:$0xff] }
 0x509   : > { %24721 = vst [vmem:[#allocation134_spill] sm:$0xff] %v21889_v26  ;;  %v7374_v24 = vrot.slane %v7358_v18, %v20124_v32  ;;  %v7395_v38 = vrot.slane %v7367_v61, %v20124_v32  ;;  %v9017_v5 = vcombine.high %v3721_v43, %v3721_v43  ;;  %v7381_v13 = vrot.slane %v7365_v16, %v20124_v32  ;;  %v24728_v42 = vld [vmem:[#allocation38_spill] sm:$0xff]  ;;  %v24729_v18 = vld [vmem:[#allocation175_spill] sm:$0xff] }
 0x50a   : > { %24725 = vst [vmem:[#allocation133_spill] sm:$0xff] %v21896_v59  ;;  %v9024_v29 = vrot.slane %v3721_v43, %v20124_v32  ;;  %16540 = vperm.xlu1 %18661, %v12201_v40   ;;  %v10478_v46 = vrot.slane %v10470_v51, %v20124_v32  ;;  %v10485_v8 = vrot.slane %v10471_v34, %v20124_v32 }
 0x50b   : > { %v9103_v28 = vrot.slane %v9081_v10, %v20124_v32  ;;  %v7498_v45 = vcombine.high %v3690_v0, %v3690_v0  ;;  %v10715_v17 = vcombine.low %v24727_v20, %v24726_v1  ;;  %v10716_v26 = vcombine.low %v24729_v18, %v24728_v42 }
 0x50c   : > { %v13623_v61 = vcombine.low %v7374_v24, %v7388_v36  ;;  %v17837_v59 = vcombine.high %v7374_v24, %v7388_v36  ;;  %v9110_v16 = vrot.slane %v9082_v48, %v20124_v32  ;;  %v10486_v49 = vcombine.low %v10478_v46, %v10485_v8 }
 0x50d   : > { %v13625_v43 = vcombine.low %v7381_v13, %v7395_v38  ;;  %v17838_v40 = vcombine.high %v7381_v13, %v7395_v38  ;;  %v9089_v51 = vrot.slane %v9073_v62, %v20124_v32  ;;  %v9031_v34 = vrot.slane %v9017_v5, %v20124_v32 }
 0x50e   : > { %v9096_v10 = vrot.slane %v9080_v6, %v20124_v32  ;;  %v9032_v50 = vcombine.high %v9024_v29, %v9024_v29  ;;  %v7505_v1 = vrot.slane %v3690_v0, %v20124_v32  ;;  %16435 = vperm.xlu0 %18660, %v10486_v49   ;;  %v10730_v20 = vrot.slane %v10716_v26, %v20124_v32  ;;  %v24732_v6 = vld [vmem:[#allocation63_spill] sm:$0xff] }
 0x50f   : > { %v15338_v42 = vcombine.low %v9089_v51, %v9103_v28  ;;  %v17907_v36 = vcombine.high %v9089_v51, %v9103_v28  ;;  %v7512_v48 = vrot.slane %v7498_v45, %v20124_v32  ;;  %v10723_v24 = vrot.slane %v10715_v17, %v20124_v32  ;;  %v24741_v51 = vld [vmem:[#allocation143_spill] sm:$0xff] }
 0x510   : > { %v21918_v38 = vrot.slane %v13674_v52, %v20124_v32  ;;  %v21921_v62 = vrot.slane %v17840_v23, %v20124_v32  ;;  %v15340_v5 = vcombine.low %v9096_v10, %v9110_v16  ;;  %v3689_v13 = vadd.f32 %v24732_v6, %v2787_v55 }
 0x511   : > { %v21925_v0 = vrot.slane %v13623_v61, %v20124_v32  ;;  %v17908_v49 = vcombine.high %v9096_v10, %v9110_v16  ;;  %v9033_v26 = vcombine.high %v9031_v34, %v9031_v34  ;;  %v10731_v46 = vcombine.low %v10723_v24, %v10730_v20  ;;  %v2892_v61 = vpop.xlane.xlu1 %2891  ;;  %v24744_v24 = vld [vmem:[#allocation145_spill] sm:$0xff] }
 0x512   : > { %24730 = vst [vmem:[#allocation98_spill] sm:$0xff] %v21918_v38  ;;  %24731 = vst [vmem:[#allocation15_spill] sm:$0xff] %v21921_v62  ;;  %v21928_v8 = vrot.slane %v17837_v59, %v20124_v32  ;;  %v21931_v28 = vrot.slane %v13625_v43, %v20124_v32  ;;  %v9054_v52 = vrot.slane %v9032_v50, %v20124_v32  ;;  %v24740_v50 = vld [vmem:[#allocation144_spill] sm:$0xff]  ;;  %v24749_v62 = vld [vmem:[#allocation181_spill] sm:$0xff] }
 0x513   : > { %24733 = vst [vmem:[#allocation168_spill] sm:$0xff] %v21925_v0  ;;  %v7513_v45 = vcombine.high %v7505_v1, %v7505_v1  ;;  %v21935_v23 = vrot.slane %v17838_v40, %v20124_v32  ;;  %v21938_v55 = vrot.slane %v15338_v42, %v20124_v32  ;;  %v21941_v17 = vrot.slane %v17907_v36, %v20124_v32  ;;  %v24743_v36 = vld [vmem:[#allocation146_spill] sm:$0xff] }
 0x514   : > { %24734 = vst [vmem:[#allocation169_spill] sm:$0xff] %v21928_v8  ;;  %24735 = vst [vmem:[#allocation119_spill] sm:$0xff] %v21931_v28  ;;  %v7514_v18 = vcombine.high %v7512_v48, %v7512_v48  ;;  %16450 = vperm.xlu1 %18661, %v10731_v46   ;;  %v21944_v59 = vrot.slane %v15340_v5, %v20124_v32  ;;  %v9040_v16 = vrot.slane %v9024_v29, %v20124_v32  ;;  %v24745_v29 = vld [vmem:[#allocation100_spill] sm:$0xff] }
 0x515   : > { %24736 = vst [vmem:[#allocation95_spill] sm:$0xff] %v21935_v23  ;;  %24737 = vst [vmem:[#allocation140_spill] sm:$0xff] %v21938_v55  ;;  %v7449_v43 = vcombine.high %v3689_v13, %v3689_v13  ;;  %v12038_v10 = vcombine.low %v24741_v51, %v24740_v50  ;;  %v21950_v40 = vrot.slane %v17908_v49, %v20124_v32  ;;  %v2889_v49 = vpop.xlane.xlu0 %2888 }
 0x516   : > { %24738 = vst [vmem:[#allocation139_spill] sm:$0xff] %v21941_v17  ;;  %24739 = vst [vmem:[#allocation66_spill] sm:$0xff] %v21944_v59  ;;  %v9047_v20 = vrot.slane %v9031_v34, %v20124_v32  ;;  %v9061_v42 = vrot.slane %v9033_v26, %v20124_v32  ;;  %v12039_v6 = vcombine.low %v24744_v24, %v24743_v36  ;;  %v24746_v36 = vld [vmem:[#allocation180_spill] sm:$0xff]  ;;  %v24747_v24 = vld [vmem:[#allocation179_spill] sm:$0xff] }
 0x517   : > { %24742 = vst [vmem:[#allocation142_spill] sm:$0xff] %v21950_v40  ;;  %v15289_v46 = vcombine.low %v9040_v16, %v9054_v52  ;;  %v7521_v5 = vrot.slane %v7505_v1, %v20124_v32  ;;  %v7535_v59 = vrot.slane %v7513_v45, %v20124_v32  ;;  %v3724_v55 = vadd.f32 %v24745_v29, %v2892_v61  ;;  %v24748_v1 = vld [vmem:[#allocation182_spill] sm:$0xff] }
 0x518   : > { %v7542_v17 = vrot.slane %v7514_v18, %v20124_v32  ;;  %v7456_v50 = vrot.slane %v3689_v13, %v20124_v32  ;;  %v12046_v51 = vrot.slane %v12038_v10, %v20124_v32  ;;  %v12053_v34 = vrot.slane %v12039_v6, %v20124_v32  ;;  %v24751_v6 = vld [vmem:[#allocation97_spill] sm:$0xff] }
 0x519   : > { %v17905_v26 = vcombine.high %v9040_v16, %v9054_v52  ;;  %v7463_v40 = vrot.slane %v7449_v43, %v20124_v32  ;;  %v12283_v38 = vcombine.low %v24747_v24, %v24746_v36  ;;  %v12284_v45 = vcombine.low %v24749_v62, %v24748_v1 }
 0x51a   : > { %v15291_v28 = vcombine.low %v9047_v20, %v9061_v42  ;;  %v17906_v61 = vcombine.high %v9047_v20, %v9061_v42  ;;  %v7528_v18 = vrot.slane %v7512_v48, %v20124_v32  ;;  %v12054_v29 = vcombine.low %v12046_v51, %v12053_v34  ;;  %v2796_v34 = vpop.xlane.xlu1 %2795 }
 0x51b   : > { %v21970_v13 = vrot.slane %v15289_v46, %v20124_v32  ;;  %v13770_v10 = vcombine.low %v7521_v5, %v7535_v59  ;;  %v9164_v23 = vcombine.high %v3724_v55, %v3724_v55  ;;  %v3723_v52 = vadd.f32 %v24751_v6, %v2889_v49 }
 0x51c   : > { %v17843_v16 = vcombine.high %v7521_v5, %v7535_v59  ;;  %v13772_v43 = vcombine.low %v7528_v18, %v7542_v17  ;;  %v7464_v0 = vcombine.high %v7456_v50, %v7456_v50  ;;  %v9171_v36 = vrot.slane %v3724_v55, %v20124_v32  ;;  %16531 = vperm.xlu0 %18660, %v12054_v29   ;;  %v24755_v59 = vld [vmem:[#allocation148_spill] sm:$0xff]  ;;  %v24756_v5 = vld [vmem:[#allocation147_spill] sm:$0xff] }
 0x51d   : > { %24750 = vst [vmem:[#allocation141_spill] sm:$0xff] %v21970_v13  ;;  %v17844_v24 = vcombine.high %v7528_v18, %v7542_v17  ;;  %v7465_v62 = vcombine.high %v7463_v40, %v7463_v40  ;;  %v12291_v20 = vrot.slane %v12283_v38, %v20124_v32  ;;  %v12298_v48 = vrot.slane %v12284_v45, %v20124_v32  ;;  %v24757_v38 = vld [vmem:[#allocation10_spill] sm:$0xff]  ;;  %v24758_v18 = vld [vmem:[#allocation149_spill] sm:$0xff] }
 0x51e   : > { %v21977_v42 = vrot.slane %v17905_v26, %v20124_v32  ;;  %v21980_v46 = vrot.slane %v15291_v28, %v20124_v32  ;;  %v21983_v49 = vrot.slane %v17906_v61, %v20124_v32  ;;  %v10568_v51 = vcombine.low %v24756_v5, %v24755_v59  ;;  %v24763_v59 = vld [vmem:[#allocation68_spill] sm:$0xff] }
 0x51f   : > { %v9178_v55 = vrot.slane %v9164_v23, %v20124_v32  ;;  %v9115_v17 = vcombine.high %v3723_v52, %v3723_v52  ;;  %v12299_v1 = vcombine.low %v12291_v20, %v12298_v48  ;;  %v10569_v45 = vcombine.low %v24758_v18, %v24757_v38 }
 0x520   : > { %24752 = vst [vmem:[#allocation174_spill] sm:$0xff] %v21977_v42  ;;  %24753 = vst [vmem:[#allocation173_spill] sm:$0xff] %v21980_v46  ;;  %v21991_v26 = vrot.slane %v13770_v10, %v20124_v32  ;;  %v21994_v28 = vrot.slane %v17843_v16, %v20124_v32  ;;  %v7486_v61 = vrot.slane %v7464_v0, %v20124_v32 }
 0x521   : > { %24754 = vst [vmem:[#allocation38_spill] sm:$0xff] %v21983_v49  ;;  %v9179_v29 = vcombine.high %v9171_v36, %v9171_v36  ;;  %v21998_v6 = vrot.slane %v13772_v43, %v20124_v32  ;;  %v22001_v23 = vrot.slane %v17844_v24, %v20124_v32  ;;  %v7493_v20 = vrot.slane %v7465_v62, %v20124_v32  ;;  %v24764_v24 = vld [vmem:[#allocation185_spill] sm:$0xff] }
 0x522   : > { %24759 = vst [vmem:[#allocation175_spill] sm:$0xff] %v21991_v26  ;;  %24760 = vst [vmem:[#allocation63_spill] sm:$0xff] %v21994_v28  ;;  %v9122_v48 = vrot.slane %v3723_v52, %v20124_v32  ;;  %16546 = vperm.xlu1 %18661, %v12299_v1   ;;  %v7472_v10 = vrot.slane %v7456_v50, %v20124_v32  ;;  %v3692_v5 = vadd.f32 %v24763_v59, %v2796_v34  ;;  %v24766_v50 = vld [vmem:[#allocation186_spill] sm:$0xff]  ;;  %v2793_v28 = vpop.xlane.xlu0 %2792 }
 0x523   : > { %24761 = vst [vmem:[#allocation144_spill] sm:$0xff] %v21998_v6  ;;  %24762 = vst [vmem:[#allocation143_spill] sm:$0xff] %v22001_v23  ;;  %v10576_v16 = vrot.slane %v10568_v51, %v20124_v32  ;;  %v10583_v0 = vrot.slane %v10569_v45, %v20124_v32  ;;  %v7479_v38 = vrot.slane %v7463_v40, %v20124_v32  ;;  %v24765_v23 = vld [vmem:[#allocation40_spill] sm:$0xff] }
 0x524   : > { %v9180_v43 = vcombine.high %v9178_v55, %v9178_v55  ;;  %v9129_v18 = vrot.slane %v9115_v17, %v20124_v32  ;;  %v10813_v6 = vcombine.low %v24764_v24, %v20771_v56  ;;  %v13721_v62 = vcombine.low %v7472_v10, %v7486_v61 }
 0x525   : > { %v9201_v52 = vrot.slane %v9179_v29, %v20124_v32  ;;  %v10584_v1 = vcombine.low %v10576_v16, %v10583_v0  ;;  %v10814_v26 = vcombine.low %v24766_v50, %v24765_v23  ;;  %v17841_v34 = vcombine.high %v7472_v10, %v7486_v61  ;;  %v24768_v10 = vld [vmem:[#allocation65_spill] sm:$0xff]  ;;  %v2898_v50 = vpop.xlane.xlu1 %2897 }
 0x526   : > { %v13723_v59 = vcombine.low %v7479_v38, %v7493_v20  ;;  %v9187_v51 = vrot.slane %v9171_v36, %v20124_v32  ;;  %v9130_v45 = vcombine.high %v9122_v48, %v9122_v48  ;;  %v7596_v40 = vcombine.high %v3692_v5, %v3692_v5 }
 0x527   : > { %v7603_v46 = vrot.slane %v3692_v5, %v20124_v32  ;;  %16441 = vperm.xlu0 %18660, %v10584_v1   ;;  %v10821_v17 = vrot.slane %v10813_v6, %v20124_v32  ;;  %v10828_v56 = vrot.slane %v10814_v26, %v20124_v32  ;;  %v17842_v24 = vcombine.high %v7479_v38, %v7493_v20  ;;  %v24771_v20 = vld [vmem:[#allocation154_spill] sm:$0xff] }
 0x528   : > { %v9194_v29 = vrot.slane %v9178_v55, %v20124_v32  ;;  %v9208_v16 = vrot.slane %v9180_v43, %v20124_v32  ;;  %v9131_v23 = vcombine.high %v9129_v18, %v9129_v18  ;;  %v22023_v61 = vrot.slane %v13721_v62, %v20124_v32  ;;  %v24772_v55 = vld [vmem:[#allocation153_spill] sm:$0xff] }
 0x529   : > { %v15436_v36 = vcombine.low %v9187_v51, %v9201_v52  ;;  %v3691_v0 = vadd.f32 %v24768_v10, %v2793_v28  ;;  %v10829_v49 = vcombine.low %v10821_v17, %v10828_v56  ;;  %v22027_v5 = vrot.slane %v17841_v34, %v20124_v32  ;;  %v24774_v28 = vld [vmem:[#allocation155_spill] sm:$0xff]  ;;  %v24776_v56 = vld [vmem:[#allocation102_spill] sm:$0xff] }
 0x52a   : > { %24767 = vst [vmem:[#allocation146_spill] sm:$0xff] %v22023_v61  ;;  %v22030_v6 = vrot.slane %v13723_v59, %v20124_v32  ;;  %v17911_v26 = vcombine.high %v9187_v51, %v9201_v52  ;;  %v12136_v38 = vcombine.low %v24772_v55, %v24771_v20  ;;  %v9152_v43 = vrot.slane %v9130_v45, %v20124_v32  ;;  %v24773_v61 = vld [vmem:[#allocation32_spill] sm:$0xff] }
 0x52b   : > { %24769 = vst [vmem:[#allocation145_spill] sm:$0xff] %v22027_v5  ;;  %v7610_v62 = vrot.slane %v7596_v40, %v20124_v32  ;;  %v7611_v1 = vcombine.high %v7603_v46, %v7603_v46  ;;  %16456 = vperm.xlu1 %18661, %v10829_v49   ;;  %v12137_v10 = vcombine.low %v24774_v28, %v24773_v61 }
 0x52c   : > { %24770 = vst [vmem:[#allocation100_spill] sm:$0xff] %v22030_v6  ;;  %v22039_v17 = vrot.slane %v17842_v24, %v20124_v32  ;;  %v15438_v34 = vcombine.low %v9194_v29, %v9208_v16  ;;  %v9159_v59 = vrot.slane %v9131_v23, %v20124_v32  ;;  %v3726_v52 = vadd.f32 %v24776_v56, %v2898_v50 }
 0x52d   : > { %v17912_v51 = vcombine.high %v9194_v29, %v9208_v16  ;;  %v22044_v20 = vrot.slane %v15436_v36, %v20124_v32  ;;  %v9138_v45 = vrot.slane %v9122_v48, %v20124_v32  ;;  %v7547_v40 = vcombine.high %v3691_v0, %v3691_v0 }
 0x52e   : > { %24775 = vst [vmem:[#allocation180_spill] sm:$0xff] %v22039_v17  ;;  %v22048_v49 = vrot.slane %v17911_v26, %v20124_v32  ;;  %v9145_v61 = vrot.slane %v9129_v18, %v20124_v32  ;;  %v12144_v24 = vrot.slane %v12136_v38, %v20124_v32  ;;  %v12151_v55 = vrot.slane %v12137_v10, %v20124_v32  ;;  %v24794_v17 = vld [vmem:[#allocation161_spill] sm:$0xff] }
 0x52f   : > { %24777 = vst [vmem:[#allocation179_spill] sm:$0xff] %v22044_v20  ;;  %v15387_v28 = vcombine.low %v9138_v45, %v9152_v43  ;;  %v17909_v23 = vcombine.high %v9138_v45, %v9152_v43  ;;  %v7612_v6 = vcombine.high %v7610_v62, %v7610_v62  ;;  %v7633_v29 = vrot.slane %v7611_v1, %v20124_v32  ;;  %v2895_v45 = vpop.xlane.xlu0 %2894  ;;  %v24781_v1 = vld [vmem:[#allocation191_spill] sm:$0xff]  ;;  %v24782_v20 = vld [vmem:[#allocation190_spill] sm:$0xff] }
 0x530   : > { %24778 = vst [vmem:[#allocation182_spill] sm:$0xff] %v22048_v49  ;;  %v15389_v16 = vcombine.low %v9145_v61, %v9159_v59  ;;  %v7554_v36 = vrot.slane %v3691_v0, %v20124_v32  ;;  %v9262_v50 = vcombine.high %v3726_v52, %v3726_v52  ;;  %v12152_v48 = vcombine.low %v12144_v24, %v12151_v55  ;;  %v24783_v49 = vld [vmem:[#allocation193_spill] sm:$0xff]  ;;  %v24784_v24 = vld [vmem:[#allocation192_spill] sm:$0xff] }
 0x531   : > { %v22056_v56 = vrot.slane %v15438_v34, %v20124_v32  ;;  %v22059_v26 = vrot.slane %v17912_v51, %v20124_v32  ;;  %v7619_v18 = vrot.slane %v7603_v46, %v20124_v32  ;;  %v7561_v38 = vrot.slane %v7547_v40, %v20124_v32 }
 0x532   : > { %v17910_v10 = vcombine.high %v9145_v61, %v9159_v59  ;;  %v9269_v43 = vrot.slane %v3726_v52, %v20124_v32  ;;  %16537 = vperm.xlu0 %18660, %v12152_v48   ;;  %v12381_v0 = vcombine.low %v24782_v20, %v24781_v1  ;;  %v12382_v55 = vcombine.low %v24784_v24, %v24783_v49  ;;  %v2802_v48 = vpop.xlane.xlu1 %2801  ;;  %v24788_v24 = vld [vmem:[#allocation99_spill] sm:$0xff] }
 0x533   : > { %24779 = vst [vmem:[#allocation181_spill] sm:$0xff] %v22056_v56  ;;  %24780 = vst [vmem:[#allocation97_spill] sm:$0xff] %v22059_v26  ;;  %v22069_v34 = vrot.slane %v15387_v28, %v20124_v32  ;;  %v22072_v51 = vrot.slane %v17909_v23, %v20124_v32  ;;  %v7640_v46 = vrot.slane %v7612_v6, %v20124_v32 }
 0x534   : > { %v13868_v40 = vcombine.low %v7619_v18, %v7633_v29  ;;  %v22076_v59 = vrot.slane %v15389_v16, %v20124_v32  ;;  %v7626_v52 = vrot.slane %v7610_v62, %v20124_v32  ;;  %v7562_v61 = vcombine.high %v7554_v36, %v7554_v36  ;;  %v24790_v16 = vld [vmem:[#allocation160_spill] sm:$0xff] }
 0x535   : > { %24785 = vst [vmem:[#allocation148_spill] sm:$0xff] %v22069_v34  ;;  %24786 = vst [vmem:[#allocation147_spill] sm:$0xff] %v22072_v51  ;;  %v9276_v20 = vrot.slane %v9262_v50, %v20124_v32  ;;  %v17847_v1 = vcombine.high %v7619_v18, %v7633_v29  ;;  %v7563_v49 = vcombine.high %v7561_v38, %v7561_v38  ;;  %v24793_v29 = vld [vmem:[#allocation70_spill] sm:$0xff] }
 0x536   : > { %24787 = vst [vmem:[#allocation10_spill] sm:$0xff] %v22076_v59  ;;  %v3725_v28 = vadd.f32 %v24788_v24, %v2895_v45  ;;  %v12396_v56 = vrot.slane %v12382_v55, %v20124_v32  ;;  %v22083_v23 = vrot.slane %v17910_v10, %v20124_v32  ;;  %v9277_v6 = vcombine.high %v9269_v43, %v9269_v43  ;;  %v24791_v59 = vld [vmem:[#allocation159_spill] sm:$0xff] }
 0x537   : > { %v12389_v26 = vrot.slane %v12381_v0, %v20124_v32  ;;  %v10666_v34 = vcombine.low %v24791_v59, %v24790_v16  ;;  %v13870_v62 = vcombine.low %v7626_v52, %v7640_v46  ;;  %v17848_v51 = vcombine.high %v7626_v52, %v7640_v46  ;;  %v24795_v10 = vld [vmem:[#allocation11_spill] sm:$0xff] }
 0x538   : > { %24789 = vst [vmem:[#allocation149_spill] sm:$0xff] %v22083_v23  ;;  %v22089_v50 = vrot.slane %v13868_v40, %v20124_v32  ;;  %v3694_v18 = vadd.f32 %v24793_v29, %v2802_v48  ;;  %v7584_v45 = vrot.slane %v7562_v61, %v20124_v32  ;;  %v9278_v24 = vcombine.high %v9276_v20, %v9276_v20  ;;  %v24797_v48 = vld [vmem:[#allocation197_spill] sm:$0xff]  ;;  %v24799_v29 = vld [vmem:[#allocation199_spill] sm:$0xff] }
 0x539   : > { %v12397_v55 = vcombine.low %v12389_v26, %v12396_v56  ;;  %v10667_v23 = vcombine.low %v24795_v10, %v24794_v17  ;;  %v22096_v5 = vrot.slane %v17847_v1, %v20124_v32  ;;  %v7570_v0 = vrot.slane %v7554_v36, %v20124_v32  ;;  %v24798_v1 = vld [vmem:[#allocation196_spill] sm:$0xff]  ;;  %v24800_v36 = vld [vmem:[#allocation198_spill] sm:$0xff] }
 0x53a   : > { %24792 = vst [vmem:[#allocation68_spill] sm:$0xff] %v22089_v50  ;;  %v7591_v59 = vrot.slane %v7563_v49, %v20124_v32  ;;  %v9213_v46 = vcombine.high %v3725_v28, %v3725_v28  ;;  %v9299_v40 = vrot.slane %v9277_v6, %v20124_v32  ;;  %v9220_v52 = vrot.slane %v3725_v28, %v20124_v32 }
 0x53b   : > { %24796 = vst [vmem:[#allocation185_spill] sm:$0xff] %v22096_v5  ;;  %16552 = vperm.xlu1 %18661, %v12397_v55   ;;  %v10674_v61 = vrot.slane %v10666_v34, %v20124_v32  ;;  %v10681_v56 = vrot.slane %v10667_v23, %v20124_v32  ;;  %v7577_v26 = vrot.slane %v7561_v38, %v20124_v32 }
 0x53c   : > { %v7694_v17 = vcombine.high %v3694_v18, %v3694_v18  ;;  %v10911_v16 = vcombine.low %v24798_v1, %v24797_v48  ;;  %v10912_v10 = vcombine.low %v24800_v36, %v24799_v29  ;;  %v13819_v49 = vcombine.low %v7570_v0, %v7584_v45  ;;  %v2799_v36 = vpop.xlane.xlu0 %2798 }
 0x53d   : > { %v9285_v50 = vrot.slane %v9269_v43, %v20124_v32  ;;  %v9306_v6 = vrot.slane %v9278_v24, %v20124_v32  ;;  %v10682_v28 = vcombine.low %v10674_v61, %v10681_v56  ;;  %v17845_v55 = vcombine.high %v7570_v0, %v7584_v45 }
 0x53e   : > { %v13821_v5 = vcombine.low %v7577_v26, %v7591_v59  ;;  %v17846_v34 = vcombine.high %v7577_v26, %v7591_v59  ;;  %v9227_v23 = vrot.slane %v9213_v46, %v20124_v32  ;;  %v9292_v38 = vrot.slane %v9276_v20, %v20124_v32  ;;  %v24807_v26 = vld [vmem:[#allocation67_spill] sm:$0xff] }
 0x53f   : > { %v15534_v13 = vcombine.low %v9285_v50, %v9299_v40  ;;  %v9228_v42 = vcombine.high %v9220_v52, %v9220_v52  ;;  %16447 = vperm.xlu0 %18660, %v10682_v28   ;;  %v10926_v48 = vrot.slane %v10912_v10, %v20124_v32  ;;  %v17915_v1 = vcombine.high %v9285_v50, %v9299_v40  ;;  %v2904_v40 = vpop.xlane.xlu1 %2903 }
 0x540   : > { %v7701_v29 = vrot.slane %v3694_v18, %v20124_v32  ;;  %v7708_v43 = vrot.slane %v7694_v17, %v20124_v32  ;;  %v10919_v24 = vrot.slane %v10911_v16, %v20124_v32  ;;  %v22118_v45 = vrot.slane %v13870_v62, %v20124_v32 }
 0x541   : > { %v22121_v0 = vrot.slane %v17848_v51, %v20124_v32  ;;  %v22124_v20 = vrot.slane %v13819_v49, %v20124_v32  ;;  %v15536_v59 = vcombine.low %v9292_v38, %v9306_v6  ;;  %v22127_v46 = vrot.slane %v17845_v55, %v20124_v32  ;;  %v24811_v55 = vld [vmem:[#allocation104_spill] sm:$0xff] }
 0x542   : > { %24801 = vst [vmem:[#allocation40_spill] sm:$0xff] %v22118_v45  ;;  %v17916_v50 = vcombine.high %v9292_v38, %v9306_v6  ;;  %v9229_v18 = vcombine.high %v9227_v23, %v9227_v23  ;;  %v10927_v61 = vcombine.low %v10919_v24, %v10926_v48  ;;  %v22130_v56 = vrot.slane %v13821_v5, %v20124_v32  ;;  %v24812_v38 = vld [vmem:[#allocation33_spill] sm:$0xff]  ;;  %v24815_v24 = vld [vmem:[#allocation167_spill] sm:$0xff] }
 0x543   : > { %24802 = vst [vmem:[#allocation186_spill] sm:$0xff] %v22121_v0  ;;  %24803 = vst [vmem:[#allocation65_spill] sm:$0xff] %v22124_v20  ;;  %v22133_v62 = vrot.slane %v17846_v34, %v20124_v32  ;;  %v9250_v51 = vrot.slane %v9228_v42, %v20124_v32  ;;  %v3693_v17 = vadd.f32 %v24807_v26, %v2799_v36  ;;  %v24813_v42 = vld [vmem:[#allocation165_spill] sm:$0xff]  ;;  %v24816_v26 = vld [vmem:[#allocation166_spill] sm:$0xff] }
 0x544   : > { %24804 = vst [vmem:[#allocation154_spill] sm:$0xff] %v22127_v46  ;;  %24805 = vst [vmem:[#allocation153_spill] sm:$0xff] %v22130_v56  ;;  %v22138_v16 = vrot.slane %v15534_v13, %v20124_v32  ;;  %v22141_v10 = vrot.slane %v17915_v1, %v20124_v32  ;;  %v7709_v49 = vcombine.high %v7701_v29, %v7701_v29  ;;  %16462 = vperm.xlu1 %18661, %v10927_v61   ;;  %v24845_v20 = vld [vmem:[#allocation178_spill] sm:$0xff] }
 0x545   : > { %24806 = vst [vmem:[#allocation32_spill] sm:$0xff] %v22133_v62  ;;  %v7710_v6 = vcombine.high %v7708_v43, %v7708_v43  ;;  %v22144_v28 = vrot.slane %v15536_v59, %v20124_v32  ;;  %v9236_v5 = vrot.slane %v9220_v52, %v20124_v32  ;;  %v3728_v34 = vadd.f32 %v24811_v55, %v2904_v40  ;;  %v24843_v62 = vld [vmem:[#allocation176_spill] sm:$0xff] }
 0x546   : > { %24808 = vst [vmem:[#allocation155_spill] sm:$0xff] %v22138_v16  ;;  %24809 = vst [vmem:[#allocation102_spill] sm:$0xff] %v22141_v10  ;;  %v12234_v48 = vcombine.low %v24813_v42, %v24812_v38  ;;  %v22151_v36 = vrot.slane %v17916_v50, %v20124_v32  ;;  %v9243_v13 = vrot.slane %v9227_v23, %v20124_v32 }
 0x547   : > { %24810 = vst [vmem:[#allocation191_spill] sm:$0xff] %v22144_v28  ;;  %v9257_v1 = vrot.slane %v9229_v18, %v20124_v32  ;;  %v12235_v61 = vcombine.low %v24816_v26, %v24815_v24  ;;  %v15485_v16 = vcombine.low %v9236_v5, %v9250_v51  ;;  %v17913_v59 = vcombine.high %v9236_v5, %v9250_v51  ;;  %v24817_v18 = vld [vmem:[#allocation203_spill] sm:$0xff]  ;;  %v24819_v24 = vld [vmem:[#allocation204_spill] sm:$0xff]  ;;  %v24820_v26 = vld [vmem:[#allocation21_spill] sm:$0xff] }
 0x548   : > { %24814 = vst [vmem:[#allocation190_spill] sm:$0xff] %v22151_v36  ;;  %v7645_v10 = vcombine.high %v3693_v17, %v3693_v17  ;;  %v7652_v52 = vrot.slane %v3693_v17, %v20124_v32  ;;  %v7731_v40 = vrot.slane %v7709_v49, %v20124_v32  ;;  %v7738_v55 = vrot.slane %v7710_v6, %v20124_v32  ;;  %v24818_v28 = vld [vmem:[#allocation39_spill] sm:$0xff]  ;;  %v2901_v49 = vpop.xlane.xlu0 %2900 }
 0x549   : > { %v12242_v38 = vrot.slane %v12234_v48, %v20124_v32  ;;  %v12249_v50 = vrot.slane %v12235_v61, %v20124_v32  ;;  %v7717_v23 = vrot.slane %v7701_v29, %v20124_v32  ;;  %v9360_v42 = vcombine.high %v3728_v34, %v3728_v34 }
 0x54a   : > { %v12479_v36 = vcombine.low %v24818_v28, %v24817_v18  ;;  %v12480_v51 = vcombine.low %v24820_v26, %v24819_v24  ;;  %v15487_v5 = vcombine.low %v9243_v13, %v9257_v1  ;;  %v17914_v45 = vcombine.high %v9243_v13, %v9257_v1  ;;  %v24827_v26 = vld [vmem:[#allocation170_spill] sm:$0xff] }
 0x54b   : > { %v7724_v17 = vrot.slane %v7708_v43, %v20124_v32  ;;  %v12250_v0 = vcombine.low %v12242_v38, %v12249_v50  ;;  %v22169_v6 = vrot.slane %v15485_v16, %v20124_v32  ;;  %v22172_v48 = vrot.slane %v17913_v59, %v20124_v32  ;;  %v24823_v43 = vld [vmem:[#allocation101_spill] sm:$0xff]  ;;  %v2808_v38 = vpop.xlane.xlu1 %2807 }
 0x54c   : > { %v7659_v29 = vrot.slane %v7645_v10, %v20124_v32  ;;  %v7660_v61 = vcombine.high %v7652_v52, %v7652_v52  ;;  %v13966_v56 = vcombine.low %v7717_v23, %v7731_v40  ;;  %v17851_v28 = vcombine.high %v7717_v23, %v7731_v40  ;;  %v24826_v23 = vld [vmem:[#allocation171_spill] sm:$0xff] }
 0x54d   : > { %24821 = vst [vmem:[#allocation193_spill] sm:$0xff] %v22169_v6  ;;  %24822 = vst [vmem:[#allocation192_spill] sm:$0xff] %v22172_v48  ;;  %v13968_v18 = vcombine.low %v7724_v17, %v7738_v55  ;;  %v9367_v24 = vrot.slane %v3728_v34, %v20124_v32  ;;  %16543 = vperm.xlu0 %18660, %v12250_v0   ;;  %v9374_v13 = vrot.slane %v9360_v42, %v20124_v32 }
 0x54e   : > { %v3727_v1 = vadd.f32 %v24823_v43, %v2901_v49  ;;  %v12487_v16 = vrot.slane %v12479_v36, %v20124_v32  ;;  %v12494_v50 = vrot.slane %v12480_v51, %v20124_v32  ;;  %v22181_v59 = vrot.slane %v15487_v5, %v20124_v32  ;;  %v24828_v49 = vld [vmem:[#allocation172_spill] sm:$0xff] }
 0x54f   : > { %v22184_v10 = vrot.slane %v17914_v45, %v20124_v32  ;;  %v17852_v40 = vcombine.high %v7724_v17, %v7738_v55  ;;  %v10764_v34 = vcombine.low %v24827_v26, %v24826_v23  ;;  %v7661_v0 = vcombine.high %v7659_v29, %v7659_v29  ;;  %v24829_v43 = vld [vmem:[#allocation12_spill] sm:$0xff] }
 0x550   : > { %24824 = vst [vmem:[#allocation99_spill] sm:$0xff] %v22181_v59  ;;  %v7682_v42 = vrot.slane %v7660_v61, %v20124_v32  ;;  %v12495_v6 = vcombine.low %v12487_v16, %v12494_v50  ;;  %v10765_v48 = vcombine.low %v24829_v43, %v24828_v49  ;;  %v22192_v36 = vrot.slane %v13966_v56, %v20124_v32  ;;  %v24832_v45 = vld [vmem:[#allocation72_spill] sm:$0xff]  ;;  %v24835_v49 = vld [vmem:[#allocation209_spill] sm:$0xff] }
 0x551   : > { %24825 = vst [vmem:[#allocation160_spill] sm:$0xff] %v22184_v10  ;;  %v22195_v51 = vrot.slane %v17851_v28, %v20124_v32  ;;  %v9375_v5 = vcombine.high %v9367_v24, %v9367_v24  ;;  %v3696_v59 = vadd.f32 %v24832_v45, %v2808_v38  ;;  %v22199_v55 = vrot.slane %v13968_v18, %v20124_v32  ;;  %v24836_v43 = vld [vmem:[#allocation208_spill] sm:$0xff] }
 0x552   : > { %24830 = vst [vmem:[#allocation159_spill] sm:$0xff] %v22192_v36  ;;  %v7668_v17 = vrot.slane %v7652_v52, %v20124_v32  ;;  %v9376_v23 = vcombine.high %v9374_v13, %v9374_v13  ;;  %v9311_v61 = vcombine.high %v3727_v1, %v3727_v1  ;;  %16558 = vperm.xlu1 %18661, %v12495_v6   ;;  %v2805_v36 = vpop.xlane.xlu0 %2804 }
 0x553   : > { %24831 = vst [vmem:[#allocation70_spill] sm:$0xff] %v22195_v51  ;;  %24833 = vst [vmem:[#allocation161_spill] sm:$0xff] %v22199_v55  ;;  %v22203_v16 = vrot.slane %v17852_v40, %v20124_v32  ;;  %v9318_v56 = vrot.slane %v3727_v1, %v20124_v32  ;;  %v10772_v50 = vrot.slane %v10764_v34, %v20124_v32  ;;  %v24837_v40 = vld [vmem:[#allocation211_spill] sm:$0xff]  ;;  %v24838_v55 = vld [vmem:[#allocation210_spill] sm:$0xff] }
 0x554   : > { %v10779_v28 = vrot.slane %v10765_v48, %v20124_v32  ;;  %v7675_v26 = vrot.slane %v7659_v29, %v20124_v32  ;;  %v7689_v38 = vrot.slane %v7661_v0, %v20124_v32  ;;  %v13917_v18 = vcombine.low %v7668_v17, %v7682_v42 }
 0x555   : > { %24834 = vst [vmem:[#allocation11_spill] sm:$0xff] %v22203_v16  ;;  %v11009_v52 = vcombine.low %v24836_v43, %v24835_v49  ;;  %v9397_v45 = vrot.slane %v9375_v5, %v20124_v32  ;;  %v7792_v6 = vcombine.high %v3696_v59, %v3696_v59  ;;  %v11010_v16 = vcombine.low %v24838_v55, %v24837_v40  ;;  %v2910_v43 = vpop.xlane.xlu1 %2909 }
 0x556   : > { %v10780_v10 = vcombine.low %v10772_v50, %v10779_v28  ;;  %v17849_v1 = vcombine.high %v7668_v17, %v7682_v42  ;;  %v9383_v34 = vrot.slane %v9367_v24, %v20124_v32  ;;  %v9404_v48 = vrot.slane %v9376_v23, %v20124_v32  ;;  %v24840_v23 = vld [vmem:[#allocation69_spill] sm:$0xff] }
 0x557   : > { %v9325_v29 = vrot.slane %v9311_v61, %v20124_v32  ;;  %v9326_v0 = vcombine.high %v9318_v56, %v9318_v56  ;;  %v7799_v51 = vrot.slane %v3696_v59, %v20124_v32  ;;  %v11017_v49 = vrot.slane %v11009_v52, %v20124_v32 }
 0x558   : > { %16453 = vperm.xlu0 %18660, %v10780_v10   ;;  %v11024_v5 = vrot.slane %v11010_v16, %v20124_v32  ;;  %v13919_v50 = vcombine.low %v7675_v26, %v7689_v38  ;;  %v17850_v28 = vcombine.high %v7675_v26, %v7689_v38  ;;  %v22222_v55 = vrot.slane %v13917_v18, %v20124_v32  ;;  %v24842_v16 = vld [vmem:[#allocation177_spill] sm:$0xff] }
 0x559   : > { %v9390_v24 = vrot.slane %v9374_v13, %v20124_v32  ;;  %v15632_v42 = vcombine.low %v9383_v34, %v9397_v45  ;;  %v7806_v17 = vrot.slane %v7792_v6, %v20124_v32  ;;  %v3695_v61 = vadd.f32 %v24840_v23, %v2805_v36  ;;  %v24844_v13 = vld [vmem:[#allocation35_spill] sm:$0xff] }
 0x55a   : > { %24839 = vst [vmem:[#allocation197_spill] sm:$0xff] %v22222_v55  ;;  %v11025_v40 = vcombine.low %v11017_v49, %v11024_v5  ;;  %v22228_v59 = vrot.slane %v17849_v1, %v20124_v32  ;;  %v17919_v10 = vcombine.high %v9383_v34, %v9397_v45  ;;  %v9327_v52 = vcombine.high %v9325_v29, %v9325_v29  ;;  %v24848_v45 = vld [vmem:[#allocation106_spill] sm:$0xff] }
 0x55b   : > { %v12332_v26 = vcombine.low %v24843_v62, %v24842_v16  ;;  %v15634_v38 = vcombine.low %v9390_v24, %v9404_v48  ;;  %v9348_v18 = vrot.slane %v9326_v0, %v20124_v32  ;;  %v7807_v55 = vcombine.high %v7799_v51, %v7799_v51 }
 0x55c   : > { %24841 = vst [vmem:[#allocation196_spill] sm:$0xff] %v22228_v59  ;;  %16468 = vperm.xlu1 %18661, %v11025_v40   ;;  %v12333_v6 = vcombine.low %v24845_v20, %v24844_v13  ;;  %v22236_v36 = vrot.slane %v13919_v50, %v20124_v32  ;;  %v22239_v49 = vrot.slane %v17850_v28, %v20124_v32 }
 0x55d   : > { %v17920_v1 = vcombine.high %v9390_v24, %v9404_v48  ;;  %v3730_v34 = vadd.f32 %v24848_v45, %v2910_v43  ;;  %v22243_v5 = vrot.slane %v15632_v42, %v20124_v32  ;;  %v9334_v62 = vrot.slane %v9318_v56, %v20124_v32  ;;  %v24856_v45 = vld [vmem:[#allocation213_spill] sm:$0xff] }
 0x55e   : > { %24846 = vst [vmem:[#allocation199_spill] sm:$0xff] %v22236_v36  ;;  %24847 = vst [vmem:[#allocation198_spill] sm:$0xff] %v22239_v49  ;;  %v7808_v0 = vcombine.high %v7806_v17, %v7806_v17  ;;  %v7743_v23 = vcombine.high %v3695_v61, %v3695_v61  ;;  %v22247_v40 = vrot.slane %v17919_v10, %v20124_v32  ;;  %v24869_v36 = vld [vmem:[#allocation184_spill] sm:$0xff] }
 0x55f   : > { %24849 = vst [vmem:[#allocation67_spill] sm:$0xff] %v22243_v5  ;;  %v22250_v20 = vrot.slane %v9327_v52, %v20124_v32  ;;  %v12340_v50 = vrot.slane %v12332_v26, %v20124_v32  ;;  %v12347_v28 = vrot.slane %v12333_v6, %v20124_v32  ;;  %v22255_v48 = vrot.slane %v15634_v38, %v20124_v32 }
 0x560   : > { %24850 = vst [vmem:[#allocation104_spill] sm:$0xff] %v22247_v40  ;;  %v22258_v24 = vrot.slane %v9325_v29, %v20124_v32  ;;  %v15583_v42 = vcombine.low %v9334_v62, %v9348_v18  ;;  %v7829_v56 = vrot.slane %v7807_v55, %v20124_v32  ;;  %v17917_v43 = vcombine.high %v9334_v62, %v9348_v18  ;;  %v2907_v18 = vpop.xlane.xlu0 %2906 }
 0x561   : > { %24851 = vst [vmem:[#allocation33_spill] sm:$0xff] %v22250_v20  ;;  %24852 = vst [vmem:[#allocation165_spill] sm:$0xff] %v22255_v48  ;;  %v7750_v10 = vrot.slane %v3695_v61, %v20124_v32  ;;  %v9458_v16 = vcombine.high %v3730_v34, %v3730_v34  ;;  %v12348_v13 = vcombine.low %v12340_v50, %v12347_v28  ;;  %v24855_v61 = vld [vmem:[#allocation215_spill] sm:$0xff]  ;;  %v24857_v50 = vld [vmem:[#allocation216_spill] sm:$0xff] }
 0x562   : > { %24853 = vst [vmem:[#allocation167_spill] sm:$0xff] %v22258_v24  ;;  %v22263_v52 = vrot.slane %v17920_v1, %v20124_v32  ;;  %v7815_v26 = vrot.slane %v7799_v51, %v20124_v32  ;;  %v22267_v6 = vrot.slane %v7808_v0, %v20124_v32  ;;  %v7757_v38 = vrot.slane %v7743_v23, %v20124_v32  ;;  %v24858_v1 = vld [vmem:[#allocation23_spill] sm:$0xff] }
 0x563   : > { %v15585_v29 = vcombine.low %v22258_v24, %v22250_v20  ;;  %v9465_v55 = vrot.slane %v3730_v34, %v20124_v32  ;;  %16549 = vperm.xlu0 %18660, %v12348_v13   ;;  %v12577_v62 = vcombine.low %v24856_v45, %v24855_v61  ;;  %v12578_v28 = vcombine.low %v24858_v1, %v24857_v50  ;;  %v2814_v61 = vpop.xlane.xlu1 %2813  ;;  %v24861_v1 = vld [vmem:[#allocation103_spill] sm:$0xff]  ;;  %v24868_v24 = vld [vmem:[#allocation14_spill] sm:$0xff] }
 0x564   : > { %24854 = vst [vmem:[#allocation166_spill] sm:$0xff] %v22263_v52  ;;  %v7822_v0 = vrot.slane %v7806_v17, %v20124_v32  ;;  %v14064_v48 = vcombine.low %v7815_v26, %v7829_v56  ;;  %v17855_v23 = vcombine.high %v7815_v26, %v7829_v56  ;;  %v22281_v52 = vrot.slane %v15583_v42, %v20124_v32  ;;  %v24863_v26 = vld [vmem:[#allocation183_spill] sm:$0xff] }
 0x565   : > { %v22284_v34 = vrot.slane %v17917_v43, %v20124_v32  ;;  %v7758_v13 = vcombine.high %v7750_v10, %v7750_v10  ;;  %v9472_v5 = vrot.slane %v9458_v16, %v20124_v32  ;;  %v7759_v50 = vcombine.high %v7757_v38, %v7757_v38  ;;  %v24864_v43 = vld [vmem:[#allocation17_spill] sm:$0xff] }
 0x566   : > { %24859 = vst [vmem:[#allocation203_spill] sm:$0xff] %v22281_v52  ;;  %v14066_v45 = vcombine.low %v7822_v0, %v22267_v6  ;;  %v3729_v40 = vadd.f32 %v24861_v1, %v2907_v18  ;;  %v12592_v51 = vrot.slane %v12578_v28, %v20124_v32  ;;  %v22291_v17 = vrot.slane %v15585_v29, %v20124_v32  ;;  %v24867_v18 = vld [vmem:[#allocation74_spill] sm:$0xff] }
 0x567   : > { %24860 = vst [vmem:[#allocation39_spill] sm:$0xff] %v22284_v34  ;;  %v9473_v56 = vcombine.high %v9465_v55, %v9465_v55  ;;  %v12585_v42 = vrot.slane %v12577_v62, %v20124_v32  ;;  %v10862_v52 = vcombine.low %v24864_v43, %v24863_v26  ;;  %v17856_v34 = vcombine.high %v7822_v0, %v22267_v6  ;;  %v24873_v43 = vld [vmem:[#allocation223_spill] sm:$0xff] }
 0x568   : > { %24862 = vst [vmem:[#allocation204_spill] sm:$0xff] %v22291_v17  ;;  %v22298_v16 = vrot.slane %v14064_v48, %v20124_v32  ;;  %v22301_v20 = vrot.slane %v17855_v23, %v20124_v32  ;;  %v3698_v1 = vadd.f32 %v24867_v18, %v2814_v61  ;;  %v7780_v28 = vrot.slane %v7758_v13, %v20124_v32 }
 0x569   : > { %v9474_v29 = vcombine.high %v9472_v5, %v9472_v5  ;;  %v12593_v17 = vcombine.low %v12585_v42, %v12592_v51  ;;  %v10863_v62 = vcombine.low %v24869_v36, %v24868_v24  ;;  %v22308_v49 = vrot.slane %v14066_v45, %v20124_v32  ;;  %v24871_v24 = vld [vmem:[#allocation221_spill] sm:$0xff]  ;;  %v24872_v45 = vld [vmem:[#allocation220_spill] sm:$0xff] }
 0x56a   : > { %24865 = vst [vmem:[#allocation21_spill] sm:$0xff] %v22298_v16  ;;  %24866 = vst [vmem:[#allocation101_spill] sm:$0xff] %v22301_v20  ;;  %v7766_v6 = vrot.slane %v7750_v10, %v20124_v32  ;;  %v7787_v48 = vrot.slane %v7759_v50, %v20124_v32  ;;  %v9409_v0 = vcombine.high %v3729_v40, %v3729_v40  ;;  %v24874_v10 = vld [vmem:[#allocation222_spill] sm:$0xff]  ;;  %v2811_v20 = vpop.xlane.xlu0 %2810 }
 0x56b   : > { %24870 = vst [vmem:[#allocation171_spill] sm:$0xff] %v22308_v49  ;;  %v9495_v23 = vrot.slane %v9473_v56, %v20124_v32  ;;  %v9416_v26 = vrot.slane %v3729_v40, %v20124_v32  ;;  %16564 = vperm.xlu1 %18661, %v12593_v17   ;;  %v10870_v13 = vrot.slane %v10862_v52, %v20124_v32 }
 0x56c   : > { %v10877_v51 = vrot.slane %v10863_v62, %v20124_v32  ;;  %v7773_v61 = vrot.slane %v7757_v38, %v20124_v32  ;;  %v7890_v36 = vcombine.high %v3698_v1, %v3698_v1  ;;  %v11107_v42 = vcombine.low %v24872_v45, %v24871_v24 }
 0x56d   : > { %v11108_v18 = vcombine.low %v24874_v10, %v24873_v43  ;;  %v14015_v50 = vcombine.low %v7766_v6, %v7780_v28  ;;  %v9481_v49 = vrot.slane %v9465_v55, %v20124_v32  ;;  %v9502_v56 = vrot.slane %v9474_v29, %v20124_v32 }
 0x56e   : > { %v10878_v40 = vcombine.low %v10870_v13, %v10877_v51  ;;  %v17853_v17 = vcombine.high %v7766_v6, %v7780_v28  ;;  %v14017_v16 = vcombine.low %v7773_v61, %v7787_v48  ;;  %v17854_v52 = vcombine.high %v7773_v61, %v7787_v48 }
 0x56f   : > { %v9423_v62 = vrot.slane %v9409_v0, %v20124_v32  ;;  %v9488_v38 = vrot.slane %v9472_v5, %v20124_v32  ;;  %v15730_v59 = vcombine.low %v9481_v49, %v9495_v23  ;;  %v9424_v46 = vcombine.high %v9416_v26, %v9416_v26  ;;  %v24877_v5 = vld [vmem:[#allocation71_spill] sm:$0xff] }
 0x570   : > { %16459 = vperm.xlu0 %18660, %v10878_v40   ;;  %v11122_v24 = vrot.slane %v11108_v18, %v20124_v32  ;;  %v17923_v45 = vcombine.high %v9481_v49, %v9495_v23  ;;  %v7897_v43 = vrot.slane %v3698_v1, %v20124_v32  ;;  %v7904_v55 = vrot.slane %v7890_v36, %v20124_v32  ;;  %v2916_v23 = vpop.xlane.xlu1 %2915  ;;  %v24884_v40 = vld [vmem:[#allocation108_spill] sm:$0xff] }
 0x571   : > { %v11115_v29 = vrot.slane %v11107_v42, %v20124_v32  ;;  %v22330_v28 = vrot.slane %v17856_v34, %v20124_v32  ;;  %v22333_v6 = vrot.slane %v14015_v50, %v20124_v32  ;;  %v15732_v48 = vcombine.low %v9488_v38, %v9502_v56 }
 0x572   : > { %v3697_v0 = vadd.f32 %v24877_v5, %v2811_v20  ;;  %v22337_v13 = vrot.slane %v17853_v17, %v20124_v32  ;;  %v17924_v51 = vcombine.high %v9488_v38, %v9502_v56  ;;  %v9425_v49 = vcombine.high %v9423_v62, %v9423_v62  ;;  %v24886_v38 = vld [vmem:[#allocation187_spill] sm:$0xff] }
 0x573   : > { %24875 = vst [vmem:[#allocation170_spill] sm:$0xff] %v22330_v28  ;;  %24876 = vst [vmem:[#allocation172_spill] sm:$0xff] %v22333_v6  ;;  %v11123_v1 = vcombine.low %v11115_v29, %v11122_v24  ;;  %v22340_v61 = vrot.slane %v14017_v16, %v20124_v32  ;;  %v22343_v36 = vrot.slane %v17854_v52, %v20124_v32  ;;  %v24885_v52 = vld [vmem:[#allocation188_spill] sm:$0xff]  ;;  %v24889_v29 = vld [vmem:[#allocation189_spill] sm:$0xff] }
 0x574   : > { %24878 = vst [vmem:[#allocation12_spill] sm:$0xff] %v22337_v13  ;;  %v22346_v34 = vrot.slane %v15730_v59, %v20124_v32  ;;  %v9446_v42 = vrot.slane %v9424_v46, %v20124_v32  ;;  %v22350_v20 = vrot.slane %v17923_v45, %v20124_v32  ;;  %v9432_v10 = vrot.slane %v9416_v26, %v20124_v32  ;;  %v24888_v26 = vld [vmem:[#allocation37_spill] sm:$0xff] }
 0x575   : > { %24879 = vst [vmem:[#allocation72_spill] sm:$0xff] %v22340_v61  ;;  %24880 = vst [vmem:[#allocation209_spill] sm:$0xff] %v22343_v36  ;;  %v7905_v18 = vcombine.high %v7897_v43, %v7897_v43  ;;  %v7906_v50 = vcombine.high %v7904_v55, %v7904_v55  ;;  %16474 = vperm.xlu1 %18661, %v11123_v1   ;;  %v22354_v56 = vrot.slane %v15732_v48, %v20124_v32 }
 0x576   : > { %24881 = vst [vmem:[#allocation208_spill] sm:$0xff] %v22346_v34  ;;  %24882 = vst [vmem:[#allocation211_spill] sm:$0xff] %v22350_v20  ;;  %v7841_v16 = vcombine.high %v3697_v0, %v3697_v0  ;;  %v3732_v17 = vadd.f32 %v24884_v40, %v2916_v23  ;;  %v12430_v59 = vcombine.low %v24886_v38, %v24885_v52  ;;  %v2913_v52 = vpop.xlane.xlu0 %2912 }
 0x577   : > { %24883 = vst [vmem:[#allocation210_spill] sm:$0xff] %v22354_v56  ;;  %v22360_v24 = vrot.slane %v17924_v51, %v20124_v32  ;;  %v9439_v46 = vrot.slane %v9423_v62, %v20124_v32  ;;  %v9453_v45 = vrot.slane %v9425_v49, %v20124_v32  ;;  %v12431_v5 = vcombine.low %v24889_v29, %v24888_v26  ;;  %v24890_v26 = vld [vmem:[#allocation226_spill] sm:$0xff] }
 0x578   : > { %v15681_v1 = vcombine.low %v9432_v10, %v9446_v42  ;;  %v17921_v34 = vcombine.high %v9432_v10, %v9446_v42  ;;  %v7913_v48 = vrot.slane %v7897_v43, %v20124_v32  ;;  %v7848_v56 = vrot.slane %v3697_v0, %v20124_v32  ;;  %v24891_v42 = vld [vmem:[#allocation228_spill] sm:$0xff]  ;;  %v24892_v10 = vld [vmem:[#allocation227_spill] sm:$0xff] }
 0x579   : > { %24887 = vst [vmem:[#allocation69_spill] sm:$0xff] %v22360_v24  ;;  %v7927_v23 = vrot.slane %v7905_v18, %v20124_v32  ;;  %v7934_v40 = vrot.slane %v7906_v50, %v20124_v32  ;;  %v12438_v51 = vrot.slane %v12430_v59, %v20124_v32  ;;  %v12445_v62 = vrot.slane %v12431_v5, %v20124_v32 }
 0x57a   : > { %v7855_v49 = vrot.slane %v7841_v16, %v20124_v32  ;;  %v9556_v38 = vcombine.high %v3732_v17, %v3732_v17  ;;  %v12675_v29 = vcombine.low %v24890_v26, %v21066_v21  ;;  %v12676_v43 = vcombine.low %v24892_v10, %v24891_v42  ;;  %v24895_v16 = vld [vmem:[#allocation105_spill] sm:$0xff] }
 0x57b   : > { %v15683_v24 = vcombine.low %v9439_v46, %v9453_v45  ;;  %v17922_v0 = vcombine.high %v9439_v46, %v9453_v45  ;;  %v7920_v18 = vrot.slane %v7904_v55, %v20124_v32  ;;  %v12446_v20 = vcombine.low %v12438_v51, %v12445_v62  ;;  %v2820_v55 = vpop.xlane.xlu1 %2819 }
 0x57c   : > { %v22379_v50 = vrot.slane %v15681_v1, %v20124_v32  ;;  %v22382_v59 = vrot.slane %v17921_v34, %v20124_v32  ;;  %v7856_v5 = vcombine.high %v7848_v56, %v7848_v56  ;;  %v3731_v28 = vadd.f32 %v24895_v16, %v2913_v52  ;;  %v24901_v16 = vld [vmem:[#allocation16_spill] sm:$0xff] }
 0x57d   : > { %v14162_v61 = vcombine.low %v7913_v48, %v7927_v23  ;;  %v17859_v36 = vcombine.high %v7913_v48, %v7927_v23  ;;  %v14164_v21 = vcombine.low %v7920_v18, %v7934_v40  ;;  %v9563_v26 = vrot.slane %v3732_v17, %v20124_v32  ;;  %16555 = vperm.xlu0 %18660, %v12446_v20   ;;  %v24898_v48 = vld [vmem:[#allocation19_spill] sm:$0xff]  ;;  %v24899_v23 = vld [vmem:[#allocation194_spill] sm:$0xff] }
 0x57e   : > { %24893 = vst [vmem:[#allocation177_spill] sm:$0xff] %v22379_v50  ;;  %24894 = vst [vmem:[#allocation176_spill] sm:$0xff] %v22382_v59  ;;  %v7857_v42 = vcombine.high %v7855_v49, %v7855_v49  ;;  %v9570_v46 = vrot.slane %v9556_v38, %v20124_v32  ;;  %v12683_v45 = vrot.slane %v12675_v29, %v20124_v32  ;;  %v24900_v38 = vld [vmem:[#allocation195_spill] sm:$0xff]  ;;  %v24918_v59 = vld [vmem:[#allocation42_spill] sm:$0xff] }
 0x57f   : > { %v12690_v1 = vrot.slane %v12676_v43, %v20124_v32  ;;  %v22390_v34 = vrot.slane %v15683_v24, %v20124_v32  ;;  %v22393_v51 = vrot.slane %v17922_v0, %v20124_v32  ;;  %v17860_v52 = vcombine.high %v7920_v18, %v7934_v40  ;;  %v24904_v0 = vld [vmem:[#allocation76_spill] sm:$0xff] }
 0x580   : > { %v10960_v62 = vcombine.low %v24899_v23, %v24898_v48  ;;  %v7878_v20 = vrot.slane %v7856_v5, %v20124_v32  ;;  %v9507_v17 = vcombine.high %v3731_v28, %v3731_v28  ;;  %v10961_v50 = vcombine.low %v24901_v16, %v24900_v38  ;;  %v24907_v38 = vld [vmem:[#allocation232_spill] sm:$0xff] }
 0x581   : > { %24896 = vst [vmem:[#allocation35_spill] sm:$0xff] %v22390_v34  ;;  %24897 = vst [vmem:[#allocation178_spill] sm:$0xff] %v22393_v51  ;;  %v12691_v10 = vcombine.low %v12683_v45, %v12690_v1  ;;  %v22401_v29 = vrot.slane %v14162_v61, %v20124_v32  ;;  %v22404_v24 = vrot.slane %v17859_v36, %v20124_v32 }
 0x582   : > { %v9571_v43 = vcombine.high %v9563_v26, %v9563_v26  ;;  %v3700_v34 = vadd.f32 %v24904_v0, %v2820_v55  ;;  %v22408_v40 = vrot.slane %v14164_v21, %v20124_v32  ;;  %v7864_v18 = vrot.slane %v7848_v56, %v20124_v32  ;;  %v24908_v56 = vld [vmem:[#allocation22_spill] sm:$0xff] }
 0x583   : > { %24902 = vst [vmem:[#allocation106_spill] sm:$0xff] %v22401_v29  ;;  %24903 = vst [vmem:[#allocation215_spill] sm:$0xff] %v22404_v24  ;;  %v7885_v5 = vrot.slane %v7857_v42, %v20124_v32  ;;  %v9572_v45 = vcombine.high %v9570_v46, %v9570_v46  ;;  %16570 = vperm.xlu1 %18661, %v12691_v10   ;;  %v22413_v1 = vrot.slane %v17860_v52, %v20124_v32  ;;  %v24909_v52 = vld [vmem:[#allocation233_spill] sm:$0xff]  ;;  %v24910_v29 = vld [vmem:[#allocation48_spill] sm:$0xff] }
 0x584   : > { %24905 = vst [vmem:[#allocation213_spill] sm:$0xff] %v22408_v40  ;;  %v9514_v61 = vrot.slane %v3731_v28, %v20124_v32  ;;  %v10968_v36 = vrot.slane %v10960_v62, %v20124_v32  ;;  %v10975_v48 = vrot.slane %v10961_v50, %v20124_v32  ;;  %v7871_v55 = vrot.slane %v7855_v49, %v20124_v32  ;;  %v2817_v49 = vpop.xlane.xlu0 %2816 }
 0x585   : > { %24906 = vst [vmem:[#allocation216_spill] sm:$0xff] %v22413_v1  ;;  %v14113_v23 = vcombine.low %v7864_v18, %v7878_v20  ;;  %v9521_v21 = vrot.slane %v9507_v17, %v20124_v32  ;;  %v11205_v16 = vcombine.low %v24908_v56, %v24907_v38  ;;  %v9593_v42 = vrot.slane %v9571_v43, %v20124_v32 }
 0x586   : > { %v7988_v10 = vcombine.high %v3700_v34, %v3700_v34  ;;  %v10976_v0 = vcombine.low %v10968_v36, %v10975_v48  ;;  %v11206_v24 = vcombine.low %v24910_v29, %v24909_v52  ;;  %v17857_v28 = vcombine.high %v7864_v18, %v7878_v20  ;;  %v2922_v52 = vpop.xlane.xlu1 %2921 }
 0x587   : > { %v14115_v40 = vcombine.low %v7871_v55, %v7885_v5  ;;  %v9579_v62 = vrot.slane %v9563_v26, %v20124_v32  ;;  %v9600_v50 = vrot.slane %v9572_v45, %v20124_v32  ;;  %v9522_v1 = vcombine.high %v9514_v61, %v9514_v61  ;;  %v24912_v45 = vld [vmem:[#allocation73_spill] sm:$0xff] }
 0x588   : > { %v7995_v17 = vrot.slane %v3700_v34, %v20124_v32  ;;  %16465 = vperm.xlu0 %18660, %v10976_v0   ;;  %v11213_v38 = vrot.slane %v11205_v16, %v20124_v32  ;;  %v11220_v43 = vrot.slane %v11206_v24, %v20124_v32  ;;  %v17858_v56 = vcombine.high %v7871_v55, %v7885_v5  ;;  %v24915_v5 = vld [vmem:[#allocation201_spill] sm:$0xff]  ;;  %v24916_v55 = vld [vmem:[#allocation200_spill] sm:$0xff] }
 0x589   : > { %v22431_v36 = vrot.slane %v14113_v23, %v20124_v32  ;;  %v9586_v20 = vrot.slane %v9570_v46, %v20124_v32  ;;  %v9523_v29 = vcombine.high %v9521_v21, %v9521_v21  ;;  %v15828_v18 = vcombine.low %v9579_v62, %v9593_v42 }
 0x58a   : > { %v8002_v26 = vrot.slane %v7988_v10, %v20124_v32  ;;  %v3699_v48 = vadd.f32 %v24912_v45, %v2817_v49  ;;  %v11221_v51 = vcombine.low %v11213_v38, %v11220_v43  ;;  %v22437_v34 = vrot.slane %v17857_v28, %v20124_v32  ;;  %v24917_v10 = vld [vmem:[#allocation202_spill] sm:$0xff] }
 0x58b   : > { %24911 = vst [vmem:[#allocation23_spill] sm:$0xff] %v22431_v36  ;;  %v22440_v16 = vrot.slane %v14115_v40, %v20124_v32  ;;  %v17927_v24 = vcombine.high %v9579_v62, %v9593_v42  ;;  %v12528_v23 = vcombine.low %v24916_v55, %v24915_v5  ;;  %v15830_v0 = vcombine.low %v9586_v20, %v9600_v50  ;;  %v24920_v40 = vld [vmem:[#allocation110_spill] sm:$0xff] }
 0x58c   : > { %24913 = vst [vmem:[#allocation103_spill] sm:$0xff] %v22437_v34  ;;  %v9544_v46 = vrot.slane %v9522_v1, %v20124_v32  ;;  %v8003_v36 = vcombine.high %v7995_v17, %v7995_v17  ;;  %16480 = vperm.xlu1 %18661, %v11221_v51   ;;  %v12529_v49 = vcombine.low %v24918_v59, %v24917_v10 }
 0x58d   : > { %24914 = vst [vmem:[#allocation183_spill] sm:$0xff] %v22440_v16  ;;  %v22448_v38 = vrot.slane %v17858_v56, %v20124_v32  ;;  %v17928_v28 = vcombine.high %v9586_v20, %v9600_v50  ;;  %v9551_v43 = vrot.slane %v9523_v29, %v20124_v32  ;;  %v3734_v45 = vadd.f32 %v24920_v40, %v2922_v52  ;;  %v24939_v16 = vld [vmem:[#allocation207_spill] sm:$0xff] }
 0x58e   : > { %v22453_v42 = vrot.slane %v15828_v18, %v20124_v32  ;;  %v9530_v62 = vrot.slane %v9514_v61, %v20124_v32  ;;  %v8004_v5 = vcombine.high %v8002_v26, %v8002_v26  ;;  %v7939_v1 = vcombine.high %v3699_v48, %v3699_v48 }
 0x58f   : > { %24919 = vst [vmem:[#allocation17_spill] sm:$0xff] %v22448_v38  ;;  %v22457_v51 = vrot.slane %v17927_v24, %v20124_v32  ;;  %v9537_v59 = vrot.slane %v9521_v21, %v20124_v32  ;;  %v12536_v56 = vrot.slane %v12528_v23, %v20124_v32  ;;  %v12543_v50 = vrot.slane %v12529_v49, %v20124_v32  ;;  %v2919_v49 = vpop.xlane.xlu0 %2918 }
 0x590   : > { %24921 = vst [vmem:[#allocation74_spill] sm:$0xff] %v22453_v42  ;;  %v22463_v20 = vrot.slane %v15830_v0, %v20124_v32  ;;  %v15779_v29 = vcombine.low %v9530_v62, %v9544_v46  ;;  %v17925_v52 = vcombine.high %v9530_v62, %v9544_v46  ;;  %v8025_v18 = vrot.slane %v8003_v36, %v20124_v32  ;;  %v2826_v36 = vpop.xlane.xlu1 %2825  ;;  %v24925_v62 = vld [vmem:[#allocation238_spill] sm:$0xff] }
 0x591   : > { %24922 = vst [vmem:[#allocation14_spill] sm:$0xff] %v22457_v51  ;;  %v15781_v55 = vcombine.low %v9537_v59, %v9551_v43  ;;  %v7946_v61 = vrot.slane %v3699_v48, %v20124_v32  ;;  %v9654_v10 = vcombine.high %v3734_v45, %v3734_v45  ;;  %v12544_v40 = vcombine.low %v12536_v56, %v12543_v50  ;;  %v24926_v48 = vld [vmem:[#allocation237_spill] sm:$0xff]  ;;  %v24927_v56 = vld [vmem:[#allocation27_spill] sm:$0xff] }
 0x592   : > { %24923 = vst [vmem:[#allocation184_spill] sm:$0xff] %v22463_v20  ;;  %v22468_v24 = vrot.slane %v17928_v28, %v20124_v32  ;;  %v8011_v21 = vrot.slane %v7995_v17, %v20124_v32  ;;  %v22472_v23 = vrot.slane %v8004_v5, %v20124_v32  ;;  %v7953_v0 = vrot.slane %v7939_v1, %v20124_v32  ;;  %v24928_v50 = vld [vmem:[#allocation239_spill] sm:$0xff] }
 0x593   : > { %v17926_v20 = vcombine.high %v9537_v59, %v9551_v43  ;;  %v9661_v46 = vrot.slane %v3734_v45, %v20124_v32  ;;  %16561 = vperm.xlu0 %18660, %v12544_v40   ;;  %v12773_v42 = vcombine.low %v24926_v48, %v24925_v62  ;;  %v12774_v28 = vcombine.low %v24928_v50, %v24927_v56  ;;  %v24932_v48 = vld [vmem:[#allocation107_spill] sm:$0xff]  ;;  %v24935_v50 = vld [vmem:[#allocation205_spill] sm:$0xff] }
 0x594   : > { %24924 = vst [vmem:[#allocation221_spill] sm:$0xff] %v22468_v24  ;;  %v22481_v24 = vrot.slane %v15779_v29, %v20124_v32  ;;  %v8018_v17 = vrot.slane %v8002_v26, %v20124_v32  ;;  %v14260_v5 = vcombine.low %v8011_v21, %v8025_v18  ;;  %v17863_v51 = vcombine.high %v8011_v21, %v8025_v18  ;;  %v24934_v21 = vld [vmem:[#allocation18_spill] sm:$0xff]  ;;  %v2928_v34 = vpop.xlane.xlu1 %2927 }
 0x595   : > { %v22485_v1 = vrot.slane %v17925_v52, %v20124_v32  ;;  %v22488_v43 = vrot.slane %v15781_v55, %v20124_v32  ;;  %v7954_v45 = vcombine.high %v7946_v61, %v7946_v61  ;;  %v9668_v59 = vrot.slane %v9654_v10, %v20124_v32 }
 0x596   : > { %24929 = vst [vmem:[#allocation220_spill] sm:$0xff] %v22481_v24  ;;  %v14262_v40 = vcombine.low %v8018_v17, %v22472_v23  ;;  %v7955_v62 = vcombine.high %v7953_v0, %v7953_v0  ;;  %v3733_v56 = vadd.f32 %v24932_v48, %v2919_v49  ;;  %v12788_v29 = vrot.slane %v12774_v28, %v20124_v32  ;;  %v24938_v49 = vld [vmem:[#allocation78_spill] sm:$0xff]  ;;  %v2823_v28 = vpop.xlane.xlu0 %2822 }
 0x597   : > { %24930 = vst [vmem:[#allocation223_spill] sm:$0xff] %v22485_v1  ;;  %24931 = vst [vmem:[#allocation222_spill] sm:$0xff] %v22488_v43  ;;  %v22495_v26 = vrot.slane %v17926_v20, %v20124_v32  ;;  %v9669_v18 = vcombine.high %v9661_v46, %v9661_v46  ;;  %v12781_v52 = vrot.slane %v12773_v42, %v20124_v32  ;;  %v24940_v42 = vld [vmem:[#allocation206_spill] sm:$0xff] }
 0x598   : > { %v11058_v55 = vcombine.low %v24935_v50, %v24934_v21  ;;  %v17864_v43 = vcombine.high %v8018_v17, %v22472_v23  ;;  %v22502_v10 = vrot.slane %v14260_v5, %v20124_v32  ;;  %v22505_v24 = vrot.slane %v17863_v51, %v20124_v32  ;;  %v24942_v50 = vld [vmem:[#allocation242_spill] sm:$0xff] }
 0x599   : > { %24933 = vst [vmem:[#allocation71_spill] sm:$0xff] %v22495_v26  ;;  %v3702_v48 = vadd.f32 %v24938_v49, %v2826_v36  ;;  %v7976_v20 = vrot.slane %v7954_v45, %v20124_v32  ;;  %v9670_v26 = vcombine.high %v9668_v59, %v9668_v59  ;;  %v12789_v1 = vcombine.low %v12781_v52, %v12788_v29 }
 0x59a   : > { %24936 = vst [vmem:[#allocation108_spill] sm:$0xff] %v22502_v10  ;;  %24937 = vst [vmem:[#allocation188_spill] sm:$0xff] %v22505_v24  ;;  %v11059_v38 = vcombine.low %v24940_v42, %v24939_v16  ;;  %v22512_v21 = vrot.slane %v14262_v40, %v20124_v32  ;;  %v7962_v23 = vrot.slane %v7946_v61, %v20124_v32  ;;  %v24943_v40 = vld [vmem:[#allocation24_spill] sm:$0xff]  ;;  %v24944_v42 = vld [vmem:[#allocation245_spill] sm:$0xff]  ;;  %v2925_v6 = vpop.xlane.xlu0 %2924 }
 0x59b   : > { %v7983_v17 = vrot.slane %v7955_v62, %v20124_v32  ;;  %v9605_v51 = vcombine.high %v3733_v56, %v3733_v56  ;;  %v9691_v5 = vrot.slane %v9669_v18, %v20124_v32  ;;  %v9612_v36 = vrot.slane %v3733_v56, %v20124_v32  ;;  %16576 = vperm.xlu1 %18661, %v12789_v1   ;;  %v24945_v61 = vld [vmem:[#allocation50_spill] sm:$0xff] }
 0x59c   : > { %24941 = vst [vmem:[#allocation187_spill] sm:$0xff] %v22512_v21  ;;  %v11066_v45 = vrot.slane %v11058_v55, %v20124_v32  ;;  %v11073_v29 = vrot.slane %v11059_v38, %v20124_v32  ;;  %v7969_v16 = vrot.slane %v7953_v0, %v20124_v32  ;;  %v8086_v52 = vcombine.high %v3702_v48, %v3702_v48 }
 0x59d   : > { %v11303_v49 = vcombine.low %v24943_v40, %v24942_v50  ;;  %v11304_v10 = vcombine.low %v24945_v61, %v24944_v42  ;;  %v14211_v62 = vcombine.low %v7962_v23, %v7976_v20  ;;  %v9677_v24 = vrot.slane %v9661_v46, %v20124_v32  ;;  %v22530_v40 = vpop.xlane.xlu1 %2831 }
 0x59e   : > { %v9698_v18 = vrot.slane %v9670_v26, %v20124_v32  ;;  %v11074_v56 = vcombine.low %v11066_v45, %v11073_v29  ;;  %v17861_v1 = vcombine.high %v7962_v23, %v7976_v20  ;;  %v14213_v21 = vcombine.low %v7969_v16, %v7983_v17 }
 0x59f   : > { %v17862_v55 = vcombine.high %v7969_v16, %v7983_v17  ;;  %v9619_v38 = vrot.slane %v9605_v51, %v20124_v32  ;;  %v9684_v0 = vrot.slane %v9668_v59, %v20124_v32  ;;  %v15926_v13 = vcombine.low %v9677_v24, %v9691_v5  ;;  %v24948_v51 = vld [vmem:[#allocation75_spill] sm:$0xff] }
 0x5a0   : > { %v9620_v8 = vcombine.high %v9612_v36, %v9612_v36  ;;  %16471 = vperm.xlu0 %18660, %v11074_v56   ;;  %v11318_v50 = vrot.slane %v11304_v10, %v20124_v32  ;;  %v17931_v42 = vcombine.high %v9677_v24, %v9691_v5  ;;  %v8093_v46 = vrot.slane %v3702_v48, %v20124_v32 }
 0x5a1   : > { %v8100_v26 = vrot.slane %v8086_v52, %v20124_v32  ;;  %v11311_v20 = vrot.slane %v11303_v49, %v20124_v32  ;;  %v22536_v23 = vrot.slane %v17864_v43, %v20124_v32  ;;  %v22539_v17 = vrot.slane %v14211_v62, %v20124_v32 }
 0x5a2   : > { %v15928_v59 = vcombine.low %v9684_v0, %v9698_v18  ;;  %v3701_v45 = vadd.f32 %v24948_v51, %v2823_v28  ;;  %v22543_v10 = vrot.slane %v17861_v1, %v20124_v32  ;;  %v17932_v29 = vcombine.high %v9684_v0, %v9698_v18  ;;  %v22559_v18 = vpop.xlane.xlu0 %2828  ;;  %v24955_v1 = vld [vmem:[#allocation112_spill] sm:$0xff]  ;;  %v24959_v51 = vld [vmem:[#allocation214_spill] sm:$0xff] }
 0x5a3   : > { %24946 = vst [vmem:[#allocation37_spill] sm:$0xff] %v22536_v23  ;;  %24947 = vst [vmem:[#allocation189_spill] sm:$0xff] %v22539_v17  ;;  %v9621_v24 = vcombine.high %v9619_v38, %v9619_v38  ;;  %v11319_v5 = vcombine.low %v11311_v20, %v11318_v50  ;;  %v22546_v48 = vrot.slane %v14213_v21, %v20124_v32  ;;  %v24957_v0 = vld [vmem:[#allocation44_spill] sm:$0xff]  ;;  %v24962_v23 = vld [vmem:[#allocation249_spill] sm:$0xff] }
 0x5a4   : > { %24949 = vst [vmem:[#allocation226_spill] sm:$0xff] %v22543_v10  ;;  %v22549_v16 = vrot.slane %v17862_v55, %v20124_v32  ;;  %v22552_v43 = vrot.slane %v15926_v13, %v20124_v32  ;;  %v9642_v52 = vrot.slane %v9620_v8, %v20124_v32  ;;  %v22556_v49 = vrot.slane %v17931_v42, %v20124_v32  ;;  %v24956_v13 = vld [vmem:[#allocation212_spill] sm:$0xff]  ;;  %v22567_v8 = vpop.xlane.xlu1 %2933 }
 0x5a5   : > { %24950 = vst [vmem:[#allocation228_spill] sm:$0xff] %v22546_v48  ;;  %v9628_v28 = vrot.slane %v9612_v36, %v20124_v32  ;;  %v8101_v61 = vcombine.high %v8093_v46, %v8093_v46  ;;  %v8102_v62 = vcombine.high %v8100_v26, %v8100_v26  ;;  %16486 = vperm.xlu1 %18661, %v11319_v5   ;;  %v24960_v5 = vld [vmem:[#allocation41_spill] sm:$0xff] }
 0x5a6   : > { %24951 = vst [vmem:[#allocation227_spill] sm:$0xff] %v22549_v16  ;;  %24952 = vst [vmem:[#allocation105_spill] sm:$0xff] %v22552_v43  ;;  %v22562_v21 = vrot.slane %v15928_v59, %v20124_v32  ;;  %v8037_v56 = vcombine.high %v3701_v45, %v3701_v45  ;;  %v3736_v55 = vadd.f32 %v24955_v1, %v2928_v34  ;;  %v22588_v48 = vpop.xlane.xlu0 %2930 }
 0x5a7   : > { %24953 = vst [vmem:[#allocation19_spill] sm:$0xff] %v22556_v49  ;;  %v12626_v50 = vcombine.low %v24957_v0, %v24956_v13  ;;  %v22570_v42 = vrot.slane %v17932_v29, %v20124_v32  ;;  %v9635_v36 = vrot.slane %v9619_v38, %v20124_v32  ;;  %v9649_v20 = vrot.slane %v9621_v24, %v20124_v32 }
 0x5a8   : > { %24954 = vst [vmem:[#allocation194_spill] sm:$0xff] %v22562_v21  ;;  %v12627_v43 = vcombine.low %v24960_v5, %v24959_v51  ;;  %v15877_v59 = vcombine.low %v9628_v28, %v9642_v52  ;;  %v17929_v49 = vcombine.high %v9628_v28, %v9642_v52  ;;  %v8109_v21 = vrot.slane %v8093_v46, %v20124_v32  ;;  %v24963_v52 = vld [vmem:[#allocation251_spill] sm:$0xff] }
 0x5a9   : > { %24958 = vst [vmem:[#allocation195_spill] sm:$0xff] %v22570_v42  ;;  %v8044_v34 = vrot.slane %v3701_v45, %v20124_v32  ;;  %v8123_v1 = vrot.slane %v8101_v61, %v20124_v32  ;;  %v8130_v13 = vrot.slane %v8102_v62, %v20124_v32  ;;  %v12634_v29 = vrot.slane %v12626_v50, %v20124_v32  ;;  %v24961_v42 = vld [vmem:[#allocation250_spill] sm:$0xff]  ;;  %v24966_v50 = vld [vmem:[#allocation109_spill] sm:$0xff] }
 0x5aa   : > { %v12641_v0 = vrot.slane %v12627_v43, %v20124_v32  ;;  %v8051_v38 = vrot.slane %v8037_v56, %v20124_v32  ;;  %v9752_v24 = vcombine.high %v3736_v55, %v3736_v55  ;;  %v12871_v51 = vcombine.low %v24962_v23, %v24961_v42  ;;  %v22597_v23 = vpop.xlane.xlu1 %2837 }
 0x5ab   : > { %v12872_v28 = vcombine.low %v24963_v52, %v21255_v14  ;;  %v15879_v46 = vcombine.low %v9635_v36, %v9649_v20  ;;  %v17930_v5 = vcombine.high %v9635_v36, %v9649_v20  ;;  %v8116_v45 = vrot.slane %v8100_v26, %v20124_v32 }
 0x5ac   : > { %v12642_v61 = vcombine.low %v12634_v29, %v12641_v0  ;;  %v22591_v62 = vrot.slane %v15877_v59, %v20124_v32  ;;  %v22594_v43 = vrot.slane %v17929_v49, %v20124_v32  ;;  %v8052_v56 = vcombine.high %v8044_v34, %v8044_v34 }
 0x5ad   : > { %v3735_v16 = vadd.f32 %v24966_v50, %v2925_v6  ;;  %v14358_v42 = vcombine.low %v8109_v21, %v8123_v1  ;;  %v17867_v14 = vcombine.high %v8109_v21, %v8123_v1  ;;  %v14360_v52 = vcombine.low %v8116_v45, %v8130_v13  ;;  %v24969_v50 = vld [vmem:[#allocation218_spill] sm:$0xff]  ;;  %v24970_v21 = vld [vmem:[#allocation217_spill] sm:$0xff] }
 0x5ae   : > { %24964 = vst [vmem:[#allocation16_spill] sm:$0xff] %v22591_v62  ;;  %24965 = vst [vmem:[#allocation76_spill] sm:$0xff] %v22594_v43  ;;  %v9759_v36 = vrot.slane %v3736_v55, %v20124_v32  ;;  %16567 = vperm.xlu0 %18660, %v12642_v61   ;;  %v8053_v26 = vcombine.high %v8051_v38, %v8051_v38  ;;  %v9766_v20 = vrot.slane %v9752_v24, %v20124_v32  ;;  %v24971_v43 = vld [vmem:[#allocation20_spill] sm:$0xff]  ;;  %v24972_v24 = vld [vmem:[#allocation219_spill] sm:$0xff] }
 0x5af   : > { %v12879_v59 = vrot.slane %v12871_v51, %v20124_v32  ;;  %v12886_v29 = vrot.slane %v12872_v28, %v20124_v32  ;;  %v22604_v49 = vrot.slane %v15879_v46, %v20124_v32  ;;  %v22607_v6 = vrot.slane %v17930_v5, %v20124_v32  ;;  %v24975_v5 = vld [vmem:[#allocation80_spill] sm:$0xff] }
 0x5b0   : > { %v17868_v0 = vcombine.high %v8116_v45, %v8130_v13  ;;  %v11156_v1 = vcombine.low %v24970_v21, %v24969_v50  ;;  %v8074_v55 = vrot.slane %v8052_v56, %v20124_v32  ;;  %v9703_v61 = vcombine.high %v3735_v16, %v3735_v16  ;;  %v22622_v45 = vpop.xlane.xlu0 %2834 }
 0x5b1   : > { %24967 = vst [vmem:[#allocation232_spill] sm:$0xff] %v22604_v49  ;;  %24968 = vst [vmem:[#allocation22_spill] sm:$0xff] %v22607_v6  ;;  %v12887_v62 = vcombine.low %v12879_v59, %v12886_v29  ;;  %v11157_v17 = vcombine.low %v24972_v24, %v24971_v43  ;;  %v22615_v51 = vrot.slane %v14358_v42, %v20124_v32  ;;  %v22629_v42 = vpop.xlane.xlu1 %2939 }
 0x5b2   : > { %v22618_v28 = vrot.slane %v17867_v14, %v20124_v32  ;;  %v9767_v46 = vcombine.high %v9759_v36, %v9759_v36  ;;  %v3704_v13 = vadd.f32 %v24975_v5, %v22530_v40  ;;  %v22625_v50 = vrot.slane %v14360_v52, %v20124_v32  ;;  %v24978_v5 = vld [vmem:[#allocation52_spill] sm:$0xff] }
 0x5b3   : > { %24973 = vst [vmem:[#allocation233_spill] sm:$0xff] %v22615_v51  ;;  %v8060_v56 = vrot.slane %v8044_v34, %v20124_v32  ;;  %v8081_v59 = vrot.slane %v8053_v26, %v20124_v32  ;;  %v9768_v43 = vcombine.high %v9766_v20, %v9766_v20  ;;  %16582 = vperm.xlu1 %18661, %v12887_v62   ;;  %v24979_v26 = vld [vmem:[#allocation254_spill] sm:$0xff] }
 0x5b4   : > { %24974 = vst [vmem:[#allocation48_spill] sm:$0xff] %v22618_v28  ;;  %24976 = vst [vmem:[#allocation73_spill] sm:$0xff] %v22625_v50  ;;  %v22632_v14 = vrot.slane %v17868_v0, %v20124_v32  ;;  %v9710_v29 = vrot.slane %v3735_v16, %v20124_v32  ;;  %v11164_v40 = vrot.slane %v11156_v1, %v20124_v32  ;;  %v24980_v0 = vld [vmem:[#allocation256_spill] sm:$0xff] }
 0x5b5   : > { %v11171_v21 = vrot.slane %v11157_v17, %v20124_v32  ;;  %v8067_v52 = vrot.slane %v8051_v38, %v20124_v32  ;;  %v14309_v24 = vcombine.low %v8060_v56, %v8074_v55  ;;  %v9717_v34 = vrot.slane %v9703_v61, %v20124_v32 }
 0x5b6   : > { %24977 = vst [vmem:[#allocation201_spill] sm:$0xff] %v22632_v14  ;;  %v11401_v51 = vcombine.low %v24979_v26, %v24978_v5  ;;  %v9789_v62 = vrot.slane %v9767_v46, %v20124_v32  ;;  %v8184_v28 = vcombine.high %v3704_v13, %v3704_v13  ;;  %v24981_v14 = vld [vmem:[#allocation255_spill] sm:$0xff]  ;;  %v17865_v16 = vcombine.high %v8060_v56, %v8074_v55  ;;  %v22649_v46 = vpop.xlane.xlu0 %2936  ;;  %v24987_v26 = vld [vmem:[#allocation46_spill] sm:$0xff] }
 0x5b7   : > { %v11172_v50 = vcombine.low %v11164_v40, %v11171_v21  ;;  %v11402_v49 = vcombine.low %v24981_v14, %v24980_v0  ;;  %v14311_v6 = vcombine.low %v8067_v52, %v8081_v59  ;;  %v9775_v1 = vrot.slane %v9759_v36, %v20124_v32  ;;  %v22655_v36 = vpop.xlane.xlu1 %2843 }
 0x5b8   : > { %v9796_v17 = vrot.slane %v9768_v43, %v20124_v32  ;;  %v9718_v38 = vcombine.high %v9710_v29, %v9710_v29  ;;  %v8191_v10 = vrot.slane %v3704_v13, %v20124_v32  ;;  %v11409_v61 = vrot.slane %v11401_v51, %v20124_v32  ;;  %v24983_v13 = vld [vmem:[#allocation77_spill] sm:$0xff] }
 0x5b9   : > { %16477 = vperm.xlu0 %18660, %v11172_v50   ;;  %v11416_v5 = vrot.slane %v11402_v49, %v20124_v32  ;;  %v17866_v40 = vcombine.high %v8067_v52, %v8081_v59  ;;  %v22652_v21 = vrot.slane %v14309_v24, %v20124_v32  ;;  %v9782_v55 = vrot.slane %v9766_v20, %v20124_v32  ;;  %v24986_v24 = vld [vmem:[#allocation224_spill] sm:$0xff] }
 0x5ba   : > { %v9719_v56 = vcombine.high %v9717_v34, %v9717_v34  ;;  %v16024_v43 = vcombine.low %v9775_v1, %v9789_v62  ;;  %v8198_v14 = vrot.slane %v8184_v28, %v20124_v32  ;;  %v3703_v50 = vadd.f32 %v24983_v13, %v22559_v18  ;;  %v24988_v28 = vld [vmem:[#allocation225_spill] sm:$0xff] }
 0x5bb   : > { %24982 = vst [vmem:[#allocation200_spill] sm:$0xff] %v22652_v21  ;;  %v11417_v51 = vcombine.low %v11409_v61, %v11416_v5  ;;  %v22661_v49 = vrot.slane %v17865_v16, %v20124_v32  ;;  %v22664_v59 = vrot.slane %v14311_v6, %v20124_v32  ;;  %v17935_v52 = vcombine.high %v9775_v1, %v9789_v62  ;;  %v24991_v6 = vld [vmem:[#allocation113_spill] sm:$0xff] }
 0x5bc   : > { %v12724_v20 = vcombine.low %v24987_v26, %v24986_v24  ;;  %v16026_v0 = vcombine.low %v9782_v55, %v9796_v17  ;;  %v9740_v21 = vrot.slane %v9718_v38, %v20124_v32  ;;  %v8199_v27 = vcombine.high %v8191_v10, %v8191_v10 }
 0x5bd   : > { %24984 = vst [vmem:[#allocation202_spill] sm:$0xff] %v22661_v49  ;;  %24985 = vst [vmem:[#allocation42_spill] sm:$0xff] %v22664_v59  ;;  %16492 = vperm.xlu1 %18661, %v11417_v51   ;;  %v12725_v25 = vcombine.low %v24989_v41, %v24988_v28  ;;  %v22672_v18 = vrot.slane %v17866_v40, %v20124_v32  ;;  %v17936_v16 = vcombine.high %v9782_v55, %v9796_v17  ;;  %v22681_v51 = vpop.xlane.xlu0 %2840  ;;  %v25010_v59 = vld [vmem:[#allocation231_spill] sm:$0xff] }
 0x5be   : > { %v9747_v61 = vrot.slane %v9719_v56, %v20124_v32  ;;  %v3738_v62 = vadd.f32 %v24991_v6, %v22567_v8  ;;  %v22678_v1 = vrot.slane %v16024_v43, %v20124_v32  ;;  %v9726_v5 = vrot.slane %v9710_v29, %v20124_v32  ;;  %v22689_v56 = vpop.xlane.xlu1 %2945 }
 0x5bf   : > { %24990 = vst [vmem:[#allocation110_spill] sm:$0xff] %v22672_v18  ;;  %v8200_v38 = vcombine.high %v8198_v14, %v8198_v14  ;;  %v8135_v13 = vcombine.high %v3703_v50, %v3703_v50  ;;  %v22684_v41 = vrot.slane %v17935_v52, %v20124_v32  ;;  %v9733_v40 = vrot.slane %v9717_v34, %v20124_v32 }
 0x5c0   : > { %24992 = vst [vmem:[#allocation238_spill] sm:$0xff] %v22678_v1  ;;  %v12732_v17 = vrot.slane %v12724_v20, %v20124_v32  ;;  %v12739_v55 = vrot.slane %v12725_v25, %v20124_v32  ;;  %v22692_v8 = vrot.slane %v16026_v0, %v20124_v32  ;;  %v15975_v43 = vcombine.low %v9726_v5, %v9740_v21 }
 0x5c1   : > { %24993 = vst [vmem:[#allocation237_spill] sm:$0xff] %v22684_v41  ;;  %v17933_v29 = vcombine.high %v9726_v5, %v9740_v21  ;;  %v8221_v24 = vrot.slane %v8199_v27, %v20124_v32  ;;  %v15977_v26 = vcombine.low %v9733_v40, %v9747_v61  ;;  %v8142_v28 = vrot.slane %v3703_v50, %v20124_v32  ;;  %v24996_v27 = vld [vmem:[#allocation261_spill] sm:$0xff]  ;;  %v24997_v5 = vld [vmem:[#allocation260_spill] sm:$0xff]  ;;  %v24998_v50 = vld [vmem:[#allocation262_spill] sm:$0xff] }
 0x5c2   : > { %24994 = vst [vmem:[#allocation27_spill] sm:$0xff] %v22692_v8  ;;  %v9850_v52 = vcombine.high %v3738_v62, %v3738_v62  ;;  %v12740_v6 = vcombine.low %v12732_v17, %v12739_v55  ;;  %v22697_v34 = vrot.slane %v17936_v16, %v20124_v32  ;;  %v8207_v20 = vrot.slane %v8191_v10, %v20124_v32  ;;  %v24999_v8 = vld [vmem:[#allocation31_spill] sm:$0xff] }
 0x5c3   : > { %v22701_v25 = vrot.slane %v8200_v38, %v20124_v32  ;;  %v8149_v0 = vrot.slane %v8135_v13, %v20124_v32  ;;  %v17934_v1 = vcombine.high %v9733_v40, %v9747_v61  ;;  %v9857_v21 = vrot.slane %v3738_v62, %v20124_v32 }
 0x5c4   : > { %24995 = vst [vmem:[#allocation239_spill] sm:$0xff] %v22697_v34  ;;  %16573 = vperm.xlu0 %18660, %v12740_v6   ;;  %v12969_v41 = vcombine.low %v24997_v5, %v24996_v27  ;;  %v12970_v17 = vcombine.low %v24999_v8, %v24998_v50  ;;  %v22710_v16 = vrot.slane %v15975_v43, %v20124_v32  ;;  %v22713_v34 = vpop.xlane.xlu0 %2942  ;;  %v22722_v6 = vpop.xlane.xlu1 %2849  ;;  %v25005_v5 = vld [vmem:[#allocation25_spill] sm:$0xff] }
 0x5c5   : > { %v8214_v10 = vrot.slane %v8198_v14, %v20124_v32  ;;  %v14456_v55 = vcombine.low %v8207_v20, %v8221_v24  ;;  %v17871_v38 = vcombine.high %v8207_v20, %v8221_v24  ;;  %v22716_v61 = vrot.slane %v17933_v29, %v20124_v32  ;;  %v25003_v14 = vld [vmem:[#allocation111_spill] sm:$0xff]  ;;  %v25006_v50 = vld [vmem:[#allocation229_spill] sm:$0xff] }
 0x5c6   : > { %25000 = vst [vmem:[#allocation107_spill] sm:$0xff] %v22710_v16  ;;  %v22719_v62 = vrot.slane %v15977_v26, %v20124_v32  ;;  %v8150_v13 = vcombine.high %v8142_v28, %v8142_v28  ;;  %v9864_v40 = vrot.slane %v9850_v52, %v20124_v32  ;;  %v8151_v43 = vcombine.high %v8149_v0, %v8149_v0 }
 0x5c7   : > { %25001 = vst [vmem:[#allocation18_spill] sm:$0xff] %v22716_v61  ;;  %v14458_v8 = vcombine.low %v8214_v10, %v22701_v25  ;;  %v3737_v27 = vadd.f32 %v25003_v14, %v22588_v48  ;;  %v12984_v24 = vrot.slane %v12970_v17, %v20124_v32  ;;  %v22729_v20 = vrot.slane %v17934_v1, %v20124_v32  ;;  %v25009_v48 = vld [vmem:[#allocation82_spill] sm:$0xff] }
 0x5c8   : > { %25002 = vst [vmem:[#allocation205_spill] sm:$0xff] %v22719_v62  ;;  %v9865_v29 = vcombine.high %v9857_v21, %v9857_v21  ;;  %v12977_v26 = vrot.slane %v12969_v41, %v20124_v32  ;;  %v11254_v62 = vcombine.low %v25006_v50, %v25005_v5  ;;  %v17872_v52 = vcombine.high %v8214_v10, %v22701_v25  ;;  %v25011_v41 = vld [vmem:[#allocation230_spill] sm:$0xff] }
 0x5c9   : > { %25004 = vst [vmem:[#allocation78_spill] sm:$0xff] %v22729_v20  ;;  %v22736_v16 = vrot.slane %v14456_v55, %v20124_v32  ;;  %v22739_v61 = vrot.slane %v17871_v38, %v20124_v32  ;;  %v3706_v17 = vadd.f32 %v25009_v48, %v22597_v23  ;;  %v8172_v1 = vrot.slane %v8150_v13, %v20124_v32  ;;  %v22751_v38 = vpop.xlane.xlu0 %2846  ;;  %v25014_v48 = vld [vmem:[#allocation266_spill] sm:$0xff] }
 0x5ca   : > { %v9866_v14 = vcombine.high %v9864_v40, %v9864_v40  ;;  %v12985_v20 = vcombine.low %v12977_v26, %v12984_v24  ;;  %v11255_v18 = vcombine.low %v25011_v41, %v25010_v59  ;;  %v22747_v5 = vrot.slane %v14458_v8, %v20124_v32  ;;  %v22757_v59 = vpop.xlane.xlu1 %2855 }
 0x5cb   : > { %25007 = vst [vmem:[#allocation207_spill] sm:$0xff] %v22736_v16  ;;  %25008 = vst [vmem:[#allocation206_spill] sm:$0xff] %v22739_v61  ;;  %v8158_v25 = vrot.slane %v8142_v28, %v20124_v32  ;;  %v8179_v10 = vrot.slane %v8151_v43, %v20124_v32  ;;  %v9801_v55 = vcombine.high %v3737_v27, %v3737_v27  ;;  %v25013_v43 = vld [vmem:[#allocation267_spill] sm:$0xff] }
 0x5cc   : > { %25012 = vst [vmem:[#allocation242_spill] sm:$0xff] %v22747_v5  ;;  %v9887_v50 = vrot.slane %v9865_v29, %v20124_v32  ;;  %v9808_v23 = vrot.slane %v3737_v27, %v20124_v32  ;;  %16588 = vperm.xlu1 %18661, %v12985_v20   ;;  %v11262_v13 = vrot.slane %v11254_v62, %v20124_v32 }
 0x5cd   : > { %v11269_v24 = vrot.slane %v11255_v18, %v20124_v32  ;;  %v8165_v8 = vrot.slane %v8149_v0, %v20124_v32  ;;  %v8282_v26 = vcombine.high %v3706_v17, %v3706_v17  ;;  %v11499_v28 = vcombine.low %v21356_v9, %v21360_v54 }
 0x5ce   : > { %v11500_v41 = vcombine.low %v25014_v48, %v25013_v43  ;;  %v14407_v16 = vcombine.low %v8158_v25, %v8172_v1  ;;  %v9873_v29 = vrot.slane %v9857_v21, %v20124_v32  ;;  %v9894_v27 = vrot.slane %v9866_v14, %v20124_v32 }
 0x5cf   : > { %v11270_v20 = vcombine.low %v11262_v13, %v11269_v24  ;;  %v17869_v62 = vcombine.high %v8158_v25, %v8172_v1  ;;  %v14409_v61 = vcombine.low %v8165_v8, %v8179_v10  ;;  %v17870_v18 = vcombine.high %v8165_v8, %v8179_v10  ;;  %v22772_v13 = vpop.xlane.xlu0 %2948  ;;  %v25016_v24 = vld [vmem:[#allocation79_spill] sm:$0xff] }
 0x5d0   : > { %v9815_v5 = vrot.slane %v9801_v55, %v20124_v32  ;;  %v9880_v0 = vrot.slane %v9864_v40, %v20124_v32  ;;  %v16122_v49 = vcombine.low %v9873_v29, %v9887_v50  ;;  %v9816_v33 = vcombine.high %v9808_v23, %v9808_v23  ;;  %v22780_v55 = vpop.permute.xlu1 %16420 }
 0x5d1   : > { %16483 = vperm.xlu0 %18660, %v11270_v20   ;;  %v11514_v9 = vrot.slane %v11500_v41, %v20124_v32  ;;  %v17939_v54 = vcombine.high %v9873_v29, %v9887_v50  ;;  %v8289_v43 = vrot.slane %v3706_v17, %v20124_v32  ;;  %v8296_v21 = vrot.slane %v8282_v26, %v20124_v32 }
 0x5d2   : > { %v11507_v14 = vrot.slane %v11499_v28, %v20124_v32  ;;  %v22775_v1 = vrot.slane %v17872_v52, %v20124_v32  ;;  %v22778_v25 = vrot.slane %v14407_v16, %v20124_v32  ;;  %v16124_v40 = vcombine.low %v9880_v0, %v9894_v27 }
 0x5d3   : > { %v17940_v10 = vcombine.high %v9880_v0, %v9894_v27  ;;  %v22783_v50 = vrot.slane %v17869_v62, %v20124_v32  ;;  %v9817_v17 = vcombine.high %v9815_v5, %v9815_v5  ;;  %v3705_v8 = vadd.f32 %v25016_v24, %v22622_v45  ;;  %v25022_v62 = vld [vmem:[#allocation115_spill] sm:$0xff]  ;;  %v25024_v0 = vld [vmem:[#allocation45_spill] sm:$0xff] }
 0x5d4   : > { %25015 = vst [vmem:[#allocation24_spill] sm:$0xff] %v22775_v1  ;;  %v11515_v26 = vcombine.low %v11507_v14, %v11514_v9  ;;  %v22788_v28 = vrot.slane %v14409_v61, %v20124_v32  ;;  %v22791_v52 = vrot.slane %v17870_v18, %v20124_v32  ;;  %v22794_v16 = vrot.slane %v16122_v49, %v20124_v32  ;;  %v25023_v18 = vld [vmem:[#allocation234_spill] sm:$0xff]  ;;  %v25025_v14 = vld [vmem:[#allocation236_spill] sm:$0xff]  ;;  %v25026_v24 = vld [vmem:[#allocation235_spill] sm:$0xff]  ;;  %v22815_v1 = vpop.xlane.xlu0 %2852 }
 0x5d5   : > { %v9838_v48 = vrot.slane %v9816_v33, %v20124_v32  ;;  %v22798_v41 = vrot.slane %v17939_v54, %v20124_v32  ;;  %v9824_v29 = vrot.slane %v9808_v23, %v20124_v32  ;;  %v8297_v27 = vcombine.high %v8289_v43, %v8289_v43 }
 0x5d6   : > { %25017 = vst [vmem:[#allocation245_spill] sm:$0xff] %v22788_v28  ;;  %25018 = vst [vmem:[#allocation50_spill] sm:$0xff] %v22794_v16  ;;  %v8298_v20 = vcombine.high %v8296_v21, %v8296_v21  ;;  %16498 = vperm.xlu1 %18661, %v11515_v26   ;;  %v22802_v45 = vrot.slane %v16124_v40, %v20124_v32  ;;  %v22805_v61 = vrot.slane %v17940_v10, %v20124_v32 }
 0x5d7   : > { %25019 = vst [vmem:[#allocation75_spill] sm:$0xff] %v22798_v41  ;;  %v3740_v49 = vadd.f32 %v25022_v62, %v22629_v42  ;;  %v12822_v33 = vcombine.low %v25024_v0, %v25023_v18  ;;  %v9831_v9 = vrot.slane %v9815_v5, %v20124_v32  ;;  %v9845_v54 = vrot.slane %v9817_v17, %v20124_v32  ;;  %v22819_v42 = vpop.permute.xlu1 %16516 }
 0x5d8   : > { %25020 = vst [vmem:[#allocation112_spill] sm:$0xff] %v22802_v45  ;;  %25021 = vst [vmem:[#allocation212_spill] sm:$0xff] %v22805_v61  ;;  %v8233_v23 = vcombine.high %v3705_v8, %v3705_v8  ;;  %v12823_v26 = vcombine.low %v25026_v24, %v25025_v14  ;;  %v16073_v40 = vcombine.low %v9824_v29, %v9838_v48 }
 0x5d9   : > { %v17937_v16 = vcombine.high %v9824_v29, %v9838_v48  ;;  %v8305_v10 = vrot.slane %v8289_v43, %v20124_v32  ;;  %v8240_v41 = vrot.slane %v3705_v8, %v20124_v32  ;;  %v8319_v62 = vrot.slane %v8297_v27, %v20124_v32  ;;  %v25027_v43 = vld [vmem:[#allocation270_spill] sm:$0xff] }
 0x5da   : > { %v8326_v5 = vrot.slane %v8298_v20, %v20124_v32  ;;  %v12830_v17 = vrot.slane %v12822_v33, %v20124_v32  ;;  %v12837_v18 = vrot.slane %v12823_v26, %v20124_v32  ;;  %v8312_v0 = vrot.slane %v8296_v21, %v20124_v32 }
 0x5db   : > { %v9948_v14 = vcombine.high %v3740_v49, %v3740_v49  ;;  %v13067_v48 = vcombine.low %v21396_v63, %v21401_v30  ;;  %v13068_v29 = vcombine.low %v25027_v43, %v21410_v37  ;;  %v16075_v8 = vcombine.low %v9831_v9, %v9845_v54  ;;  %v25030_v30 = vld [vmem:[#allocation114_spill] sm:$0xff] }
 0x5dc   : > { %v17938_v24 = vcombine.high %v9831_v9, %v9845_v54  ;;  %v8247_v45 = vrot.slane %v8233_v23, %v20124_v32  ;;  %v12838_v27 = vcombine.low %v12830_v17, %v12837_v18  ;;  %v22832_v20 = vrot.slane %v16073_v40, %v20124_v32  ;;  %v22840_v9 = vpop.xlane.xlu0 %2858  ;;  %v22845_v17 = vpop.permute.xlu1 %16426  ;;  %v25034_v18 = vld [vmem:[#allocation240_spill] sm:$0xff] }
 0x5dd   : > { %v22835_v33 = vrot.slane %v17937_v16, %v20124_v32  ;;  %v8248_v26 = vcombine.high %v8240_v41, %v8240_v41  ;;  %v9955_v21 = vrot.slane %v3740_v49, %v20124_v32  ;;  %v14554_v61 = vcombine.low %v8305_v10, %v8319_v62 }
 0x5de   : > { %25028 = vst [vmem:[#allocation44_spill] sm:$0xff] %v22832_v20  ;;  %v17875_v28 = vcombine.high %v8305_v10, %v8319_v62  ;;  %v14556_v63 = vcombine.low %v8312_v0, %v8326_v5  ;;  %v3739_v37 = vadd.f32 %v25030_v30, %v22649_v46  ;;  %16579 = vperm.xlu0 %18660, %v12838_v27   ;;  %v25033_v46 = vld [vmem:[#allocation241_spill] sm:$0xff]  ;;  %v25035_v27 = vld [vmem:[#allocation244_spill] sm:$0xff] }
 0x5df   : > { %25029 = vst [vmem:[#allocation214_spill] sm:$0xff] %v22835_v33  ;;  %v17876_v54 = vcombine.high %v8312_v0, %v8326_v5  ;;  %v9962_v23 = vrot.slane %v9948_v14, %v20124_v32  ;;  %v13075_v40 = vrot.slane %v13067_v48, %v20124_v32  ;;  %v13082_v16 = vrot.slane %v13068_v29, %v20124_v32  ;;  %v25036_v48 = vld [vmem:[#allocation243_spill] sm:$0xff]  ;;  %v25048_v33 = vld [vmem:[#allocation246_spill] sm:$0xff] }
 0x5e0   : > { %v22848_v49 = vrot.slane %v16075_v8, %v20124_v32  ;;  %v22851_v10 = vrot.slane %v17938_v24, %v20124_v32  ;;  %v8249_v62 = vcombine.high %v8247_v45, %v8247_v45  ;;  %v11352_v43 = vcombine.low %v25034_v18, %v25033_v46  ;;  %v25039_v24 = vld [vmem:[#allocation84_spill] sm:$0xff]  ;;  %v22866_v20 = vpop.permute.xlu0 %16417 }
 0x5e1   : > { %v8270_v5 = vrot.slane %v8248_v26, %v20124_v32  ;;  %v9963_v0 = vcombine.high %v9955_v21, %v9955_v21  ;;  %v13083_v14 = vcombine.low %v13075_v40, %v13082_v16  ;;  %v11353_v30 = vcombine.low %v25036_v48, %v25035_v27 }
 0x5e2   : > { %25031 = vst [vmem:[#allocation41_spill] sm:$0xff] %v22848_v49  ;;  %25032 = vst [vmem:[#allocation250_spill] sm:$0xff] %v22851_v10  ;;  %v22859_v29 = vrot.slane %v14554_v61, %v20124_v32  ;;  %v22862_v8 = vrot.slane %v17875_v28, %v20124_v32  ;;  %v9899_v49 = vcombine.high %v3739_v37, %v3739_v37 }
 0x5e3   : > { %v3708_v10 = vadd.f32 %v25039_v24, %v22655_v36  ;;  %v22869_v46 = vrot.slane %v14556_v63, %v20124_v32  ;;  %v22872_v26 = vrot.slane %v17876_v54, %v20124_v32  ;;  %v8256_v40 = vrot.slane %v8240_v41, %v20124_v32  ;;  %16594 = vperm.xlu1 %18661, %v13083_v14   ;;  %v22883_v24 = vpop.permute.xlu1 %16522 }
 0x5e4   : > { %25037 = vst [vmem:[#allocation249_spill] sm:$0xff] %v22859_v29  ;;  %25038 = vst [vmem:[#allocation251_spill] sm:$0xff] %v22862_v8  ;;  %v9964_v16 = vcombine.high %v9962_v23, %v9962_v23  ;;  %v8263_v61 = vrot.slane %v8247_v45, %v20124_v32  ;;  %v8277_v28 = vrot.slane %v8249_v62, %v20124_v32  ;;  %v25042_v29 = vld [vmem:[#allocation274_spill] sm:$0xff]  ;;  %v25043_v62 = vld [vmem:[#allocation273_spill] sm:$0xff] }
 0x5e5   : > { %25040 = vst [vmem:[#allocation109_spill] sm:$0xff] %v22869_v46  ;;  %25041 = vst [vmem:[#allocation218_spill] sm:$0xff] %v22872_v26  ;;  %v11360_v18 = vrot.slane %v11352_v43, %v20124_v32  ;;  %v11367_v36 = vrot.slane %v11353_v30, %v20124_v32  ;;  %v14505_v27 = vcombine.low %v8256_v40, %v8270_v5 }
 0x5e6   : > { %v9985_v48 = vrot.slane %v9963_v0, %v20124_v32  ;;  %v9906_v63 = vrot.slane %v3739_v37, %v20124_v32  ;;  %v11597_v54 = vcombine.low %v21439_v39, %v21445_v15  ;;  %v9913_v41 = vrot.slane %v9899_v49, %v20124_v32  ;;  %v22894_v49 = vpop.permute.xlu0 %16513 }
 0x5e7   : > { %v8380_v14 = vcombine.high %v3708_v10, %v3708_v10  ;;  %v11368_v45 = vcombine.low %v11360_v18, %v11367_v36  ;;  %v11598_v8 = vcombine.low %v25043_v62, %v25042_v29  ;;  %v17873_v43 = vcombine.high %v8256_v40, %v8270_v5  ;;  %v25047_v62 = vld [vmem:[#allocation247_spill] sm:$0xff] }
 0x5e8   : > { %v9971_v30 = vrot.slane %v9955_v21, %v20124_v32  ;;  %v9978_v46 = vrot.slane %v9962_v23, %v20124_v32  ;;  %v9992_v0 = vrot.slane %v9964_v16, %v20124_v32  ;;  %v14507_v37 = vcombine.low %v8263_v61, %v8277_v28 }
 0x5e9   : > { %v8387_v26 = vrot.slane %v3708_v10, %v20124_v32  ;;  %16489 = vperm.xlu0 %18660, %v11368_v45   ;;  %v11605_v39 = vrot.slane %v11597_v54, %v20124_v32  ;;  %v11612_v15 = vrot.slane %v11598_v8, %v20124_v32  ;;  %v17874_v18 = vcombine.high %v8263_v61, %v8277_v28  ;;  %v25046_v54 = vld [vmem:[#allocation81_spill] sm:$0xff]  ;;  %v22907_v28 = vpop.permute.xlu1 %16432 }
 0x5ea   : > { %v22897_v29 = vrot.slane %v14505_v27, %v20124_v32  ;;  %v16220_v5 = vcombine.low %v9971_v30, %v9985_v48  ;;  %v9914_v21 = vcombine.high %v9906_v63, %v9906_v63  ;;  %v17943_v40 = vcombine.high %v9971_v30, %v9985_v48  ;;  %v25049_v48 = vld [vmem:[#allocation117_spill] sm:$0xff] }
 0x5eb   : > { %v9915_v23 = vcombine.high %v9913_v41, %v9913_v41  ;;  %v8394_v16 = vrot.slane %v8380_v14, %v20124_v32  ;;  %v11613_v36 = vcombine.low %v11605_v39, %v11612_v15  ;;  %v22901_v10 = vrot.slane %v17873_v43, %v20124_v32  ;;  %v25050_v14 = vld [vmem:[#allocation248_spill] sm:$0xff]  ;;  %v25051_v39 = vld [vmem:[#allocation47_spill] sm:$0xff] }
 0x5ec   : > { %25044 = vst [vmem:[#allocation217_spill] sm:$0xff] %v22897_v29  ;;  %v16222_v45 = vcombine.low %v9978_v46, %v9992_v0  ;;  %v3707_v8 = vadd.f32 %v25046_v54, %v22681_v51  ;;  %v12920_v61 = vcombine.low %v25048_v33, %v25047_v62  ;;  %v17944_v27 = vcombine.high %v9978_v46, %v9992_v0  ;;  %v22928_v54 = vpop.permute.xlu0 %16423 }
 0x5ed   : > { %25045 = vst [vmem:[#allocation20_spill] sm:$0xff] %v22901_v10  ;;  %v8395_v29 = vcombine.high %v8387_v26, %v8387_v26  ;;  %v3742_v30 = vadd.f32 %v25049_v48, %v22689_v56  ;;  %16504 = vperm.xlu1 %18661, %v11613_v36   ;;  %v12921_v15 = vcombine.low %v25051_v39, %v25050_v14 }
 0x5ee   : > { %v22914_v43 = vrot.slane %v14507_v37, %v20124_v32  ;;  %v22917_v10 = vrot.slane %v17874_v18, %v20124_v32  ;;  %v22920_v51 = vrot.slane %v16220_v5, %v20124_v32  ;;  %v9936_v33 = vrot.slane %v9914_v21, %v20124_v32 }
 0x5ef   : > { %v22924_v46 = vrot.slane %v17943_v40, %v20124_v32  ;;  %v9922_v56 = vrot.slane %v9906_v63, %v20124_v32  ;;  %v9943_v0 = vrot.slane %v9915_v23, %v20124_v32  ;;  %v8396_v36 = vcombine.high %v8394_v16, %v8394_v16 }
 0x5f0   : > { %25052 = vst [vmem:[#allocation219_spill] sm:$0xff] %v22920_v51  ;;  %v22931_v37 = vrot.slane %v16222_v45, %v20124_v32  ;;  %v8331_v18 = vcombine.high %v3707_v8, %v3707_v8  ;;  %v12928_v62 = vrot.slane %v12920_v61, %v20124_v32  ;;  %v12935_v5 = vrot.slane %v12921_v15, %v20124_v32  ;;  %v22941_v45 = vpop.permute.xlu1 %16528 }
 0x5f1   : > { %25053 = vst [vmem:[#allocation80_spill] sm:$0xff] %v22924_v46  ;;  %v22936_v21 = vrot.slane %v17944_v27, %v20124_v32  ;;  %v9929_v40 = vrot.slane %v9913_v41, %v20124_v32  ;;  %v8417_v63 = vrot.slane %v8395_v29, %v20124_v32  ;;  %v10046_v48 = vcombine.high %v3742_v30, %v3742_v30 }
 0x5f2   : > { %25054 = vst [vmem:[#allocation52_spill] sm:$0xff] %v22931_v37  ;;  %v16171_v23 = vcombine.low %v9922_v56, %v9936_v33  ;;  %v17941_v14 = vcombine.high %v9922_v56, %v9936_v33  ;;  %v8338_v39 = vrot.slane %v3707_v8, %v20124_v32  ;;  %v12936_v51 = vcombine.low %v12928_v62, %v12935_v5 }
 0x5f3   : > { %25055 = vst [vmem:[#allocation254_spill] sm:$0xff] %v22936_v21  ;;  %v16173_v46 = vcombine.low %v9929_v40, %v9943_v0  ;;  %v17942_v37 = vcombine.high %v9929_v40, %v9943_v0  ;;  %v8403_v61 = vrot.slane %v8387_v26, %v20124_v32  ;;  %v8424_v15 = vrot.slane %v8396_v36, %v20124_v32  ;;  %v22953_v26 = vpop.permute.xlu0 %16519  ;;  %v25063_v21 = vld [vmem:[#allocation253_spill] sm:$0xff] }
 0x5f4   : > { %v8410_v27 = vrot.slane %v8394_v16, %v20124_v32  ;;  %v8345_v41 = vrot.slane %v8331_v18, %v20124_v32  ;;  %16585 = vperm.xlu0 %18660, %v12936_v51   ;;  %v13165_v29 = vcombine.low %v21481_v60, %v21484_v4  ;;  %v13166_v8 = vcombine.low %v21488_v7, %v21492_v35  ;;  %v25058_v60 = vld [vmem:[#allocation116_spill] sm:$0xff] }
 0x5f5   : > { %v14652_v33 = vcombine.low %v8403_v61, %v8417_v63  ;;  %v17879_v56 = vcombine.high %v8403_v61, %v8417_v63  ;;  %v10053_v62 = vrot.slane %v3742_v30, %v20124_v32  ;;  %v10060_v0 = vrot.slane %v10046_v48, %v20124_v32  ;;  %v25059_v48 = vld [vmem:[#allocation26_spill] sm:$0xff]  ;;  %v22973_v61 = vpop.permute.xlu1 %16438 }
 0x5f6   : > { %v22956_v36 = vrot.slane %v16171_v23, %v20124_v32  ;;  %v22959_v16 = vrot.slane %v17941_v14, %v20124_v32  ;;  %v8346_v51 = vcombine.high %v8338_v39, %v8338_v39  ;;  %v3741_v4 = vadd.f32 %v25058_v60, %v22713_v34  ;;  %v25060_v23 = vld [vmem:[#allocation29_spill] sm:$0xff] }
 0x5f7   : > { %v22964_v7 = vrot.slane %v16173_v46, %v20124_v32  ;;  %v14654_v35 = vcombine.low %v8410_v27, %v8424_v15  ;;  %v17880_v18 = vcombine.high %v8410_v27, %v8424_v15  ;;  %v13180_v30 = vrot.slane %v13166_v8, %v20124_v32 }
 0x5f8   : > { %25056 = vst [vmem:[#allocation256_spill] sm:$0xff] %v22956_v36  ;;  %25057 = vst [vmem:[#allocation255_spill] sm:$0xff] %v22959_v16  ;;  %v22968_v5 = vrot.slane %v17942_v37, %v20124_v32  ;;  %v8347_v40 = vcombine.high %v8345_v41, %v8345_v41  ;;  %v13173_v63 = vrot.slane %v13165_v29, %v20124_v32  ;;  %v25064_v36 = vld [vmem:[#allocation252_spill] sm:$0xff] }
 0x5f9   : > { %v11450_v14 = vcombine.low %v25060_v23, %v25059_v48  ;;  %v22976_v34 = vrot.slane %v14652_v33, %v20124_v32  ;;  %v22979_v46 = vrot.slane %v17879_v56, %v20124_v32  ;;  %v10061_v15 = vcombine.high %v10053_v62, %v10053_v62  ;;  %v22992_v23 = vpop.permute.xlu0 %16429 }
 0x5fa   : > { %v10062_v27 = vcombine.high %v10060_v0, %v10060_v0  ;;  %v8368_v8 = vrot.slane %v8346_v51, %v20124_v32  ;;  %v9997_v37 = vcombine.high %v3741_v4, %v3741_v4  ;;  %v13181_v60 = vcombine.low %v13173_v63, %v13180_v30  ;;  %v25067_v51 = vld [vmem:[#allocation86_spill] sm:$0xff] }
 0x5fb   : > { %25061 = vst [vmem:[#allocation77_spill] sm:$0xff] %v22976_v34  ;;  %25062 = vst [vmem:[#allocation224_spill] sm:$0xff] %v22979_v46  ;;  %v11451_v29 = vcombine.low %v25064_v36, %v25063_v21  ;;  %v22985_v16 = vrot.slane %v14654_v35, %v20124_v32  ;;  %v22988_v48 = vrot.slane %v17880_v18, %v20124_v32 }
 0x5fc   : > { %v8354_v33 = vrot.slane %v8338_v39, %v20124_v32  ;;  %v10004_v56 = vrot.slane %v3741_v4, %v20124_v32  ;;  %v8375_v34 = vrot.slane %v8347_v40, %v20124_v32  ;;  %v3710_v30 = vadd.f32 %v25067_v51, %v22722_v6  ;;  %16600 = vperm.xlu1 %18661, %v13181_v60   ;;  %v23007_v51 = vpop.permute.xlu1 %16534 }
 0x5fd   : > { %25065 = vst [vmem:[#allocation46_spill] sm:$0xff] %v22985_v16  ;;  %25066 = vst [vmem:[#allocation225_spill] sm:$0xff] %v22988_v48  ;;  %v11458_v21 = vrot.slane %v11450_v14, %v20124_v32  ;;  %v11465_v36 = vrot.slane %v11451_v29, %v20124_v32  ;;  %v10083_v35 = vrot.slane %v10061_v15, %v20124_v32 }
 0x5fe   : > { %v10090_v18 = vrot.slane %v10062_v27, %v20124_v32  ;;  %v11695_v39 = vcombine.low %v21524_v12, %v21527_v11  ;;  %v11696_v4 = vcombine.low %v21534_v31, %v21538_v47  ;;  %v8361_v40 = vrot.slane %v8345_v41, %v20124_v32 }
 0x5ff   : > { %v14603_v63 = vcombine.low %v8354_v33, %v8368_v8  ;;  %v10011_v6 = vrot.slane %v9997_v37, %v20124_v32  ;;  %v11466_v60 = vcombine.low %v11458_v21, %v11465_v36  ;;  %v17877_v14 = vcombine.high %v8354_v33, %v8368_v8  ;;  %v23013_v21 = vpop.permute.xlu0 %16525  ;;  %v25069_v33 = vld [vmem:[#allocation83_spill] sm:$0xff] }
 0x600   : > { %v10069_v29 = vrot.slane %v10053_v62, %v20124_v32  ;;  %v10076_v15 = vrot.slane %v10060_v0, %v20124_v32  ;;  %v10012_v27 = vcombine.high %v10004_v56, %v10004_v56  ;;  %v14605_v46 = vcombine.low %v8361_v40, %v8375_v34  ;;  %v23034_v48 = vpop.permute.xlu1 %16444 }
 0x601   : > { %v17878_v16 = vcombine.high %v8361_v40, %v8375_v34  ;;  %v8478_v12 = vcombine.high %v3710_v30, %v3710_v30  ;;  %16495 = vperm.xlu0 %18660, %v11466_v60   ;;  %v11710_v11 = vrot.slane %v11696_v4, %v20124_v32  ;;  %v11703_v37 = vrot.slane %v11695_v39, %v20124_v32 }
 0x602   : > { %v16318_v31 = vcombine.low %v10069_v29, %v10083_v35  ;;  %v17947_v47 = vcombine.high %v10069_v29, %v10083_v35  ;;  %v16320_v41 = vcombine.low %v10076_v15, %v10090_v18  ;;  %v23016_v8 = vrot.slane %v14603_v63, %v20124_v32 }
 0x603   : > { %v10013_v62 = vcombine.high %v10011_v6, %v10011_v6  ;;  %v8485_v0 = vrot.slane %v3710_v30, %v20124_v32  ;;  %v3709_v34 = vadd.f32 %v25069_v33, %v22751_v38  ;;  %v23022_v36 = vrot.slane %v17877_v14, %v20124_v32  ;;  %v25070_v30 = vld [vmem:[#allocation88_spill] sm:$0xff]  ;;  %v25077_v33 = vld [vmem:[#allocation259_spill] sm:$0xff] }
 0x604   : > { %25068 = vst [vmem:[#allocation43_spill] sm:$0xff] %v23016_v8  ;;  %v17948_v4 = vcombine.high %v10076_v15, %v10090_v18  ;;  %v10034_v35 = vrot.slane %v10012_v27, %v20124_v32  ;;  %v11711_v40 = vcombine.low %v11703_v37, %v11710_v11  ;;  %v23026_v39 = vrot.slane %v14605_v46, %v20124_v32 }
 0x605   : > { %v23029_v60 = vrot.slane %v17878_v16, %v20124_v32  ;;  %v8492_v63 = vrot.slane %v8478_v12, %v20124_v32  ;;  %v3712_v29 = vadd.f32 %v25070_v30, %v22757_v59  ;;  %v23037_v38 = vrot.slane %v16318_v31, %v20124_v32  ;;  %v25074_v12 = vld [vmem:[#allocation258_spill] sm:$0xff]  ;;  %v25075_v59 = vld [vmem:[#allocation257_spill] sm:$0xff] }
 0x606   : > { %v23040_v18 = vrot.slane %v17947_v47, %v20124_v32  ;;  %v23043_v14 = vrot.slane %v16320_v41, %v20124_v32  ;;  %v10020_v46 = vrot.slane %v10004_v56, %v20124_v32  ;;  %16510 = vperm.xlu1 %18661, %v11711_v40   ;;  %v10041_v16 = vrot.slane %v10013_v62, %v20124_v32  ;;  %v25078_v30 = vld [vmem:[#allocation49_spill] sm:$0xff] }
 0x607   : > { %25071 = vst [vmem:[#allocation113_spill] sm:$0xff] %v23037_v38  ;;  %v8493_v15 = vcombine.high %v8485_v0, %v8485_v0  ;;  %v8429_v27 = vcombine.high %v3709_v34, %v3709_v34  ;;  %v13018_v11 = vcombine.low %v25075_v59, %v25074_v12  ;;  %v23050_v37 = vrot.slane %v17948_v4, %v20124_v32  ;;  %v23055_v38 = vpop.permute.xlu0 %16435 }
 0x608   : > { %25072 = vst [vmem:[#allocation261_spill] sm:$0xff] %v23040_v18  ;;  %25073 = vst [vmem:[#allocation260_spill] sm:$0xff] %v23043_v14  ;;  %v10027_v31 = vrot.slane %v10011_v6, %v20124_v32  ;;  %v16269_v47 = vcombine.low %v10020_v46, %v10034_v35  ;;  %v13019_v41 = vcombine.low %v25078_v30, %v25077_v33 }
 0x609   : > { %25076 = vst [vmem:[#allocation262_spill] sm:$0xff] %v23050_v37  ;;  %v17945_v56 = vcombine.high %v10020_v46, %v10034_v35  ;;  %v8494_v40 = vcombine.high %v8492_v63, %v8492_v63  ;;  %v8436_v62 = vrot.slane %v3709_v34, %v20124_v32  ;;  %v8576_v18 = vcombine.high %v3712_v29, %v3712_v29  ;;  %v23066_v46 = vpop.permute.xlu1 %16540 }
 0x60a   : > { %v13026_v14 = vrot.slane %v13018_v11, %v20124_v32  ;;  %v13033_v12 = vrot.slane %v13019_v41, %v20124_v32  ;;  %v13263_v4 = vcombine.low %v21566_v3, %v21572_v2  ;;  %v13264_v6 = vcombine.low %v21575_v57, %v21580_v58 }
 0x60b   : > { %v16271_v59 = vcombine.low %v10027_v31, %v10041_v16  ;;  %v17946_v37 = vcombine.high %v10027_v31, %v10041_v16  ;;  %v8515_v33 = vrot.slane %v8493_v15, %v20124_v32  ;;  %v8443_v35 = vrot.slane %v8429_v27, %v20124_v32  ;;  %v23081_v27 = vpop.permute.xlu0 %16531 }
 0x60c   : > { %v8583_v34 = vrot.slane %v3712_v29, %v20124_v32  ;;  %v13034_v30 = vcombine.low %v13026_v14, %v13033_v12  ;;  %v13271_v11 = vrot.slane %v13263_v4, %v20124_v32  ;;  %v13278_v41 = vrot.slane %v13264_v6, %v20124_v32  ;;  %v25082_v4 = vld [vmem:[#allocation263_spill] sm:$0xff] }
 0x60d   : > { %v23072_v3 = vrot.slane %v16269_v47, %v20124_v32  ;;  %v23075_v2 = vrot.slane %v17945_v56, %v20124_v32  ;;  %v8501_v57 = vrot.slane %v8485_v0, %v20124_v32  ;;  %v8508_v58 = vrot.slane %v8492_v63, %v20124_v32  ;;  %v25081_v47 = vld [vmem:[#allocation28_spill] sm:$0xff]  ;;  %v25083_v56 = vld [vmem:[#allocation265_spill] sm:$0xff] }
 0x60e   : > { %v8522_v16 = vrot.slane %v8494_v40, %v20124_v32  ;;  %v8444_v15 = vcombine.high %v8436_v62, %v8436_v62  ;;  %v8590_v29 = vrot.slane %v8576_v18, %v20124_v32  ;;  %16591 = vperm.xlu0 %18660, %v13034_v30   ;;  %v13279_v14 = vcombine.low %v13271_v11, %v13278_v41 }
 0x60f   : > { %25079 = vst [vmem:[#allocation31_spill] sm:$0xff] %v23072_v3  ;;  %25080 = vst [vmem:[#allocation111_spill] sm:$0xff] %v23075_v2  ;;  %v14750_v31 = vcombine.low %v8501_v57, %v8515_v33  ;;  %v17883_v12 = vcombine.high %v8501_v57, %v8515_v33  ;;  %v11548_v6 = vcombine.low %v25082_v4, %v25081_v47  ;;  %v25084_v3 = vld [vmem:[#allocation264_spill] sm:$0xff] }
 0x610   : > { %v11549_v2 = vcombine.low %v25084_v3, %v25083_v56  ;;  %v23088_v0 = vrot.slane %v16271_v59, %v20124_v32  ;;  %v23091_v63 = vrot.slane %v17946_v37, %v20124_v32  ;;  %v8445_v40 = vcombine.high %v8443_v35, %v8443_v35  ;;  %16606 = vperm.xlu1 %18661, %v13279_v14   ;;  %v23099_v3 = vpop.permute.xlu1 %16450  ;;  %v25088_v56 = vld [vmem:[#allocation54_spill] sm:$0xff] }
 0x611   : > { %v8591_v18 = vcombine.high %v8583_v34, %v8583_v34  ;;  %v11556_v30 = vrot.slane %v11548_v6, %v20124_v32  ;;  %v13361_v33 = vcombine.low %v21610_v44, %v21614_v19  ;;  %v13362_v41 = vcombine.low %v21628_v22, %v21640_v53  ;;  %25087 = vst [vmem:[#allocation82_spill] sm:$0xff] %v23099_v3 }
 0x612   : > { %25085 = vst [vmem:[#allocation25_spill] sm:$0xff] %v23088_v0  ;;  %25086 = vst [vmem:[#allocation229_spill] sm:$0xff] %v23091_v63  ;;  %v11563_v11 = vrot.slane %v11549_v2, %v20124_v32  ;;  %v14752_v59 = vcombine.low %v8508_v58, %v8522_v16  ;;  %v17884_v57 = vcombine.high %v8508_v58, %v8522_v16  ;;  %v25089_v2 = vld [vmem:[#allocation268_spill] sm:$0xff]  ;;  %v23114_v58 = vpop.permute.xlu0 %16441  ;;  %v25140_v63 = vld [vmem:[#allocation130_spill] sm:$0xff] }
 0x613   : > { %v8466_v37 = vrot.slane %v8444_v15, %v20124_v32  ;;  %v8592_v47 = vcombine.high %v8590_v29, %v8590_v29  ;;  %v13369_v14 = vrot.slane %v13361_v33, %v20124_v32  ;;  %v13376_v6 = vrot.slane %v13362_v41, %v20124_v32  ;;  %25092 = vst [vmem:[#allocation267_spill] sm:$0xff] %v23114_v58  ;;  %v25093_v15 = vld [vmem:[#allocation118_spill] sm:$0xff]  ;;  %v25094_v33 = vld [vmem:[#allocation269_spill] sm:$0xff]  ;;  %v25095_v41 = vld [vmem:[#allocation51_spill] sm:$0xff] }
 0x614   : > { %v11564_v4 = vcombine.low %v11556_v30, %v11563_v11  ;;  %v13116_v0 = vcombine.low %v25089_v2, %v25088_v56  ;;  %v23107_v44 = vrot.slane %v14750_v31, %v20124_v32  ;;  %v23110_v22 = vrot.slane %v17883_v12, %v20124_v32 }
 0x615   : > { %v8452_v19 = vrot.slane %v8436_v62, %v20124_v32  ;;  %v8473_v53 = vrot.slane %v8445_v40, %v20124_v32  ;;  %v8613_v16 = vrot.slane %v8591_v18, %v20124_v32  ;;  %v3743_v30 = vadd.f32 %v25093_v15, %v22772_v13  ;;  %v25099_v15 = vld [vmem:[#allocation91_spill] sm:$0xff] }
 0x616   : > { %25090 = vst [vmem:[#allocation231_spill] sm:$0xff] %v23107_v44  ;;  %25091 = vst [vmem:[#allocation230_spill] sm:$0xff] %v23110_v22  ;;  %16501 = vperm.xlu0 %18660, %v11564_v4   ;;  %v13377_v11 = vcombine.low %v13369_v14, %v13376_v6  ;;  %v13117_v31 = vcombine.low %v25095_v41, %v25094_v33  ;;  %v23122_v56 = vrot.slane %v14752_v59, %v20124_v32  ;;  %v23129_v4 = vpop.permute.xlu1 %16546  ;;  %v25103_v41 = vld [vmem:[#allocation285_spill] sm:$0xff]  ;;  %v25106_v44 = vld [vmem:[#allocation56_spill] sm:$0xff] }
 0x617   : > { %v8459_v12 = vrot.slane %v8443_v35, %v20124_v32  ;;  %v14701_v62 = vcombine.low %v8452_v19, %v8466_v37  ;;  %v17881_v2 = vcombine.high %v8452_v19, %v8466_v37  ;;  %v8599_v40 = vrot.slane %v8583_v34, %v20124_v32  ;;  %25097 = vst [vmem:[#allocation79_spill] sm:$0xff] %v23129_v4  ;;  %v25100_v35 = vld [vmem:[#allocation94_spill] sm:$0xff]  ;;  %v25105_v4 = vld [vmem:[#allocation271_spill] sm:$0xff] }
 0x618   : > { %25096 = vst [vmem:[#allocation266_spill] sm:$0xff] %v23122_v56  ;;  %v8620_v3 = vrot.slane %v8592_v47, %v20124_v32  ;;  %16612 = vperm.xlu1 %18661, %v13377_v11   ;;  %v13124_v18 = vrot.slane %v13116_v0, %v20124_v32  ;;  %v13131_v13 = vrot.slane %v13117_v31, %v20124_v32  ;;  %v25104_v31 = vld [vmem:[#allocation284_spill] sm:$0xff] }
 0x619   : > { %v23132_v14 = vrot.slane %v17884_v57, %v20124_v32  ;;  %v14703_v59 = vcombine.low %v8459_v12, %v8473_v53  ;;  %v17882_v6 = vcombine.high %v8459_v12, %v8473_v53  ;;  %v15027_v33 = vcombine.low %v25100_v35, %v25099_v15  ;;  %v23147_v12 = vpop.permute.xlu0 %16537  ;;  %v25116_v56 = vld [vmem:[#allocation152_spill] sm:$0xff] }
 0x61a   : > { %v8606_v37 = vrot.slane %v8590_v29, %v20124_v32  ;;  %v14848_v34 = vcombine.low %v8599_v40, %v8613_v16  ;;  %v10095_v19 = vcombine.high %v3743_v30, %v3743_v30  ;;  %v13132_v47 = vcombine.low %v13124_v18, %v13131_v13  ;;  %25107 = vst [vmem:[#allocation236_spill] sm:$0xff] %v23147_v12  ;;  %v25108_v18 = vld [vmem:[#allocation30_spill] sm:$0xff]  ;;  %v25109_v13 = vld [vmem:[#allocation272_spill] sm:$0xff] }
 0x61b   : > { %25098 = vst [vmem:[#allocation115_spill] sm:$0xff] %v23132_v14  ;;  %v23138_v11 = vrot.slane %v14701_v62, %v20124_v32  ;;  %v23141_v0 = vrot.slane %v17881_v2, %v20124_v32  ;;  %v15028_v57 = vcombine.low %v25104_v31, %v25103_v41  ;;  %v11646_v53 = vcombine.low %v25106_v44, %v25105_v4 }
 0x61c   : > { %v17887_v15 = vcombine.high %v8599_v40, %v8613_v16  ;;  %v14850_v35 = vcombine.low %v8606_v37, %v8620_v3  ;;  %v10102_v29 = vrot.slane %v3743_v30, %v20124_v32  ;;  %16597 = vperm.xlu0 %18660, %v13132_v47   ;;  %v11647_v62 = vcombine.low %v25109_v13, %v25108_v18  ;;  %v23165_v47 = vpop.permute.xlu1 %16456  ;;  %v25114_v18 = vld [vmem:[#allocation150_spill] sm:$0xff] }
 0x61d   : > { %25101 = vst [vmem:[#allocation234_spill] sm:$0xff] %v23138_v11  ;;  %25102 = vst [vmem:[#allocation45_spill] sm:$0xff] %v23141_v0  ;;  %v23153_v22 = vrot.slane %v14703_v59, %v20124_v32  ;;  %v23156_v2 = vrot.slane %v17882_v6, %v20124_v32  ;;  %v15035_v41 = vrot.slane %v15027_v33, %v20124_v32  ;;  %v25115_v6 = vld [vmem:[#allocation62_spill] sm:$0xff]  ;;  %v25149_v11 = vld [vmem:[#allocation132_spill] sm:$0xff] }
 0x61e   : > { %v15042_v44 = vrot.slane %v15028_v57, %v20124_v32  ;;  %v17888_v4 = vcombine.high %v8606_v37, %v8620_v3  ;;  %v23161_v16 = vrot.slane %v14848_v34, %v20124_v32  ;;  %v10109_v30 = vrot.slane %v10095_v19, %v20124_v32  ;;  %25113 = vst [vmem:[#allocation241_spill] sm:$0xff] %v23165_v47  ;;  %v25117_v33 = vld [vmem:[#allocation34_spill] sm:$0xff]  ;;  %v25125_v47 = vld [vmem:[#allocation276_spill] sm:$0xff] }
 0x61f   : > { %25110 = vst [vmem:[#allocation235_spill] sm:$0xff] %v23153_v22  ;;  %25111 = vst [vmem:[#allocation270_spill] sm:$0xff] %v23156_v2  ;;  %v11654_v40 = vrot.slane %v11646_v53, %v20124_v32  ;;  %v11661_v59 = vrot.slane %v11647_v62, %v20124_v32  ;;  %v13459_v13 = vcombine.low %v25115_v6, %v25114_v18  ;;  %v25249_v22 = vld [vmem:[#allocation189_spill] sm:$0xff] }
 0x620   : > { %25112 = vst [vmem:[#allocation114_spill] sm:$0xff] %v23161_v16  ;;  %v15043_v31 = vcombine.low %v15035_v41, %v15042_v44  ;;  %v13460_v14 = vcombine.low %v25117_v33, %v25116_v56  ;;  %v23173_v3 = vrot.slane %v17887_v15, %v20124_v32  ;;  %v23176_v37 = vrot.slane %v14850_v35, %v20124_v32  ;;  %v25120_v41 = vld [vmem:[#allocation53_spill] sm:$0xff]  ;;  %v25121_v44 = vld [vmem:[#allocation90_spill] sm:$0xff]  ;;  %v23185_v56 = vpop.permute.xlu0 %16447 }
 0x621   : > { %v10110_v34 = vcombine.high %v10102_v29, %v10102_v29  ;;  %v23179_v19 = vrot.slane %v10102_v29, %v20124_v32  ;;  %v11662_v57 = vcombine.low %v11654_v40, %v11661_v59  ;;  %v13467_v53 = vrot.slane %v13459_v13, %v20124_v32  ;;  %25122 = vst [vmem:[#allocation243_spill] sm:$0xff] %v23185_v56  ;;  %v25124_v35 = vld [vmem:[#allocation85_spill] sm:$0xff]  ;;  %v25126_v29 = vld [vmem:[#allocation275_spill] sm:$0xff]  ;;  %v25128_v40 = vld [vmem:[#allocation126_spill] sm:$0xff] }
 0x622   : > { %25118 = vst [vmem:[#allocation240_spill] sm:$0xff] %v23173_v3  ;;  %25119 = vst [vmem:[#allocation244_spill] sm:$0xff] %v23176_v37  ;;  %16714 = vperm.xlu1 %18661, %v15043_v31   ;;  %v13474_v62 = vrot.slane %v13460_v14, %v20124_v32  ;;  %v13214_v18 = vcombine.low %v25121_v44, %v25120_v41  ;;  %v25123_v15 = vlaneseq  ;;  %v3711_v33 = vadd.f32 %v25124_v35, %v22815_v1  ;;  %v25127_v31 = vld [vmem:[#allocation125_spill] sm:$0xff]  ;;  %v25130_v44 = vld [vmem:[#allocation156_spill] sm:$0xff] }
 0x623   : > { %v13215_v16 = vcombine.low %v25126_v29, %v25125_v47  ;;  %v15125_v59 = vcombine.low %v25128_v40, %v25127_v31  ;;  %v23197_v13 = vrot.slane %v17888_v4, %v20124_v32  ;;  %v10111_v14 = vcombine.high %v10109_v30, %v10109_v30  ;;  %16507 = vperm.xlu0 %18660, %v11662_v57   ;;  %v25131_v3 = vld [vmem:[#allocation96_spill] sm:$0xff]  ;;  %v23207_v29 = vpop.permute.xlu1 %16552  ;;  %v25136_v40 = vld [vmem:[#allocation278_spill] sm:$0xff] }
 0x624   : > { %v23188_v6 = vand.u32 127, %v25123_v15  ;;  %v13475_v41 = vcombine.low %v13467_v53, %v13474_v62  ;;  %v15126_v56 = vcombine.low %v25131_v3, %v25130_v44  ;;  %v23202_v15 = vrot.slane %v10109_v30, %v20124_v32  ;;  %25132 = vst [vmem:[#allocation274_spill] sm:$0xff] %v23207_v29  ;;  %v25133_v53 = vld [vmem:[#allocation277_spill] sm:$0xff]  ;;  %v25134_v62 = vld [vmem:[#allocation58_spill] sm:$0xff]  ;;  %v25135_v3 = vld [vmem:[#allocation279_spill] sm:$0xff] }
 0x625   : > { %25129 = vst [vmem:[#allocation84_spill] sm:$0xff] %v23197_v13  ;;  %v10132_v1 = vrot.slane %v10110_v34, %v20124_v32  ;;  %v13222_v35 = vrot.slane %v13214_v18, %v20124_v32  ;;  %v13229_v47 = vrot.slane %v13215_v16, %v20124_v32  ;;  %v15133_v4 = vrot.slane %v15125_v59, %v20124_v32  ;;  %v25137_v18 = vld [vmem:[#allocation127_spill] sm:$0xff]  ;;  %v25138_v13 = vld [vmem:[#allocation128_spill] sm:$0xff] }
 0x626   : > { %16618 = vperm.xlu1 %18661, %v13475_v41   ;;  %v15140_v57 = vrot.slane %v15126_v56, %v20124_v32  ;;  %v13312_v31 = vcombine.low %v25134_v62, %v25133_v53  ;;  %v13313_v30 = vcombine.low %v25136_v40, %v25135_v3  ;;  %v16806_v44 = vadd.s32 4294967288, %v23188_v6  ;;  %v25139_v56 = vld [vmem:[#allocation129_spill] sm:$0xff]  ;;  %v23224_v53 = vpop.permute.xlu0 %16543 }
 0x627   : > { %v8527_v34 = vcombine.high %v3711_v33, %v3711_v33  ;;  %v13230_v37 = vcombine.low %v13222_v35, %v13229_v47  ;;  %v13557_v16 = vcombine.low %v25138_v13, %v25137_v18  ;;  %v23219_v29 = vrot.slane %v10111_v14, %v20124_v32  ;;  %25141 = vst [vmem:[#allocation273_spill] sm:$0xff] %v23224_v53  ;;  %v25142_v47 = vld [vmem:[#allocation280_spill] sm:$0xff]  ;;  %v25143_v13 = vld [vmem:[#allocation55_spill] sm:$0xff] }
 0x628   : > { %v15141_v41 = vcombine.low %v15133_v4, %v15140_v57  ;;  %v13327_v59 = vrot.slane %v13313_v30, %v20124_v32  ;;  %v13558_v12 = vcombine.low %v25140_v63, %v25139_v56  ;;  %v16367_v62 = vcombine.low %v23179_v19, %v10132_v1  ;;  %v25144_v63 = vld [vmem:[#allocation89_spill] sm:$0xff]  ;;  %v25145_v30 = vld [vmem:[#allocation92_spill] sm:$0xff] }
 0x629   : > { %v8534_v3 = vrot.slane %v3711_v33, %v20124_v32  ;;  %16603 = vperm.xlu0 %18660, %v13230_v37   ;;  %v13320_v35 = vrot.slane %v13312_v31, %v20124_v32  ;;  %v14978_v40 = vcombine.low %v25143_v13, %v25142_v47  ;;  %v17949_v14 = vcombine.high %v23179_v19, %v10132_v1  ;;  %v25146_v33 = vld [vmem:[#allocation61_spill] sm:$0xff]  ;;  %v25147_v37 = vld [vmem:[#allocation163_spill] sm:$0xff]  ;;  %v23241_v47 = vpop.permute.xlu1 %16462 }
 0x62a   : > { %16720 = vperm.xlu1 %18661, %v15141_v41   ;;  %v13565_v4 = vrot.slane %v13557_v16, %v20124_v32  ;;  %v13572_v57 = vrot.slane %v13558_v12, %v20124_v32  ;;  %v14979_v18 = vcombine.low %v25145_v30, %v25144_v63  ;;  %v8541_v56 = vrot.slane %v8527_v34, %v20124_v32  ;;  %v25148_v31 = vld [vmem:[#allocation131_spill] sm:$0xff]  ;;  %v25151_v1 = vld [vmem:[#allocation9_spill] sm:$0xff] }
 0x62b   : > { %v13328_v53 = vcombine.low %v13320_v35, %v13327_v59  ;;  %v15223_v58 = vcombine.low %v25147_v37, %v25146_v33  ;;  %v15224_v0 = vcombine.low %v25149_v11, %v25148_v31  ;;  %25150 = vst [vmem:[#allocation81_spill] sm:$0xff] %v23241_v47  ;;  %v16369_v19 = vcombine.low %v23202_v15, %v23219_v29  ;;  %v25152_v35 = vld [vmem:[#allocation282_spill] sm:$0xff]  ;;  %v25153_v63 = vld [vmem:[#allocation281_spill] sm:$0xff]  ;;  %v25159_v37 = vld [vmem:[#allocation87_spill] sm:$0xff] }
 0x62c   : > { %v23246_v16 = vsub.s32 %v16806_v44, %v25151_v1  ;;  %v13573_v12 = vcombine.low %v13565_v4, %v13572_v57  ;;  %v14993_v41 = vrot.slane %v14979_v18, %v20124_v32  ;;  %v8542_v13 = vcombine.high %v8534_v3, %v8534_v3  ;;  %v25155_v4 = vld [vmem:[#allocation60_spill] sm:$0xff]  ;;  %v25156_v57 = vld [vmem:[#allocation283_spill] sm:$0xff] }
 0x62d   : > { %16609 = vperm.xlu0 %18660, %v13328_v53   ;;  %v14986_v34 = vrot.slane %v14978_v40, %v20124_v32  ;;  %v15238_v59 = vrot.slane %v15224_v0, %v20124_v32  ;;  %v13410_v11 = vcombine.low %v25153_v63, %v25152_v35  ;;  %v17950_v30 = vcombine.high %v23202_v15, %v23219_v29  ;;  %v23261_v53 = vpop.permute.xlu0 %16453  ;;  %v25163_v47 = vld [vmem:[#allocation119_spill] sm:$0xff] }
 0x62e   : > { %v23256_v33 = vrot.slane %v16367_v62, %v20124_v32  ;;  %16624 = vperm.xlu1 %18661, %v13573_v12   ;;  %v15231_v44 = vrot.slane %v15223_v58, %v20124_v32  ;;  %v13411_v18 = vcombine.low %v25156_v57, %v25155_v4  ;;  %25157 = vst [vmem:[#allocation246_spill] sm:$0xff] %v23261_v53  ;;  %v25160_v62 = vld [vmem:[#allocation169_spill] sm:$0xff]  ;;  %v25161_v12 = vld [vmem:[#allocation168_spill] sm:$0xff]  ;;  %v25162_v58 = vld [vmem:[#allocation95_spill] sm:$0xff] }
 0x62f   : > { %v23264_v40 = vrot.slane %v17949_v14, %v20124_v32  ;;  %v8543_v0 = vcombine.high %v8541_v56, %v8541_v56  ;;  %v3713_v31 = vadd.f32 %v25159_v37, %v22840_v9  ;;  %v14994_v35 = vcombine.low %v14986_v34, %v14993_v41  ;;  %v25164_v53 = vld [vmem:[#allocation121_spill] sm:$0xff]  ;;  %v23279_v34 = vpop.permute.xlu1 %16558  ;;  %v25169_v37 = vld [vmem:[#allocation120_spill] sm:$0xff] }
 0x630   : > { %25154 = vst [vmem:[#allocation247_spill] sm:$0xff] %v23256_v33  ;;  %v15239_v15 = vcombine.low %v15231_v44, %v15238_v59  ;;  %v13425_v29 = vrot.slane %v13411_v18, %v20124_v32  ;;  %v13655_v63 = vcombine.low %v25161_v12, %v25160_v62  ;;  %v13656_v33 = vcombine.low %v25163_v47, %v25162_v58  ;;  %v25165_v9 = vld [vmem:[#allocation57_spill] sm:$0xff]  ;;  %v25168_v18 = vld [vmem:[#allocation122_spill] sm:$0xff] }
 0x631   : > { %25158 = vst [vmem:[#allocation117_spill] sm:$0xff] %v23264_v40  ;;  %v8564_v14 = vrot.slane %v8542_v13, %v20124_v32  ;;  %16711 = vperm.xlu0 %18660, %v14994_v35   ;;  %v13418_v57 = vrot.slane %v13410_v11, %v20124_v32  ;;  %v15076_v41 = vcombine.low %v25165_v9, %v25164_v53  ;;  %25166 = vst [vmem:[#allocation248_spill] sm:$0xff] %v23279_v34  ;;  %v25170_v12 = vld [vmem:[#allocation174_spill] sm:$0xff]  ;;  %v25171_v53 = vld [vmem:[#allocation141_spill] sm:$0xff]  ;;  %v23295_v40 = vpop.permute.xlu0 %16549 }
 0x632   : > { %v23282_v59 = vrot.slane %v16369_v19, %v20124_v32  ;;  %16726 = vperm.xlu1 %18661, %v15239_v15   ;;  %v13663_v44 = vrot.slane %v13655_v63, %v20124_v32  ;;  %v13670_v47 = vrot.slane %v13656_v33, %v20124_v32  ;;  %v15077_v62 = vcombine.low %v25169_v37, %v25168_v18  ;;  %v25172_v15 = vld [vmem:[#allocation38_spill] sm:$0xff]  ;;  %v25173_v34 = vld [vmem:[#allocation173_spill] sm:$0xff] }
 0x633   : > { %v8550_v13 = vrot.slane %v8534_v3, %v20124_v32  ;;  %v8571_v11 = vrot.slane %v8543_v0, %v20124_v32  ;;  %v13426_v35 = vcombine.low %v13418_v57, %v13425_v29  ;;  %v15321_v58 = vcombine.low %v25171_v53, %v25170_v12  ;;  %25174 = vst [vmem:[#allocation116_spill] sm:$0xff] %v23295_v40  ;;  %v25175_v57 = vld [vmem:[#allocation135_spill] sm:$0xff]  ;;  %v25177_v37 = vld [vmem:[#allocation137_spill] sm:$0xff] }
 0x634   : > { %25167 = vst [vmem:[#allocation47_spill] sm:$0xff] %v23282_v59  ;;  %v8625_v9 = vcombine.high %v3713_v31, %v3713_v31  ;;  %v13671_v4 = vcombine.low %v13663_v44, %v13670_v47  ;;  %v15091_v19 = vrot.slane %v15077_v62, %v20124_v32  ;;  %v15322_v63 = vcombine.low %v25173_v34, %v25172_v15  ;;  %v25176_v44 = vld [vmem:[#allocation136_spill] sm:$0xff]  ;;  %v25178_v62 = vld [vmem:[#allocation138_spill] sm:$0xff] }
 0x635   : > { %v14799_v33 = vcombine.low %v8550_v13, %v8564_v14  ;;  %v17885_v59 = vcombine.high %v8550_v13, %v8564_v14  ;;  %v8632_v18 = vrot.slane %v3713_v31, %v20124_v32  ;;  %16615 = vperm.xlu0 %18660, %v13426_v35   ;;  %v15084_v3 = vrot.slane %v15076_v41, %v20124_v32  ;;  %v25181_v15 = vld [vmem:[#allocation146_spill] sm:$0xff]  ;;  %v25192_v31 = vld [vmem:[#allocation65_spill] sm:$0xff] }
 0x636   : > { %16630 = vperm.xlu1 %18661, %v13671_v4   ;;  %v15329_v0 = vrot.slane %v15321_v58, %v20124_v32  ;;  %v15336_v29 = vrot.slane %v15322_v63, %v20124_v32  ;;  %v13508_v47 = vcombine.low %v25176_v44, %v25175_v57  ;;  %v13509_v34 = vcombine.low %v25178_v62, %v25177_v37  ;;  %v23311_v4 = vpop.permute.xlu1 %16468  ;;  %v25180_v58 = vld [vmem:[#allocation145_spill] sm:$0xff]  ;;  %v25183_v37 = vld [vmem:[#allocation100_spill] sm:$0xff] }
 0x637   : > { %v23306_v12 = vrot.slane %v17950_v30, %v20124_v32  ;;  %v8557_v14 = vrot.slane %v8541_v56, %v20124_v32  ;;  %v15092_v41 = vcombine.low %v15084_v3, %v15091_v19  ;;  %v8639_v13 = vrot.slane %v8625_v9, %v20124_v32  ;;  %v25182_v56 = vld [vmem:[#allocation180_spill] sm:$0xff] }
 0x638   : > { %v15337_v35 = vcombine.low %v15329_v0, %v15336_v29  ;;  %v13523_v53 = vrot.slane %v13509_v34, %v20124_v32  ;;  %v13753_v63 = vcombine.low %v25181_v15, %v25180_v58  ;;  %v13516_v30 = vrot.slane %v13508_v47, %v20124_v32  ;;  %v25186_v0 = vld [vmem:[#allocation59_spill] sm:$0xff]  ;;  %v23328_v58 = vpop.permute.xlu0 %16459  ;;  %v25190_v15 = vld [vmem:[#allocation124_spill] sm:$0xff] }
 0x639   : > { %25179 = vst [vmem:[#allocation26_spill] sm:$0xff] %v23306_v12  ;;  %v14801_v57 = vcombine.low %v8557_v14, %v8571_v11  ;;  %v17886_v44 = vcombine.high %v8557_v14, %v8571_v11  ;;  %16717 = vperm.xlu0 %18660, %v15092_v41   ;;  %v13754_v62 = vcombine.low %v25183_v37, %v25182_v56  ;;  %v25187_v29 = vld [vmem:[#allocation151_spill] sm:$0xff]  ;;  %25188 = vst [vmem:[#allocation252_spill] sm:$0xff] %v23328_v58  ;;  %v25194_v12 = vld [vmem:[#allocation153_spill] sm:$0xff] }
 0x63a   : > { %v23321_v19 = vrot.slane %v14799_v33, %v20124_v32  ;;  %v23324_v3 = vrot.slane %v17885_v59, %v20124_v32  ;;  %v8640_v9 = vcombine.high %v8632_v18, %v8632_v18  ;;  %16732 = vperm.xlu1 %18661, %v15337_v35   ;;  %v15174_v34 = vcombine.low %v25187_v29, %v25186_v0  ;;  %v25189_v41 = vld [vmem:[#allocation123_spill] sm:$0xff]  ;;  %v25191_v59 = vld [vmem:[#allocation154_spill] sm:$0xff]  ;;  %v25193_v35 = vld [vmem:[#allocation32_spill] sm:$0xff] }
 0x63b   : > { %v13524_v11 = vcombine.low %v13516_v30, %v13523_v53  ;;  %v13761_v14 = vrot.slane %v13753_v63, %v20124_v32  ;;  %v13768_v47 = vrot.slane %v13754_v62, %v20124_v32  ;;  %v15175_v56 = vcombine.low %v25190_v15, %v25189_v41  ;;  %v23344_v62 = vpop.permute.xlu1 %16564  ;;  %v25195_v15 = vld [vmem:[#allocation158_spill] sm:$0xff] }
 0x63c   : > { %25184 = vst [vmem:[#allocation29_spill] sm:$0xff] %v23321_v19  ;;  %25185 = vst [vmem:[#allocation253_spill] sm:$0xff] %v23324_v3  ;;  %v8641_v33 = vcombine.high %v8639_v13, %v8639_v13  ;;  %v16820_v37 = vadd.s32 4294967272, %v23188_v6  ;;  %v13851_v40 = vcombine.low %v25192_v31, %v25191_v59  ;;  %v13852_v19 = vcombine.low %v25194_v12, %v25193_v35  ;;  %v25196_v59 = vld [vmem:[#allocation13_spill] sm:$0xff]  ;;  %v25210_v3 = vld [vmem:[#allocation12_spill] sm:$0xff] }
 0x63d   : > { %v23340_v0 = vrot.slane %v8632_v18, %v20124_v32  ;;  %16621 = vperm.xlu0 %18660, %v13524_v11   ;;  %v13769_v53 = vcombine.low %v13761_v14, %v13768_v47  ;;  %v15182_v63 = vrot.slane %v15174_v34, %v20124_v32  ;;  %v15189_v30 = vrot.slane %v15175_v56, %v20124_v32  ;;  %v25199_v14 = vld [vmem:[#allocation93_spill] sm:$0xff] }
 0x63e   : > { %v8662_v29 = vrot.slane %v8640_v9, %v20124_v32  ;;  %v13859_v41 = vrot.slane %v13851_v40, %v20124_v32  ;;  %v13866_v31 = vrot.slane %v13852_v19, %v20124_v32  ;;  %v13606_v12 = vcombine.low %v25196_v59, %v25195_v15  ;;  %v25200_v47 = vld [vmem:[#allocation157_spill] sm:$0xff]  ;;  %v23364_v15 = vpop.permute.xlu0 %16555  ;;  %v25204_v59 = vld [vmem:[#allocation198_spill] sm:$0xff] }
 0x63f   : > { %v23352_v18 = vrot.slane %v14801_v57, %v20124_v32  ;;  %v23355_v11 = vrot.slane %v17886_v44, %v20124_v32  ;;  %16636 = vperm.xlu1 %18661, %v13769_v53   ;;  %v15190_v34 = vcombine.low %v15182_v63, %v15189_v30  ;;  %v13607_v56 = vcombine.low %v25200_v47, %v25199_v14  ;;  %v25202_v53 = vld [vmem:[#allocation196_spill] sm:$0xff]  ;;  %v25203_v63 = vld [vmem:[#allocation197_spill] sm:$0xff]  ;;  %v25205_v14 = vld [vmem:[#allocation199_spill] sm:$0xff] }
 0x640   : > { %v8655_v9 = vrot.slane %v8639_v13, %v20124_v32  ;;  %v8669_v40 = vrot.slane %v8641_v33, %v20124_v32  ;;  %v23362_v19 = vsub.s32 %v16820_v37, %v25151_v1  ;;  %v13867_v35 = vcombine.low %v13859_v41, %v13866_v31  ;;  %25201 = vst [vmem:[#allocation88_spill] sm:$0xff] %v23364_v15  ;;  %v25206_v41 = vld [vmem:[#allocation36_spill] sm:$0xff]  ;;  %v25209_v15 = vld [vmem:[#allocation162_spill] sm:$0xff] }
 0x641   : > { %25197 = vst [vmem:[#allocation86_spill] sm:$0xff] %v23352_v18  ;;  %25198 = vst [vmem:[#allocation83_spill] sm:$0xff] %v23355_v11  ;;  %16723 = vperm.xlu0 %18660, %v15190_v34   ;;  %v13614_v57 = vrot.slane %v13606_v12, %v20124_v32  ;;  %v13621_v44 = vrot.slane %v13607_v56, %v20124_v32  ;;  %v13949_v30 = vcombine.low %v25203_v63, %v25202_v53  ;;  %v25207_v31 = vld [vmem:[#allocation64_spill] sm:$0xff] }
 0x642   : > { %v13950_v47 = vcombine.low %v25205_v14, %v25204_v59  ;;  %v14897_v13 = vcombine.low %v23340_v0, %v8662_v29  ;;  %v17889_v33 = vcombine.high %v23340_v0, %v8662_v29  ;;  %v23376_v37 = vsub.s32 %v23188_v6, %v25151_v1  ;;  %v25208_v63 = vld [vmem:[#allocation164_spill] sm:$0xff]  ;;  %v23384_v14 = vpop.permute.xlu1 %16474  ;;  %v23400_v11 = vpop.permute.xlu0 %16465 }
 0x643   : > { %v15272_v34 = vcombine.low %v25207_v31, %v25206_v41  ;;  %16642 = vperm.xlu1 %18661, %v13867_v35   ;;  %v13622_v12 = vcombine.low %v13614_v57, %v13621_v44  ;;  %v13957_v56 = vrot.slane %v13949_v30, %v20124_v32  ;;  %v15273_v59 = vcombine.low %v25209_v15, %v25208_v63  ;;  %v25211_v41 = vld [vmem:[#allocation172_spill] sm:$0xff] }
 0x644   : > { %v13964_v53 = vrot.slane %v13950_v47, %v20124_v32  ;;  %v14899_v58 = vcombine.low %v8655_v9, %v8669_v40  ;;  %v14047_v35 = vcombine.low %v25211_v41, %v25210_v3  ;;  %v25212_v47 = vld [vmem:[#allocation209_spill] sm:$0xff]  ;;  %v25213_v15 = vld [vmem:[#allocation72_spill] sm:$0xff]  ;;  %v17890_v63 = vcombine.high %v8655_v9, %v8669_v40  ;;  %v25217_v41 = vld [vmem:[#allocation10_spill] sm:$0xff] }
 0x645   : > { %16627 = vperm.xlu0 %18660, %v13622_v12   ;;  %v15280_v44 = vrot.slane %v15272_v34, %v20124_v32  ;;  %v15287_v30 = vrot.slane %v15273_v59, %v20124_v32  ;;  %v14048_v31 = vcombine.low %v25213_v15, %v25212_v47  ;;  %v16805_v18 = vrot.slane %v22866_v20, %v23376_v37  ;;  %v25214_v34 = vld [vmem:[#allocation147_spill] sm:$0xff]  ;;  %v25216_v59 = vld [vmem:[#allocation149_spill] sm:$0xff] }
 0x646   : > { %v13965_v57 = vcombine.low %v13957_v56, %v13964_v53  ;;  %v16813_v0 = vadd.s32 4294967280, %v23188_v6  ;;  %v14055_v29 = vrot.slane %v14047_v35, %v20124_v32  ;;  %v25215_v56 = vld [vmem:[#allocation148_spill] sm:$0xff]  ;;  %v15420_v47 = vcombine.low %v25217_v41, %v25216_v59  ;;  %v25220_v15 = vld [vmem:[#allocation177_spill] sm:$0xff] }
 0x647   : > { %v15288_v3 = vcombine.low %v15280_v44, %v15287_v30  ;;  %v14062_v12 = vrot.slane %v14048_v31, %v20124_v32  ;;  %v15419_v53 = vcombine.low %v25215_v56, %v25214_v34  ;;  %v23408_v9 = vrot.slane %v14897_v13, %v20124_v32  ;;  %v25219_v30 = vld [vmem:[#allocation176_spill] sm:$0xff]  ;;  %v23417_v34 = vpop.permute.xlu1 %16570 }
 0x648   : > { %16648 = vperm.xlu1 %18661, %v13965_v57   ;;  %v16834_v20 = vadd.s32 4294967256, %v23188_v6  ;;  %v16993_v40 = vrot.slane %v22894_v49, %v23376_v37  ;;  %v15434_v44 = vrot.slane %v15420_v47, %v20124_v32  ;;  %v15713_v31 = vcombine.low %v25220_v15, %v25219_v30  ;;  %v25223_v49 = vld [vmem:[#allocation178_spill] sm:$0xff]  ;;  %v25227_v47 = vld [vmem:[#allocation133_spill] sm:$0xff] }
 0x649   : > { %25218 = vst [vmem:[#allocation258_spill] sm:$0xff] %v23408_v9  ;;  %16729 = vperm.xlu0 %18660, %v15288_v3   ;;  %v14063_v35 = vcombine.low %v14055_v29, %v14062_v12  ;;  %v15427_v57 = vrot.slane %v15419_v53, %v20124_v32  ;;  %v23420_v13 = vrot.slane %v17889_v33, %v20124_v32  ;;  %v25224_v29 = vld [vmem:[#allocation35_spill] sm:$0xff]  ;;  %v25228_v30 = vld [vmem:[#allocation134_spill] sm:$0xff] }
 0x64a   : > { %v23423_v56 = vrot.slane %v14899_v58, %v20124_v32  ;;  %v23426_v59 = vsub.s32 %v16813_v0, %v25151_v1  ;;  %v15714_v3 = vcombine.low %v25224_v29, %v25223_v49  ;;  %v23431_v12 = vrot.slane %v17890_v63, %v20124_v32  ;;  %v25229_v29 = vld [vmem:[#allocation15_spill] sm:$0xff]  ;;  %v25230_v63 = vld [vmem:[#allocation98_spill] sm:$0xff] }
 0x64b   : > { %25221 = vst [vmem:[#allocation257_spill] sm:$0xff] %v23420_v13  ;;  %v25226_v53 = vrot.slane %v22780_v55, %v23246_v16  ;;  %v15435_v33 = vcombine.low %v15427_v57, %v15434_v44  ;;  %v13704_v58 = vcombine.low %v25228_v30, %v25227_v47  ;;  %v23440_v15 = vsub.s32 %v16834_v20, %v25151_v1  ;;  %v23446_v13 = vpop.permute.xlu0 %16561  ;;  %v25232_v57 = vld [vmem:[#allocation103_spill] sm:$0xff] }
 0x64c   : > { %25222 = vst [vmem:[#allocation259_spill] sm:$0xff] %v23423_v56  ;;  %25225 = vst [vmem:[#allocation49_spill] sm:$0xff] %v23431_v12  ;;  %16654 = vperm.xlu1 %18661, %v14063_v35   ;;  %v15721_v0 = vrot.slane %v15713_v31, %v20124_v32  ;;  %v15728_v49 = vrot.slane %v15714_v3, %v20124_v32  ;;  %v13705_v9 = vcombine.low %v25230_v63, %v25229_v29  ;;  %v25233_v20 = vld [vmem:[#allocation23_spill] sm:$0xff]  ;;  %v25237_v56 = vld [vmem:[#allocation140_spill] sm:$0xff] }
 0x64d   : > { %v16812_v41 = vsel %vm16811_vm4, %v25226_v53, %v16805_v18  ;;  %v25231_v55 = vrot.slane %v22819_v42, %v23246_v16  ;;  %v16848_v35 = vadd.s32 4294967240, %v23188_v6  ;;  %16738 = vperm.xlu0 %18660, %v15435_v33   ;;  %v14145_v44 = vcombine.low %v25233_v20, %v25232_v57  ;;  %v25234_v53 = vld [vmem:[#allocation17_spill] sm:$0xff]  ;;  %v25235_v31 = vld [vmem:[#allocation183_spill] sm:$0xff]  ;;  %v23466_v20 = vpop.permute.xlu1 %16480 }
 0x64e   : > { %v14146_v47 = vcombine.low %v25235_v31, %v25234_v53  ;;  %v16817_v3 = vrot.slane %v22928_v54, %v23426_v59  ;;  %v15729_v30 = vcombine.low %v15721_v0, %v15728_v49  ;;  %v13712_v29 = vrot.slane %v13704_v58, %v20124_v32  ;;  %v25238_v58 = vld [vmem:[#allocation142_spill] sm:$0xff]  ;;  %v25242_v53 = vld [vmem:[#allocation71_spill] sm:$0xff] }
 0x64f   : > { %v16998_v18 = vsel %vm16811_vm4, %v25231_v55, %v16993_v40  ;;  %v13719_v63 = vrot.slane %v13705_v9, %v20124_v32  ;;  %v16827_v42 = vadd.s32 4294967264, %v23188_v6  ;;  %v14153_v40 = vrot.slane %v14145_v44, %v20124_v32  ;;  %v25236_v55 = vld [vmem:[#allocation139_spill] sm:$0xff]  ;;  %v25239_v0 = vld [vmem:[#allocation66_spill] sm:$0xff]  ;;  %v23485_v12 = vpop.permute.xlu0 %16471 }
 0x650   : > { %v14160_v33 = vrot.slane %v14146_v47, %v20124_v32  ;;  %v15370_v57 = vcombine.low %v25237_v56, %v25236_v55  ;;  %16756 = vperm.xlu1 %18661, %v15729_v30   ;;  %v15371_v9 = vcombine.low %v25239_v0, %v25238_v58  ;;  %v23475_v44 = vsub.s32 %v16848_v35, %v25151_v1  ;;  %v25240_v30 = vld [vmem:[#allocation223_spill] sm:$0xff]  ;;  %v25243_v58 = vld [vmem:[#allocation222_spill] sm:$0xff] }
 0x651   : > { %v13720_v54 = vcombine.low %v13712_v29, %v13719_v63  ;;  %v17002_v56 = vrot.slane %v22953_v26, %v23426_v59  ;;  %v25241_v29 = vld [vmem:[#allocation220_spill] sm:$0xff]  ;;  %v15812_v0 = vcombine.low %v25243_v58, %v25242_v53  ;;  %v16819_v35 = vsel %vm16818_vm5, %v16817_v3, %v16812_v41  ;;  %v25244_v26 = vld [vmem:[#allocation63_spill] sm:$0xff]  ;;  %v23502_v8 = vpop.permute.xlu1 %16576 }
 0x652   : > { %v14161_v31 = vcombine.low %v14153_v40, %v14160_v33  ;;  %v15378_v47 = vrot.slane %v15370_v57, %v20124_v32  ;;  %v15385_v55 = vrot.slane %v15371_v9, %v20124_v32  ;;  %v15811_v63 = vcombine.low %v25241_v29, %v25240_v30  ;;  %v25245_v40 = vld [vmem:[#allocation175_spill] sm:$0xff]  ;;  %v25247_v29 = vld [vmem:[#allocation144_spill] sm:$0xff] }
 0x653   : > { %16633 = vperm.xlu0 %18660, %v13720_v54   ;;  %v23489_v49 = vsub.s32 %v16827_v42, %v25151_v1  ;;  %v13802_v33 = vcombine.low %v25245_v40, %v25244_v26  ;;  %v15826_v9 = vrot.slane %v15812_v0, %v20124_v32  ;;  %v25246_v30 = vld [vmem:[#allocation143_spill] sm:$0xff]  ;;  %v17003_v58 = vsel %vm16818_vm5, %v17002_v56, %v16998_v18  ;;  %v25248_v42 = vld [vmem:[#allocation226_spill] sm:$0xff]  ;;  %v25251_v0 = vld [vmem:[#allocation228_spill] sm:$0xff] }
 0x654   : > { %16660 = vperm.xlu1 %18661, %v14161_v31   ;;  %v15386_v57 = vcombine.low %v15378_v47, %v15385_v55  ;;  %v15819_v54 = vrot.slane %v15811_v63, %v20124_v32  ;;  %v13803_v53 = vcombine.low %v25247_v29, %v25246_v30  ;;  %v16862_v41 = vadd.s32 4294967224, %v23188_v6  ;;  %v25250_v63 = vld [vmem:[#allocation227_spill] sm:$0xff]  ;;  %v25253_v40 = vld [vmem:[#allocation185_spill] sm:$0xff]  ;;  %v25254_v30 = vld [vmem:[#allocation68_spill] sm:$0xff] }
 0x655   : > { %v16841_v3 = vadd.s32 4294967248, %v23188_v6  ;;  %v14243_v2 = vcombine.low %v25249_v22, %v25248_v42  ;;  %v13810_v47 = vrot.slane %v13802_v33, %v20124_v32  ;;  %v14244_v26 = vcombine.low %v25251_v0, %v25250_v63  ;;  %v25255_v29 = vld [vmem:[#allocation186_spill] sm:$0xff]  ;;  %v23520_v63 = vpop.permute.xlu0 %16567 }
 0x656   : > { %v15827_v31 = vcombine.low %v15819_v54, %v15826_v9  ;;  %v13817_v55 = vrot.slane %v13803_v53, %v20124_v32  ;;  %v25252_v18 = vrot.slane %v22845_v17, %v23362_v19  ;;  %v16831_v22 = vrot.slane %v22992_v23, %v23489_v49  ;;  %v25256_v53 = vld [vmem:[#allocation40_spill] sm:$0xff] }
 0x657   : > { %16735 = vperm.xlu0 %18660, %v15386_v57   ;;  %v13900_v57 = vcombine.low %v25254_v30, %v25253_v40  ;;  %v14251_v33 = vrot.slane %v14243_v2, %v20124_v32  ;;  %v14258_v9 = vrot.slane %v14244_v26, %v20124_v32  ;;  %v13901_v42 = vcombine.low %v25256_v53, %v25255_v29  ;;  %v25260_v40 = vld [vmem:[#allocation232_spill] sm:$0xff] }
 0x658   : > { %v16826_v56 = vsel %vm16825_vm6, %v25252_v18, %v16819_v35  ;;  %16762 = vperm.xlu1 %18661, %v15827_v31   ;;  %v13818_v54 = vcombine.low %v13810_v47, %v13817_v55  ;;  %v23523_v17 = vsub.s32 %v16862_v41, %v25151_v1  ;;  %v17012_v23 = vrot.slane %v23013_v21, %v23489_v49  ;;  %v25257_v31 = vld [vmem:[#allocation76_spill] sm:$0xff]  ;;  %v25259_v18 = vld [vmem:[#allocation22_spill] sm:$0xff] }
 0x659   : > { %v23528_v35 = vsub.s32 %v16841_v3, %v25151_v1  ;;  %v25258_v47 = vld [vmem:[#allocation16_spill] sm:$0xff]  ;;  %v14259_v2 = vcombine.low %v14251_v33, %v14258_v9  ;;  %v13908_v0 = vrot.slane %v13900_v57, %v20124_v32  ;;  %v13915_v26 = vrot.slane %v13901_v42, %v20124_v32  ;;  %v23545_v33 = vpop.permute.xlu1 %16486  ;;  %v25262_v42 = vld [vmem:[#allocation70_spill] sm:$0xff] }
 0x65a   : > { %v15909_v55 = vcombine.low %v25258_v47, %v25257_v31  ;;  %v15910_v30 = vcombine.low %v25260_v40, %v25259_v18  ;;  %v16852_v41 = vrot.slane %v22973_v61, %v23475_v44  ;;  %v16833_v3 = vsel %vm16832_vm7, %v16831_v22, %v16826_v56  ;;  %v25263_v31 = vld [vmem:[#allocation159_spill] sm:$0xff]  ;;  %v25292_v61 = vld [vmem:[#allocation41_spill] sm:$0xff] }
 0x65b   : > { %16639 = vperm.xlu0 %18660, %v13818_v54   ;;  %v25261_v29 = vrot.slane %v22883_v24, %v23362_v19  ;;  %v13916_v57 = vcombine.low %v13908_v0, %v13915_v26  ;;  %v13998_v47 = vcombine.low %v25263_v31, %v25262_v42  ;;  %v25264_v22 = vld [vmem:[#allocation11_spill] sm:$0xff]  ;;  %v25265_v24 = vld [vmem:[#allocation161_spill] sm:$0xff]  ;;  %v25268_v0 = vld [vmem:[#allocation110_spill] sm:$0xff]  ;;  %v23562_v42 = vpop.permute.xlu0 %16477 }
 0x65c   : > { %16666 = vperm.xlu1 %18661, %v14259_v2   ;;  %v15917_v9 = vrot.slane %v15909_v55, %v20124_v32  ;;  %v15924_v53 = vrot.slane %v15910_v30, %v20124_v32  ;;  %v13999_v40 = vcombine.low %v25265_v24, %v25264_v22  ;;  %v16845_v55 = vrot.slane %v23055_v38, %v23528_v35  ;;  %v25269_v26 = vld [vmem:[#allocation42_spill] sm:$0xff] }
 0x65d   : > { %v17008_v54 = vsel %vm16825_vm6, %v25261_v29, %v17003_v58  ;;  %v25266_v58 = vld [vmem:[#allocation202_spill] sm:$0xff]  ;;  %v25267_v29 = vld [vmem:[#allocation200_spill] sm:$0xff]  ;;  %v14342_v30 = vcombine.low %v25269_v26, %v25268_v0  ;;  %v25274_v0 = vrot.slane %v22907_v28, %v23440_v15  ;;  %v17022_v28 = vrot.slane %v23081_v27, %v23528_v35 }
 0x65e   : > { %v17013_v56 = vsel %vm16832_vm7, %v17012_v23, %v17008_v54  ;;  %v14341_v21 = vcombine.low %v25267_v29, %v25266_v58  ;;  %v15925_v2 = vcombine.low %v15917_v9, %v15924_v53  ;;  %v14006_v54 = vrot.slane %v13998_v47, %v20124_v32  ;;  %v25271_v9 = vld [vmem:[#allocation67_spill] sm:$0xff]  ;;  %v25272_v24 = vld [vmem:[#allocation166_spill] sm:$0xff]  ;;  %v25273_v58 = vld [vmem:[#allocation165_spill] sm:$0xff] }
 0x65f   : > { %16645 = vperm.xlu0 %18660, %v13916_v57   ;;  %v14013_v31 = vrot.slane %v13999_v40, %v20124_v32  ;;  %v14356_v38 = vrot.slane %v14342_v30, %v20124_v32  ;;  %v25270_v57 = vld [vmem:[#allocation104_spill] sm:$0xff]  ;;  %v15665_v29 = vcombine.low %v25273_v58, %v25272_v24  ;;  %v16840_v26 = vsel %vm16839_vm8, %v25274_v0, %v16833_v3  ;;  %v25275_v40 = vld [vmem:[#allocation18_spill] sm:$0xff]  ;;  %v25279_v58 = vld [vmem:[#allocation205_spill] sm:$0xff] }
 0x660   : > { %16768 = vperm.xlu1 %18661, %v15925_v2   ;;  %v14349_v22 = vrot.slane %v14341_v21, %v20124_v32  ;;  %v15664_v53 = vcombine.low %v25271_v9, %v25270_v57  ;;  %v16876_v47 = vadd.s32 4294967208, %v23188_v6  ;;  %v25276_v2 = vld [vmem:[#allocation107_spill] sm:$0xff]  ;;  %v23581_v21 = vpop.permute.xlu1 %16582  ;;  %v16847_v30 = vsel %vm16846_vm9, %v16845_v55, %v16840_v26  ;;  %v25280_v26 = vld [vmem:[#allocation101_spill] sm:$0xff] }
 0x661   : > { %v14014_v23 = vcombine.low %v14006_v54, %v14013_v31  ;;  %v16007_v18 = vcombine.low %v25276_v2, %v25275_v40  ;;  %v25277_v57 = vrot.slane %v22941_v45, %v23440_v15  ;;  %v15679_v54 = vrot.slane %v15665_v29, %v20124_v32  ;;  %v25278_v31 = vld [vmem:[#allocation78_spill] sm:$0xff]  ;;  %v25281_v45 = vld [vmem:[#allocation21_spill] sm:$0xff]  ;;  %v25283_v2 = vld [vmem:[#allocation171_spill] sm:$0xff] }
 0x662   : > { %v14357_v24 = vcombine.low %v14349_v22, %v14356_v38  ;;  %v15672_v3 = vrot.slane %v15664_v53, %v20124_v32  ;;  %v16008_v0 = vcombine.low %v25279_v58, %v25278_v31  ;;  %v16855_v55 = vadd.s32 4294967232, %v23188_v6  ;;  %v25284_v29 = vld [vmem:[#allocation245_spill] sm:$0xff] }
 0x663   : > { %v17018_v9 = vsel %vm16839_vm8, %v25277_v57, %v17013_v56  ;;  %16651 = vperm.xlu0 %18660, %v14014_v23   ;;  %v14096_v40 = vcombine.low %v25281_v45, %v25280_v26  ;;  %v25282_v56 = vld [vmem:[#allocation170_spill] sm:$0xff]  ;;  %v14439_v27 = vcombine.low %v22778_v25, %v22783_v50  ;;  %v23601_v23 = vpop.permute.xlu0 %16573  ;;  %v16015_v38 = vrot.slane %v16007_v18, %v20124_v32  ;;  %v25285_v18 = vld [vmem:[#allocation211_spill] sm:$0xff]  ;;  %v25287_v45 = vld [vmem:[#allocation69_spill] sm:$0xff] }
 0x664   : > { %16672 = vperm.xlu1 %18661, %v14357_v24   ;;  %v14097_v57 = vcombine.low %v25283_v2, %v25282_v56  ;;  %v15680_v22 = vcombine.low %v15672_v3, %v15679_v54  ;;  %v16022_v53 = vrot.slane %v16008_v0, %v20124_v32  ;;  %v14440_v31 = vcombine.low %v25284_v29, %v22791_v52  ;;  %v25286_v54 = vld [vmem:[#allocation208_spill] sm:$0xff]  ;;  %v25288_v56 = vld [vmem:[#allocation210_spill] sm:$0xff]  ;;  %v23620_v2 = vpop.permute.xlu1 %16492 }
 0x665   : > { %v23608_v24 = vsub.s32 %v16876_v47, %v25151_v1  ;;  %v23611_v58 = vsel %vm16846_vm9, %v17022_v28, %v17018_v9  ;;  %v14104_v26 = vrot.slane %v14096_v40, %v20124_v32  ;;  %v15762_v0 = vcombine.low %v25286_v54, %v25285_v18 }
 0x666   : > { %v14111_v25 = vrot.slane %v14097_v57, %v20124_v32  ;;  %v16023_v50 = vcombine.low %v16015_v38, %v16022_v53  ;;  %v14454_v3 = vrot.slane %v14440_v31, %v20124_v32  ;;  %v15763_v52 = vcombine.low %v25288_v56, %v25287_v45  ;;  %v25289_v38 = vld [vmem:[#allocation214_spill] sm:$0xff]  ;;  %v25290_v53 = vld [vmem:[#allocation44_spill] sm:$0xff]  ;;  %v25295_v56 = vld [vmem:[#allocation215_spill] sm:$0xff] }
 0x667   : > { %16753 = vperm.xlu0 %18660, %v15680_v22   ;;  %v23626_v47 = vsel %vm16853_vm10, %v16852_v41, %v16847_v30  ;;  %v23629_v9 = vsub.s32 %v16855_v55, %v25151_v1  ;;  %v16914_v28 = vrot.slane %v23400_v11, %v23376_v37  ;;  %v14447_v40 = vrot.slane %v14439_v27, %v20124_v32  ;;  %v25291_v31 = vld [vmem:[#allocation250_spill] sm:$0xff]  ;;  %v25293_v55 = vld [vmem:[#allocation216_spill] sm:$0xff]  ;;  %v25294_v27 = vld [vmem:[#allocation213_spill] sm:$0xff] }
 0x668   : > { %16774 = vperm.xlu1 %18661, %v16023_v50   ;;  %v14112_v57 = vcombine.low %v14104_v26, %v14111_v25  ;;  %v15777_v22 = vrot.slane %v15763_v52, %v20124_v32  ;;  %v16105_v29 = vcombine.low %v25290_v53, %v25289_v38  ;;  %v16106_v18 = vcombine.low %v25292_v61, %v25291_v31  ;;  %v23647_v25 = vpop.permute.xlu0 %16483  ;;  %v25296_v52 = vld [vmem:[#allocation106_spill] sm:$0xff]  ;;  %v25297_v38 = vld [vmem:[#allocation20_spill] sm:$0xff]  ;;  %v25298_v53 = vld [vmem:[#allocation217_spill] sm:$0xff] }
 0x669   : > { %v16918_v41 = vrot.slane %v23311_v4, %v23246_v16  ;;  %v17076_v30 = vrot.slane %v23344_v62, %v23246_v16  ;;  %v16923_v11 = vrot.slane %v23485_v12, %v23426_v59  ;;  %v14195_v26 = vcombine.low %v25294_v27, %v25293_v55  ;;  %v25299_v55 = vld [vmem:[#allocation14_spill] sm:$0xff] }
 0x66a   : > { %v14455_v50 = vcombine.low %v14447_v40, %v14454_v3  ;;  %v15770_v54 = vrot.slane %v15762_v0, %v20124_v32  ;;  %v16120_v45 = vrot.slane %v16106_v18, %v20124_v32  ;;  %v14194_v4 = vcombine.low %v25296_v52, %v25295_v56  ;;  %v23664_v18 = vpop.permute.xlu1 %16588  ;;  %v25300_v27 = vld [vmem:[#allocation74_spill] sm:$0xff]  ;;  %v25301_v52 = vld [vmem:[#allocation221_spill] sm:$0xff] }
 0x66b   : > { %16657 = vperm.xlu0 %18660, %v14112_v57   ;;  %v16928_v62 = vrot.slane %v23384_v14, %v23362_v19  ;;  %v17072_v12 = vrot.slane %v23446_v13, %v23376_v37  ;;  %v14537_v31 = vcombine.low %v25298_v53, %v25297_v38  ;;  %v14538_v57 = vcombine.low %v22914_v43, %v22917_v10  ;;  %v25302_v10 = vld [vmem:[#allocation184_spill] sm:$0xff] }
 0x66c   : > { %v16919_v3 = vsel %vm16811_vm4, %v16918_v41, %v16914_v28  ;;  %16678 = vperm.xlu1 %18661, %v14455_v50   ;;  %v15778_v0 = vcombine.low %v15770_v54, %v15777_v22  ;;  %v16113_v40 = vrot.slane %v16105_v29, %v20124_v32  ;;  %v14209_v61 = vrot.slane %v14195_v26, %v20124_v32  ;;  %v25304_v50 = vld [vmem:[#allocation256_spill] sm:$0xff]  ;;  %v23683_v53 = vpop.permute.xlu0 %16579 }
 0x66d   : > { %v16924_v14 = vsel %vm16818_vm5, %v16923_v11, %v16919_v3  ;;  %v17081_v13 = vrot.slane %v23520_v63, %v23426_v59  ;;  %v15860_v56 = vcombine.low %v25300_v27, %v25299_v55  ;;  %v15861_v43 = vcombine.low %v25302_v10, %v25301_v52  ;;  %v25303_v63 = vld [vmem:[#allocation255_spill] sm:$0xff]  ;;  %v25305_v3 = vld [vmem:[#allocation37_spill] sm:$0xff]  ;;  %v25308_v55 = vld [vmem:[#allocation108_spill] sm:$0xff] }
 0x66e   : > { %v16121_v28 = vcombine.low %v16113_v40, %v16120_v45  ;;  %v14202_v22 = vrot.slane %v14194_v4, %v20124_v32  ;;  %v14552_v29 = vrot.slane %v14538_v57, %v20124_v32  ;;  %v16204_v41 = vcombine.low %v22964_v7, %v22968_v5  ;;  %v25306_v7 = vld [vmem:[#allocation187_spill] sm:$0xff]  ;;  %v23699_v10 = vpop.permute.xlu1 %16498 }
 0x66f   : > { %16759 = vperm.xlu0 %18660, %v15778_v0   ;;  %v17077_v11 = vsel %vm16811_vm4, %v17076_v30, %v17072_v12  ;;  %v14545_v26 = vrot.slane %v14537_v31, %v20124_v32  ;;  %v16203_v54 = vcombine.low %v25304_v50, %v25303_v63  ;;  %v16933_v38 = vrot.slane %v23562_v42, %v23489_v49  ;;  %v25314_v63 = vld [vmem:[#allocation194_spill] sm:$0xff] }
 0x670   : > { %16780 = vperm.xlu1 %18661, %v16121_v28   ;;  %v14210_v45 = vcombine.low %v14202_v22, %v14209_v61  ;;  %v15875_v4 = vrot.slane %v15861_v43, %v20124_v32  ;;  %v16929_v57 = vsel %vm16825_vm6, %v16928_v62, %v16924_v14  ;;  %v14293_v5 = vcombine.low %v25306_v7, %v25305_v3  ;;  %v25307_v61 = vld [vmem:[#allocation188_spill] sm:$0xff]  ;;  %v25312_v43 = vld [vmem:[#allocation50_spill] sm:$0xff]  ;;  %v25316_v3 = vld [vmem:[#allocation105_spill] sm:$0xff] }
 0x671   : > { %v17086_v30 = vrot.slane %v23417_v34, %v23362_v19  ;;  %v17082_v12 = vsel %vm16818_vm5, %v17081_v13, %v17077_v11  ;;  %v15868_v31 = vrot.slane %v15860_v56, %v20124_v32  ;;  %v16934_v42 = vsel %vm16832_vm7, %v16933_v38, %v16929_v57  ;;  %v25309_v62 = vld [vmem:[#allocation212_spill] sm:$0xff]  ;;  %v25311_v56 = vld [vmem:[#allocation75_spill] sm:$0xff] }
 0x672   : > { %v14553_v0 = vcombine.low %v14545_v26, %v14552_v29  ;;  %v16218_v40 = vrot.slane %v16204_v41, %v20124_v32  ;;  %v14292_v27 = vcombine.low %v25308_v55, %v25307_v61  ;;  %v25310_v14 = vld [vmem:[#allocation112_spill] sm:$0xff]  ;;  %v23702_v34 = vadd.s32 4294967192, %v23188_v6  ;;  %v25313_v26 = vld [vmem:[#allocation195_spill] sm:$0xff] }
 0x673   : > { %16663 = vperm.xlu0 %18660, %v14210_v45   ;;  %v16155_v52 = vcombine.low %v25310_v14, %v25309_v62  ;;  %v16211_v13 = vrot.slane %v16203_v54, %v20124_v32  ;;  %v16154_v28 = vcombine.low %v25312_v43, %v25311_v56  ;;  %v17091_v22 = vrot.slane %v23601_v23, %v23489_v49  ;;  %v25315_v57 = vld [vmem:[#allocation19_spill] sm:$0xff]  ;;  %v16490_v23 = vpop.permute.xlu0 %16489  ;;  %v25320_v62 = vld [vmem:[#allocation73_spill] sm:$0xff]  ;;  %v25321_v56 = vld [vmem:[#allocation48_spill] sm:$0xff] }
 0x674   : > { %16684 = vperm.xlu1 %18661, %v14553_v0   ;;  %v15876_v29 = vcombine.low %v15868_v31, %v15875_v4  ;;  %v14307_v41 = vrot.slane %v14293_v5, %v20124_v32  ;;  %v17087_v11 = vsel %vm16825_vm6, %v17086_v30, %v17082_v12  ;;  %v15959_v50 = vcombine.low %v25314_v63, %v25313_v26  ;;  %v25318_v61 = vld [vmem:[#allocation43_spill] sm:$0xff]  ;;  %v25322_v43 = vld [vmem:[#allocation233_spill] sm:$0xff] }
 0x675   : > { %v16938_v38 = vrot.slane %v23466_v20, %v23440_v15  ;;  %v16169_v54 = vrot.slane %v16155_v52, %v20124_v32  ;;  %v17092_v45 = vsel %vm16832_vm7, %v17091_v22, %v17087_v11  ;;  %v15958_v7 = vcombine.low %v25316_v3, %v25315_v57  ;;  %v25323_v22 = vld [vmem:[#allocation270_spill] sm:$0xff] }
 0x676   : > { %v16219_v4 = vcombine.low %v16211_v13, %v16218_v40  ;;  %v14300_v5 = vrot.slane %v14292_v27, %v20124_v32  ;;  %v14636_v30 = vcombine.low %v23026_v39, %v23029_v60  ;;  %v16943_v12 = vrot.slane %v23647_v25, %v23528_v35  ;;  %v25319_v25 = vld [vmem:[#allocation201_spill] sm:$0xff] }
 0x677   : > { %16765 = vperm.xlu0 %18660, %v15876_v29   ;;  %v25317_v20 = vrot.slane %v23007_v51, %v23475_v44  ;;  %v16162_v0 = vrot.slane %v16154_v28, %v20124_v32  ;;  %v14635_v40 = vcombine.low %v25318_v61, %v23022_v36  ;;  %v16939_v55 = vsel %vm16839_vm8, %v16938_v38, %v16934_v42  ;;  %v23739_v51 = vpop.permute.xlu1 %16594  ;;  %v25324_v29 = vld [vmem:[#allocation235_spill] sm:$0xff]  ;;  %v16586_v57 = vpop.permute.xlu0 %16585 }
 0x678   : > { %16786 = vperm.xlu1 %18661, %v16219_v4   ;;  %v14308_v27 = vcombine.low %v14300_v5, %v14307_v41  ;;  %v15973_v39 = vrot.slane %v15959_v50, %v20124_v32  ;;  %v16944_v60 = vsel %vm16846_vm9, %v16943_v12, %v16939_v55  ;;  %v14391_v14 = vcombine.low %v25320_v62, %v25319_v25  ;;  %v25325_v50 = vld [vmem:[#allocation239_spill] sm:$0xff]  ;;  %v25327_v4 = vld [vmem:[#allocation45_spill] sm:$0xff]  ;;  %v25328_v5 = vld [vmem:[#allocation234_spill] sm:$0xff] }
 0x679   : > { %v23729_v31 = vsel %vm16853_vm10, %v25317_v20, %v23611_v58  ;;  %v16869_v58 = vadd.s32 4294967216, %v23188_v6  ;;  %v17096_v52 = vrot.slane %v23502_v8, %v23440_v15  ;;  %v16170_v13 = vcombine.low %v16162_v0, %v16169_v54  ;;  %v25326_v38 = vld [vmem:[#allocation27_spill] sm:$0xff]  ;;  %v25329_v12 = vld [vmem:[#allocation237_spill] sm:$0xff] }
 0x67a   : > { %v15966_v36 = vrot.slane %v15958_v7, %v20124_v32  ;;  %v14650_v42 = vrot.slane %v14636_v30, %v20124_v32  ;;  %v14390_v28 = vcombine.low %v25322_v43, %v25321_v56  ;;  %v14734_v41 = vcombine.low %v25324_v29, %v25323_v22  ;;  %v25336_v22 = vld [vmem:[#allocation242_spill] sm:$0xff] }
 0x67b   : > { %16669 = vperm.xlu0 %18660, %v14308_v27   ;;  %v17101_v11 = vrot.slane %v23683_v53, %v23528_v35  ;;  %v16948_v26 = vrot.slane %v23545_v33, %v23475_v44  ;;  %v14643_v8 = vrot.slane %v14635_v40, %v20124_v32  ;;  %v17097_v63 = vsel %vm16839_vm8, %v17096_v52, %v17092_v45  ;;  %v25330_v33 = vld [vmem:[#allocation238_spill] sm:$0xff]  ;;  %v25331_v27 = vld [vmem:[#allocation83_spill] sm:$0xff]  ;;  %v23770_v62 = vpop.permute.xlu1 %16504 }
 0x67c   : > { %v16057_v54 = vcombine.low %v25326_v38, %v25325_v50  ;;  %16783 = vperm.xlu1 %18661, %v16170_v13   ;;  %v15974_v3 = vcombine.low %v15966_v36, %v15973_v39  ;;  %v14405_v7 = vrot.slane %v14391_v14, %v20124_v32  ;;  %v14733_v30 = vcombine.low %v25328_v5, %v25327_v4  ;;  %v25332_v39 = vld [vmem:[#allocation86_spill] sm:$0xff]  ;;  %v25333_v13 = vld [vmem:[#allocation253_spill] sm:$0xff]  ;;  %v25338_v38 = vld [vmem:[#allocation207_spill] sm:$0xff] }
 0x67d   : > { %v17102_v53 = vsel %vm16846_vm9, %v17101_v11, %v17097_v63  ;;  %v16056_v20 = vcombine.low %v25330_v33, %v25329_v12  ;;  %v16949_v0 = vsel %vm16853_vm10, %v16948_v26, %v16944_v60  ;;  %v16953_v45 = vrot.slane %v16490_v23, %v23629_v9  ;;  %v25334_v60 = vld [vmem:[#allocation29_spill] sm:$0xff]  ;;  %v25337_v50 = vld [vmem:[#allocation206_spill] sm:$0xff] }
 0x67e   : > { %v14651_v61 = vcombine.low %v14643_v8, %v14650_v42  ;;  %v14398_v40 = vrot.slane %v14390_v28, %v20124_v32  ;;  %v14748_v55 = vrot.slane %v14734_v41, %v20124_v32  ;;  %v14832_v25 = vcombine.low %v25332_v39, %v25331_v27  ;;  %v25335_v28 = vld [vmem:[#allocation24_spill] sm:$0xff]  ;;  %v16496_v8 = vpop.permute.xlu0 %16495  ;;  %v25342_v12 = vld [vmem:[#allocation258_spill] sm:$0xff]  ;;  %v25345_v39 = vld [vmem:[#allocation251_spill] sm:$0xff] }
 0x67f   : > { %16771 = vperm.xlu0 %18660, %v15974_v3   ;;  %v17106_v14 = vrot.slane %v23581_v21, %v23475_v44  ;;  %v16071_v52 = vrot.slane %v16057_v54, %v20124_v32  ;;  %v14831_v36 = vcombine.low %v25334_v60, %v25333_v13  ;;  %v16954_v23 = vsel %vm16860_vm11, %v16953_v45, %v16949_v0  ;;  %v25339_v3 = vld [vmem:[#allocation49_spill] sm:$0xff]  ;;  %v25348_v13 = vld [vmem:[#allocation52_spill] sm:$0xff] }
 0x680   : > { %v23779_v42 = vsub.s32 %v16869_v58, %v25151_v1  ;;  %16690 = vperm.xlu1 %18661, %v14651_v61   ;;  %v14406_v56 = vcombine.low %v14398_v40, %v14405_v7  ;;  %v14741_v43 = vrot.slane %v14733_v30, %v20124_v32  ;;  %v14489_v29 = vcombine.low %v25336_v22, %v25335_v28  ;;  %v25340_v7 = vld [vmem:[#allocation259_spill] sm:$0xff]  ;;  %v25341_v30 = vld [vmem:[#allocation257_spill] sm:$0xff]  ;;  %v23801_v61 = vpop.permute.xlu1 %16600 }
 0x681   : > { %v16958_v21 = vrot.slane %v23620_v2, %v23523_v17  ;;  %v16064_v41 = vrot.slane %v16056_v20, %v20124_v32  ;;  %v17107_v11 = vsel %vm16853_vm10, %v17106_v14, %v17102_v53  ;;  %v17111_v26 = vrot.slane %v16586_v57, %v23629_v9  ;;  %v25343_v20 = vld [vmem:[#allocation218_spill] sm:$0xff]  ;;  %v25344_v0 = vld [vmem:[#allocation109_spill] sm:$0xff]  ;;  %v25349_v28 = vld [vmem:[#allocation267_spill] sm:$0xff] }
 0x682   : > { %v14749_v58 = vcombine.low %v14741_v43, %v14748_v55  ;;  %v14846_v63 = vrot.slane %v14832_v25, %v20124_v32  ;;  %v14488_v54 = vcombine.low %v25338_v38, %v25337_v50  ;;  %v14930_v4 = vcombine.low %v25340_v7, %v25339_v3  ;;  %v25346_v25 = vld [vmem:[#allocation249_spill] sm:$0xff] }
 0x683   : > { %16675 = vperm.xlu0 %18660, %v14406_v56   ;;  %v16072_v5 = vcombine.low %v16064_v41, %v16071_v52  ;;  %v14839_v2 = vrot.slane %v14831_v36, %v20124_v32  ;;  %v14929_v33 = vcombine.low %v25342_v12, %v25341_v30  ;;  %v17112_v53 = vsel %vm16860_vm11, %v17111_v26, %v17107_v11  ;;  %v25347_v52 = vld [vmem:[#allocation254_spill] sm:$0xff]  ;;  %v25351_v41 = vld [vmem:[#allocation219_spill] sm:$0xff] }
 0x684   : > { %16696 = vperm.xlu1 %18661, %v14749_v58   ;;  %v14503_v57 = vrot.slane %v14489_v29, %v20124_v32  ;;  %v14587_v45 = vcombine.low %v25344_v0, %v25343_v20  ;;  %v16959_v40 = vsel %vm16867_vm12, %v16958_v21, %v16954_v23  ;;  %v16963_v55 = vrot.slane %v16496_v8, %v23779_v42  ;;  %v25350_v21 = vld [vmem:[#allocation80_spill] sm:$0xff]  ;;  %v25352_v58 = vld [vmem:[#allocation225_spill] sm:$0xff]  ;;  %v23831_v12 = vpop.permute.xlu1 %16510 }
 0x685   : > { %v17116_v27 = vrot.slane %v23664_v18, %v23523_v17  ;;  %v14586_v14 = vcombine.low %v25346_v25, %v25345_v39  ;;  %v16253_v60 = vcombine.low %v25348_v13, %v25347_v52  ;;  %v14847_v36 = vcombine.low %v14839_v2, %v14846_v63  ;;  %v25353_v63 = vld [vmem:[#allocation46_spill] sm:$0xff]  ;;  %v25356_v2 = vld [vmem:[#allocation77_spill] sm:$0xff]  ;;  %v25360_v52 = vld [vmem:[#allocation31_spill] sm:$0xff] }
 0x686   : > { %v14496_v56 = vrot.slane %v14488_v54, %v20124_v32  ;;  %v14944_v43 = vrot.slane %v14930_v4, %v20124_v32  ;;  %v16964_v23 = vsel %vm16874_vm13, %v16963_v55, %v16959_v40  ;;  %v16859_v22 = vrot.slane %v25349_v28, %v23629_v9  ;;  %v25354_v54 = vld [vmem:[#allocation236_spill] sm:$0xff]  ;;  %v25363_v28 = vld [vmem:[#allocation230_spill] sm:$0xff] }
 0x687   : > { %16777 = vperm.xlu0 %18660, %v16072_v5   ;;  %v16968_v18 = vrot.slane %v23699_v10, %v23608_v24  ;;  %v14937_v29 = vrot.slane %v14929_v33, %v20124_v32  ;;  %v16252_v11 = vcombine.low %v25351_v41, %v25350_v21  ;;  %v14601_v8 = vrot.slane %v14587_v45, %v20124_v32  ;;  %v25355_v5 = vld [vmem:[#allocation224_spill] sm:$0xff]  ;;  %v25357_v33 = vld [vmem:[#allocation229_spill] sm:$0xff] }
 0x688   : > { %16702 = vperm.xlu1 %18661, %v14847_v36   ;;  %v14504_v26 = vcombine.low %v14496_v56, %v14503_v57  ;;  %v14685_v50 = vcombine.low %v25353_v63, %v25352_v58  ;;  %v17117_v38 = vsel %vm16867_vm12, %v17116_v27, %v17112_v53  ;;  %v17032_v3 = vrot.slane %v25354_v54, %v23629_v9  ;;  %v25358_v57 = vld [vmem:[#allocation25_spill] sm:$0xff]  ;;  %v25362_v36 = vld [vmem:[#allocation266_spill] sm:$0xff] }
 0x689   : > { %v14594_v10 = vrot.slane %v14586_v14, %v20124_v32  ;;  %v16267_v7 = vrot.slane %v16253_v60, %v20124_v32  ;;  %v14945_v4 = vcombine.low %v14937_v29, %v14944_v43  ;;  %v14684_v30 = vcombine.low %v25356_v2, %v25355_v5  ;;  %v16592_v0 = vpop.permute.xlu0 %16591  ;;  %v25359_v14 = vld [vmem:[#allocation111_spill] sm:$0xff]  ;;  %v25368_v54 = vld [vmem:[#allocation113_spill] sm:$0xff] }
 0x68a   : > { %v16302_v20 = vcombine.low %v25358_v57, %v25357_v33  ;;  %v16969_v53 = vsel %vm16881_vm14, %v16968_v18, %v16964_v23  ;;  %v16883_v45 = vadd.s32 4294967200, %v23188_v6  ;;  %v17126_v40 = vrot.slane %v23739_v51, %v23608_v24  ;;  %v25361_v60 = vld [vmem:[#allocation115_spill] sm:$0xff]  ;;  %v25370_v33 = vld [vmem:[#allocation244_spill] sm:$0xff] }
 0x68b   : > { %16681 = vperm.xlu0 %18660, %v14504_v26   ;;  %v16260_v55 = vrot.slane %v16252_v11, %v20124_v32  ;;  %v17121_v27 = vrot.slane %v16592_v0, %v23779_v42  ;;  %v14602_v39 = vcombine.low %v14594_v10, %v14601_v8  ;;  %v14699_v25 = vrot.slane %v14685_v50, %v20124_v32  ;;  %v25364_v18 = vld [vmem:[#allocation231_spill] sm:$0xff]  ;;  %v25365_v11 = vld [vmem:[#allocation262_spill] sm:$0xff]  ;;  %v25366_v26 = vld [vmem:[#allocation260_spill] sm:$0xff]  ;;  %v23869_v2 = vpop.permute.xlu1 %16606 }
 0x68c   : > { %16708 = vperm.xlu1 %18661, %v14945_v4   ;;  %v16301_v13 = vcombine.low %v25360_v52, %v25359_v14  ;;  %v14783_v56 = vcombine.low %v25362_v36, %v25361_v60  ;;  %v23848_v43 = vsub.s32 %v23702_v34, %v25151_v1  ;;  %v14782_v29 = vcombine.low %v25364_v18, %v25363_v28  ;;  %v25373_v0 = vld [vmem:[#allocation114_spill] sm:$0xff]  ;;  %v25376_v60 = vld [vmem:[#allocation117_spill] sm:$0xff]  ;;  %v25377_v36 = vld [vmem:[#allocation247_spill] sm:$0xff] }
 0x68d   : > { %v16268_v23 = vcombine.low %v16260_v55, %v16267_v7  ;;  %v17122_v51 = vsel %vm16874_vm13, %v17121_v27, %v17117_v38  ;;  %v14692_v21 = vrot.slane %v14684_v30, %v20124_v32  ;;  %v16316_v41 = vrot.slane %v16302_v20, %v20124_v32  ;;  %v25367_v38 = vld [vmem:[#allocation261_spill] sm:$0xff]  ;;  %v25369_v30 = vld [vmem:[#allocation84_spill] sm:$0xff] }
 0x68e   : > { %v16351_v8 = vcombine.low %v25366_v26, %v25365_v11  ;;  %v17127_v58 = vsel %vm16881_vm14, %v17126_v40, %v17122_v51  ;;  %v16861_v34 = vsel %vm16860_vm11, %v16859_v22, %v23626_v47  ;;  %v17033_v63 = vsel %vm16860_vm11, %v17032_v3, %v23729_v31  ;;  %v25371_v22 = vld [vmem:[#allocation243_spill] sm:$0xff]  ;;  %v25372_v20 = vld [vmem:[#allocation240_spill] sm:$0xff]  ;;  %v25378_v18 = vld [vmem:[#allocation97_spill] sm:$0xff] }
 0x68f   : > { %16687 = vperm.xlu0 %18660, %v14602_v39   ;;  %v23863_v50 = vsub.s32 %v16883_v45, %v25151_v1  ;;  %v16350_v10 = vcombine.low %v25368_v54, %v25367_v38  ;;  %v14700_v7 = vcombine.low %v14692_v21, %v14699_v25  ;;  %v16309_v4 = vrot.slane %v16301_v13, %v20124_v32  ;;  %v25374_v39 = vld [vmem:[#allocation26_spill] sm:$0xff]  ;;  %v25375_v25 = vld [vmem:[#allocation47_spill] sm:$0xff] }
 0x690   : > { %16789 = vperm.xlu1 %18661, %v16268_v23   ;;  %v14797_v5 = vrot.slane %v14783_v56, %v20124_v32  ;;  %v14881_v47 = vcombine.low %v25370_v33, %v25369_v30  ;;  %v16873_v31 = vrot.slane %v25371_v22, %v23779_v42  ;;  %v14790_v3 = vrot.slane %v14782_v29, %v20124_v32  ;;  %v25379_v29 = vld [vmem:[#allocation181_spill] sm:$0xff] }
 0x691   : > { %v16502_v57 = vpop.permute.xlu0 %16501  ;;  %v14880_v45 = vcombine.low %v25373_v0, %v25372_v20  ;;  %v16317_v40 = vcombine.low %v16309_v4, %v16316_v41  ;;  %v16365_v55 = vrot.slane %v16351_v8, %v20124_v32  ;;  %v16400_v14 = vcombine.low %v25375_v25, %v25374_v39  ;;  %v25382_v4 = vld [vmem:[#allocation182_spill] sm:$0xff] }
 0x692   : > { %v16973_v27 = vrot.slane %v16502_v57, %v23863_v50  ;;  %v16978_v52 = vrot.slane %v23770_v62, %v23848_v43  ;;  %v16358_v13 = vrot.slane %v16350_v10, %v20124_v32  ;;  %v16399_v56 = vcombine.low %v25377_v36, %v25376_v60  ;;  %v25381_v62 = vld [vmem:[#allocation273_spill] sm:$0xff]  ;;  %v25390_v36 = vld [vmem:[#allocation82_spill] sm:$0xff] }
 0x693   : > { %16693 = vperm.xlu0 %18660, %v14700_v7   ;;  %v14798_v23 = vcombine.low %v14790_v3, %v14797_v5  ;;  %v14895_v28 = vrot.slane %v14881_v47, %v20124_v32  ;;  %v15469_v21 = vcombine.low %v25379_v29, %v25378_v18  ;;  %v25380_v41 = vrot.slane %v23034_v48, %v23523_v17  ;;  %v23900_v10 = vpop.permute.xlu1 %16612  ;;  %v25383_v5 = vld [vmem:[#allocation179_spill] sm:$0xff] }
 0x694   : > { %16792 = vperm.xlu1 %18661, %v16317_v40   ;;  %v16974_v51 = vsel %vm16888_vm15, %v16973_v27, %v16969_v53  ;;  %v17042_v26 = vrot.slane %v25381_v62, %v23779_v42  ;;  %v16897_v8 = vadd.s32 4294967184, %v23188_v6  ;;  %v16366_v54 = vcombine.low %v16358_v13, %v16365_v55  ;;  %v25386_v40 = vld [vmem:[#allocation99_spill] sm:$0xff]  ;;  %v25389_v13 = vld [vmem:[#allocation193_spill] sm:$0xff] }
 0x695   : > { %v16868_v11 = vsel %vm16867_vm12, %v25380_v41, %v16861_v34  ;;  %v16979_v38 = vsel %vm16895_vm0, %v16978_v52, %v16974_v51  ;;  %v14888_v53 = vrot.slane %v14880_v45, %v20124_v32  ;;  %v16414_v7 = vrot.slane %v16400_v14, %v20124_v32  ;;  %v25385_v45 = vld [vmem:[#allocation160_spill] sm:$0xff]  ;;  %v25393_v29 = vld [vmem:[#allocation167_spill] sm:$0xff] }
 0x696   : > { %v15468_v48 = vcombine.low %v25383_v5, %v25382_v4  ;;  %v16875_v34 = vsel %vm16874_vm13, %v16873_v31, %v16868_v11  ;;  %v16904_v30 = vadd.s32 4294967176, %v23188_v6  ;;  %v25384_v33 = vrot.slane %v23066_v46, %v23523_v17  ;;  %v25387_v6 = vld [vmem:[#allocation246_spill] sm:$0xff]  ;;  %v25388_v52 = vld [vmem:[#allocation192_spill] sm:$0xff] }
 0x697   : > { %16699 = vperm.xlu0 %18660, %v14798_v23   ;;  %v16407_v22 = vrot.slane %v16399_v56, %v20124_v32  ;;  %v16598_v3 = vpop.permute.xlu0 %16597  ;;  %v14896_v57 = vcombine.low %v14888_v53, %v14895_v28  ;;  %v15483_v0 = vrot.slane %v15469_v21, %v20124_v32  ;;  %v15518_v55 = vcombine.low %v25386_v40, %v25385_v45  ;;  %v25391_v23 = vld [vmem:[#allocation79_spill] sm:$0xff]  ;;  %v25392_v28 = vld [vmem:[#allocation116_spill] sm:$0xff]  ;;  %v25394_v21 = vld [vmem:[#allocation33_spill] sm:$0xff] }
 0x698   : > { %v17038_v47 = vsel %vm16867_vm12, %v25384_v33, %v17033_v63  ;;  %16795 = vperm.xlu1 %18661, %v16366_v54   ;;  %v17131_v20 = vrot.slane %v16598_v3, %v23863_v50  ;;  %v16887_v27 = vrot.slane %v25387_v6, %v23863_v50  ;;  %v23920_v46 = vsub.s32 %v16897_v8, %v25151_v1  ;;  %v25396_v8 = vld [vmem:[#allocation190_spill] sm:$0xff]  ;;  %v25397_v54 = vld [vmem:[#allocation191_spill] sm:$0xff] }
 0x699   : > { %v17043_v31 = vsel %vm16874_vm13, %v17042_v26, %v17038_v47  ;;  %v17136_v63 = vrot.slane %v23801_v61, %v23848_v43  ;;  %v16415_v39 = vcombine.low %v16407_v22, %v16414_v7  ;;  %v15476_v14 = vrot.slane %v15468_v48, %v20124_v32  ;;  %v25398_v7 = vld [vmem:[#allocation241_spill] sm:$0xff]  ;;  %v25399_v22 = vld [vmem:[#allocation252_spill] sm:$0xff]  ;;  %v25401_v45 = vld [vmem:[#allocation155_spill] sm:$0xff] }
 0x69a   : > { %v17132_v25 = vsel %vm16888_vm15, %v17131_v20, %v17127_v58  ;;  %v15517_v60 = vcombine.low %v25389_v13, %v25388_v52  ;;  %v16880_v56 = vrot.slane %v25390_v36, %v23608_v24  ;;  %v17047_v51 = vrot.slane %v25391_v23, %v23608_v24  ;;  %v25405_v23 = vld [vmem:[#allocation39_spill] sm:$0xff] }
 0x69b   : > { %16705 = vperm.xlu0 %18660, %v14896_v57   ;;  %v17052_v18 = vrot.slane %v25392_v28, %v23863_v50  ;;  %v17137_v61 = vsel %vm16895_vm0, %v17136_v63, %v17132_v25  ;;  %v25395_v58 = vcombine.high %v25393_v29, %v25394_v21  ;;  %v15484_v11 = vcombine.low %v15476_v14, %v15483_v0  ;;  %v25400_v0 = vld [vmem:[#allocation102_spill] sm:$0xff] }
 0x69c   : > { %16798 = vperm.xlu1 %18661, %v16415_v39   ;;  %v15532_v26 = vrot.slane %v15518_v55, %v20124_v32  ;;  %v15567_v53 = vcombine.low %v25397_v54, %v25396_v8  ;;  %v16894_v4 = vrot.slane %v25398_v7, %v23848_v43  ;;  %v23947_v5 = vsub.s32 %v16904_v30, %v25151_v1  ;;  %v25402_v1 = vld [vmem:[#allocation88_spill] sm:$0xff]  ;;  %v25404_v14 = vld [vmem:[#allocation274_spill] sm:$0xff] }
 0x69d   : > { %v15614_v41 = vrot.slane %v25395_v58, %v20124_v32  ;;  %v23939_v62 = vpop.permute.xlu1 %16714  ;;  %v16882_v48 = vsel %vm16881_vm14, %v16880_v56, %v16875_v34  ;;  %v17048_v33 = vsel %vm16881_vm14, %v17047_v51, %v17043_v31  ;;  %v16901_v3 = vrot.slane %v25399_v22, %v23920_v46  ;;  %v25403_v39 = vld [vmem:[#allocation204_spill] sm:$0xff]  ;;  %v25406_v51 = vld [vmem:[#allocation203_spill] sm:$0xff] }
 0x69e   : > { %v16889_v47 = vsel %vm16888_vm15, %v16887_v27, %v16882_v48  ;;  %v16508_v57 = vpop.permute.xlu0 %16507  ;;  %v15525_v20 = vrot.slane %v15517_v60, %v20124_v32  ;;  %v15566_v40 = vcombine.low %v25401_v45, %v25400_v0  ;;  %v17053_v55 = vsel %vm16888_vm15, %v17052_v18, %v17048_v33  ;;  %v25407_v18 = vld [vmem:[#allocation81_spill] sm:$0xff]  ;;  %v25408_v54 = vld [vmem:[#allocation248_spill] sm:$0xff] }
 0x69f   : > { %16741 = vperm.xlu0 %18660, %v15484_v11   ;;  %v17062_v34 = vrot.slane %v25402_v1, %v23920_v46  ;;  %v16983_v30 = vrot.slane %v16508_v57, %v23920_v46  ;;  %v16988_v31 = vrot.slane %v23831_v12, %v23947_v5  ;;  %v15581_v63 = vrot.slane %v15567_v53, %v20124_v32 }
 0x6a0   : > { %v15533_v6 = vcombine.low %v15525_v20, %v15532_v26  ;;  %v15616_v25 = vcombine.low %v25403_v39, %v15614_v41  ;;  %v17057_v52 = vrot.slane %v25404_v14, %v23848_v43  ;;  %v16896_v13 = vsel %vm16895_vm0, %v16894_v4, %v16889_v47 }
 0x6a1   : > { %v16619_v27 = vpop.permute.xlu1 %16618  ;;  %v16984_v60 = vsel %vm16902_vm1, %v16983_v30, %v16979_v38  ;;  %v16903_v36 = vsel %vm16902_vm1, %v16901_v3, %v16896_v13  ;;  %v15574_v12 = vrot.slane %v15566_v40, %v20124_v32  ;;  %v15615_v28 = vcombine.low %v25406_v51, %v25405_v23 }
 0x6a2   : > { %v16989_v56 = vsel %vm16909_vm2, %v16988_v31, %v16984_v60  ;;  %v16908_v29 = vrot.slane %v25407_v18, %v23947_v5  ;;  %v17058_v21 = vsel %vm16895_vm0, %v17057_v52, %v17053_v55  ;;  %v15630_v8 = vrot.slane %v15616_v25, %v20124_v32 }
 0x6a3   : > { %16744 = vperm.xlu0 %18660, %v15533_v6   ;;  %v17063_v41 = vsel %vm16902_vm1, %v17062_v34, %v17058_v21  ;;  %v15582_v11 = vcombine.low %v15574_v12, %v15581_v63  ;;  %v17067_v53 = vrot.slane %v25408_v54, %v23947_v5  ;;  %v17146_v4 = vrot.slane %v23869_v2, %v23947_v5 }
 0x6a4   : > { %v16604_v58 = vpop.permute.xlu0 %16603  ;;  %v16910_v7 = vsel %vm16909_vm2, %v16908_v29, %v16903_v36  ;;  %v15623_v47 = vrot.slane %v15615_v28, %v20124_v32  ;;  %v17155_v20 = vrot.slane %v23900_v10, %v23246_v16  ;;  %v17165_v39 = vrot.slane %v16619_v27, %v23362_v19 }
 0x6a5   : > { %v17141_v38 = vrot.slane %v16604_v58, %v23920_v46  ;;  %v23979_v26 = vpop.permute.xlu1 %16720  ;;  %v17464_v48 = vcombine.low %v16910_v7, %v16989_v56  ;;  %v17068_v22 = vsel %vm16909_vm2, %v17067_v53, %v17063_v41 }
 0x6a6   : > { %v15631_v40 = vcombine.low %v15623_v47, %v15630_v8 }
 0x6a7   : > { %v17142_v33 = vsel %vm16902_vm1, %v17141_v38, %v17137_v61  ;;  %16747 = vperm.xlu0 %18660, %v15582_v11   ;;  %v23995_v2 = vrot.slane %v17464_v48, %v20124_v32 }
 0x6a8   : > { %v17147_v3 = vsel %vm16909_vm2, %v17146_v4, %v17142_v33  ;;  %v16610_v57 = vpop.permute.xlu0 %16609 }
 0x6a9   : > { %v17465_v0 = vcombine.low %v17068_v22, %v17147_v3  ;;  %v17151_v45 = vrot.slane %v16610_v57, %v23376_v37  ;;  %v16625_v55 = vpop.permute.xlu1 %16624  ;;  %25409 = vst [vmem:[#allocation28_spill] sm:$0xff] %v23995_v2 }
 0x6aa   : > { %v17175_v56 = vrot.slane %v16625_v55, %v23440_v15 }
 0x6ab   : > { %v23998_v61 = vrot.slane %v17465_v0, %v20124_v32  ;;  %v17156_v1 = vsel %vm16811_vm4, %v17155_v20, %v17151_v45  ;;  %16750 = vperm.xlu0 %18660, %v15631_v40  }
 0x6ac   : > { %v24001_v34 = vpop.permute.xlu0 %16711 }
 0x6ad   : > { %25410 = vst [vmem:[#allocation263_spill] sm:$0xff] %v23998_v61  ;;  %v24005_v10 = vpop.permute.xlu1 %16726 }
 0x6b0   : > { %v16616_v31 = vpop.permute.xlu0 %16615 }
 0x6b1   : > { %v17160_v6 = vrot.slane %v16616_v31, %v23426_v59  ;;  %v16631_v63 = vpop.permute.xlu1 %16630 }
 0x6b2   : > { %v17185_v21 = vrot.slane %v16631_v63, %v23475_v44 }
 0x6b3   : > { %v17161_v25 = vsel %vm16818_vm5, %v17160_v6, %v17156_v1 }
 0x6b4   : > { %v24010_v14 = vpop.permute.xlu0 %16717  ;;  %v17166_v52 = vsel %vm16825_vm6, %v17165_v39, %v17161_v25 }
 0x6b5   : > { %v24013_v13 = vpop.permute.xlu1 %16732 }
 0x6b8   : > { %v16622_v60 = vpop.permute.xlu0 %16621 }
 0x6b9   : > { %v17170_v36 = vrot.slane %v16622_v60, %v23489_v49 }
 0x6ba   : > { %v16637_v12 = vpop.permute.xlu1 %16636 }
 0x6bb   : > { %v17171_v23 = vsel %vm16832_vm7, %v17170_v36, %v17166_v52  ;;  %v17195_v48 = vrot.slane %v16637_v12, %v23523_v17 }
 0x6bc   : > { %v24018_v51 = vpop.permute.xlu0 %16723  ;;  %v17176_v27 = vsel %vm16839_vm8, %v17175_v56, %v17171_v23 }
 0x6be   : > { %v16643_v28 = vpop.permute.xlu1 %16642 }
 0x6bf   : > { %v17205_v45 = vrot.slane %v16643_v28, %v23608_v24 }
 0x6c0   : > { %v16628_v18 = vpop.permute.xlu0 %16627 }
 0x6c1   : > { %v17180_v29 = vrot.slane %v16628_v18, %v23528_v35 }
 0x6c3   : > { %v16649_v58 = vpop.permute.xlu1 %16648  ;;  %v17181_v41 = vsel %vm16846_vm9, %v17180_v29, %v17176_v27 }
 0x6c4   : > { %v24024_v38 = vpop.permute.xlu0 %16729  ;;  %v17186_v11 = vsel %vm16853_vm10, %v17185_v21, %v17181_v41  ;;  %v17215_v63 = vrot.slane %v16649_v58, %v23848_v43 }
 0x6c7   : > { %v16655_v8 = vpop.permute.xlu1 %16654 }
 0x6c8   : > { %v24027_v54 = vpop.permute.xlu0 %16738  ;;  %v17225_v12 = vrot.slane %v16655_v8, %v23947_v5 }
 0x6cb   : > { %v16757_v53 = vpop.permute.xlu1 %16756 }
 0x6ce   : > { %v16634_v7 = vpop.permute.xlu0 %16633 }
 0x6cf   : > { %v17190_v4 = vrot.slane %v16634_v7, %v23629_v9  ;;  %v16661_v33 = vpop.permute.xlu1 %16660 }
 0x6d1   : > { %v17191_v47 = vsel %vm16860_vm11, %v17190_v4, %v17186_v11 }
 0x6d2   : > { %v24032_v22 = vpop.permute.xlu0 %16735  ;;  %v17196_v3 = vsel %vm16867_vm12, %v17195_v48, %v17191_v47 }
 0x6d3   : > { %v24035_v57 = vpop.permute.xlu1 %16762 }
 0x6d6   : > { %v16640_v20 = vpop.permute.xlu0 %16639 }
 0x6d7   : > { %v17200_v0 = vrot.slane %v16640_v20, %v23779_v42  ;;  %v16667_v40 = vpop.permute.xlu1 %16666 }
 0x6d8   : > { %v17244_v61 = vrot.slane %v16667_v40, %v23362_v19  ;;  %v17402_v40 = vrot.slane %v24035_v57, %v23362_v19 }
 0x6d9   : > { %v17201_v55 = vsel %vm16874_vm13, %v17200_v0, %v17196_v3 }
 0x6da   : > { %v17206_v1 = vsel %vm16881_vm14, %v17205_v45, %v17201_v55  ;;  %v16646_v31 = vpop.permute.xlu0 %16645 }
 0x6db   : > { %v17210_v6 = vrot.slane %v16646_v31, %v23863_v50  ;;  %v24043_v39 = vpop.permute.xlu1 %16768 }
 0x6dc   : > { %v17412_v57 = vrot.slane %v24043_v39, %v23440_v15 }
 0x6dd   : > { %v17211_v25 = vsel %vm16888_vm15, %v17210_v6, %v17206_v1 }
 0x6de   : > { %v17216_v52 = vsel %vm16895_vm0, %v17215_v63, %v17211_v25  ;;  %v16652_v60 = vpop.permute.xlu0 %16651  ;;  %v17234_v25 = vrot.slane %v16661_v33, %v23246_v16 }
 0x6df   : > { %v17220_v36 = vrot.slane %v16652_v60, %v23920_v46  ;;  %v16673_v56 = vpop.permute.xlu1 %16672 }
 0x6e1   : > { %v17221_v23 = vsel %vm16902_vm1, %v17220_v36, %v17216_v52 }
 0x6e2   : > { %v24051_v27 = vsel %vm16909_vm2, %v17225_v12, %v17221_v23  ;;  %v16754_v28 = vpop.permute.xlu0 %16753 }
 0x6e3   : > { %v24053_v18 = vpop.permute.xlu1 %16774  ;;  %v17388_v60 = vrot.slane %v16754_v28, %v23376_v37 }
 0x6e6   : > { %v16658_v29 = vpop.permute.xlu0 %16657 }
 0x6e7   : > { %v16679_v21 = vpop.permute.xlu1 %16678  ;;  %v17230_v31 = vrot.slane %v16658_v29, %v23376_v37  ;;  %v17392_v29 = vrot.slane %v16757_v53, %v23246_v16 }
 0x6e9   : > { %v17235_v52 = vsel %vm16811_vm4, %v17234_v25, %v17230_v31  ;;  %v17393_v33 = vsel %vm16811_vm4, %v17392_v29, %v17388_v60 }
 0x6ea   : > { %v16760_v58 = vpop.permute.xlu0 %16759 }
 0x6eb   : > { %v24055_v41 = vpop.permute.xlu1 %16780  ;;  %v17397_v2 = vrot.slane %v16760_v58, %v23426_v59 }
 0x6ee   : > { %v16664_v11 = vpop.permute.xlu0 %16663 }
 0x6ef   : > { %v16685_v7 = vpop.permute.xlu1 %16684  ;;  %v17239_v6 = vrot.slane %v16664_v11, %v23426_v59 }
 0x6f0   : > { %v17274_v29 = vrot.slane %v16685_v7, %v23523_v17  ;;  %v17318_v7 = vrot.slane %v24001_v34, %v23426_v59 }
 0x6f1   : > { %v17240_v36 = vsel %vm16818_vm5, %v17239_v6, %v17235_v52  ;;  %v17254_v6 = vrot.slane %v16673_v56, %v23440_v15  ;;  %v17264_v56 = vrot.slane %v16679_v21, %v23475_v44 }
 0x6f2   : > { %v16766_v4 = vpop.permute.xlu0 %16765  ;;  %v17245_v11 = vsel %vm16825_vm6, %v17244_v61, %v17240_v36 }
 0x6f3   : > { %v24057_v48 = vpop.permute.xlu1 %16786  ;;  %v17407_v52 = vrot.slane %v16766_v4, %v23489_v49 }
 0x6f6   : > { %v16670_v47 = vpop.permute.xlu0 %16669 }
 0x6f7   : > { %v24059_v8 = vpop.permute.xlu1 %16783  ;;  %v17249_v12 = vrot.slane %v16670_v47, %v23489_v49  ;;  %v17398_v47 = vsel %vm16818_vm5, %v17397_v2, %v17393_v33 }
 0x6f8   : > { %v17403_v53 = vsel %vm16825_vm6, %v17402_v40, %v17398_v47  ;;  %v17422_v47 = vrot.slane %v24053_v18, %v23475_v44  ;;  %v17333_v18 = vrot.slane %v23979_v26, %v23440_v15  ;;  %v17348_v15 = vrot.slane %v24024_v38, %v23629_v9 }
 0x6f9   : > { %v17250_v31 = vsel %vm16832_vm7, %v17249_v12, %v17245_v11  ;;  %v17408_v2 = vsel %vm16832_vm7, %v17407_v52, %v17403_v53  ;;  %v17328_v52 = vrot.slane %v24010_v14, %v23489_v49  ;;  %v17338_v14 = vrot.slane %v24018_v51, %v23528_v35 }
 0x6fa   : > { %v16772_v3 = vpop.permute.xlu0 %16771  ;;  %v17255_v61 = vsel %vm16839_vm8, %v17254_v6, %v17250_v31  ;;  %v17413_v11 = vsel %vm16839_vm8, %v17412_v57, %v17408_v2  ;;  %v17353_v2 = vrot.slane %v24013_v13, %v23523_v17  ;;  %v17363_v38 = vrot.slane %v24027_v54, %v23608_v24 }
 0x6fb   : > { %v24061_v20 = vpop.permute.xlu1 %16690  ;;  %v17417_v4 = vrot.slane %v16772_v3, %v23528_v35  ;;  %v17442_v57 = vrot.slane %v24057_v48, %v23608_v24 }
 0x6fe   : > { %v16676_v0 = vpop.permute.xlu0 %16675 }
 0x6ff   : > { %v24063_v45 = vpop.permute.xlu1 %16696  ;;  %v17259_v28 = vrot.slane %v16676_v0, %v23528_v35 }
 0x701   : > { %v17260_v60 = vsel %vm16846_vm9, %v17259_v28, %v17255_v61  ;;  %v17418_v28 = vsel %vm16846_vm9, %v17417_v4, %v17413_v11  ;;  %v17432_v61 = vrot.slane %v24055_v41, %v23523_v17 }
 0x702   : > { %v16778_v55 = vpop.permute.xlu0 %16777  ;;  %v17265_v12 = vsel %vm16853_vm10, %v17264_v56, %v17260_v60  ;;  %v17343_v60 = vrot.slane %v24005_v10, %v23475_v44  ;;  %v17437_v44 = vrot.slane %v24059_v8, %v23779_v42 }
 0x703   : > { %v24065_v1 = vpop.permute.xlu1 %16702  ;;  %v17427_v3 = vrot.slane %v16778_v55, %v23629_v9 }
 0x706   : > { %v16682_v63 = vpop.permute.xlu0 %16681 }
 0x707   : > { %v16709_v23 = vpop.permute.xlu1 %16708  ;;  %v17269_v0 = vrot.slane %v16682_v63, %v23629_v9  ;;  %v17294_v9 = vrot.slane %v24063_v45, %v23848_v43 }
 0x708   : > { %v17313_v6 = vrot.slane %v16709_v23, %v23246_v16  ;;  %v17423_v16 = vsel %vm16853_vm10, %v17422_v47, %v17418_v28 }
 0x709   : > { %v17270_v33 = vsel %vm16860_vm11, %v17269_v0, %v17265_v12  ;;  %v17428_v49 = vsel %vm16860_vm11, %v17427_v3, %v17423_v16 }
 0x70a   : > { %v16688_v30 = vpop.permute.xlu0 %16687  ;;  %v17275_v40 = vsel %vm16867_vm12, %v17274_v29, %v17270_v33  ;;  %v17433_v0 = vsel %vm16867_vm12, %v17432_v61, %v17428_v49 }
 0x70b   : > { %v24086_v58 = vpop.permute.xlu1 %16789  ;;  %v17279_v63 = vrot.slane %v16688_v30, %v23779_v42  ;;  %v17323_v30 = vrot.slane %v23939_v62, %v23362_v19  ;;  %v17284_v19 = vrot.slane %v24061_v20, %v23608_v24  ;;  %v17438_v17 = vsel %vm16874_vm13, %v17437_v44, %v17433_v0 }
 0x70c   : > { %v17447_v45 = vrot.slane %v24086_v58, %v23863_v50  ;;  %v17304_v24 = vrot.slane %v24065_v1, %v23947_v5  ;;  %v17443_v28 = vsel %vm16881_vm14, %v17442_v57, %v17438_v17 }
 0x70e   : > { %v16694_v25 = vpop.permute.xlu0 %16693 }
 0x70f   : > { %v24102_v31 = vpop.permute.xlu1 %16792  ;;  %v17289_v23 = vrot.slane %v16694_v25, %v23863_v50 }
 0x710   : > { %v17452_v48 = vrot.slane %v24102_v31, %v23848_v43  ;;  %v17448_v31 = vsel %vm16888_vm15, %v17447_v45, %v17443_v28 }
 0x712   : > { %v16700_v36 = vpop.permute.xlu0 %16699 }
 0x713   : > { %v16796_v25 = vpop.permute.xlu1 %16795  ;;  %v17299_v51 = vrot.slane %v16700_v36, %v23920_v46  ;;  %v17358_v36 = vrot.slane %v24032_v22, %v23779_v42 }
 0x714   : > { %v17457_v58 = vrot.slane %v16796_v25, %v23920_v46 }
 0x716   : > { %v16706_v21 = vpop.permute.xlu0 %16705 }
 0x717   : > { %v17309_v39 = vrot.slane %v16706_v21, %v23376_v37  ;;  %v17280_v37 = vsel %vm16874_vm13, %v17279_v63, %v17275_v40  ;;  %v16799_v54 = vpop.permute.xlu1 %16798 }
 0x718   : > { %v17285_v26 = vsel %vm16881_vm14, %v17284_v19, %v17280_v37  ;;  %v17462_v3 = vrot.slane %v16799_v54, %v23947_v5 }
 0x719   : > { %v17314_v55 = vsel %vm16811_vm4, %v17313_v6, %v17309_v39  ;;  %v17290_v35 = vsel %vm16888_vm15, %v17289_v23, %v17285_v26  ;;  %v25412_v23 = vld [vmem:[#allocation263_spill] sm:$0xff] }
 0x71a   : > { %v17319_v59 = vsel %vm16818_vm5, %v17318_v7, %v17314_v55  ;;  %v16742_v34 = vpop.permute.xlu0 %16741  ;;  %v17295_v13 = vsel %vm16895_vm0, %v17294_v9, %v17290_v35 }
 0x71b   : > { %v17324_v62 = vsel %vm16825_vm6, %v17323_v30, %v17319_v59  ;;  %v17300_v12 = vsel %vm16902_vm1, %v17299_v51, %v17295_v13  ;;  %v17368_v42 = vrot.slane %v16742_v34, %v23863_v50 }
 0x71c   : > { %v17329_v53 = vsel %vm16832_vm7, %v17328_v52, %v17324_v62  ;;  %v17305_v50 = vsel %vm16909_vm2, %v17304_v24, %v17300_v12 }
 0x71d   : > { %v17334_v20 = vsel %vm16839_vm8, %v17333_v18, %v17329_v53  ;;  %v17466_v7 = vcombine.low %v24051_v27, %v17305_v50  ;;  %v25411_v27 = vld [vmem:[#allocation28_spill] sm:$0xff] }
 0x71e   : > { %v17339_v41 = vsel %vm16846_vm9, %v17338_v14, %v17334_v20  ;;  %v16745_v56 = vpop.permute.xlu0 %16744  ;;  %v25413_v59 = vcombine.low %v25411_v27, %v25412_v23 }
 0x71f   : > { %v17344_v10 = vsel %vm16853_vm10, %v17343_v60, %v17339_v41  ;;  %v17373_v33 = vrot.slane %v16745_v56, %v23848_v43  ;;  %v17453_v43 = vsel %vm16895_vm0, %v17452_v48, %v17448_v31  ;;  %v17488_v55 = vrot.slane %v17466_v7, %v20124_v32 }
 0x720   : > { %v17349_v4 = vsel %vm16860_vm11, %v17348_v15, %v17344_v10  ;;  %v17504_v34 = vrot.slane %v25413_v59, %v20124_v32 }
 0x721   : > { %v17354_v8 = vsel %vm16867_vm12, %v17353_v2, %v17349_v4 }
 0x722   : > { %v17359_v29 = vsel %vm16874_vm13, %v17358_v36, %v17354_v8  ;;  %v16748_v22 = vpop.permute.xlu0 %16747 }
 0x723   : > { %v17364_v11 = vsel %vm16881_vm14, %v17363_v38, %v17359_v29  ;;  %v17378_v21 = vrot.slane %v16748_v22, %v23920_v46  ;;  %v17458_v46 = vsel %vm16902_vm1, %v17457_v58, %v17453_v43 }
 0x724   : > { %v17369_v63 = vsel %vm16888_vm15, %v17368_v42, %v17364_v11  ;;  %v17463_v30 = vsel %vm16909_vm2, %v17462_v3, %v17458_v46 }
 0x725   : > { %v17374_v1 = vsel %vm16895_vm0, %v17373_v33, %v17369_v63 }
 0x726   : > { %v16751_v6 = vpop.permute.xlu0 %16750  ;;  %v17379_v47 = vsel %vm16902_vm1, %v17378_v21, %v17374_v1 }
 0x727   : > { %v17383_v39 = vrot.slane %v16751_v6, %v23947_v5 }
 0x729   : > { %v17384_v52 = vsel %vm16909_vm2, %v17383_v39, %v17379_v47 }
 0x72a   : > { %v17467_v40 = vcombine.low %v17384_v52, %v17463_v30 }
 0x72c   : > { %v17495_v16 = vrot.slane %v17467_v40, %v20124_v32 }
 0x72e   : > { %v17497_v37 = vcombine.low %v17488_v55, %v17495_v16 }
 0x730   : > { %v17511_v5 = vrot.slane %v17497_v37, %v20124_v32 }
 0x732   : > { %v17512_v18 = vcombine.low %v17504_v34, %v17511_v5 }
 0x734   : > { %17514 = vst [vmem:[%s334_s26] sm:$0xff] %v17512_v18 }
 0x735   : > { %18702 = shalt.err (!%p18699_p3)
}
 0x736   : > { %s18703_s24 = scalar_lea.hbm %s17536_s16, 128  ;;  %s18707_s26 = scalar_lea.hbm %s24239_s7, 256 }
 0x737   : > { %p18704_p5 = scmp.ne.s32.totalorder %s17536_s16, %s18703_s24  ;;  %p18708_p9 = scmp.lt.s32.totalorder %s17536_s16, %s24239_s7 }
 0x738   : > { %p18709_p12 = scmp.lt.s32.totalorder %s18707_s26, %s18703_s24 }
 0x739   : > { %p18705_p6 = pnand %p18704_p5, %p18863_p4 }
 0x73a   : > { %p18710_p10 = por %p18709_p12, %p18708_p9 }
 0x73b   : > { %p18706_p7 = pneg %p18705_p6 }
 0x73d   : > { %p18711_p11 = pnand %p18710_p10, %p18706_p7 }
 0x73f   : > { %18714 = shalt.err (!%p18711_p11)
}
 0x740   : > { %18593 = dma.vmem_to_hbm [thread:$0]  (%p18863_p4), %s17539_s12, 128, %s17536_s16, %s17516_s21  }
 0x741 PF: > { %p18605_p13 = scmp.ge.s32.totalorder %s18769_s10, 2  ;;  %s17553_s19 = sand.u32 1, %s18749_s27  }
 0x742   : > { %s17554_s30 = scalar_lea.sflag [#allocation5], %s17553_s19 }
 0x743   : > { %p18600_p0 = pnand %p18605_p13, %p18870_p8 }
 0x745   : > { %p18601_p1 = pneg %p18600_p0 }
 0x747   : > { %18744 = dma.done.wait (%p18601_p1), %s17554_s30, 128  }
 0x748   : > { %18746 = vsyncadd (%p18601_p1), %s17554_s30, 4294967168  ;;  %s23_s10 = sadd.s32 1, %s18769_s10   ;;  %s25414_s27 = smov %s18753_s28 }
 0x749   : > { %p20_p2 = scmp.ge.s32.totalorder %s23_s10, 4   ;;  %s25415_s28 = smov %s18757_s29 }
 0x74a   : > { %s25416_s29 = smov %s18876_s18  ;;  %s25417_s30 = smov %s18765_s9 }
 0x74b   : > { %s25418_s9 = smov %s25420_s13  ;;  %22 = sbr.rel (!%p20_p2) target bundleno = 5 (0x5), region = 108 }
 0x750   :  { %17570 = vsyncpa [#allocation4], 1 }
 0x751   :  { %17572 = vsyncpa [#allocation4 + $0x1], 1 }
 0x752   :  { %17573 = vsyncpa [#allocation5], 1 }
 0x753   :  { %17575 = vsyncpa [#allocation5 + $0x1], 1 }

</bundles_post_ra>
